<compile_context>
chip_gen: v7x
topology: tpu7x:2x2x1
jax: 0.10.0
libtpu: 0.0.40
codegen_flags: <defaults>
</compile_context>

<pallas_src>
import functools

import jax
import jax.numpy as jnp
import numpy as np
from jax.experimental import pallas as pl
from jax.experimental.pallas import tpu as pltpu

# Module constants (from the PyTorch script)
MIN = 5.9     # clamp_min
MAX = 6.6     # clamp_max
MIN_1 = -3.3  # clamp_min (after relu)  -- no-op after clamp(5.9, 6.6)
MAX_1 = 7.5   # clamp_max (after relu)  -- no-op after clamp(5.9, 6.6)

KS = 7        # kernel size (cubic)
STRIDE = 2
PAD = 3
CIN = 1
COUT = 7


def _round_up(x, m):
    return ((x + m - 1) // m) * m


def _conv_tap_kernel(xph_ref, b_ref, o_ref, *, t_do, ho_pad, wk, ks):
    """Direct stride-2 Conv3d, accumulated as 49 tap-plane matmuls.

    xph_ref: (2, 2, dh_tot, hh_tot, wk)  polyphase(D,H)-split, zero-padded input,
                                         with a trailing all-ones W column (bias).
    b_ref  : (ks*ks, wk, COUT*Wo)        per-(kd,kh) weight/unfold matrices.
    o_ref  : (t_do*ho_pad, COUT*Wo)      rows = (od, oh), cols = (co, ow).
    """
    od0 = pl.program_id(0) * t_do            # this block's first output-D row
    acc = jnp.zeros(o_ref.shape, jnp.float32)
    for kd in range(ks):
        pd, ad = kd % 2, kd // 2              # phase / offset along D
        for kh in range(ks):
            ph, bh = kh % 2, kh // 2          # phase / offset along H
            # (t_do, ho_pad, wk): static unit-stride slices; only the D start
            # is dynamic (block offset).  No strided access anywhere.
            slab = xph_ref[pd, ph, pl.ds(od0 + ad, t_do), bh:bh + ho_pad, :]
            acc += jnp.dot(slab.reshape(t_do * ho_pad, wk),
                           b_ref[kd * ks + kh],
                           preferred_element_type=jnp.float32,
                           precision=jax.lax.Precision.HIGHEST)
    # clamp_min(5.9) -> clamp_max(6.6); the remaining ops are no-ops.
    o_ref[...] = jnp.minimum(jnp.maximum(acc, MIN), MAX).astype(o_ref.dtype)


def model_forward(x, weight, bias, *, n_d_blocks=2):
    """x: (1, 1, D, H, W) f32; weight: (7, 1, 7, 7, 7); bias: (7,)."""
    N, C, D, H, W = x.shape
    assert N == 1 and C == CIN and STRIDE == 2

    Do = (D + 2 * PAD - KS) // STRIDE + 1
    Ho = (H + 2 * PAD - KS) // STRIDE + 1
    Wo = (W + 2 * PAD - KS) // STRIDE + 1

    # Output tiling: keep (od, oh) rows sublane-aligned, split D across the grid.
    ho_pad = _round_up(Ho, 8)
    n_blk = n_d_blocks if Do >= n_d_blocks else 1
    do_pad = _round_up(Do, n_blk)
    t_do = do_pad // n_blk

    half = (KS - 1) // 2                      # max polyphase offset (=3)
    dh_tot = do_pad + half
    hh_tot = ho_pad + half
    wp = W + 2 * PAD
    wk = wp + 1                               # +1 all-ones column -> bias fold
    n_cols = COUT * Wo

    x32 = x.astype(jnp.float32)
    w4 = weight.astype(jnp.float32)[:, 0]     # (COUT, KS, KS, KS)
    b32 = bias.astype(jnp.float32)

    # --- padded input, ones column, polyphase split of D/H (all tiny ops) ---
    xpad = jnp.pad(x32[0, 0], ((PAD, PAD), (PAD, PAD), (PAD, PAD)))   # (Dp,Hp,wp)
    xpad = jnp.concatenate([xpad, jnp.ones_like(xpad[:, :, :1])], axis=2)  # +1s col
    Dp, Hp = D + 2 * PAD, H + 2 * PAD
    dpe, hpe = _round_up(Dp, 2), _round_up(Hp, 2)
    xpad = jnp.pad(xpad, ((0, dpe - Dp), (0, hpe - Hp), (0, 0)))
    xph = xpad.reshape(dpe // 2, 2, hpe // 2, 2, wk).transpose(1, 3, 0, 2, 4)
    xph = jnp.pad(xph, ((0, 0), (0, 0),
                        (0, dh_tot - dpe // 2), (0, hh_tot - hpe // 2), (0, 0)))

    # --- per-tap matrices B[(kd,kh), p, (co,ow)] = w[co,kd,kh,kw] at p=2*ow+kw ---
    # Built with one small einsum (no gathers); last row of each tap carries the
    # bias (tap 0 only), matched to the constant-1 input column.
    s3 = (jnp.arange(wp)[:, None, None] ==
          (STRIDE * jnp.arange(Wo)[None, None, :] +
           jnp.arange(KS)[None, :, None])).astype(jnp.float32)        # (wp,KS,Wo)
    bmain = jnp.einsum('pkw,cdhk->dhpcw', s3, w4).reshape(KS * KS, wp, n_cols)
    bias_row = jnp.broadcast_to(b32[:, None], (COUT, Wo)).reshape(1, 1, n_cols)
    bias_rows = jnp.concatenate(
        [bias_row, jnp.zeros((KS * KS - 1, 1, n_cols), jnp.float32)], axis=0)
    bmat = jnp.concatenate([bmain, bias_rows], axis=1)                # (49,wk,ncols)

    kernel = functools.partial(_conv_tap_kernel, t_do=t_do, ho_pad=ho_pad,
                               wk=wk, ks=KS)

    out_cp = pl.pallas_call(
        kernel,
        out_shape=jax.ShapeDtypeStruct((do_pad * ho_pad, n_cols), jnp.float32),
        grid_spec=pltpu.PrefetchScalarGridSpec(
            num_scalar_prefetch=0,
            grid=(n_blk,),
            in_specs=[
                # Full (small) arrays resident in VMEM; constant block index
                # -> fetched once, reused across grid steps.
                pl.BlockSpec((2, 2, dh_tot, hh_tot, wk),
                             lambda i: (0, 0, 0, 0, 0)),
                pl.BlockSpec((KS * KS, wk, n_cols), lambda i: (0, 0, 0)),
            ],
            out_specs=pl.BlockSpec((t_do * ho_pad, n_cols), lambda i: (i, 0)),
        ),
        compiler_params=pltpu.CompilerParams(
            dimension_semantics=("parallel",)),   # splits across v7x's two TCs
    )(xph, bmat)

    # rows=(od,oh), cols=(co,ow) -> NCDHW (tiny output relabeling).
    out = out_cp.reshape(do_pad, ho_pad, COUT, Wo)[:Do, :Ho]
    return jnp.transpose(out, (2, 0, 1, 3))[None]


def _reference(x, weight, bias):
    y = jax.lax.conv_general_dilated(
        x, weight, window_strides=(STRIDE,) * 3, padding=[(PAD, PAD)] * 3,
        dimension_numbers=("NCDHW", "OIDHW", "NCDHW"),
        precision=jax.lax.Precision.HIGHEST)
    y = y + bias.reshape(1, COUT, 1, 1, 1)
    y = jnp.maximum(y, MIN)       # clamp_min(5.9)
    y = jnp.minimum(y, MAX)       # clamp_max(6.6)
    y = jnp.maximum(y, 0.0)       # relu
    y = jnp.maximum(y, MIN_1)     # clamp_min(-3.3)
    y = jnp.minimum(y, MAX_1)     # clamp_max(7.5)
    return y


if __name__ == "__main__":
    key = jax.random.PRNGKey(0)
    kx, kw_, kb = jax.random.split(key, 3)

    # Small input consistent with the module: (N=1, C=1, D=16, H=16, W=16).
    x = jax.random.normal(kx, (1, 1, 16, 16, 16), dtype=jnp.float32)

    # Conv3d-style weight init; bias chosen to straddle the [5.9, 6.6] clamp
    # window so the check exercises clamped-low, pass-through and clamped-high.
    fan_in = CIN * KS * KS * KS
    bound = 1.0 / np.sqrt(fan_in)
    weight = jax.random.uniform(kw_, (COUT, CIN, KS, KS, KS),
                                dtype=jnp.float32, minval=-bound, maxval=bound)
    bias = jnp.linspace(5.5, 7.0, COUT, dtype=jnp.float32)

    out = jax.block_until_ready(jax.jit(model_forward)(x, weight, bias))

    ref = _reference(x, weight, bias)
    np.testing.assert_allclose(np.asarray(out), np.asarray(ref),
                               rtol=1e-3, atol=1e-3)

    print("KERNEL_OK")
</pallas_src>

<mosaic_0001>
module attributes {stable_mosaic.version = 11 : i64} {
  func.func @_conv_tap_kernel(%arg0: i32, %arg1: memref<2x2x11x11x23xf32, #tpu.memory_space<vmem>>, %arg2: memref<49x23x56xf32, #tpu.memory_space<vmem>>, %arg3: memref<32x56xf32, #tpu.memory_space<vmem>>) attributes {dimension_semantics = [#tpu.dimension_semantics<parallel>], iteration_bounds = array<i64: 2>, scalar_prefetch = 0 : i64, scratch_operands = 0 : i64, tpu.core_type = #tpu.core_type<tc>, window_params = [{pipeline_mode = #tpu.pipeline_mode<synchronous>, transform_indices = @transform_0, window_bounds = array<i64: 2, 2, 11, 11, 23>}, {pipeline_mode = #tpu.pipeline_mode<synchronous>, transform_indices = @transform_1, window_bounds = array<i64: 49, 23, 56>}, {transform_indices = @transform_2, window_bounds = array<i64: 32, 56>}]} {
    %c4_i32 = arith.constant 4 : i32
    %0 = arith.muli %arg0, %c4_i32 : i32
    %cst = arith.constant 0.000000e+00 : f32
    %1 = vector.broadcast %cst : f32 to vector<32x56xf32>
    %c0_i32 = arith.constant 0 : i32
    %2 = arith.addi %0, %c0_i32 : i32
    %c0 = arith.constant 0 : index
    %c0_0 = arith.constant 0 : index
    %3 = arith.index_cast %2 : i32 to index
    %c0_1 = arith.constant 0 : index
    %c0_2 = arith.constant 0 : index
    %4 = vector.load %arg1[%c0, %c0_0, %3, %c0_1, %c0_2] : memref<2x2x11x11x23xf32, #tpu.memory_space<vmem>>, vector<1x1x4x8x23xf32>
    %5 = vector.shape_cast %4 : vector<1x1x4x8x23xf32> to vector<4x8x23xf32>
    %6 = vector.shape_cast %5 : vector<4x8x23xf32> to vector<32x23xf32>
    %c0_3 = arith.constant 0 : index
    %c0_4 = arith.constant 0 : index
    %c0_5 = arith.constant 0 : index
    %7 = vector.load %arg2[%c0_3, %c0_4, %c0_5] : memref<49x23x56xf32, #tpu.memory_space<vmem>>, vector<1x23x56xf32>
    %8 = vector.shape_cast %7 : vector<1x23x56xf32> to vector<23x56xf32>
    %cst_6 = arith.constant dense<0.000000e+00> : vector<32x56xf32>
    %9 = tpu.matmul %6, %8, %cst_6 {dimension_numbers = #tpu.dot_dimension_numbers<[1], [0], [0], [1], [0, 0, 1, 1], [], []>, precision = #tpu.contract_precision<fp32>} : vector<32x23xf32>, vector<23x56xf32>, vector<32x56xf32> -> vector<32x56xf32>
    %10 = arith.addf %1, %9 : vector<32x56xf32>
    %c0_i32_7 = arith.constant 0 : i32
    %11 = arith.addi %0, %c0_i32_7 : i32
    %c0_8 = arith.constant 0 : index
    %c1 = arith.constant 1 : index
    %12 = arith.index_cast %11 : i32 to index
    %c0_9 = arith.constant 0 : index
    %c0_10 = arith.constant 0 : index
    %13 = vector.load %arg1[%c0_8, %c1, %12, %c0_9, %c0_10] : memref<2x2x11x11x23xf32, #tpu.memory_space<vmem>>, vector<1x1x4x8x23xf32>
    %14 = vector.shape_cast %13 : vector<1x1x4x8x23xf32> to vector<4x8x23xf32>
    %15 = vector.shape_cast %14 : vector<4x8x23xf32> to vector<32x23xf32>
    %c1_11 = arith.constant 1 : index
    %c0_12 = arith.constant 0 : index
    %c0_13 = arith.constant 0 : index
    %16 = vector.load %arg2[%c1_11, %c0_12, %c0_13] : memref<49x23x56xf32, #tpu.memory_space<vmem>>, vector<1x23x56xf32>
    %17 = vector.shape_cast %16 : vector<1x23x56xf32> to vector<23x56xf32>
    %cst_14 = arith.constant dense<0.000000e+00> : vector<32x56xf32>
    %18 = tpu.matmul %15, %17, %cst_14 {dimension_numbers = #tpu.dot_dimension_numbers<[1], [0], [0], [1], [0, 0, 1, 1], [], []>, precision = #tpu.contract_precision<fp32>} : vector<32x23xf32>, vector<23x56xf32>, vector<32x56xf32> -> vector<32x56xf32>
    %19 = arith.addf %10, %18 : vector<32x56xf32>
    %c0_i32_15 = arith.constant 0 : i32
    %20 = arith.addi %0, %c0_i32_15 : i32
    %c0_16 = arith.constant 0 : index
    %c0_17 = arith.constant 0 : index
    %21 = arith.index_cast %20 : i32 to index
    %c1_18 = arith.constant 1 : index
    %c0_19 = arith.constant 0 : index
    %22 = vector.load %arg1[%c0_16, %c0_17, %21, %c1_18, %c0_19] : memref<2x2x11x11x23xf32, #tpu.memory_space<vmem>>, vector<1x1x4x8x23xf32>
    %23 = vector.shape_cast %22 : vector<1x1x4x8x23xf32> to vector<4x8x23xf32>
    %24 = vector.shape_cast %23 : vector<4x8x23xf32> to vector<32x23xf32>
    %c2 = arith.constant 2 : index
    %c0_20 = arith.constant 0 : index
    %c0_21 = arith.constant 0 : index
    %25 = vector.load %arg2[%c2, %c0_20, %c0_21] : memref<49x23x56xf32, #tpu.memory_space<vmem>>, vector<1x23x56xf32>
    %26 = vector.shape_cast %25 : vector<1x23x56xf32> to vector<23x56xf32>
    %cst_22 = arith.constant dense<0.000000e+00> : vector<32x56xf32>
    %27 = tpu.matmul %24, %26, %cst_22 {dimension_numbers = #tpu.dot_dimension_numbers<[1], [0], [0], [1], [0, 0, 1, 1], [], []>, precision = #tpu.contract_precision<fp32>} : vector<32x23xf32>, vector<23x56xf32>, vector<32x56xf32> -> vector<32x56xf32>
    %28 = arith.addf %19, %27 : vector<32x56xf32>
    %c0_i32_23 = arith.constant 0 : i32
    %29 = arith.addi %0, %c0_i32_23 : i32
    %c0_24 = arith.constant 0 : index
    %c1_25 = arith.constant 1 : index
    %30 = arith.index_cast %29 : i32 to index
    %c1_26 = arith.constant 1 : index
    %c0_27 = arith.constant 0 : index
    %31 = vector.load %arg1[%c0_24, %c1_25, %30, %c1_26, %c0_27] : memref<2x2x11x11x23xf32, #tpu.memory_space<vmem>>, vector<1x1x4x8x23xf32>
    %32 = vector.shape_cast %31 : vector<1x1x4x8x23xf32> to vector<4x8x23xf32>
    %33 = vector.shape_cast %32 : vector<4x8x23xf32> to vector<32x23xf32>
    %c3 = arith.constant 3 : index
    %c0_28 = arith.constant 0 : index
    %c0_29 = arith.constant 0 : index
    %34 = vector.load %arg2[%c3, %c0_28, %c0_29] : memref<49x23x56xf32, #tpu.memory_space<vmem>>, vector<1x23x56xf32>
    %35 = vector.shape_cast %34 : vector<1x23x56xf32> to vector<23x56xf32>
    %cst_30 = arith.constant dense<0.000000e+00> : vector<32x56xf32>
    %36 = tpu.matmul %33, %35, %cst_30 {dimension_numbers = #tpu.dot_dimension_numbers<[1], [0], [0], [1], [0, 0, 1, 1], [], []>, precision = #tpu.contract_precision<fp32>} : vector<32x23xf32>, vector<23x56xf32>, vector<32x56xf32> -> vector<32x56xf32>
    %37 = arith.addf %28, %36 : vector<32x56xf32>
    %c0_i32_31 = arith.constant 0 : i32
    %38 = arith.addi %0, %c0_i32_31 : i32
    %c0_32 = arith.constant 0 : index
    %c0_33 = arith.constant 0 : index
    %39 = arith.index_cast %38 : i32 to index
    %c2_34 = arith.constant 2 : index
    %c0_35 = arith.constant 0 : index
    %40 = vector.load %arg1[%c0_32, %c0_33, %39, %c2_34, %c0_35] : memref<2x2x11x11x23xf32, #tpu.memory_space<vmem>>, vector<1x1x4x8x23xf32>
    %41 = vector.shape_cast %40 : vector<1x1x4x8x23xf32> to vector<4x8x23xf32>
    %42 = vector.shape_cast %41 : vector<4x8x23xf32> to vector<32x23xf32>
    %c4 = arith.constant 4 : index
    %c0_36 = arith.constant 0 : index
    %c0_37 = arith.constant 0 : index
    %43 = vector.load %arg2[%c4, %c0_36, %c0_37] : memref<49x23x56xf32, #tpu.memory_space<vmem>>, vector<1x23x56xf32>
    %44 = vector.shape_cast %43 : vector<1x23x56xf32> to vector<23x56xf32>
    %cst_38 = arith.constant dense<0.000000e+00> : vector<32x56xf32>
    %45 = tpu.matmul %42, %44, %cst_38 {dimension_numbers = #tpu.dot_dimension_numbers<[1], [0], [0], [1], [0, 0, 1, 1], [], []>, precision = #tpu.contract_precision<fp32>} : vector<32x23xf32>, vector<23x56xf32>, vector<32x56xf32> -> vector<32x56xf32>
    %46 = arith.addf %37, %45 : vector<32x56xf32>
    %c0_i32_39 = arith.constant 0 : i32
    %47 = arith.addi %0, %c0_i32_39 : i32
    %c0_40 = arith.constant 0 : index
    %c1_41 = arith.constant 1 : index
    %48 = arith.index_cast %47 : i32 to index
    %c2_42 = arith.constant 2 : index
    %c0_43 = arith.constant 0 : index
    %49 = vector.load %arg1[%c0_40, %c1_41, %48, %c2_42, %c0_43] : memref<2x2x11x11x23xf32, #tpu.memory_space<vmem>>, vector<1x1x4x8x23xf32>
    %50 = vector.shape_cast %49 : vector<1x1x4x8x23xf32> to vector<4x8x23xf32>
    %51 = vector.shape_cast %50 : vector<4x8x23xf32> to vector<32x23xf32>
    %c5 = arith.constant 5 : index
    %c0_44 = arith.constant 0 : index
    %c0_45 = arith.constant 0 : index
    %52 = vector.load %arg2[%c5, %c0_44, %c0_45] : memref<49x23x56xf32, #tpu.memory_space<vmem>>, vector<1x23x56xf32>
    %53 = vector.shape_cast %52 : vector<1x23x56xf32> to vector<23x56xf32>
    %cst_46 = arith.constant dense<0.000000e+00> : vector<32x56xf32>
    %54 = tpu.matmul %51, %53, %cst_46 {dimension_numbers = #tpu.dot_dimension_numbers<[1], [0], [0], [1], [0, 0, 1, 1], [], []>, precision = #tpu.contract_precision<fp32>} : vector<32x23xf32>, vector<23x56xf32>, vector<32x56xf32> -> vector<32x56xf32>
    %55 = arith.addf %46, %54 : vector<32x56xf32>
    %c0_i32_47 = arith.constant 0 : i32
    %56 = arith.addi %0, %c0_i32_47 : i32
    %c0_48 = arith.constant 0 : index
    %c0_49 = arith.constant 0 : index
    %57 = arith.index_cast %56 : i32 to index
    %c3_50 = arith.constant 3 : index
    %c0_51 = arith.constant 0 : index
    %58 = vector.load %arg1[%c0_48, %c0_49, %57, %c3_50, %c0_51] : memref<2x2x11x11x23xf32, #tpu.memory_space<vmem>>, vector<1x1x4x8x23xf32>
    %59 = vector.shape_cast %58 : vector<1x1x4x8x23xf32> to vector<4x8x23xf32>
    %60 = vector.shape_cast %59 : vector<4x8x23xf32> to vector<32x23xf32>
    %c6 = arith.constant 6 : index
    %c0_52 = arith.constant 0 : index
    %c0_53 = arith.constant 0 : index
    %61 = vector.load %arg2[%c6, %c0_52, %c0_53] : memref<49x23x56xf32, #tpu.memory_space<vmem>>, vector<1x23x56xf32>
    %62 = vector.shape_cast %61 : vector<1x23x56xf32> to vector<23x56xf32>
    %cst_54 = arith.constant dense<0.000000e+00> : vector<32x56xf32>
    %63 = tpu.matmul %60, %62, %cst_54 {dimension_numbers = #tpu.dot_dimension_numbers<[1], [0], [0], [1], [0, 0, 1, 1], [], []>, precision = #tpu.contract_precision<fp32>} : vector<32x23xf32>, vector<23x56xf32>, vector<32x56xf32> -> vector<32x56xf32>
    %64 = arith.addf %55, %63 : vector<32x56xf32>
    %c0_i32_55 = arith.constant 0 : i32
    %65 = arith.addi %0, %c0_i32_55 : i32
    %c1_56 = arith.constant 1 : index
    %c0_57 = arith.constant 0 : index
    %66 = arith.index_cast %65 : i32 to index
    %c0_58 = arith.constant 0 : index
    %c0_59 = arith.constant 0 : index
    %67 = vector.load %arg1[%c1_56, %c0_57, %66, %c0_58, %c0_59] : memref<2x2x11x11x23xf32, #tpu.memory_space<vmem>>, vector<1x1x4x8x23xf32>
    %68 = vector.shape_cast %67 : vector<1x1x4x8x23xf32> to vector<4x8x23xf32>
    %69 = vector.shape_cast %68 : vector<4x8x23xf32> to vector<32x23xf32>
    %c7 = arith.constant 7 : index
    %c0_60 = arith.constant 0 : index
    %c0_61 = arith.constant 0 : index
    %70 = vector.load %arg2[%c7, %c0_60, %c0_61] : memref<49x23x56xf32, #tpu.memory_space<vmem>>, vector<1x23x56xf32>
    %71 = vector.shape_cast %70 : vector<1x23x56xf32> to vector<23x56xf32>
    %cst_62 = arith.constant dense<0.000000e+00> : vector<32x56xf32>
    %72 = tpu.matmul %69, %71, %cst_62 {dimension_numbers = #tpu.dot_dimension_numbers<[1], [0], [0], [1], [0, 0, 1, 1], [], []>, precision = #tpu.contract_precision<fp32>} : vector<32x23xf32>, vector<23x56xf32>, vector<32x56xf32> -> vector<32x56xf32>
    %73 = arith.addf %64, %72 : vector<32x56xf32>
    %c0_i32_63 = arith.constant 0 : i32
    %74 = arith.addi %0, %c0_i32_63 : i32
    %c1_64 = arith.constant 1 : index
    %c1_65 = arith.constant 1 : index
    %75 = arith.index_cast %74 : i32 to index
    %c0_66 = arith.constant 0 : index
    %c0_67 = arith.constant 0 : index
    %76 = vector.load %arg1[%c1_64, %c1_65, %75, %c0_66, %c0_67] : memref<2x2x11x11x23xf32, #tpu.memory_space<vmem>>, vector<1x1x4x8x23xf32>
    %77 = vector.shape_cast %76 : vector<1x1x4x8x23xf32> to vector<4x8x23xf32>
    %78 = vector.shape_cast %77 : vector<4x8x23xf32> to vector<32x23xf32>
    %c8 = arith.constant 8 : index
    %c0_68 = arith.constant 0 : index
    %c0_69 = arith.constant 0 : index
    %79 = vector.load %arg2[%c8, %c0_68, %c0_69] : memref<49x23x56xf32, #tpu.memory_space<vmem>>, vector<1x23x56xf32>
    %80 = vector.shape_cast %79 : vector<1x23x56xf32> to vector<23x56xf32>
    %cst_70 = arith.constant dense<0.000000e+00> : vector<32x56xf32>
    %81 = tpu.matmul %78, %80, %cst_70 {dimension_numbers = #tpu.dot_dimension_numbers<[1], [0], [0], [1], [0, 0, 1, 1], [], []>, precision = #tpu.contract_precision<fp32>} : vector<32x23xf32>, vector<23x56xf32>, vector<32x56xf32> -> vector<32x56xf32>
    %82 = arith.addf %73, %81 : vector<32x56xf32>
    %c0_i32_71 = arith.constant 0 : i32
    %83 = arith.addi %0, %c0_i32_71 : i32
    %c1_72 = arith.constant 1 : index
    %c0_73 = arith.constant 0 : index
    %84 = arith.index_cast %83 : i32 to index
    %c1_74 = arith.constant 1 : index
    %c0_75 = arith.constant 0 : index
    %85 = vector.load %arg1[%c1_72, %c0_73, %84, %c1_74, %c0_75] : memref<2x2x11x11x23xf32, #tpu.memory_space<vmem>>, vector<1x1x4x8x23xf32>
    %86 = vector.shape_cast %85 : vector<1x1x4x8x23xf32> to vector<4x8x23xf32>
    %87 = vector.shape_cast %86 : vector<4x8x23xf32> to vector<32x23xf32>
    %c9 = arith.constant 9 : index
    %c0_76 = arith.constant 0 : index
    %c0_77 = arith.constant 0 : index
    %88 = vector.load %arg2[%c9, %c0_76, %c0_77] : memref<49x23x56xf32, #tpu.memory_space<vmem>>, vector<1x23x56xf32>
    %89 = vector.shape_cast %88 : vector<1x23x56xf32> to vector<23x56xf32>
    %cst_78 = arith.constant dense<0.000000e+00> : vector<32x56xf32>
    %90 = tpu.matmul %87, %89, %cst_78 {dimension_numbers = #tpu.dot_dimension_numbers<[1], [0], [0], [1], [0, 0, 1, 1], [], []>, precision = #tpu.contract_precision<fp32>} : vector<32x23xf32>, vector<23x56xf32>, vector<32x56xf32> -> vector<32x56xf32>
    %91 = arith.addf %82, %90 : vector<32x56xf32>
    %c0_i32_79 = arith.constant 0 : i32
    %92 = arith.addi %0, %c0_i32_79 : i32
    %c1_80 = arith.constant 1 : index
    %c1_81 = arith.constant 1 : index
    %93 = arith.index_cast %92 : i32 to index
    %c1_82 = arith.constant 1 : index
    %c0_83 = arith.constant 0 : index
    %94 = vector.load %arg1[%c1_80, %c1_81, %93, %c1_82, %c0_83] : memref<2x2x11x11x23xf32, #tpu.memory_space<vmem>>, vector<1x1x4x8x23xf32>
    %95 = vector.shape_cast %94 : vector<1x1x4x8x23xf32> to vector<4x8x23xf32>
    %96 = vector.shape_cast %95 : vector<4x8x23xf32> to vector<32x23xf32>
    %c10 = arith.constant 10 : index
    %c0_84 = arith.constant 0 : index
    %c0_85 = arith.constant 0 : index
    %97 = vector.load %arg2[%c10, %c0_84, %c0_85] : memref<49x23x56xf32, #tpu.memory_space<vmem>>, vector<1x23x56xf32>
    %98 = vector.shape_cast %97 : vector<1x23x56xf32> to vector<23x56xf32>
    %cst_86 = arith.constant dense<0.000000e+00> : vector<32x56xf32>
    %99 = tpu.matmul %96, %98, %cst_86 {dimension_numbers = #tpu.dot_dimension_numbers<[1], [0], [0], [1], [0, 0, 1, 1], [], []>, precision = #tpu.contract_precision<fp32>} : vector<32x23xf32>, vector<23x56xf32>, vector<32x56xf32> -> vector<32x56xf32>
    %100 = arith.addf %91, %99 : vector<32x56xf32>
    %c0_i32_87 = arith.constant 0 : i32
    %101 = arith.addi %0, %c0_i32_87 : i32
    %c1_88 = arith.constant 1 : index
    %c0_89 = arith.constant 0 : index
    %102 = arith.index_cast %101 : i32 to index
    %c2_90 = arith.constant 2 : index
    %c0_91 = arith.constant 0 : index
    %103 = vector.load %arg1[%c1_88, %c0_89, %102, %c2_90, %c0_91] : memref<2x2x11x11x23xf32, #tpu.memory_space<vmem>>, vector<1x1x4x8x23xf32>
    %104 = vector.shape_cast %103 : vector<1x1x4x8x23xf32> to vector<4x8x23xf32>
    %105 = vector.shape_cast %104 : vector<4x8x23xf32> to vector<32x23xf32>
    %c11 = arith.constant 11 : index
    %c0_92 = arith.constant 0 : index
    %c0_93 = arith.constant 0 : index
    %106 = vector.load %arg2[%c11, %c0_92, %c0_93] : memref<49x23x56xf32, #tpu.memory_space<vmem>>, vector<1x23x56xf32>
    %107 = vector.shape_cast %106 : vector<1x23x56xf32> to vector<23x56xf32>
    %cst_94 = arith.constant dense<0.000000e+00> : vector<32x56xf32>
    %108 = tpu.matmul %105, %107, %cst_94 {dimension_numbers = #tpu.dot_dimension_numbers<[1], [0], [0], [1], [0, 0, 1, 1], [], []>, precision = #tpu.contract_precision<fp32>} : vector<32x23xf32>, vector<23x56xf32>, vector<32x56xf32> -> vector<32x56xf32>
    %109 = arith.addf %100, %108 : vector<32x56xf32>
    %c0_i32_95 = arith.constant 0 : i32
    %110 = arith.addi %0, %c0_i32_95 : i32
    %c1_96 = arith.constant 1 : index
    %c1_97 = arith.constant 1 : index
    %111 = arith.index_cast %110 : i32 to index
    %c2_98 = arith.constant 2 : index
    %c0_99 = arith.constant 0 : index
    %112 = vector.load %arg1[%c1_96, %c1_97, %111, %c2_98, %c0_99] : memref<2x2x11x11x23xf32, #tpu.memory_space<vmem>>, vector<1x1x4x8x23xf32>
    %113 = vector.shape_cast %112 : vector<1x1x4x8x23xf32> to vector<4x8x23xf32>
    %114 = vector.shape_cast %113 : vector<4x8x23xf32> to vector<32x23xf32>
    %c12 = arith.constant 12 : index
    %c0_100 = arith.constant 0 : index
    %c0_101 = arith.constant 0 : index
    %115 = vector.load %arg2[%c12, %c0_100, %c0_101] : memref<49x23x56xf32, #tpu.memory_space<vmem>>, vector<1x23x56xf32>
    %116 = vector.shape_cast %115 : vector<1x23x56xf32> to vector<23x56xf32>
    %cst_102 = arith.constant dense<0.000000e+00> : vector<32x56xf32>
    %117 = tpu.matmul %114, %116, %cst_102 {dimension_numbers = #tpu.dot_dimension_numbers<[1], [0], [0], [1], [0, 0, 1, 1], [], []>, precision = #tpu.contract_precision<fp32>} : vector<32x23xf32>, vector<23x56xf32>, vector<32x56xf32> -> vector<32x56xf32>
    %118 = arith.addf %109, %117 : vector<32x56xf32>
    %c0_i32_103 = arith.constant 0 : i32
    %119 = arith.addi %0, %c0_i32_103 : i32
    %c1_104 = arith.constant 1 : index
    %c0_105 = arith.constant 0 : index
    %120 = arith.index_cast %119 : i32 to index
    %c3_106 = arith.constant 3 : index
    %c0_107 = arith.constant 0 : index
    %121 = vector.load %arg1[%c1_104, %c0_105, %120, %c3_106, %c0_107] : memref<2x2x11x11x23xf32, #tpu.memory_space<vmem>>, vector<1x1x4x8x23xf32>
    %122 = vector.shape_cast %121 : vector<1x1x4x8x23xf32> to vector<4x8x23xf32>
    %123 = vector.shape_cast %122 : vector<4x8x23xf32> to vector<32x23xf32>
    %c13 = arith.constant 13 : index
    %c0_108 = arith.constant 0 : index
    %c0_109 = arith.constant 0 : index
    %124 = vector.load %arg2[%c13, %c0_108, %c0_109] : memref<49x23x56xf32, #tpu.memory_space<vmem>>, vector<1x23x56xf32>
    %125 = vector.shape_cast %124 : vector<1x23x56xf32> to vector<23x56xf32>
    %cst_110 = arith.constant dense<0.000000e+00> : vector<32x56xf32>
    %126 = tpu.matmul %123, %125, %cst_110 {dimension_numbers = #tpu.dot_dimension_numbers<[1], [0], [0], [1], [0, 0, 1, 1], [], []>, precision = #tpu.contract_precision<fp32>} : vector<32x23xf32>, vector<23x56xf32>, vector<32x56xf32> -> vector<32x56xf32>
    %127 = arith.addf %118, %126 : vector<32x56xf32>
    %c1_i32 = arith.constant 1 : i32
    %128 = arith.addi %0, %c1_i32 : i32
    %c0_111 = arith.constant 0 : index
    %c0_112 = arith.constant 0 : index
    %129 = arith.index_cast %128 : i32 to index
    %c0_113 = arith.constant 0 : index
    %c0_114 = arith.constant 0 : index
    %130 = vector.load %arg1[%c0_111, %c0_112, %129, %c0_113, %c0_114] : memref<2x2x11x11x23xf32, #tpu.memory_space<vmem>>, vector<1x1x4x8x23xf32>
    %131 = vector.shape_cast %130 : vector<1x1x4x8x23xf32> to vector<4x8x23xf32>
    %132 = vector.shape_cast %131 : vector<4x8x23xf32> to vector<32x23xf32>
    %c14 = arith.constant 14 : index
    %c0_115 = arith.constant 0 : index
    %c0_116 = arith.constant 0 : index
    %133 = vector.load %arg2[%c14, %c0_115, %c0_116] : memref<49x23x56xf32, #tpu.memory_space<vmem>>, vector<1x23x56xf32>
    %134 = vector.shape_cast %133 : vector<1x23x56xf32> to vector<23x56xf32>
    %cst_117 = arith.constant dense<0.000000e+00> : vector<32x56xf32>
    %135 = tpu.matmul %132, %134, %cst_117 {dimension_numbers = #tpu.dot_dimension_numbers<[1], [0], [0], [1], [0, 0, 1, 1], [], []>, precision = #tpu.contract_precision<fp32>} : vector<32x23xf32>, vector<23x56xf32>, vector<32x56xf32> -> vector<32x56xf32>
    %136 = arith.addf %127, %135 : vector<32x56xf32>
    %c1_i32_118 = arith.constant 1 : i32
    %137 = arith.addi %0, %c1_i32_118 : i32
    %c0_119 = arith.constant 0 : index
    %c1_120 = arith.constant 1 : index
    %138 = arith.index_cast %137 : i32 to index
    %c0_121 = arith.constant 0 : index
    %c0_122 = arith.constant 0 : index
    %139 = vector.load %arg1[%c0_119, %c1_120, %138, %c0_121, %c0_122] : memref<2x2x11x11x23xf32, #tpu.memory_space<vmem>>, vector<1x1x4x8x23xf32>
    %140 = vector.shape_cast %139 : vector<1x1x4x8x23xf32> to vector<4x8x23xf32>
    %141 = vector.shape_cast %140 : vector<4x8x23xf32> to vector<32x23xf32>
    %c15 = arith.constant 15 : index
    %c0_123 = arith.constant 0 : index
    %c0_124 = arith.constant 0 : index
    %142 = vector.load %arg2[%c15, %c0_123, %c0_124] : memref<49x23x56xf32, #tpu.memory_space<vmem>>, vector<1x23x56xf32>
    %143 = vector.shape_cast %142 : vector<1x23x56xf32> to vector<23x56xf32>
    %cst_125 = arith.constant dense<0.000000e+00> : vector<32x56xf32>
    %144 = tpu.matmul %141, %143, %cst_125 {dimension_numbers = #tpu.dot_dimension_numbers<[1], [0], [0], [1], [0, 0, 1, 1], [], []>, precision = #tpu.contract_precision<fp32>} : vector<32x23xf32>, vector<23x56xf32>, vector<32x56xf32> -> vector<32x56xf32>
    %145 = arith.addf %136, %144 : vector<32x56xf32>
    %c1_i32_126 = arith.constant 1 : i32
    %146 = arith.addi %0, %c1_i32_126 : i32
    %c0_127 = arith.constant 0 : index
    %c0_128 = arith.constant 0 : index
    %147 = arith.index_cast %146 : i32 to index
    %c1_129 = arith.constant 1 : index
    %c0_130 = arith.constant 0 : index
    %148 = vector.load %arg1[%c0_127, %c0_128, %147, %c1_129, %c0_130] : memref<2x2x11x11x23xf32, #tpu.memory_space<vmem>>, vector<1x1x4x8x23xf32>
    %149 = vector.shape_cast %148 : vector<1x1x4x8x23xf32> to vector<4x8x23xf32>
    %150 = vector.shape_cast %149 : vector<4x8x23xf32> to vector<32x23xf32>
    %c16 = arith.constant 16 : index
    %c0_131 = arith.constant 0 : index
    %c0_132 = arith.constant 0 : index
    %151 = vector.load %arg2[%c16, %c0_131, %c0_132] : memref<49x23x56xf32, #tpu.memory_space<vmem>>, vector<1x23x56xf32>
    %152 = vector.shape_cast %151 : vector<1x23x56xf32> to vector<23x56xf32>
    %cst_133 = arith.constant dense<0.000000e+00> : vector<32x56xf32>
    %153 = tpu.matmul %150, %152, %cst_133 {dimension_numbers = #tpu.dot_dimension_numbers<[1], [0], [0], [1], [0, 0, 1, 1], [], []>, precision = #tpu.contract_precision<fp32>} : vector<32x23xf32>, vector<23x56xf32>, vector<32x56xf32> -> vector<32x56xf32>
    %154 = arith.addf %145, %153 : vector<32x56xf32>
    %c1_i32_134 = arith.constant 1 : i32
    %155 = arith.addi %0, %c1_i32_134 : i32
    %c0_135 = arith.constant 0 : index
    %c1_136 = arith.constant 1 : index
    %156 = arith.index_cast %155 : i32 to index
    %c1_137 = arith.constant 1 : index
    %c0_138 = arith.constant 0 : index
    %157 = vector.load %arg1[%c0_135, %c1_136, %156, %c1_137, %c0_138] : memref<2x2x11x11x23xf32, #tpu.memory_space<vmem>>, vector<1x1x4x8x23xf32>
    %158 = vector.shape_cast %157 : vector<1x1x4x8x23xf32> to vector<4x8x23xf32>
    %159 = vector.shape_cast %158 : vector<4x8x23xf32> to vector<32x23xf32>
    %c17 = arith.constant 17 : index
    %c0_139 = arith.constant 0 : index
    %c0_140 = arith.constant 0 : index
    %160 = vector.load %arg2[%c17, %c0_139, %c0_140] : memref<49x23x56xf32, #tpu.memory_space<vmem>>, vector<1x23x56xf32>
    %161 = vector.shape_cast %160 : vector<1x23x56xf32> to vector<23x56xf32>
    %cst_141 = arith.constant dense<0.000000e+00> : vector<32x56xf32>
    %162 = tpu.matmul %159, %161, %cst_141 {dimension_numbers = #tpu.dot_dimension_numbers<[1], [0], [0], [1], [0, 0, 1, 1], [], []>, precision = #tpu.contract_precision<fp32>} : vector<32x23xf32>, vector<23x56xf32>, vector<32x56xf32> -> vector<32x56xf32>
    %163 = arith.addf %154, %162 : vector<32x56xf32>
    %c1_i32_142 = arith.constant 1 : i32
    %164 = arith.addi %0, %c1_i32_142 : i32
    %c0_143 = arith.constant 0 : index
    %c0_144 = arith.constant 0 : index
    %165 = arith.index_cast %164 : i32 to index
    %c2_145 = arith.constant 2 : index
    %c0_146 = arith.constant 0 : index
    %166 = vector.load %arg1[%c0_143, %c0_144, %165, %c2_145, %c0_146] : memref<2x2x11x11x23xf32, #tpu.memory_space<vmem>>, vector<1x1x4x8x23xf32>
    %167 = vector.shape_cast %166 : vector<1x1x4x8x23xf32> to vector<4x8x23xf32>
    %168 = vector.shape_cast %167 : vector<4x8x23xf32> to vector<32x23xf32>
    %c18 = arith.constant 18 : index
    %c0_147 = arith.constant 0 : index
    %c0_148 = arith.constant 0 : index
    %169 = vector.load %arg2[%c18, %c0_147, %c0_148] : memref<49x23x56xf32, #tpu.memory_space<vmem>>, vector<1x23x56xf32>
    %170 = vector.shape_cast %169 : vector<1x23x56xf32> to vector<23x56xf32>
    %cst_149 = arith.constant dense<0.000000e+00> : vector<32x56xf32>
    %171 = tpu.matmul %168, %170, %cst_149 {dimension_numbers = #tpu.dot_dimension_numbers<[1], [0], [0], [1], [0, 0, 1, 1], [], []>, precision = #tpu.contract_precision<fp32>} : vector<32x23xf32>, vector<23x56xf32>, vector<32x56xf32> -> vector<32x56xf32>
    %172 = arith.addf %163, %171 : vector<32x56xf32>
    %c1_i32_150 = arith.constant 1 : i32
    %173 = arith.addi %0, %c1_i32_150 : i32
    %c0_151 = arith.constant 0 : index
    %c1_152 = arith.constant 1 : index
    %174 = arith.index_cast %173 : i32 to index
    %c2_153 = arith.constant 2 : index
    %c0_154 = arith.constant 0 : index
    %175 = vector.load %arg1[%c0_151, %c1_152, %174, %c2_153, %c0_154] : memref<2x2x11x11x23xf32, #tpu.memory_space<vmem>>, vector<1x1x4x8x23xf32>
    %176 = vector.shape_cast %175 : vector<1x1x4x8x23xf32> to vector<4x8x23xf32>
    %177 = vector.shape_cast %176 : vector<4x8x23xf32> to vector<32x23xf32>
    %c19 = arith.constant 19 : index
    %c0_155 = arith.constant 0 : index
    %c0_156 = arith.constant 0 : index
    %178 = vector.load %arg2[%c19, %c0_155, %c0_156] : memref<49x23x56xf32, #tpu.memory_space<vmem>>, vector<1x23x56xf32>
    %179 = vector.shape_cast %178 : vector<1x23x56xf32> to vector<23x56xf32>
    %cst_157 = arith.constant dense<0.000000e+00> : vector<32x56xf32>
    %180 = tpu.matmul %177, %179, %cst_157 {dimension_numbers = #tpu.dot_dimension_numbers<[1], [0], [0], [1], [0, 0, 1, 1], [], []>, precision = #tpu.contract_precision<fp32>} : vector<32x23xf32>, vector<23x56xf32>, vector<32x56xf32> -> vector<32x56xf32>
    %181 = arith.addf %172, %180 : vector<32x56xf32>
    %c1_i32_158 = arith.constant 1 : i32
    %182 = arith.addi %0, %c1_i32_158 : i32
    %c0_159 = arith.constant 0 : index
    %c0_160 = arith.constant 0 : index
    %183 = arith.index_cast %182 : i32 to index
    %c3_161 = arith.constant 3 : index
    %c0_162 = arith.constant 0 : index
    %184 = vector.load %arg1[%c0_159, %c0_160, %183, %c3_161, %c0_162] : memref<2x2x11x11x23xf32, #tpu.memory_space<vmem>>, vector<1x1x4x8x23xf32>
    %185 = vector.shape_cast %184 : vector<1x1x4x8x23xf32> to vector<4x8x23xf32>
    %186 = vector.shape_cast %185 : vector<4x8x23xf32> to vector<32x23xf32>
    %c20 = arith.constant 20 : index
    %c0_163 = arith.constant 0 : index
    %c0_164 = arith.constant 0 : index
    %187 = vector.load %arg2[%c20, %c0_163, %c0_164] : memref<49x23x56xf32, #tpu.memory_space<vmem>>, vector<1x23x56xf32>
    %188 = vector.shape_cast %187 : vector<1x23x56xf32> to vector<23x56xf32>
    %cst_165 = arith.constant dense<0.000000e+00> : vector<32x56xf32>
    %189 = tpu.matmul %186, %188, %cst_165 {dimension_numbers = #tpu.dot_dimension_numbers<[1], [0], [0], [1], [0, 0, 1, 1], [], []>, precision = #tpu.contract_precision<fp32>} : vector<32x23xf32>, vector<23x56xf32>, vector<32x56xf32> -> vector<32x56xf32>
    %190 = arith.addf %181, %189 : vector<32x56xf32>
    %c1_i32_166 = arith.constant 1 : i32
    %191 = arith.addi %0, %c1_i32_166 : i32
    %c1_167 = arith.constant 1 : index
    %c0_168 = arith.constant 0 : index
    %192 = arith.index_cast %191 : i32 to index
    %c0_169 = arith.constant 0 : index
    %c0_170 = arith.constant 0 : index
    %193 = vector.load %arg1[%c1_167, %c0_168, %192, %c0_169, %c0_170] : memref<2x2x11x11x23xf32, #tpu.memory_space<vmem>>, vector<1x1x4x8x23xf32>
    %194 = vector.shape_cast %193 : vector<1x1x4x8x23xf32> to vector<4x8x23xf32>
    %195 = vector.shape_cast %194 : vector<4x8x23xf32> to vector<32x23xf32>
    %c21 = arith.constant 21 : index
    %c0_171 = arith.constant 0 : index
    %c0_172 = arith.constant 0 : index
    %196 = vector.load %arg2[%c21, %c0_171, %c0_172] : memref<49x23x56xf32, #tpu.memory_space<vmem>>, vector<1x23x56xf32>
    %197 = vector.shape_cast %196 : vector<1x23x56xf32> to vector<23x56xf32>
    %cst_173 = arith.constant dense<0.000000e+00> : vector<32x56xf32>
    %198 = tpu.matmul %195, %197, %cst_173 {dimension_numbers = #tpu.dot_dimension_numbers<[1], [0], [0], [1], [0, 0, 1, 1], [], []>, precision = #tpu.contract_precision<fp32>} : vector<32x23xf32>, vector<23x56xf32>, vector<32x56xf32> -> vector<32x56xf32>
    %199 = arith.addf %190, %198 : vector<32x56xf32>
    %c1_i32_174 = arith.constant 1 : i32
    %200 = arith.addi %0, %c1_i32_174 : i32
    %c1_175 = arith.constant 1 : index
    %c1_176 = arith.constant 1 : index
    %201 = arith.index_cast %200 : i32 to index
    %c0_177 = arith.constant 0 : index
    %c0_178 = arith.constant 0 : index
    %202 = vector.load %arg1[%c1_175, %c1_176, %201, %c0_177, %c0_178] : memref<2x2x11x11x23xf32, #tpu.memory_space<vmem>>, vector<1x1x4x8x23xf32>
    %203 = vector.shape_cast %202 : vector<1x1x4x8x23xf32> to vector<4x8x23xf32>
    %204 = vector.shape_cast %203 : vector<4x8x23xf32> to vector<32x23xf32>
    %c22 = arith.constant 22 : index
    %c0_179 = arith.constant 0 : index
    %c0_180 = arith.constant 0 : index
    %205 = vector.load %arg2[%c22, %c0_179, %c0_180] : memref<49x23x56xf32, #tpu.memory_space<vmem>>, vector<1x23x56xf32>
    %206 = vector.shape_cast %205 : vector<1x23x56xf32> to vector<23x56xf32>
    %cst_181 = arith.constant dense<0.000000e+00> : vector<32x56xf32>
    %207 = tpu.matmul %204, %206, %cst_181 {dimension_numbers = #tpu.dot_dimension_numbers<[1], [0], [0], [1], [0, 0, 1, 1], [], []>, precision = #tpu.contract_precision<fp32>} : vector<32x23xf32>, vector<23x56xf32>, vector<32x56xf32> -> vector<32x56xf32>
    %208 = arith.addf %199, %207 : vector<32x56xf32>
    %c1_i32_182 = arith.constant 1 : i32
    %209 = arith.addi %0, %c1_i32_182 : i32
    %c1_183 = arith.constant 1 : index
    %c0_184 = arith.constant 0 : index
    %210 = arith.index_cast %209 : i32 to index
    %c1_185 = arith.constant 1 : index
    %c0_186 = arith.constant 0 : index
    %211 = vector.load %arg1[%c1_183, %c0_184, %210, %c1_185, %c0_186] : memref<2x2x11x11x23xf32, #tpu.memory_space<vmem>>, vector<1x1x4x8x23xf32>
    %212 = vector.shape_cast %211 : vector<1x1x4x8x23xf32> to vector<4x8x23xf32>
    %213 = vector.shape_cast %212 : vector<4x8x23xf32> to vector<32x23xf32>
    %c23 = arith.constant 23 : index
    %c0_187 = arith.constant 0 : index
    %c0_188 = arith.constant 0 : index
    %214 = vector.load %arg2[%c23, %c0_187, %c0_188] : memref<49x23x56xf32, #tpu.memory_space<vmem>>, vector<1x23x56xf32>
    %215 = vector.shape_cast %214 : vector<1x23x56xf32> to vector<23x56xf32>
    %cst_189 = arith.constant dense<0.000000e+00> : vector<32x56xf32>
    %216 = tpu.matmul %213, %215, %cst_189 {dimension_numbers = #tpu.dot_dimension_numbers<[1], [0], [0], [1], [0, 0, 1, 1], [], []>, precision = #tpu.contract_precision<fp32>} : vector<32x23xf32>, vector<23x56xf32>, vector<32x56xf32> -> vector<32x56xf32>
    %217 = arith.addf %208, %216 : vector<32x56xf32>
    %c1_i32_190 = arith.constant 1 : i32
    %218 = arith.addi %0, %c1_i32_190 : i32
    %c1_191 = arith.constant 1 : index
    %c1_192 = arith.constant 1 : index
    %219 = arith.index_cast %218 : i32 to index
    %c1_193 = arith.constant 1 : index
    %c0_194 = arith.constant 0 : index
    %220 = vector.load %arg1[%c1_191, %c1_192, %219, %c1_193, %c0_194] : memref<2x2x11x11x23xf32, #tpu.memory_space<vmem>>, vector<1x1x4x8x23xf32>
    %221 = vector.shape_cast %220 : vector<1x1x4x8x23xf32> to vector<4x8x23xf32>
    %222 = vector.shape_cast %221 : vector<4x8x23xf32> to vector<32x23xf32>
    %c24 = arith.constant 24 : index
    %c0_195 = arith.constant 0 : index
    %c0_196 = arith.constant 0 : index
    %223 = vector.load %arg2[%c24, %c0_195, %c0_196] : memref<49x23x56xf32, #tpu.memory_space<vmem>>, vector<1x23x56xf32>
    %224 = vector.shape_cast %223 : vector<1x23x56xf32> to vector<23x56xf32>
    %cst_197 = arith.constant dense<0.000000e+00> : vector<32x56xf32>
    %225 = tpu.matmul %222, %224, %cst_197 {dimension_numbers = #tpu.dot_dimension_numbers<[1], [0], [0], [1], [0, 0, 1, 1], [], []>, precision = #tpu.contract_precision<fp32>} : vector<32x23xf32>, vector<23x56xf32>, vector<32x56xf32> -> vector<32x56xf32>
    %226 = arith.addf %217, %225 : vector<32x56xf32>
    %c1_i32_198 = arith.constant 1 : i32
    %227 = arith.addi %0, %c1_i32_198 : i32
    %c1_199 = arith.constant 1 : index
    %c0_200 = arith.constant 0 : index
    %228 = arith.index_cast %227 : i32 to index
    %c2_201 = arith.constant 2 : index
    %c0_202 = arith.constant 0 : index
    %229 = vector.load %arg1[%c1_199, %c0_200, %228, %c2_201, %c0_202] : memref<2x2x11x11x23xf32, #tpu.memory_space<vmem>>, vector<1x1x4x8x23xf32>
    %230 = vector.shape_cast %229 : vector<1x1x4x8x23xf32> to vector<4x8x23xf32>
    %231 = vector.shape_cast %230 : vector<4x8x23xf32> to vector<32x23xf32>
    %c25 = arith.constant 25 : index
    %c0_203 = arith.constant 0 : index
    %c0_204 = arith.constant 0 : index
    %232 = vector.load %arg2[%c25, %c0_203, %c0_204] : memref<49x23x56xf32, #tpu.memory_space<vmem>>, vector<1x23x56xf32>
    %233 = vector.shape_cast %232 : vector<1x23x56xf32> to vector<23x56xf32>
    %cst_205 = arith.constant dense<0.000000e+00> : vector<32x56xf32>
    %234 = tpu.matmul %231, %233, %cst_205 {dimension_numbers = #tpu.dot_dimension_numbers<[1], [0], [0], [1], [0, 0, 1, 1], [], []>, precision = #tpu.contract_precision<fp32>} : vector<32x23xf32>, vector<23x56xf32>, vector<32x56xf32> -> vector<32x56xf32>
    %235 = arith.addf %226, %234 : vector<32x56xf32>
    %c1_i32_206 = arith.constant 1 : i32
    %236 = arith.addi %0, %c1_i32_206 : i32
    %c1_207 = arith.constant 1 : index
    %c1_208 = arith.constant 1 : index
    %237 = arith.index_cast %236 : i32 to index
    %c2_209 = arith.constant 2 : index
    %c0_210 = arith.constant 0 : index
    %238 = vector.load %arg1[%c1_207, %c1_208, %237, %c2_209, %c0_210] : memref<2x2x11x11x23xf32, #tpu.memory_space<vmem>>, vector<1x1x4x8x23xf32>
    %239 = vector.shape_cast %238 : vector<1x1x4x8x23xf32> to vector<4x8x23xf32>
    %240 = vector.shape_cast %239 : vector<4x8x23xf32> to vector<32x23xf32>
    %c26 = arith.constant 26 : index
    %c0_211 = arith.constant 0 : index
    %c0_212 = arith.constant 0 : index
    %241 = vector.load %arg2[%c26, %c0_211, %c0_212] : memref<49x23x56xf32, #tpu.memory_space<vmem>>, vector<1x23x56xf32>
    %242 = vector.shape_cast %241 : vector<1x23x56xf32> to vector<23x56xf32>
    %cst_213 = arith.constant dense<0.000000e+00> : vector<32x56xf32>
    %243 = tpu.matmul %240, %242, %cst_213 {dimension_numbers = #tpu.dot_dimension_numbers<[1], [0], [0], [1], [0, 0, 1, 1], [], []>, precision = #tpu.contract_precision<fp32>} : vector<32x23xf32>, vector<23x56xf32>, vector<32x56xf32> -> vector<32x56xf32>
    %244 = arith.addf %235, %243 : vector<32x56xf32>
    %c1_i32_214 = arith.constant 1 : i32
    %245 = arith.addi %0, %c1_i32_214 : i32
    %c1_215 = arith.constant 1 : index
    %c0_216 = arith.constant 0 : index
    %246 = arith.index_cast %245 : i32 to index
    %c3_217 = arith.constant 3 : index
    %c0_218 = arith.constant 0 : index
    %247 = vector.load %arg1[%c1_215, %c0_216, %246, %c3_217, %c0_218] : memref<2x2x11x11x23xf32, #tpu.memory_space<vmem>>, vector<1x1x4x8x23xf32>
    %248 = vector.shape_cast %247 : vector<1x1x4x8x23xf32> to vector<4x8x23xf32>
    %249 = vector.shape_cast %248 : vector<4x8x23xf32> to vector<32x23xf32>
    %c27 = arith.constant 27 : index
    %c0_219 = arith.constant 0 : index
    %c0_220 = arith.constant 0 : index
    %250 = vector.load %arg2[%c27, %c0_219, %c0_220] : memref<49x23x56xf32, #tpu.memory_space<vmem>>, vector<1x23x56xf32>
    %251 = vector.shape_cast %250 : vector<1x23x56xf32> to vector<23x56xf32>
    %cst_221 = arith.constant dense<0.000000e+00> : vector<32x56xf32>
    %252 = tpu.matmul %249, %251, %cst_221 {dimension_numbers = #tpu.dot_dimension_numbers<[1], [0], [0], [1], [0, 0, 1, 1], [], []>, precision = #tpu.contract_precision<fp32>} : vector<32x23xf32>, vector<23x56xf32>, vector<32x56xf32> -> vector<32x56xf32>
    %253 = arith.addf %244, %252 : vector<32x56xf32>
    %c2_i32 = arith.constant 2 : i32
    %254 = arith.addi %0, %c2_i32 : i32
    %c0_222 = arith.constant 0 : index
    %c0_223 = arith.constant 0 : index
    %255 = arith.index_cast %254 : i32 to index
    %c0_224 = arith.constant 0 : index
    %c0_225 = arith.constant 0 : index
    %256 = vector.load %arg1[%c0_222, %c0_223, %255, %c0_224, %c0_225] : memref<2x2x11x11x23xf32, #tpu.memory_space<vmem>>, vector<1x1x4x8x23xf32>
    %257 = vector.shape_cast %256 : vector<1x1x4x8x23xf32> to vector<4x8x23xf32>
    %258 = vector.shape_cast %257 : vector<4x8x23xf32> to vector<32x23xf32>
    %c28 = arith.constant 28 : index
    %c0_226 = arith.constant 0 : index
    %c0_227 = arith.constant 0 : index
    %259 = vector.load %arg2[%c28, %c0_226, %c0_227] : memref<49x23x56xf32, #tpu.memory_space<vmem>>, vector<1x23x56xf32>
    %260 = vector.shape_cast %259 : vector<1x23x56xf32> to vector<23x56xf32>
    %cst_228 = arith.constant dense<0.000000e+00> : vector<32x56xf32>
    %261 = tpu.matmul %258, %260, %cst_228 {dimension_numbers = #tpu.dot_dimension_numbers<[1], [0], [0], [1], [0, 0, 1, 1], [], []>, precision = #tpu.contract_precision<fp32>} : vector<32x23xf32>, vector<23x56xf32>, vector<32x56xf32> -> vector<32x56xf32>
    %262 = arith.addf %253, %261 : vector<32x56xf32>
    %c2_i32_229 = arith.constant 2 : i32
    %263 = arith.addi %0, %c2_i32_229 : i32
    %c0_230 = arith.constant 0 : index
    %c1_231 = arith.constant 1 : index
    %264 = arith.index_cast %263 : i32 to index
    %c0_232 = arith.constant 0 : index
    %c0_233 = arith.constant 0 : index
    %265 = vector.load %arg1[%c0_230, %c1_231, %264, %c0_232, %c0_233] : memref<2x2x11x11x23xf32, #tpu.memory_space<vmem>>, vector<1x1x4x8x23xf32>
    %266 = vector.shape_cast %265 : vector<1x1x4x8x23xf32> to vector<4x8x23xf32>
    %267 = vector.shape_cast %266 : vector<4x8x23xf32> to vector<32x23xf32>
    %c29 = arith.constant 29 : index
    %c0_234 = arith.constant 0 : index
    %c0_235 = arith.constant 0 : index
    %268 = vector.load %arg2[%c29, %c0_234, %c0_235] : memref<49x23x56xf32, #tpu.memory_space<vmem>>, vector<1x23x56xf32>
    %269 = vector.shape_cast %268 : vector<1x23x56xf32> to vector<23x56xf32>
    %cst_236 = arith.constant dense<0.000000e+00> : vector<32x56xf32>
    %270 = tpu.matmul %267, %269, %cst_236 {dimension_numbers = #tpu.dot_dimension_numbers<[1], [0], [0], [1], [0, 0, 1, 1], [], []>, precision = #tpu.contract_precision<fp32>} : vector<32x23xf32>, vector<23x56xf32>, vector<32x56xf32> -> vector<32x56xf32>
    %271 = arith.addf %262, %270 : vector<32x56xf32>
    %c2_i32_237 = arith.constant 2 : i32
    %272 = arith.addi %0, %c2_i32_237 : i32
    %c0_238 = arith.constant 0 : index
    %c0_239 = arith.constant 0 : index
    %273 = arith.index_cast %272 : i32 to index
    %c1_240 = arith.constant 1 : index
    %c0_241 = arith.constant 0 : index
    %274 = vector.load %arg1[%c0_238, %c0_239, %273, %c1_240, %c0_241] : memref<2x2x11x11x23xf32, #tpu.memory_space<vmem>>, vector<1x1x4x8x23xf32>
    %275 = vector.shape_cast %274 : vector<1x1x4x8x23xf32> to vector<4x8x23xf32>
    %276 = vector.shape_cast %275 : vector<4x8x23xf32> to vector<32x23xf32>
    %c30 = arith.constant 30 : index
    %c0_242 = arith.constant 0 : index
    %c0_243 = arith.constant 0 : index
    %277 = vector.load %arg2[%c30, %c0_242, %c0_243] : memref<49x23x56xf32, #tpu.memory_space<vmem>>, vector<1x23x56xf32>
    %278 = vector.shape_cast %277 : vector<1x23x56xf32> to vector<23x56xf32>
    %cst_244 = arith.constant dense<0.000000e+00> : vector<32x56xf32>
    %279 = tpu.matmul %276, %278, %cst_244 {dimension_numbers = #tpu.dot_dimension_numbers<[1], [0], [0], [1], [0, 0, 1, 1], [], []>, precision = #tpu.contract_precision<fp32>} : vector<32x23xf32>, vector<23x56xf32>, vector<32x56xf32> -> vector<32x56xf32>
    %280 = arith.addf %271, %279 : vector<32x56xf32>
    %c2_i32_245 = arith.constant 2 : i32
    %281 = arith.addi %0, %c2_i32_245 : i32
    %c0_246 = arith.constant 0 : index
    %c1_247 = arith.constant 1 : index
    %282 = arith.index_cast %281 : i32 to index
    %c1_248 = arith.constant 1 : index
    %c0_249 = arith.constant 0 : index
    %283 = vector.load %arg1[%c0_246, %c1_247, %282, %c1_248, %c0_249] : memref<2x2x11x11x23xf32, #tpu.memory_space<vmem>>, vector<1x1x4x8x23xf32>
    %284 = vector.shape_cast %283 : vector<1x1x4x8x23xf32> to vector<4x8x23xf32>
    %285 = vector.shape_cast %284 : vector<4x8x23xf32> to vector<32x23xf32>
    %c31 = arith.constant 31 : index
    %c0_250 = arith.constant 0 : index
    %c0_251 = arith.constant 0 : index
    %286 = vector.load %arg2[%c31, %c0_250, %c0_251] : memref<49x23x56xf32, #tpu.memory_space<vmem>>, vector<1x23x56xf32>
    %287 = vector.shape_cast %286 : vector<1x23x56xf32> to vector<23x56xf32>
    %cst_252 = arith.constant dense<0.000000e+00> : vector<32x56xf32>
    %288 = tpu.matmul %285, %287, %cst_252 {dimension_numbers = #tpu.dot_dimension_numbers<[1], [0], [0], [1], [0, 0, 1, 1], [], []>, precision = #tpu.contract_precision<fp32>} : vector<32x23xf32>, vector<23x56xf32>, vector<32x56xf32> -> vector<32x56xf32>
    %289 = arith.addf %280, %288 : vector<32x56xf32>
    %c2_i32_253 = arith.constant 2 : i32
    %290 = arith.addi %0, %c2_i32_253 : i32
    %c0_254 = arith.constant 0 : index
    %c0_255 = arith.constant 0 : index
    %291 = arith.index_cast %290 : i32 to index
    %c2_256 = arith.constant 2 : index
    %c0_257 = arith.constant 0 : index
    %292 = vector.load %arg1[%c0_254, %c0_255, %291, %c2_256, %c0_257] : memref<2x2x11x11x23xf32, #tpu.memory_space<vmem>>, vector<1x1x4x8x23xf32>
    %293 = vector.shape_cast %292 : vector<1x1x4x8x23xf32> to vector<4x8x23xf32>
    %294 = vector.shape_cast %293 : vector<4x8x23xf32> to vector<32x23xf32>
    %c32 = arith.constant 32 : index
    %c0_258 = arith.constant 0 : index
    %c0_259 = arith.constant 0 : index
    %295 = vector.load %arg2[%c32, %c0_258, %c0_259] : memref<49x23x56xf32, #tpu.memory_space<vmem>>, vector<1x23x56xf32>
    %296 = vector.shape_cast %295 : vector<1x23x56xf32> to vector<23x56xf32>
    %cst_260 = arith.constant dense<0.000000e+00> : vector<32x56xf32>
    %297 = tpu.matmul %294, %296, %cst_260 {dimension_numbers = #tpu.dot_dimension_numbers<[1], [0], [0], [1], [0, 0, 1, 1], [], []>, precision = #tpu.contract_precision<fp32>} : vector<32x23xf32>, vector<23x56xf32>, vector<32x56xf32> -> vector<32x56xf32>
    %298 = arith.addf %289, %297 : vector<32x56xf32>
    %c2_i32_261 = arith.constant 2 : i32
    %299 = arith.addi %0, %c2_i32_261 : i32
    %c0_262 = arith.constant 0 : index
    %c1_263 = arith.constant 1 : index
    %300 = arith.index_cast %299 : i32 to index
    %c2_264 = arith.constant 2 : index
    %c0_265 = arith.constant 0 : index
    %301 = vector.load %arg1[%c0_262, %c1_263, %300, %c2_264, %c0_265] : memref<2x2x11x11x23xf32, #tpu.memory_space<vmem>>, vector<1x1x4x8x23xf32>
    %302 = vector.shape_cast %301 : vector<1x1x4x8x23xf32> to vector<4x8x23xf32>
    %303 = vector.shape_cast %302 : vector<4x8x23xf32> to vector<32x23xf32>
    %c33 = arith.constant 33 : index
    %c0_266 = arith.constant 0 : index
    %c0_267 = arith.constant 0 : index
    %304 = vector.load %arg2[%c33, %c0_266, %c0_267] : memref<49x23x56xf32, #tpu.memory_space<vmem>>, vector<1x23x56xf32>
    %305 = vector.shape_cast %304 : vector<1x23x56xf32> to vector<23x56xf32>
    %cst_268 = arith.constant dense<0.000000e+00> : vector<32x56xf32>
    %306 = tpu.matmul %303, %305, %cst_268 {dimension_numbers = #tpu.dot_dimension_numbers<[1], [0], [0], [1], [0, 0, 1, 1], [], []>, precision = #tpu.contract_precision<fp32>} : vector<32x23xf32>, vector<23x56xf32>, vector<32x56xf32> -> vector<32x56xf32>
    %307 = arith.addf %298, %306 : vector<32x56xf32>
    %c2_i32_269 = arith.constant 2 : i32
    %308 = arith.addi %0, %c2_i32_269 : i32
    %c0_270 = arith.constant 0 : index
    %c0_271 = arith.constant 0 : index
    %309 = arith.index_cast %308 : i32 to index
    %c3_272 = arith.constant 3 : index
    %c0_273 = arith.constant 0 : index
    %310 = vector.load %arg1[%c0_270, %c0_271, %309, %c3_272, %c0_273] : memref<2x2x11x11x23xf32, #tpu.memory_space<vmem>>, vector<1x1x4x8x23xf32>
    %311 = vector.shape_cast %310 : vector<1x1x4x8x23xf32> to vector<4x8x23xf32>
    %312 = vector.shape_cast %311 : vector<4x8x23xf32> to vector<32x23xf32>
    %c34 = arith.constant 34 : index
    %c0_274 = arith.constant 0 : index
    %c0_275 = arith.constant 0 : index
    %313 = vector.load %arg2[%c34, %c0_274, %c0_275] : memref<49x23x56xf32, #tpu.memory_space<vmem>>, vector<1x23x56xf32>
    %314 = vector.shape_cast %313 : vector<1x23x56xf32> to vector<23x56xf32>
    %cst_276 = arith.constant dense<0.000000e+00> : vector<32x56xf32>
    %315 = tpu.matmul %312, %314, %cst_276 {dimension_numbers = #tpu.dot_dimension_numbers<[1], [0], [0], [1], [0, 0, 1, 1], [], []>, precision = #tpu.contract_precision<fp32>} : vector<32x23xf32>, vector<23x56xf32>, vector<32x56xf32> -> vector<32x56xf32>
    %316 = arith.addf %307, %315 : vector<32x56xf32>
    %c2_i32_277 = arith.constant 2 : i32
    %317 = arith.addi %0, %c2_i32_277 : i32
    %c1_278 = arith.constant 1 : index
    %c0_279 = arith.constant 0 : index
    %318 = arith.index_cast %317 : i32 to index
    %c0_280 = arith.constant 0 : index
    %c0_281 = arith.constant 0 : index
    %319 = vector.load %arg1[%c1_278, %c0_279, %318, %c0_280, %c0_281] : memref<2x2x11x11x23xf32, #tpu.memory_space<vmem>>, vector<1x1x4x8x23xf32>
    %320 = vector.shape_cast %319 : vector<1x1x4x8x23xf32> to vector<4x8x23xf32>
    %321 = vector.shape_cast %320 : vector<4x8x23xf32> to vector<32x23xf32>
    %c35 = arith.constant 35 : index
    %c0_282 = arith.constant 0 : index
    %c0_283 = arith.constant 0 : index
    %322 = vector.load %arg2[%c35, %c0_282, %c0_283] : memref<49x23x56xf32, #tpu.memory_space<vmem>>, vector<1x23x56xf32>
    %323 = vector.shape_cast %322 : vector<1x23x56xf32> to vector<23x56xf32>
    %cst_284 = arith.constant dense<0.000000e+00> : vector<32x56xf32>
    %324 = tpu.matmul %321, %323, %cst_284 {dimension_numbers = #tpu.dot_dimension_numbers<[1], [0], [0], [1], [0, 0, 1, 1], [], []>, precision = #tpu.contract_precision<fp32>} : vector<32x23xf32>, vector<23x56xf32>, vector<32x56xf32> -> vector<32x56xf32>
    %325 = arith.addf %316, %324 : vector<32x56xf32>
    %c2_i32_285 = arith.constant 2 : i32
    %326 = arith.addi %0, %c2_i32_285 : i32
    %c1_286 = arith.constant 1 : index
    %c1_287 = arith.constant 1 : index
    %327 = arith.index_cast %326 : i32 to index
    %c0_288 = arith.constant 0 : index
    %c0_289 = arith.constant 0 : index
    %328 = vector.load %arg1[%c1_286, %c1_287, %327, %c0_288, %c0_289] : memref<2x2x11x11x23xf32, #tpu.memory_space<vmem>>, vector<1x1x4x8x23xf32>
    %329 = vector.shape_cast %328 : vector<1x1x4x8x23xf32> to vector<4x8x23xf32>
    %330 = vector.shape_cast %329 : vector<4x8x23xf32> to vector<32x23xf32>
    %c36 = arith.constant 36 : index
    %c0_290 = arith.constant 0 : index
    %c0_291 = arith.constant 0 : index
    %331 = vector.load %arg2[%c36, %c0_290, %c0_291] : memref<49x23x56xf32, #tpu.memory_space<vmem>>, vector<1x23x56xf32>
    %332 = vector.shape_cast %331 : vector<1x23x56xf32> to vector<23x56xf32>
    %cst_292 = arith.constant dense<0.000000e+00> : vector<32x56xf32>
    %333 = tpu.matmul %330, %332, %cst_292 {dimension_numbers = #tpu.dot_dimension_numbers<[1], [0], [0], [1], [0, 0, 1, 1], [], []>, precision = #tpu.contract_precision<fp32>} : vector<32x23xf32>, vector<23x56xf32>, vector<32x56xf32> -> vector<32x56xf32>
    %334 = arith.addf %325, %333 : vector<32x56xf32>
    %c2_i32_293 = arith.constant 2 : i32
    %335 = arith.addi %0, %c2_i32_293 : i32
    %c1_294 = arith.constant 1 : index
    %c0_295 = arith.constant 0 : index
    %336 = arith.index_cast %335 : i32 to index
    %c1_296 = arith.constant 1 : index
    %c0_297 = arith.constant 0 : index
    %337 = vector.load %arg1[%c1_294, %c0_295, %336, %c1_296, %c0_297] : memref<2x2x11x11x23xf32, #tpu.memory_space<vmem>>, vector<1x1x4x8x23xf32>
    %338 = vector.shape_cast %337 : vector<1x1x4x8x23xf32> to vector<4x8x23xf32>
    %339 = vector.shape_cast %338 : vector<4x8x23xf32> to vector<32x23xf32>
    %c37 = arith.constant 37 : index
    %c0_298 = arith.constant 0 : index
    %c0_299 = arith.constant 0 : index
    %340 = vector.load %arg2[%c37, %c0_298, %c0_299] : memref<49x23x56xf32, #tpu.memory_space<vmem>>, vector<1x23x56xf32>
    %341 = vector.shape_cast %340 : vector<1x23x56xf32> to vector<23x56xf32>
    %cst_300 = arith.constant dense<0.000000e+00> : vector<32x56xf32>
    %342 = tpu.matmul %339, %341, %cst_300 {dimension_numbers = #tpu.dot_dimension_numbers<[1], [0], [0], [1], [0, 0, 1, 1], [], []>, precision = #tpu.contract_precision<fp32>} : vector<32x23xf32>, vector<23x56xf32>, vector<32x56xf32> -> vector<32x56xf32>
    %343 = arith.addf %334, %342 : vector<32x56xf32>
    %c2_i32_301 = arith.constant 2 : i32
    %344 = arith.addi %0, %c2_i32_301 : i32
    %c1_302 = arith.constant 1 : index
    %c1_303 = arith.constant 1 : index
    %345 = arith.index_cast %344 : i32 to index
    %c1_304 = arith.constant 1 : index
    %c0_305 = arith.constant 0 : index
    %346 = vector.load %arg1[%c1_302, %c1_303, %345, %c1_304, %c0_305] : memref<2x2x11x11x23xf32, #tpu.memory_space<vmem>>, vector<1x1x4x8x23xf32>
    %347 = vector.shape_cast %346 : vector<1x1x4x8x23xf32> to vector<4x8x23xf32>
    %348 = vector.shape_cast %347 : vector<4x8x23xf32> to vector<32x23xf32>
    %c38 = arith.constant 38 : index
    %c0_306 = arith.constant 0 : index
    %c0_307 = arith.constant 0 : index
    %349 = vector.load %arg2[%c38, %c0_306, %c0_307] : memref<49x23x56xf32, #tpu.memory_space<vmem>>, vector<1x23x56xf32>
    %350 = vector.shape_cast %349 : vector<1x23x56xf32> to vector<23x56xf32>
    %cst_308 = arith.constant dense<0.000000e+00> : vector<32x56xf32>
    %351 = tpu.matmul %348, %350, %cst_308 {dimension_numbers = #tpu.dot_dimension_numbers<[1], [0], [0], [1], [0, 0, 1, 1], [], []>, precision = #tpu.contract_precision<fp32>} : vector<32x23xf32>, vector<23x56xf32>, vector<32x56xf32> -> vector<32x56xf32>
    %352 = arith.addf %343, %351 : vector<32x56xf32>
    %c2_i32_309 = arith.constant 2 : i32
    %353 = arith.addi %0, %c2_i32_309 : i32
    %c1_310 = arith.constant 1 : index
    %c0_311 = arith.constant 0 : index
    %354 = arith.index_cast %353 : i32 to index
    %c2_312 = arith.constant 2 : index
    %c0_313 = arith.constant 0 : index
    %355 = vector.load %arg1[%c1_310, %c0_311, %354, %c2_312, %c0_313] : memref<2x2x11x11x23xf32, #tpu.memory_space<vmem>>, vector<1x1x4x8x23xf32>
    %356 = vector.shape_cast %355 : vector<1x1x4x8x23xf32> to vector<4x8x23xf32>
    %357 = vector.shape_cast %356 : vector<4x8x23xf32> to vector<32x23xf32>
    %c39 = arith.constant 39 : index
    %c0_314 = arith.constant 0 : index
    %c0_315 = arith.constant 0 : index
    %358 = vector.load %arg2[%c39, %c0_314, %c0_315] : memref<49x23x56xf32, #tpu.memory_space<vmem>>, vector<1x23x56xf32>
    %359 = vector.shape_cast %358 : vector<1x23x56xf32> to vector<23x56xf32>
    %cst_316 = arith.constant dense<0.000000e+00> : vector<32x56xf32>
    %360 = tpu.matmul %357, %359, %cst_316 {dimension_numbers = #tpu.dot_dimension_numbers<[1], [0], [0], [1], [0, 0, 1, 1], [], []>, precision = #tpu.contract_precision<fp32>} : vector<32x23xf32>, vector<23x56xf32>, vector<32x56xf32> -> vector<32x56xf32>
    %361 = arith.addf %352, %360 : vector<32x56xf32>
    %c2_i32_317 = arith.constant 2 : i32
    %362 = arith.addi %0, %c2_i32_317 : i32
    %c1_318 = arith.constant 1 : index
    %c1_319 = arith.constant 1 : index
    %363 = arith.index_cast %362 : i32 to index
    %c2_320 = arith.constant 2 : index
    %c0_321 = arith.constant 0 : index
    %364 = vector.load %arg1[%c1_318, %c1_319, %363, %c2_320, %c0_321] : memref<2x2x11x11x23xf32, #tpu.memory_space<vmem>>, vector<1x1x4x8x23xf32>
    %365 = vector.shape_cast %364 : vector<1x1x4x8x23xf32> to vector<4x8x23xf32>
    %366 = vector.shape_cast %365 : vector<4x8x23xf32> to vector<32x23xf32>
    %c40 = arith.constant 40 : index
    %c0_322 = arith.constant 0 : index
    %c0_323 = arith.constant 0 : index
    %367 = vector.load %arg2[%c40, %c0_322, %c0_323] : memref<49x23x56xf32, #tpu.memory_space<vmem>>, vector<1x23x56xf32>
    %368 = vector.shape_cast %367 : vector<1x23x56xf32> to vector<23x56xf32>
    %cst_324 = arith.constant dense<0.000000e+00> : vector<32x56xf32>
    %369 = tpu.matmul %366, %368, %cst_324 {dimension_numbers = #tpu.dot_dimension_numbers<[1], [0], [0], [1], [0, 0, 1, 1], [], []>, precision = #tpu.contract_precision<fp32>} : vector<32x23xf32>, vector<23x56xf32>, vector<32x56xf32> -> vector<32x56xf32>
    %370 = arith.addf %361, %369 : vector<32x56xf32>
    %c2_i32_325 = arith.constant 2 : i32
    %371 = arith.addi %0, %c2_i32_325 : i32
    %c1_326 = arith.constant 1 : index
    %c0_327 = arith.constant 0 : index
    %372 = arith.index_cast %371 : i32 to index
    %c3_328 = arith.constant 3 : index
    %c0_329 = arith.constant 0 : index
    %373 = vector.load %arg1[%c1_326, %c0_327, %372, %c3_328, %c0_329] : memref<2x2x11x11x23xf32, #tpu.memory_space<vmem>>, vector<1x1x4x8x23xf32>
    %374 = vector.shape_cast %373 : vector<1x1x4x8x23xf32> to vector<4x8x23xf32>
    %375 = vector.shape_cast %374 : vector<4x8x23xf32> to vector<32x23xf32>
    %c41 = arith.constant 41 : index
    %c0_330 = arith.constant 0 : index
    %c0_331 = arith.constant 0 : index
    %376 = vector.load %arg2[%c41, %c0_330, %c0_331] : memref<49x23x56xf32, #tpu.memory_space<vmem>>, vector<1x23x56xf32>
    %377 = vector.shape_cast %376 : vector<1x23x56xf32> to vector<23x56xf32>
    %cst_332 = arith.constant dense<0.000000e+00> : vector<32x56xf32>
    %378 = tpu.matmul %375, %377, %cst_332 {dimension_numbers = #tpu.dot_dimension_numbers<[1], [0], [0], [1], [0, 0, 1, 1], [], []>, precision = #tpu.contract_precision<fp32>} : vector<32x23xf32>, vector<23x56xf32>, vector<32x56xf32> -> vector<32x56xf32>
    %379 = arith.addf %370, %378 : vector<32x56xf32>
    %c3_i32 = arith.constant 3 : i32
    %380 = arith.addi %0, %c3_i32 : i32
    %c0_333 = arith.constant 0 : index
    %c0_334 = arith.constant 0 : index
    %381 = arith.index_cast %380 : i32 to index
    %c0_335 = arith.constant 0 : index
    %c0_336 = arith.constant 0 : index
    %382 = vector.load %arg1[%c0_333, %c0_334, %381, %c0_335, %c0_336] : memref<2x2x11x11x23xf32, #tpu.memory_space<vmem>>, vector<1x1x4x8x23xf32>
    %383 = vector.shape_cast %382 : vector<1x1x4x8x23xf32> to vector<4x8x23xf32>
    %384 = vector.shape_cast %383 : vector<4x8x23xf32> to vector<32x23xf32>
    %c42 = arith.constant 42 : index
    %c0_337 = arith.constant 0 : index
    %c0_338 = arith.constant 0 : index
    %385 = vector.load %arg2[%c42, %c0_337, %c0_338] : memref<49x23x56xf32, #tpu.memory_space<vmem>>, vector<1x23x56xf32>
    %386 = vector.shape_cast %385 : vector<1x23x56xf32> to vector<23x56xf32>
    %cst_339 = arith.constant dense<0.000000e+00> : vector<32x56xf32>
    %387 = tpu.matmul %384, %386, %cst_339 {dimension_numbers = #tpu.dot_dimension_numbers<[1], [0], [0], [1], [0, 0, 1, 1], [], []>, precision = #tpu.contract_precision<fp32>} : vector<32x23xf32>, vector<23x56xf32>, vector<32x56xf32> -> vector<32x56xf32>
    %388 = arith.addf %379, %387 : vector<32x56xf32>
    %c3_i32_340 = arith.constant 3 : i32
    %389 = arith.addi %0, %c3_i32_340 : i32
    %c0_341 = arith.constant 0 : index
    %c1_342 = arith.constant 1 : index
    %390 = arith.index_cast %389 : i32 to index
    %c0_343 = arith.constant 0 : index
    %c0_344 = arith.constant 0 : index
    %391 = vector.load %arg1[%c0_341, %c1_342, %390, %c0_343, %c0_344] : memref<2x2x11x11x23xf32, #tpu.memory_space<vmem>>, vector<1x1x4x8x23xf32>
    %392 = vector.shape_cast %391 : vector<1x1x4x8x23xf32> to vector<4x8x23xf32>
    %393 = vector.shape_cast %392 : vector<4x8x23xf32> to vector<32x23xf32>
    %c43 = arith.constant 43 : index
    %c0_345 = arith.constant 0 : index
    %c0_346 = arith.constant 0 : index
    %394 = vector.load %arg2[%c43, %c0_345, %c0_346] : memref<49x23x56xf32, #tpu.memory_space<vmem>>, vector<1x23x56xf32>
    %395 = vector.shape_cast %394 : vector<1x23x56xf32> to vector<23x56xf32>
    %cst_347 = arith.constant dense<0.000000e+00> : vector<32x56xf32>
    %396 = tpu.matmul %393, %395, %cst_347 {dimension_numbers = #tpu.dot_dimension_numbers<[1], [0], [0], [1], [0, 0, 1, 1], [], []>, precision = #tpu.contract_precision<fp32>} : vector<32x23xf32>, vector<23x56xf32>, vector<32x56xf32> -> vector<32x56xf32>
    %397 = arith.addf %388, %396 : vector<32x56xf32>
    %c3_i32_348 = arith.constant 3 : i32
    %398 = arith.addi %0, %c3_i32_348 : i32
    %c0_349 = arith.constant 0 : index
    %c0_350 = arith.constant 0 : index
    %399 = arith.index_cast %398 : i32 to index
    %c1_351 = arith.constant 1 : index
    %c0_352 = arith.constant 0 : index
    %400 = vector.load %arg1[%c0_349, %c0_350, %399, %c1_351, %c0_352] : memref<2x2x11x11x23xf32, #tpu.memory_space<vmem>>, vector<1x1x4x8x23xf32>
    %401 = vector.shape_cast %400 : vector<1x1x4x8x23xf32> to vector<4x8x23xf32>
    %402 = vector.shape_cast %401 : vector<4x8x23xf32> to vector<32x23xf32>
    %c44 = arith.constant 44 : index
    %c0_353 = arith.constant 0 : index
    %c0_354 = arith.constant 0 : index
    %403 = vector.load %arg2[%c44, %c0_353, %c0_354] : memref<49x23x56xf32, #tpu.memory_space<vmem>>, vector<1x23x56xf32>
    %404 = vector.shape_cast %403 : vector<1x23x56xf32> to vector<23x56xf32>
    %cst_355 = arith.constant dense<0.000000e+00> : vector<32x56xf32>
    %405 = tpu.matmul %402, %404, %cst_355 {dimension_numbers = #tpu.dot_dimension_numbers<[1], [0], [0], [1], [0, 0, 1, 1], [], []>, precision = #tpu.contract_precision<fp32>} : vector<32x23xf32>, vector<23x56xf32>, vector<32x56xf32> -> vector<32x56xf32>
    %406 = arith.addf %397, %405 : vector<32x56xf32>
    %c3_i32_356 = arith.constant 3 : i32
    %407 = arith.addi %0, %c3_i32_356 : i32
    %c0_357 = arith.constant 0 : index
    %c1_358 = arith.constant 1 : index
    %408 = arith.index_cast %407 : i32 to index
    %c1_359 = arith.constant 1 : index
    %c0_360 = arith.constant 0 : index
    %409 = vector.load %arg1[%c0_357, %c1_358, %408, %c1_359, %c0_360] : memref<2x2x11x11x23xf32, #tpu.memory_space<vmem>>, vector<1x1x4x8x23xf32>
    %410 = vector.shape_cast %409 : vector<1x1x4x8x23xf32> to vector<4x8x23xf32>
    %411 = vector.shape_cast %410 : vector<4x8x23xf32> to vector<32x23xf32>
    %c45 = arith.constant 45 : index
    %c0_361 = arith.constant 0 : index
    %c0_362 = arith.constant 0 : index
    %412 = vector.load %arg2[%c45, %c0_361, %c0_362] : memref<49x23x56xf32, #tpu.memory_space<vmem>>, vector<1x23x56xf32>
    %413 = vector.shape_cast %412 : vector<1x23x56xf32> to vector<23x56xf32>
    %cst_363 = arith.constant dense<0.000000e+00> : vector<32x56xf32>
    %414 = tpu.matmul %411, %413, %cst_363 {dimension_numbers = #tpu.dot_dimension_numbers<[1], [0], [0], [1], [0, 0, 1, 1], [], []>, precision = #tpu.contract_precision<fp32>} : vector<32x23xf32>, vector<23x56xf32>, vector<32x56xf32> -> vector<32x56xf32>
    %415 = arith.addf %406, %414 : vector<32x56xf32>
    %c3_i32_364 = arith.constant 3 : i32
    %416 = arith.addi %0, %c3_i32_364 : i32
    %c0_365 = arith.constant 0 : index
    %c0_366 = arith.constant 0 : index
    %417 = arith.index_cast %416 : i32 to index
    %c2_367 = arith.constant 2 : index
    %c0_368 = arith.constant 0 : index
    %418 = vector.load %arg1[%c0_365, %c0_366, %417, %c2_367, %c0_368] : memref<2x2x11x11x23xf32, #tpu.memory_space<vmem>>, vector<1x1x4x8x23xf32>
    %419 = vector.shape_cast %418 : vector<1x1x4x8x23xf32> to vector<4x8x23xf32>
    %420 = vector.shape_cast %419 : vector<4x8x23xf32> to vector<32x23xf32>
    %c46 = arith.constant 46 : index
    %c0_369 = arith.constant 0 : index
    %c0_370 = arith.constant 0 : index
    %421 = vector.load %arg2[%c46, %c0_369, %c0_370] : memref<49x23x56xf32, #tpu.memory_space<vmem>>, vector<1x23x56xf32>
    %422 = vector.shape_cast %421 : vector<1x23x56xf32> to vector<23x56xf32>
    %cst_371 = arith.constant dense<0.000000e+00> : vector<32x56xf32>
    %423 = tpu.matmul %420, %422, %cst_371 {dimension_numbers = #tpu.dot_dimension_numbers<[1], [0], [0], [1], [0, 0, 1, 1], [], []>, precision = #tpu.contract_precision<fp32>} : vector<32x23xf32>, vector<23x56xf32>, vector<32x56xf32> -> vector<32x56xf32>
    %424 = arith.addf %415, %423 : vector<32x56xf32>
    %c3_i32_372 = arith.constant 3 : i32
    %425 = arith.addi %0, %c3_i32_372 : i32
    %c0_373 = arith.constant 0 : index
    %c1_374 = arith.constant 1 : index
    %426 = arith.index_cast %425 : i32 to index
    %c2_375 = arith.constant 2 : index
    %c0_376 = arith.constant 0 : index
    %427 = vector.load %arg1[%c0_373, %c1_374, %426, %c2_375, %c0_376] : memref<2x2x11x11x23xf32, #tpu.memory_space<vmem>>, vector<1x1x4x8x23xf32>
    %428 = vector.shape_cast %427 : vector<1x1x4x8x23xf32> to vector<4x8x23xf32>
    %429 = vector.shape_cast %428 : vector<4x8x23xf32> to vector<32x23xf32>
    %c47 = arith.constant 47 : index
    %c0_377 = arith.constant 0 : index
    %c0_378 = arith.constant 0 : index
    %430 = vector.load %arg2[%c47, %c0_377, %c0_378] : memref<49x23x56xf32, #tpu.memory_space<vmem>>, vector<1x23x56xf32>
    %431 = vector.shape_cast %430 : vector<1x23x56xf32> to vector<23x56xf32>
    %cst_379 = arith.constant dense<0.000000e+00> : vector<32x56xf32>
    %432 = tpu.matmul %429, %431, %cst_379 {dimension_numbers = #tpu.dot_dimension_numbers<[1], [0], [0], [1], [0, 0, 1, 1], [], []>, precision = #tpu.contract_precision<fp32>} : vector<32x23xf32>, vector<23x56xf32>, vector<32x56xf32> -> vector<32x56xf32>
    %433 = arith.addf %424, %432 : vector<32x56xf32>
    %c3_i32_380 = arith.constant 3 : i32
    %434 = arith.addi %0, %c3_i32_380 : i32
    %c0_381 = arith.constant 0 : index
    %c0_382 = arith.constant 0 : index
    %435 = arith.index_cast %434 : i32 to index
    %c3_383 = arith.constant 3 : index
    %c0_384 = arith.constant 0 : index
    %436 = vector.load %arg1[%c0_381, %c0_382, %435, %c3_383, %c0_384] : memref<2x2x11x11x23xf32, #tpu.memory_space<vmem>>, vector<1x1x4x8x23xf32>
    %437 = vector.shape_cast %436 : vector<1x1x4x8x23xf32> to vector<4x8x23xf32>
    %438 = vector.shape_cast %437 : vector<4x8x23xf32> to vector<32x23xf32>
    %c48 = arith.constant 48 : index
    %c0_385 = arith.constant 0 : index
    %c0_386 = arith.constant 0 : index
    %439 = vector.load %arg2[%c48, %c0_385, %c0_386] : memref<49x23x56xf32, #tpu.memory_space<vmem>>, vector<1x23x56xf32>
    %440 = vector.shape_cast %439 : vector<1x23x56xf32> to vector<23x56xf32>
    %cst_387 = arith.constant dense<0.000000e+00> : vector<32x56xf32>
    %441 = tpu.matmul %438, %440, %cst_387 {dimension_numbers = #tpu.dot_dimension_numbers<[1], [0], [0], [1], [0, 0, 1, 1], [], []>, precision = #tpu.contract_precision<fp32>} : vector<32x23xf32>, vector<23x56xf32>, vector<32x56xf32> -> vector<32x56xf32>
    %442 = arith.addf %433, %441 : vector<32x56xf32>
    %cst_388 = arith.constant 5.900000e+00 : f32
    %443 = vector.broadcast %cst_388 : f32 to vector<32x56xf32>
    %444 = arith.maximumf %442, %443 : vector<32x56xf32>
    %cst_389 = arith.constant 6.600000e+00 : f32
    %445 = vector.broadcast %cst_389 : f32 to vector<32x56xf32>
    %446 = arith.minimumf %444, %445 : vector<32x56xf32>
    %c0_390 = arith.constant 0 : index
    %c0_391 = arith.constant 0 : index
    %447 = vector.load %arg3[%c0_390, %c0_391] : memref<32x56xf32, #tpu.memory_space<vmem>>, vector<32x56xf32>
    tpu.vector_store %arg3[%c0_390, %c0_391], %446 {strides = array<i32>} : memref<32x56xf32, #tpu.memory_space<vmem>>, vector<32x56xf32>,
    return
  }
  func.func @transform_0(%arg0: i32) -> (i32, i32, i32, i32, i32) {
    %c0_i32 = arith.constant 0 : i32
    %c0_i32_0 = arith.constant 0 : i32
    %c0_i32_1 = arith.constant 0 : i32
    %c0_i32_2 = arith.constant 0 : i32
    %c0_i32_3 = arith.constant 0 : i32
    %c0_i32_4 = arith.constant 0 : i32
    return %c0_i32, %c0_i32_0, %c0_i32_1, %c0_i32_2, %c0_i32_3 : i32, i32, i32, i32, i32
  }
  func.func @transform_1(%arg0: i32) -> (i32, i32, i32) {
    %c0_i32 = arith.constant 0 : i32
    %c0_i32_0 = arith.constant 0 : i32
    %c0_i32_1 = arith.constant 0 : i32
    %c0_i32_2 = arith.constant 0 : i32
    return %c0_i32, %c0_i32_0, %c0_i32_1 : i32, i32, i32
  }
  func.func @transform_2(%arg0: i32) -> (i32, i32) {
    %c0_i32 = arith.constant 0 : i32
    %c0_i32_0 = arith.constant 0 : i32
    return %arg0, %c0_i32 : i32, i32
  }
}

</mosaic_0001>

<bundles_post_ra>
// kernel: model_forward.1
= control target key start
LH: loop header
LB: loop body
LE: loop exit
PB: predicated region body
PF: predicated region fallthrough
CT: control target
= control target key end

     0   :  { %s39363_s9 = smov 0   ;;  %s45634_s0 = inlined_call_operand.vmem [shape: f32[2,2,11,11,23], index: 0, kind: input, shape index: {}]   ;;  %s45635_s1 = inlined_call_operand.vmem [shape: f32[49,23,56], index: 1, kind: input, shape index: {}]   ;;  %s45636_s2 = inlined_call_operand.vmem [shape: f32[64,56], index: 2, kind: output, shape index: {}]  }
   0x1 LB: > { %s31030_s10 = sadd.s32 4294967295, %s39346_s9   ;;  %p31033_p0 = scmp.ge.s32.totalorder %s39346_s9, 1  ;;  %s39346_s9 = sphi %s39363_s9, %s12_s9  }
   0x2   : > { %p102_p1 = scmp.lt.s32.totalorder %s39346_s9, 3 }
   0x4   : > { %p103_p2 = pnand %p31033_p0, %p102_p1 }
   0x6   : > { %106 = sbr.rel (%p103_p2) target bundleno = 1428 (0x594), region = 28 }
   0xd   : > { %v31202_v0 = vld [vmem:[%s45635_s1 + $0x240] sm:$0xff]  ;;  %v31203_v1 = vld [vmem:[%s45635_s1 + $0x248] sm:$0xff]  ;;  %v31043_v2 = vld [vmem:[%s45635_s1 + $0x18] sm:$0xff]  ;;  %vm158_vm0 = vcmask 1046528   ;;  %s31387_s17 = sshll.u32 %s31030_s10, 6  ;;  %vm145_vm1 = vcmask 187392  }
   0xe   : > { %v15232_v3 = vand.u32 4294901760, %v31202_v0  ;;  %v15235_v4 = vand.u32 4294901760, %v31203_v1  ;;  %v31044_v5 = vld [vmem:[%s45635_s1 + $0x20] sm:$0xff]  ;;  %v163_v6 = vand.u32 4294901760, %v31043_v2  ;;  %v31204_v7 = vld [vmem:[%s45635_s1 + $0x250] sm:$0x7f]  ;;  %s39391_s24 = scalar_lea.vmem %s45634_s0, %s31387_s17 }
   0xf   : > { %v166_v8 = vand.u32 4294901760, %v31044_v5  ;;  %v15229_v9 = vsel %vm158_vm0, %v31204_v7, 0  ;;  %v31198_v10 = vld [vmem:[%s39391_s24 + $0x221] sm:$0xff]  ;;  %v31199_v11 = vld [vmem:[%s39391_s24 + $0x231] sm:$0xff]  ;;  %vm30930_vm2 = vcmask 457728  }
  0x10   : > { %v31045_v12 = vld [vmem:[%s45635_s1 + $0x28] sm:$0x7f]  ;;  %v39399_v13 = vpack.c.bf16 %v15235_v4, %v15232_v3  ;;  %v39401_v14 = vand.u32 4294901760, %v15229_v9  ;;  %v15217_v15 = vsel %vm145_vm1, %v31198_v10, 0  ;;  %v15220_v16 = vsel %vm145_vm1, %v31199_v11, 0  ;;  %v31039_v17 = vld [vmem:[%s39391_s24 + $0xb0] sm:$0xff] }
  0x11   : > { %v39406_v18 = vpack.c.bf16 %v166_v8, %v163_v6  ;;  %v39408_v19 = vand.u32 4294901760, %v15217_v15  ;;  %v39410_v20 = vand.u32 4294901760, %v15220_v16  ;;  %v160_v21 = vsel %vm158_vm0, %v31045_v12, 0  ;;  %v31200_v22 = vld [vmem:[%s39391_s24 + $0x241] sm:$0xff]  ;;  %v31201_v40 = vld [vmem:[%s39391_s24 + $0x251] sm:$0xff] }
  0x12   : > { %37573 = vmatprep.subr.bf16.mxu0 %v39399_v13  ;;  %v39415_v23 = vand.u32 4294901760, %v160_v21  ;;  %v39417_v24 = vsub.f32 %v31202_v0, %v15232_v3  ;;  %v39419_v25 = vsub.f32 %v31203_v1, %v15235_v4  ;;  %v147_v26 = vsel %vm145_vm1, %v31039_v17, 0  ;;  %v31040_v31 = vld [vmem:[%s39391_s24 + $0xc0] sm:$0xff]  ;;  %v31041_v51 = vld [vmem:[%s39391_s24 + $0xd0] sm:$0xff]  ;;  %v39501_v0 = vld [vmem:[%s45635_s1 + $0x258] sm:$0xff] }
  0x13   : > { %45659 = vst [vmem:[#allocation2_spill] sm:$0xff] %v39408_v19  ;;  %45660 = vst [vmem:[#allocation3_spill] sm:$0xff] %v39410_v20  ;;  %37575 = vmatpush3.bf16.msra.mxu0 %v39399_v13  ;;  %36985 = vmatprep.subr.bf16.mxu1 %v39406_v18  ;;  %v39425_v27 = vsub.f32 %v15217_v15, %v39408_v19  ;;  %v39428_v28 = vsub.f32 %v15220_v16, %v39410_v20  ;;  %v39430_v29 = vand.u32 4294901760, %v147_v26  ;;  %v31042_v59 = vld [vmem:[%s39391_s24 + $0xe0] sm:$0xff]  ;;  %v31211_v10 = vld [vmem:[%s45635_s1 + $0x268] sm:$0x7f] }
  0x14   : > { %v39432_v30 = vsub.f32 %v31043_v2, %v163_v6  ;;  %36987 = vmatpush3.bf16.msra.mxu1 %v39406_v18  ;;  %35224 = vmatprep.subr.mxu0 %v39401_v14  ;;  %v45642_v32 = vand.u32 4294901760, %v39417_v24  ;;  %v45641_v33 = vand.u32 4294901760, %v39419_v25  ;;  %v39439_v34 = vsub.f32 %v31044_v5, %v166_v8  ;;  %v31210_v5 = vld [vmem:[%s45635_s1 + $0x260] sm:$0xff]  ;;  %v31205_v6 = vld [vmem:[%s39391_s24 + $0x172] sm:$0xff] }
  0x15   : > { %v15223_v35 = vsel %vm145_vm1, %v31200_v22, 0  ;;  %v45640_v36 = vand.u32 4294901760, %v39425_v27  ;;  %v45639_v37 = vand.u32 4294901760, %v39428_v28  ;;  %33460 = vmatprep.subr.mxu1 %v39415_v23  ;;  %v39446_v38 = vsub.f32 %v147_v26, %v39430_v29  ;;  %v31206_v17 = vld [vmem:[%s39391_s24 + $0x182] sm:$0xff] }
  0x16   : > { %v273_v39 = vand.u32 4294901760, %v39432_v30  ;;  %v37576_v41 = vpack.c.bf16 %v45641_v33, %v45642_v32  ;;  %v280_v42 = vand.u32 4294901760, %v39439_v34  ;;  %v39455_v43 = vand.u32 4294901760, %v15223_v35 }
  0x17   : > { %v150_v44 = vsel %vm145_vm1, %v31040_v31, 0  ;;  %35225 = vmatpush3.msra.mxu0 %v39401_v14  ;;  %35226 = vmatprep.mubr.f32.mxu0 %v45640_v36  ;;  %v232_v45 = vand.u32 4294901760, %v39446_v38  ;;  %v15226_v50 = vsel %vm145_vm1, %v31201_v40, 0  ;;  %v39488_v58 = vsub.f32 %v15229_v9, %v39401_v14 }
  0x18   : > { %45661 = vst [vmem:[#allocation4_spill] sm:$0xff] %v39455_v43  ;;  %v274_v46 = vsub.f32 %v39432_v30, %v273_v39  ;;  %35227 = vmatmul.mubr.f32.vlgmr.msra.gmra.mrb[0].mxu0 %v45639_v37  ;;  %33461 = vmatpush3.msra.mxu1 %v39415_v23  ;;  %v281_v47 = vsub.f32 %v39439_v34, %v280_v42  ;;  %v39474_v49 = vand.u32 4294901760, %v150_v44  ;;  %v39481_v54 = vand.u32 4294901760, %v15226_v50 }
  0x19   : > { %v39472_v48 = vsub.f32 %v15223_v35, %v39455_v43  ;;  %37577 = vmatprep.subr.bf16.mxu0 %v37576_v41  ;;  %v233_v52 = vsub.f32 %v39446_v38, %v232_v45  ;;  %v153_v62 = vsel %vm145_vm1, %v31041_v51, 0  ;;  %v39496_v63 = vsub.f32 %v160_v21, %v39415_v23 }
  0x1a   : > { %v275_v53 = vand.u32 4294901760, %v274_v46  ;;  %45662 = vst [vmem:[#allocation5_spill] sm:$0xff] %v39481_v54  ;;  %v282_v55 = vand.u32 4294901760, %v281_v47  ;;  %37579 = vmatpush3.bf16.msra.mxu0 %v37576_v41  ;;  %v39485_v57 = vsub.f32 %v150_v44, %v39474_v49  ;;  %v39492_v61 = vsub.f32 %v15226_v50, %v39481_v54  ;;  %v31207_v44 = vld [vmem:[%s39391_s24 + $0x192] sm:$0xff] }
  0x1b   : > { %v45638_v56 = vand.u32 4294901760, %v39472_v48  ;;  %v234_v60 = vand.u32 4294901760, %v233_v52  ;;  %v39507_v3 = vand.u32 4294901760, %v39488_v58  ;;  %v39509_v4 = vand.u32 4294901760, %v153_v62 }
  0x1c   : > { %v36988_v1 = vpack.c.bf16 %v282_v55, %v275_v53  ;;  %v242_v2 = vand.u32 4294901760, %v39485_v57  ;;  %v45637_v7 = vand.u32 4294901760, %v39492_v61  ;;  %v39517_v8 = vand.u32 4294901760, %v39496_v63 }
  0x1d   : > { %35229 = vmatprep.mubr.f32.mxu0 %v45638_v56  ;;  %33462 = vmatprep.mubr.f32.mxu1 %v234_v60  ;;  %v156_v9 = vsel %vm145_vm1, %v31042_v59, 0  ;;  %v39528_v12 = vsub.f32 %v153_v62, %v39509_v4  ;;  %v15860_v16 = vand.u32 4294901760, %v39501_v0  ;;  %v15863_v22 = vand.u32 4294901760, %v31210_v5  ;;  %v31208_v60 = vld [vmem:[%s39391_s24 + $0x1a2] sm:$0xff] }
  0x1e   : > { %36989 = vmatprep.subr.bf16.mxu1 %v36988_v1  ;;  %v243_v11 = vsub.f32 %v39485_v57, %v242_v2  ;;  %35236 = vmatprep.subr.mxu0 %v39507_v3  ;;  %v39530_v15 = vand.u32 4294901760, %v156_v9  ;;  %v288_v21 = vsub.f32 %v39496_v63, %v39517_v8  ;;  %v15845_v26 = vsel %vm145_vm1, %v31205_v6, 0 }
  0x1f   : > { %35230 = vmatmul.mubr.f32.gmra.mrb[2].mxu0 %v45637_v7  ;;  %v252_v35 = vand.u32 4294901760, %v39528_v12  ;;  %v15857_v41 = vsel %vm158_vm0, %v31211_v10, 0  ;;  %v36992_v47 = vpack.c.bf16 %v39439_v34, %v39432_v30  ;;  %v39550_v50 = vand.u32 4294901760, %v15845_v26  ;;  %v129_v30 = vld [vmem:[%s39391_s24 + $0x10] sm:$0xff] }
  0x20   : > { %v244_v31 = vand.u32 4294901760, %v243_v11  ;;  %35237 = vmatpush3.msra.mxu0 %v39507_v3  ;;  %35238 = vmatprep.mubr.f32.mxu0 %v39408_v19  ;;  %v39543_v40 = vsub.f32 %v156_v9, %v39530_v15  ;;  %v289_v46 = vand.u32 4294901760, %v288_v21  ;;  %v15848_v51 = vsel %vm145_vm1, %v31206_v17, 0 }
  0x21   : > { %37581 = vmatprep.subr.bf16.mxu0 %v39399_v13  ;;  %v253_v52 = vsub.f32 %v39528_v12, %v252_v35  ;;  %v39557_v55 = vand.u32 4294901760, %v15848_v51  ;;  %v39560_v59 = vsub.f32 %v39501_v0, %v15860_v16  ;;  %v39564_v62 = vand.u32 4294901760, %v15857_v41 }
  0x22   : > { %33463 = vmatmul.mubr.f32.vlgmr.msra.gmra.mrb[0].mxu1 %v244_v31  ;;  %v262_v53 = vand.u32 4294901760, %v39543_v40  ;;  %v39567_v6 = vsub.f32 %v15845_v26, %v39550_v50  ;;  %v39569_v9 = vsub.f32 %v31210_v5, %v15863_v22  ;;  %v15851_v10 = vsel %vm145_vm1, %v31207_v44, 0 }
  0x23   : > { %36991 = vmatpush3.bf16.msra.mxu1 %v36988_v1  ;;  %35239 = vmatmul.mubr.f32.vlgmr.msra.gmra.mrb[0].mxu0 %v39410_v20  ;;  %v254_v11 = vand.u32 4294901760, %v253_v52  ;;  %v39577_v1 = vsub.f32 %v15848_v51, %v39557_v55  ;;  %v15970_v17 = vand.u32 4294901760, %v39560_v59  ;;  %v39583_v26 = vand.u32 4294901760, %v15851_v10 }
  0x24   : > { %33472 = vmatprep.subr.mxu1 %v289_v46  ;;  %v263_v0 = vsub.f32 %v39543_v40, %v262_v53  ;;  %35241 = vmatprep.mubr.f32.mxu0 %v39455_v43  ;;  %v15929_v5 = vand.u32 4294901760, %v39567_v6  ;;  %v15977_v21 = vand.u32 4294901760, %v39569_v9  ;;  %v15854_v31 = vsel %vm145_vm1, %v31208_v60, 0 }
  0x25   : > { %37583 = vmatpush3.bf16.msra.mxu0 %v39399_v13  ;;  %33465 = vmatprep.mubr.f32.mxu1 %v254_v11  ;;  %v39587_v52 = vpack.c.bf16 %v15863_v22, %v15860_v16  ;;  %v15939_v51 = vand.u32 4294901760, %v39577_v1  ;;  %v39590_v7 = vand.u32 4294901760, %v15854_v31  ;;  %v15971_v56 = vsub.f32 %v39560_v59, %v15970_v17 }
  0x26   : > { %v264_v44 = vand.u32 4294901760, %v263_v0  ;;  %35248 = vmatprep.subr.mxu0 %v39401_v14  ;;  %v15978_v60 = vsub.f32 %v39569_v9, %v15977_v21  ;;  %v39600_v11 = vsub.f32 %v15851_v10, %v39583_v26  ;;  %v15930_v16 = vsub.f32 %v39567_v6, %v15929_v5 }
  0x27   : > { %33473 = vmatpush3.msra.mxu1 %v289_v46  ;;  %35242 = vmatmul.mubr.f32.gmra.mrb[2].mxu0 %v39481_v54  ;;  %v39606_v22 = vsub.f32 %v15854_v31, %v39590_v7  ;;  %v39609_v46 = vsub.f32 %v15857_v41, %v39564_v62  ;;  %v15940_v10 = vsub.f32 %v39577_v1, %v15939_v51  ;;  %v15972_v31 = vand.u32 4294901760, %v15971_v56 }
  0x28   : > { %33466 = vmatmul.mubr.f32.gmra.mrb[2].mxu1 %v264_v44  ;;  %36993 = vmatprep.subr.bf16.mxu1 %v36992_v47  ;;  %v15949_v0 = vand.u32 4294901760, %v39600_v11  ;;  %v15979_v44 = vand.u32 4294901760, %v15978_v60  ;;  %v15931_v36 = vand.u32 4294901760, %v15930_v16 }
  0x29   : > { %33474 = vmatprep.mubr.f32.mxu1 %v39430_v29  ;;  %35249 = vmatpush3.msra.mxu0 %v39401_v14  ;;  %v15959_v41 = vand.u32 4294901760, %v39606_v22  ;;  %v39622_v37 = vand.u32 4294901760, %v39609_v46  ;;  %v15941_v56 = vand.u32 4294901760, %v15940_v10 }
  0x2a   : > { %35250 = vmatprep.mubr.f32.mxu0 %v39408_v19  ;;  %37585 = vmatprep.subr.bf16.mxu0 %v39587_v52  ;;  %v15950_v33 = vsub.f32 %v39600_v11, %v15949_v0  ;;  %v37588_v60 = vpack.c.bf16 %v15979_v44, %v15972_v31  ;;  %v128_v44 = vld [vmem:[%s39391_s24] sm:$0xff] }
  0x2b   : > { %35251 = vmatmul.mubr.f32.vlgmr.msra.gmra.mrb[0].mxu0 %v39410_v20  ;;  %v15960_v16 = vsub.f32 %v39606_v22, %v15959_v41  ;;  %v15985_v32 = vsub.f32 %v39609_v46, %v39622_v37 }
  0x2c   : > { %33475 = vmatmul.mubr.f32.vlgmr.msra.gmra.mrb[0].mxu1 %v39474_v49  ;;  %35253 = vmatprep.mubr.f32.mxu0 %v39455_v43 }
  0x2d   : > { %36995 = vmatpush3.bf16.msra.mxu1 %v36992_v47  ;;  %33477 = vmatprep.mubr.f32.mxu1 %v39509_v4  ;;  %v15951_v47 = vand.u32 4294901760, %v15950_v33  ;;  %v15961_v10 = vand.u32 4294901760, %v15960_v16  ;;  %v15986_v31 = vand.u32 4294901760, %v15985_v32  ;;  %v37000_v33 = vpack.c.bf16 %v280_v42, %v273_v39 }
  0x2e   : > { %33484 = vmatprep.subr.mxu1 %v39496_v63  ;;  %37587 = vmatpush3.bf16.msra.mxu0 %v39587_v52  ;;  %v37592_v32 = vpack.c.bf16 %v39569_v9, %v39560_v59  ;;  %v764_v42 = vsel %vm145_vm1, %v128_v44, 0  ;;  %v39760_v59 = vld [vmem:[%s45635_s1 + $0x278] sm:$0xff] }
  0x2f   : > { %35254 = vmatmul.mubr.f32.gmra.mrb[2].mxu0 %v39481_v54  ;;  %35260 = vmatprep.subr.mxu0 %v39564_v62 }
  0x30   : > { %33478 = vmatmul.mubr.f32.gmra.mrb[2].mxu1 %v39530_v15  ;;  %35262 = vmatprep.mubr.f32.mxu0 %v15931_v36  ;;  %v132_v36 = vld [vmem:[%s45635_s1] sm:$0xff] }
  0x31   : > { %33485 = vmatpush3.msra.mxu1 %v39496_v63  ;;  %33486 = vmatprep.mubr.f32.mxu1 %v39446_v38  ;;  %v133_v63 = vld [vmem:[%s45635_s1 + $0x8] sm:$0xff]  ;;  %v779_v34 = vand.u32 4294901760, %v132_v36  ;;  %v134_v38 = vld [vmem:[%s45635_s1 + $0x10] sm:$0x7f] }
  0x32   : > { %36997 = vmatprep.subr.bf16.mxu1 %v39406_v18  ;;  %35261 = vmatpush3.msra.mxu0 %v39564_v62  ;;  %v782_v39 = vand.u32 4294901760, %v133_v63 }
  0x33   : > { %35263 = vmatmul.mubr.f32.vlgmr.msra.gmra.mrb[0].mxu0 %v15941_v56  ;;  %37589 = vmatprep.subr.bf16.mxu0 %v37588_v60  ;;  %v130_v56 = vld [vmem:[%s39391_s24 + $0x20] sm:$0xff]  ;;  %v39682_v16 = vsub.f32 %v132_v36, %v779_v34 }
  0x34   : > { %33487 = vmatmul.mubr.f32.vlgmr.msra.gmra.mrb[0].mxu1 %v39485_v57  ;;  %35265 = vmatprep.mubr.f32.mxu0 %v15951_v47  ;;  %v39684_v57 = vsub.f32 %v133_v63, %v782_v39  ;;  %v131_v47 = vld [vmem:[%s39391_s24 + $0x30] sm:$0xff] }
  0x35   : > { %36999 = vmatpush3.bf16.msra.mxu1 %v39406_v18  ;;  %33489 = vmatprep.mubr.f32.mxu1 %v39528_v12 }
  0x36   : > { %33496 = vmatprep.subr.mxu1 %v39415_v23  ;;  %37591 = vmatpush3.bf16.msra.mxu0 %v37588_v60  ;;  %v39679_v60 = vand.u32 4294901760, %v764_v42 }
  0x37   : > { %35266 = vmatmul.mubr.f32.gmra.mrb[2].mxu0 %v15961_v10  ;;  %35272 = vmatprep.subr.mxu0 %v15986_v31  ;;  %v776_v10 = vsel %vm158_vm0, %v134_v38, 0  ;;  %v39749_v38 = vld [vmem:[%s45635_s1 + $0x270] sm:$0xff] }
  0x38   : > { %33490 = vmatmul.mubr.f32.gmra.mrb[2].mxu1 %v39543_v40  ;;  %35274 = vmatprep.mubr.f32.mxu0 %v39550_v50  ;;  %v889_v40 = vand.u32 4294901760, %v39682_v16 }
  0x39   : > { %33497 = vmatpush3.msra.mxu1 %v39415_v23  ;;  %33498 = vmatprep.mubr.f32.mxu1 %v232_v45  ;;  %v767_v45 = vsel %vm145_vm1, %v129_v30, 0 }
  0x3a   : > { %37001 = vmatprep.subr.bf16.mxu1 %v37000_v33  ;;  %35273 = vmatpush3.msra.mxu0 %v15986_v31  ;;  %v39691_v12 = vand.u32 4294901760, %v767_v45  ;;  %v890_v30 = vsub.f32 %v39682_v16, %v889_v40 }
  0x3b   : > { %35275 = vmatmul.mubr.f32.vlgmr.msra.gmra.mrb[0].mxu0 %v39557_v55  ;;  %37593 = vmatprep.subr.bf16.mxu0 %v37592_v32 }
  0x3c   : > { %33499 = vmatmul.mubr.f32.vlgmr.msra.gmra.mrb[0].mxu1 %v242_v2  ;;  %35277 = vmatprep.mubr.f32.mxu0 %v39583_v26  ;;  %v770_v2 = vsel %vm145_vm1, %v130_v56, 0 }
  0x3d   : > { %37003 = vmatpush3.bf16.msra.mxu1 %v37000_v33  ;;  %33501 = vmatprep.mubr.f32.mxu1 %v252_v35  ;;  %v39699_v35 = vsub.f32 %v764_v42, %v39679_v60  ;;  %v39701_v31 = vand.u32 4294901760, %v770_v2  ;;  %v773_v33 = vsel %vm145_vm1, %v131_v47, 0  ;;  %v37600_v42 = vpack.c.bf16 %v15977_v21, %v15970_v17  ;;  %v31214_v47 = vld [vmem:[%s39391_s24 + $0x242] sm:$0xff] }
  0x3e   : > { %33508 = vmatprep.subr.mxu1 %v39517_v8  ;;  %37595 = vmatpush3.bf16.msra.mxu0 %v37592_v32  ;;  %v39706_v32 = vand.u32 4294901760, %v776_v10  ;;  %v39717_v36 = vand.u32 4294901760, %v773_v33  ;;  %v891_v21 = vand.u32 4294901760, %v890_v30 }
  0x3f   : > { %35278 = vmatmul.mubr.f32.gmra.mrb[2].mxu0 %v39590_v7  ;;  %35284 = vmatprep.subr.mxu0 %v39609_v46  ;;  %v45644_v63 = vand.u32 4294901760, %v39699_v35  ;;  %v39725_v44 = vsub.f32 %v770_v2, %v39701_v31 }
  0x40   : > { %33502 = vmatmul.mubr.f32.gmra.mrb[2].mxu1 %v262_v53  ;;  %35286 = vmatprep.mubr.f32.mxu0 %v39567_v6  ;;  %v45645_v53 = vand.u32 4294901760, %v39684_v57 }
  0x41   : > { %33509 = vmatpush3.msra.mxu1 %v39517_v8  ;;  %33510 = vmatprep.mubr.f32.mxu1 %v39430_v29  ;;  %v39713_v8 = vsub.f32 %v767_v45, %v39691_v12  ;;  %v39755_v45 = vsub.f32 %v773_v33, %v39717_v36  ;;  %v849_v9 = vsub.f32 %v39699_v35, %v45644_v63  ;;  %v39768_v6 = vand.u32 4294901760, %v39725_v44 }
  0x42   : > { %37005 = vmatprep.subr.bf16.mxu1 %v39406_v18  ;;  %35285 = vmatpush3.msra.mxu0 %v39609_v46  ;;  %v39721_v46 = vpack.c.bf16 %v782_v39, %v779_v34  ;;  %v39736_v34 = vsub.f32 %v776_v10, %v39706_v32  ;;  %v31212_v39 = vld [vmem:[%s39391_s24 + $0x222] sm:$0xff]  ;;  %v16491_v33 = vand.u32 4294901760, %v39760_v59 }
  0x43   : > { %35287 = vmatmul.mubr.f32.vlgmr.msra.gmra.mrb[0].mxu0 %v39577_v1  ;;  %37597 = vmatprep.subr.bf16.mxu0 %v39587_v52  ;;  %v45643_v56 = vand.u32 4294901760, %v39713_v8  ;;  %v16473_v17 = vsel %vm145_vm1, %v31212_v39, 0  ;;  %v39789_v30 = vand.u32 4294901760, %v39755_v45  ;;  %v31218_v1 = vld [vmem:[%s45635_s1 + $0x280] sm:$0x7f]  ;;  %v850_v39 = vand.u32 4294901760, %v849_v9 }
  0x44   : > { %33511 = vmatmul.mubr.f32.vlgmr.msra.gmra.mrb[0].mxu1 %v39474_v49  ;;  %35289 = vmatprep.mubr.f32.mxu0 %v39600_v11  ;;  %v16479_v11 = vsel %vm145_vm1, %v31214_v47, 0  ;;  %v39816_v47 = vsub.f32 %v39760_v59, %v16491_v33 }
  0x45   : > { %37007 = vmatpush3.bf16.msra.mxu1 %v39406_v18  ;;  %33513 = vmatprep.mubr.f32.mxu1 %v39509_v4  ;;  %v897_v18 = vsub.f32 %v39684_v57, %v45645_v53  ;;  %v859_v10 = vsub.f32 %v39713_v8, %v45643_v56 }
  0x46   : > { %33520 = vmatprep.subr.mxu1 %v39415_v23  ;;  %37599 = vmatpush3.bf16.msra.mxu0 %v39587_v52 }
  0x47   : > { %35290 = vmatmul.mubr.f32.gmra.mrb[2].mxu0 %v39606_v22  ;;  %35296 = vmatprep.subr.mxu0 %v39564_v62  ;;  %v898_v2 = vand.u32 4294901760, %v897_v18  ;;  %v860_v53 = vand.u32 4294901760, %v859_v10  ;;  %v39825_v22 = vand.u32 4294901760, %v16479_v11  ;;  %v16605_v10 = vand.u32 4294901760, %v39816_v47 }
  0x48   : > { %33514 = vmatmul.mubr.f32.gmra.mrb[2].mxu1 %v39530_v15  ;;  %35298 = vmatprep.mubr.f32.mxu0 %v15929_v5  ;;  %v31213_v5 = vld [vmem:[%s39391_s24 + $0x232] sm:$0xff] }
  0x49   : > { %33521 = vmatpush3.msra.mxu1 %v39415_v23  ;;  %33522 = vmatprep.mubr.f32.mxu1 %v39430_v29  ;;  %v39775_v23 = vand.u32 4294901760, %v39736_v34  ;;  %v16488_v29 = vand.u32 4294901760, %v39749_v38  ;;  %v16476_v18 = vsel %vm145_vm1, %v31213_v5, 0  ;;  %v37012_v56 = vpack.c.bf16 %v898_v2, %v891_v21 }
  0x4a   : > { %37009 = vmatprep.subr.bf16.mxu1 %v39721_v46  ;;  %35297 = vmatpush3.msra.mxu0 %v39564_v62  ;;  %v39813_v9 = vand.u32 4294901760, %v16476_v18 }
  0x4b   : > { %35299 = vmatmul.mubr.f32.vlgmr.msra.gmra.mrb[0].mxu0 %v15939_v51  ;;  %37601 = vmatprep.subr.bf16.mxu0 %v37600_v42  ;;  %v39794_v51 = vand.u32 4294901760, %v16473_v17  ;;  %v904_v63 = vsub.f32 %v39736_v34, %v39775_v23  ;;  %v39807_v5 = vsub.f32 %v39749_v38, %v16488_v29 }
  0x4c   : > { %33523 = vmatmul.mubr.f32.vlgmr.msra.gmra.mrb[0].mxu1 %v39474_v49  ;;  %35301 = vmatprep.mubr.f32.mxu0 %v15949_v0  ;;  %v869_v49 = vsub.f32 %v39725_v44, %v39768_v6  ;;  %v31215_v0 = vld [vmem:[%s39391_s24 + $0x252] sm:$0xff]  ;;  %v39838_v2 = vsub.f32 %v16476_v18, %v39813_v9  ;;  %v37016_v18 = vpack.c.bf16 %v39684_v57, %v39682_v16  ;;  %v45664_v16 = vand.u32 4294901760, %v39699_v35 }
  0x4d   : > { %37011 = vmatpush3.bf16.msra.mxu1 %v39721_v46  ;;  %33525 = vmatprep.mubr.f32.mxu1 %v39509_v4  ;;  %v16485_v4 = vsel %vm158_vm0, %v31218_v1, 0  ;;  %v39823_v38 = vsub.f32 %v16473_v17, %v39794_v51  ;;  %v905_v59 = vand.u32 4294901760, %v904_v63  ;;  %v39848_v63 = vsub.f32 %v16479_v11, %v39825_v22 }
  0x4e   : > { %33532 = vmatprep.subr.mxu1 %v39706_v32  ;;  %37603 = vmatpush3.bf16.msra.mxu0 %v37600_v42  ;;  %v879_v42 = vsub.f32 %v39755_v45, %v39789_v30  ;;  %v39829_v21 = vand.u32 4294901760, %v869_v49  ;;  %v39835_v17 = vand.u32 4294901760, %v16485_v4  ;;  %v39854_v49 = vpack.c.bf16 %v16491_v33, %v16488_v29 }
  0x4f   : > { %35302 = vmatmul.mubr.f32.gmra.mrb[2].mxu0 %v15959_v41  ;;  %35308 = vmatprep.subr.mxu0 %v39622_v37  ;;  %v16482_v41 = vsel %vm145_vm1, %v31215_v0, 0  ;;  %v16606_v11 = vsub.f32 %v39816_v47, %v16605_v10  ;;  %v45650_v33 = vand.u32 4294901760, %v39848_v63 }
  0x50   : > { %33526 = vmatmul.mubr.f32.gmra.mrb[2].mxu1 %v39530_v15  ;;  %35310 = vmatprep.mubr.f32.mxu0 %v39550_v50  ;;  %v16598_v15 = vand.u32 4294901760, %v39807_v5  ;;  %v39841_v1 = vand.u32 4294901760, %v16482_v41 }
  0x51   : > { %33533 = vmatpush3.msra.mxu1 %v39706_v32  ;;  %33534 = vmatprep.mubr.f32.mxu1 %v850_v39  ;;  %v39843_v39 = vand.u32 4294901760, %v879_v42 }
  0x52   : > { %37013 = vmatprep.subr.bf16.mxu1 %v37012_v56  ;;  %35309 = vmatpush3.msra.mxu0 %v39622_v37  ;;  %v45646_v37 = vand.u32 4294901760, %v39823_v38  ;;  %v39866_v0 = vsub.f32 %v16482_v41, %v39841_v1 }
  0x53   : > { %35311 = vmatmul.mubr.f32.vlgmr.msra.gmra.mrb[0].mxu0 %v39557_v55  ;;  %37605 = vmatprep.subr.bf16.mxu0 %v39587_v52 }
  0x54   : > { %33535 = vmatmul.mubr.f32.vlgmr.msra.gmra.mrb[0].mxu1 %v860_v53  ;;  %35313 = vmatprep.mubr.f32.mxu0 %v39583_v26  ;;  %v16599_v53 = vsub.f32 %v39807_v5, %v16598_v15  ;;  %v16558_v29 = vsub.f32 %v39823_v38, %v45646_v37  ;;  %v45649_v41 = vand.u32 4294901760, %v39866_v0 }
  0x55   : > { %37015 = vmatpush3.bf16.msra.mxu1 %v37012_v56  ;;  %33537 = vmatprep.mubr.f32.mxu1 %v39829_v21  ;;  %v16567_v56 = vand.u32 4294901760, %v39838_v2 }
  0x56   : > { %33544 = vmatprep.subr.mxu1 %v905_v59  ;;  %37607 = vmatpush3.bf16.msra.mxu0 %v39587_v52  ;;  %v39869_v52 = vsub.f32 %v16485_v4, %v39835_v17  ;;  %v16600_v42 = vand.u32 4294901760, %v16599_v53  ;;  %v16607_v4 = vand.u32 4294901760, %v16606_v11 }
  0x57   : > { %35314 = vmatmul.mubr.f32.gmra.mrb[2].mxu0 %v39590_v7  ;;  %35320 = vmatprep.subr.mxu0 %v39564_v62 }
  0x58   : > { %33538 = vmatmul.mubr.f32.gmra.mrb[2].mxu1 %v39843_v39  ;;  %35322 = vmatprep.mubr.f32.mxu0 %v39550_v50  ;;  %v16568_v50 = vsub.f32 %v39838_v2, %v16567_v56  ;;  %v39886_v37 = vand.u32 4294901760, %v39869_v52  ;;  %v37612_v53 = vpack.c.bf16 %v16607_v4, %v16600_v42  ;;  %v31046_v4 = vld [vmem:[%s45635_s1 + $0x30] sm:$0xff] }
  0x59   : > { %33545 = vmatpush3.msra.mxu1 %v905_v59  ;;  %33546 = vmatprep.mubr.f32.mxu1 %v39679_v60 }
  0x5a   : > { %37017 = vmatprep.subr.bf16.mxu1 %v37016_v18  ;;  %35321 = vmatpush3.msra.mxu0 %v39564_v62  ;;  %v16559_v62 = vand.u32 4294901760, %v16558_v29  ;;  %v16569_v59 = vand.u32 4294901760, %v16568_v50  ;;  %v16613_v11 = vsub.f32 %v39869_v52, %v39886_v37  ;;  %v37616_v50 = vpack.c.bf16 %v39816_v47, %v39807_v5  ;;  %v40022_v5 = vld [vmem:[%s45635_s1 + $0x290] sm:$0xff] }
  0x5b   : > { %35323 = vmatmul.mubr.f32.vlgmr.msra.gmra.mrb[0].mxu0 %v39557_v55  ;;  %37609 = vmatprep.subr.bf16.mxu0 %v39854_v49  ;;  %v16578_v55 = vsub.f32 %v39848_v63, %v45650_v33 }
  0x5c   : > { %33547 = vmatmul.mubr.f32.vlgmr.msra.gmra.mrb[0].mxu1 %v39691_v12  ;;  %35325 = vmatprep.mubr.f32.mxu0 %v39583_v26  ;;  %v16588_v26 = vsub.f32 %v39866_v0, %v45649_v41  ;;  %v16614_v29 = vand.u32 4294901760, %v16613_v11  ;;  %v45665_v11 = vand.u32 4294901760, %v39713_v8 }
  0x5d   : > { %37019 = vmatpush3.bf16.msra.mxu1 %v37016_v18  ;;  %33549 = vmatprep.mubr.f32.mxu1 %v39701_v31  ;;  %v16579_v18 = vand.u32 4294901760, %v16578_v55  ;;  %v1379_v55 = vld [vmem:[%s39391_s24 + $0x1] sm:$0xff] }
  0x5e   : > { %33556 = vmatprep.subr.mxu1 %v39736_v34  ;;  %37611 = vmatpush3.bf16.msra.mxu0 %v39854_v49 }
  0x5f   : > { %35326 = vmatmul.mubr.f32.gmra.mrb[2].mxu0 %v39590_v7  ;;  %35332 = vmatprep.subr.mxu0 %v39835_v17  ;;  %v16589_v7 = vand.u32 4294901760, %v16588_v26  ;;  %v1381_v26 = vld [vmem:[%s39391_s24 + $0x21] sm:$0xff] }
  0x60   : > { %33550 = vmatmul.mubr.f32.gmra.mrb[2].mxu1 %v39717_v36  ;;  %35334 = vmatprep.mubr.f32.mxu0 %v16559_v62  ;;  %v31047_v62 = vld [vmem:[%s45635_s1 + $0x38] sm:$0xff] }
  0x61   : > { %33557 = vmatpush3.msra.mxu1 %v39736_v34  ;;  %33558 = vmatprep.mubr.f32.mxu1 %v39699_v35  ;;  %v45663_v34 = vand.u32 4294901760, %v39684_v57  ;;  %v1380_v57 = vld [vmem:[%s39391_s24 + $0x11] sm:$0xff]  ;;  %v31048_v35 = vld [vmem:[%s45635_s1 + $0x40] sm:$0x7f] }
  0x62   : > { %37021 = vmatprep.subr.bf16.mxu1 %v39721_v46  ;;  %35333 = vmatpush3.msra.mxu0 %v39835_v17 }
  0x63   : > { %35335 = vmatmul.mubr.f32.vlgmr.msra.gmra.mrb[0].mxu0 %v16569_v59  ;;  %37613 = vmatprep.subr.bf16.mxu0 %v37612_v53  ;;  %v37024_v42 = vpack.c.bf16 %v45663_v34, %v889_v40  ;;  %v1403_v40 = vand.u32 4294901760, %v31046_v4  ;;  %v1406_v59 = vand.u32 4294901760, %v31047_v62  ;;  %v1394_v34 = vsel %vm145_vm1, %v1381_v26, 0 }
  0x64   : > { %33559 = vmatmul.mubr.f32.vlgmr.msra.gmra.mrb[0].mxu1 %v39713_v8  ;;  %35337 = vmatprep.mubr.f32.mxu0 %v16579_v18  ;;  %v1391_v18 = vsel %vm145_vm1, %v1380_v57, 0 }
  0x65   : > { %37023 = vmatpush3.bf16.msra.mxu1 %v39721_v46  ;;  %33561 = vmatprep.mubr.f32.mxu1 %v39725_v44  ;;  %v39947_v8 = vsub.f32 %v31047_v62, %v1406_v59 }
  0x66   : > { %33568 = vmatprep.subr.mxu1 %v39706_v32  ;;  %37615 = vmatpush3.bf16.msra.mxu0 %v37612_v53  ;;  %v1388_v53 = vsel %vm145_vm1, %v1379_v55, 0  ;;  %v1382_v55 = vld [vmem:[%s39391_s24 + $0x31] sm:$0xff] }
  0x67   : > { %35338 = vmatmul.mubr.f32.gmra.mrb[2].mxu0 %v16589_v7  ;;  %35344 = vmatprep.subr.mxu0 %v16614_v29  ;;  %v39942_v7 = vand.u32 4294901760, %v1388_v53  ;;  %v1397_v62 = vsel %vm145_vm1, %v1382_v55, 0 }
  0x68   : > { %33562 = vmatmul.mubr.f32.gmra.mrb[2].mxu1 %v39755_v45  ;;  %35346 = vmatprep.mubr.f32.mxu0 %v39794_v51 }
  0x69   : > { %33569 = vmatpush3.msra.mxu1 %v39706_v32  ;;  %33570 = vmatprep.mubr.f32.mxu1 %v45664_v16  ;;  %v39954_v16 = vand.u32 4294901760, %v1391_v18 }
  0x6a   : > { %37025 = vmatprep.subr.bf16.mxu1 %v37024_v42  ;;  %35345 = vmatpush3.msra.mxu0 %v16614_v29  ;;  %v39945_v29 = vsub.f32 %v31046_v4, %v1403_v40  ;;  %v39963_v4 = vand.u32 4294901760, %v1394_v34 }
  0x6b   : > { %35347 = vmatmul.mubr.f32.vlgmr.msra.gmra.mrb[0].mxu0 %v39813_v9  ;;  %37617 = vmatprep.subr.bf16.mxu0 %v37616_v50 }
  0x6c   : > { %33571 = vmatmul.mubr.f32.vlgmr.msra.gmra.mrb[0].mxu1 %v45665_v11  ;;  %35349 = vmatprep.mubr.f32.mxu0 %v39825_v22  ;;  %v45647_v26 = vand.u32 4294901760, %v39945_v29  ;;  %v45648_v11 = vand.u32 4294901760, %v39947_v8  ;;  %v39987_v55 = vsub.f32 %v1394_v34, %v39963_v4  ;;  %v37624_v34 = vpack.c.bf16 %v16605_v10, %v16598_v15  ;;  %v31220_v10 = vld [vmem:[%s39391_s24 + $0x183] sm:$0xff] }
  0x6d   : > { %37027 = vmatpush3.bf16.msra.mxu1 %v37024_v42  ;;  %33573 = vmatprep.mubr.f32.mxu1 %v39768_v6  ;;  %v1400_v42 = vsel %vm158_vm0, %v31048_v35, 0 }
  0x6e   : > { %33580 = vmatprep.subr.mxu1 %v39775_v23  ;;  %37619 = vmatpush3.bf16.msra.mxu0 %v37616_v50  ;;  %v39961_v50 = vsub.f32 %v1388_v53, %v39942_v7  ;;  %v39968_v57 = vand.u32 4294901760, %v1400_v42  ;;  %v39979_v53 = vand.u32 4294901760, %v1397_v62 }
  0x6f   : > { %35350 = vmatmul.mubr.f32.gmra.mrb[2].mxu0 %v39841_v1  ;;  %35356 = vmatprep.subr.mxu0 %v39869_v52 }
  0x70   : > { %33574 = vmatmul.mubr.f32.gmra.mrb[2].mxu1 %v39789_v30  ;;  %35358 = vmatprep.mubr.f32.mxu0 %v39823_v38  ;;  %v45651_v35 = vand.u32 4294901760, %v39961_v50  ;;  %v40017_v41 = vsub.f32 %v1397_v62, %v39979_v53 }
  0x71   : > { %33581 = vmatpush3.msra.mxu1 %v39775_v23  ;;  %33582 = vmatprep.mubr.f32.mxu1 %v39679_v60  ;;  %v39975_v23 = vsub.f32 %v1391_v18, %v39954_v16  ;;  %v1514_v18 = vsub.f32 %v39945_v29, %v45647_v26 }
  0x72   : > { %37029 = vmatprep.subr.bf16.mxu1 %v39721_v46  ;;  %35357 = vmatpush3.msra.mxu0 %v39869_v52  ;;  %v39983_v52 = vpack.c.bf16 %v1406_v59, %v1403_v40  ;;  %v39998_v40 = vsub.f32 %v1400_v42, %v39968_v57  ;;  %v31219_v59 = vld [vmem:[%s39391_s24 + $0x173] sm:$0xff]  ;;  %v45666_v42 = vand.u32 4294901760, %v39823_v38  ;;  %v1473_v47 = vsub.f32 %v39961_v50, %v45651_v35 }
  0x73   : > { %35359 = vmatmul.mubr.f32.vlgmr.msra.gmra.mrb[0].mxu0 %v39838_v2  ;;  %37621 = vmatprep.subr.bf16.mxu0 %v39854_v49  ;;  %v45652_v26 = vand.u32 4294901760, %v39975_v23  ;;  %v17101_v15 = vsel %vm145_vm1, %v31219_v59, 0  ;;  %v1515_v62 = vand.u32 4294901760, %v1514_v18  ;;  %v17119_v35 = vand.u32 4294901760, %v40022_v5  ;;  %v31225_v2 = vld [vmem:[%s45635_s1 + $0x298] sm:$0x7f] }
  0x74   : > { %33583 = vmatmul.mubr.f32.vlgmr.msra.gmra.mrb[0].mxu1 %v39691_v12  ;;  %35361 = vmatprep.mubr.f32.mxu0 %v39848_v63  ;;  %v40035_v33 = vand.u32 4294901760, %v39998_v40  ;;  %v45667_v18 = vand.u32 4294901760, %v39848_v63  ;;  %v40052_v38 = vand.u32 4294901760, %v17101_v15 }
  0x75   : > { %37031 = vmatpush3.bf16.msra.mxu1 %v39721_v46  ;;  %33585 = vmatprep.mubr.f32.mxu1 %v39701_v31  ;;  %v1521_v46 = vsub.f32 %v39947_v8, %v45648_v11  ;;  %v40011_v11 = vld [vmem:[%s45635_s1 + $0x288] sm:$0xff]  ;;  %v1483_v59 = vsub.f32 %v39975_v23, %v45652_v26  ;;  %v1474_v26 = vand.u32 4294901760, %v1473_v47  ;;  %v45669_v47 = vand.u32 4294901760, %v39866_v0 }
  0x76   : > { %33592 = vmatprep.subr.mxu1 %v39706_v32  ;;  %37623 = vmatpush3.bf16.msra.mxu0 %v39854_v49  ;;  %v1528_v43 = vsub.f32 %v39998_v40, %v40035_v33  ;;  %v40075_v19 = vsub.f32 %v40022_v5, %v17119_v35 }
  0x77   : > { %35362 = vmatmul.mubr.f32.gmra.mrb[2].mxu0 %v39866_v0  ;;  %35368 = vmatprep.subr.mxu0 %v39835_v17  ;;  %v1484_v20 = vand.u32 4294901760, %v1483_v59  ;;  %v40083_v0 = vsub.f32 %v17101_v15, %v40052_v38 }
  0x78   : > { %33586 = vmatmul.mubr.f32.gmra.mrb[2].mxu1 %v39717_v36  ;;  %35370 = vmatprep.mubr.f32.mxu0 %v45666_v42  ;;  %v1522_v42 = vand.u32 4294901760, %v1521_v46  ;;  %v31222_v46 = vld [vmem:[%s39391_s24 + $0x1a3] sm:$0xff]  ;;  %v1529_v59 = vand.u32 4294901760, %v1528_v43 }
  0x79   : > { %33593 = vmatpush3.msra.mxu1 %v39706_v32  ;;  %33594 = vmatprep.mubr.f32.mxu1 %v39679_v60  ;;  %v17116_v60 = vand.u32 4294901760, %v40011_v11  ;;  %v31221_v32 = vld [vmem:[%s39391_s24 + $0x193] sm:$0xff]  ;;  %v17185_v43 = vand.u32 4294901760, %v40083_v0 }
  0x7a   : > { %37033 = vmatprep.subr.bf16.mxu1 %v39983_v52  ;;  %35369 = vmatpush3.msra.mxu0 %v39835_v17  ;;  %v37036_v54 = vpack.c.bf16 %v1522_v42, %v1515_v62  ;;  %v17110_v42 = vsel %vm145_vm1, %v31222_v46, 0  ;;  %v17233_v46 = vand.u32 4294901760, %v40075_v19 }
  0x7b   : > { %35371 = vmatmul.mubr.f32.vlgmr.msra.gmra.mrb[0].mxu0 %v16567_v56  ;;  %37625 = vmatprep.subr.bf16.mxu0 %v37624_v34  ;;  %v17104_v56 = vsel %vm145_vm1, %v31220_v10, 0  ;;  %v40066_v10 = vsub.f32 %v40011_v11, %v17116_v60  ;;  %v45670_v11 = vand.u32 4294901760, %v40017_v41 }
  0x7c   : > { %33595 = vmatmul.mubr.f32.vlgmr.msra.gmra.mrb[0].mxu1 %v39691_v12  ;;  %35373 = vmatprep.mubr.f32.mxu0 %v45667_v18  ;;  %v45668_v12 = vand.u32 4294901760, %v39987_v55  ;;  %v17107_v18 = vsel %vm145_vm1, %v31221_v32, 0  ;;  %v40072_v32 = vand.u32 4294901760, %v17104_v56 }
  0x7d   : > { %37035 = vmatpush3.bf16.msra.mxu1 %v39983_v52  ;;  %33597 = vmatprep.mubr.f32.mxu1 %v39701_v31  ;;  %v40085_v62 = vand.u32 4294901760, %v17107_v18 }
  0x7e   : > { %v1493_v63 = vsub.f32 %v39987_v55, %v45668_v12  ;;  %33604 = vmatprep.subr.mxu1 %v39968_v57  ;;  %37627 = vmatpush3.bf16.msra.mxu0 %v37624_v34  ;;  %v17113_v12 = vsel %vm158_vm0, %v31225_v2, 0  ;;  %v1503_v34 = vsub.f32 %v40017_v41, %v45670_v11  ;;  %v17226_v2 = vand.u32 4294901760, %v40066_v10 }
  0x7f   : > { %35374 = vmatmul.mubr.f32.gmra.mrb[2].mxu0 %v45669_v47  ;;  %35380 = vmatprep.subr.mxu0 %v39886_v37  ;;  %v40093_v15 = vand.u32 4294901760, %v17113_v12  ;;  %v40096_v47 = vsub.f32 %v17104_v56, %v40072_v32  ;;  %v40099_v11 = vand.u32 4294901760, %v17110_v42  ;;  %v37040_v56 = vpack.c.bf16 %v39947_v8, %v39945_v29 }
  0x80   : > { %33598 = vmatmul.mubr.f32.gmra.mrb[2].mxu1 %v39717_v36  ;;  %35382 = vmatprep.mubr.f32.mxu0 %v39794_v51  ;;  %v1494_v5 = vand.u32 4294901760, %v1493_v63  ;;  %v40109_v63 = vpack.c.bf16 %v17119_v35, %v17116_v60  ;;  %v17186_v35 = vsub.f32 %v40083_v0, %v17185_v43 }
  0x81   : > { %33605 = vmatpush3.msra.mxu1 %v39968_v57  ;;  %33606 = vmatprep.mubr.f32.mxu1 %v1474_v26  ;;  %v1504_v26 = vand.u32 4294901760, %v1503_v34  ;;  %v40121_v34 = vsub.f32 %v17110_v42, %v40099_v11 }
  0x82   : > { %37037 = vmatprep.subr.bf16.mxu1 %v37036_v54  ;;  %35381 = vmatpush3.msra.mxu0 %v39886_v37  ;;  %v40104_v37 = vsub.f32 %v17107_v18, %v40085_v62  ;;  %v17195_v18 = vand.u32 4294901760, %v40096_v47 }
  0x83   : > { %35383 = vmatmul.mubr.f32.vlgmr.msra.gmra.mrb[0].mxu0 %v39813_v9  ;;  %37629 = vmatprep.subr.bf16.mxu0 %v39854_v49 }
  0x84   : > { %33607 = vmatmul.mubr.f32.vlgmr.msra.gmra.mrb[0].mxu1 %v1484_v20  ;;  %35385 = vmatprep.mubr.f32.mxu0 %v39825_v22  ;;  %v17227_v20 = vsub.f32 %v40066_v10, %v17226_v2  ;;  %v17205_v60 = vand.u32 4294901760, %v40104_v37 }
  0x85   : > { %37039 = vmatpush3.bf16.msra.mxu1 %v37036_v54  ;;  %33609 = vmatprep.mubr.f32.mxu1 %v1494_v5  ;;  %v17234_v54 = vsub.f32 %v40075_v19, %v17233_v46  ;;  %v17215_v5 = vand.u32 4294901760, %v40121_v34 }
  0x86   : > { %33616 = vmatprep.subr.mxu1 %v1529_v59  ;;  %37631 = vmatpush3.bf16.msra.mxu0 %v39854_v49  ;;  %v40124_v49 = vsub.f32 %v17113_v12, %v40093_v15  ;;  %v17228_v42 = vand.u32 4294901760, %v17227_v20 }
  0x87   : > { %35386 = vmatmul.mubr.f32.gmra.mrb[2].mxu0 %v39841_v1  ;;  %35392 = vmatprep.subr.mxu0 %v39835_v17  ;;  %v17235_v12 = vand.u32 4294901760, %v17234_v54 }
  0x88   : > { %33610 = vmatmul.mubr.f32.gmra.mrb[2].mxu1 %v1504_v26  ;;  %35394 = vmatprep.mubr.f32.mxu0 %v39794_v51  ;;  %v17196_v51 = vsub.f32 %v40096_v47, %v17195_v18  ;;  %v40140_v26 = vand.u32 4294901760, %v40124_v49 }
  0x89   : > { %33617 = vmatpush3.msra.mxu1 %v1529_v59  ;;  %33618 = vmatprep.mubr.f32.mxu1 %v39942_v7  ;;  %v37636_v20 = vpack.c.bf16 %v17235_v12, %v17228_v42  ;;  %v45672_v42 = vand.u32 4294901760, %v39947_v8  ;;  %v37640_v12 = vpack.c.bf16 %v40075_v19, %v40066_v10  ;;  %v45673_v8 = vand.u32 4294901760, %v39961_v50  ;;  %v40277_v19 = vld [vmem:[%s45635_s1 + $0x2a8] sm:$0xff] }
  0x8a   : > { %37041 = vmatprep.subr.bf16.mxu1 %v37040_v56  ;;  %35393 = vmatpush3.msra.mxu0 %v39835_v17  ;;  %v17187_v17 = vand.u32 4294901760, %v17186_v35  ;;  %v17197_v59 = vand.u32 4294901760, %v17196_v51  ;;  %v17241_v54 = vsub.f32 %v40124_v49, %v40140_v26 }
  0x8b   : > { %35395 = vmatmul.mubr.f32.vlgmr.msra.gmra.mrb[0].mxu0 %v39813_v9  ;;  %37633 = vmatprep.subr.bf16.mxu0 %v40109_v63  ;;  %v17206_v9 = vsub.f32 %v40104_v37, %v17205_v60 }
  0x8c   : > { %33619 = vmatmul.mubr.f32.vlgmr.msra.gmra.mrb[0].mxu1 %v39954_v16  ;;  %35397 = vmatprep.mubr.f32.mxu0 %v39825_v22  ;;  %v17216_v22 = vsub.f32 %v40121_v34, %v17215_v5  ;;  %v17242_v35 = vand.u32 4294901760, %v17241_v54  ;;  %v31050_v54 = vld [vmem:[%s39391_s24 + $0xc1] sm:$0xff] }
  0x8d   : > { %37043 = vmatpush3.bf16.msra.mxu1 %v37040_v56  ;;  %33621 = vmatprep.mubr.f32.mxu1 %v39963_v4  ;;  %v17207_v56 = vand.u32 4294901760, %v17206_v9  ;;  %v31054_v9 = vld [vmem:[%s45635_s1 + $0x50] sm:$0xff] }
  0x8e   : > { %33628 = vmatprep.subr.mxu1 %v39998_v40  ;;  %37635 = vmatpush3.bf16.msra.mxu0 %v40109_v63 }
  0x8f   : > { %35398 = vmatmul.mubr.f32.gmra.mrb[2].mxu0 %v39841_v1  ;;  %35404 = vmatprep.subr.mxu0 %v40093_v15  ;;  %v17217_v1 = vand.u32 4294901760, %v17216_v22 }
  0x90   : > { %33622 = vmatmul.mubr.f32.gmra.mrb[2].mxu1 %v39979_v53  ;;  %35406 = vmatprep.mubr.f32.mxu0 %v17187_v17  ;;  %v31053_v17 = vld [vmem:[%s45635_s1 + $0x48] sm:$0xff] }
  0x91   : > { %33629 = vmatpush3.msra.mxu1 %v39998_v40  ;;  %33630 = vmatprep.mubr.f32.mxu1 %v39961_v50  ;;  %v45671_v40 = vand.u32 4294901760, %v39945_v29  ;;  %v31049_v29 = vld [vmem:[%s39391_s24 + $0xb1] sm:$0xff] }
  0x92   : > { %37045 = vmatprep.subr.bf16.mxu1 %v39983_v52  ;;  %35405 = vmatpush3.msra.mxu0 %v40093_v15  ;;  %v2016_v22 = vsel %vm145_vm1, %v31049_v29, 0  ;;  %v31055_v50 = vld [vmem:[%s45635_s1 + $0x58] sm:$0x7f] }
  0x93   : > { %35407 = vmatmul.mubr.f32.vlgmr.msra.gmra.mrb[0].mxu0 %v17197_v59  ;;  %37637 = vmatprep.subr.bf16.mxu0 %v37636_v20  ;;  %v37048_v51 = vpack.c.bf16 %v45672_v42, %v45671_v40  ;;  %v2031_v59 = vand.u32 4294901760, %v31053_v17  ;;  %v40196_v40 = vand.u32 4294901760, %v2016_v22  ;;  %v2019_v42 = vsel %vm145_vm1, %v31050_v54, 0 }
  0x94   : > { %33631 = vmatmul.mubr.f32.vlgmr.msra.gmra.mrb[0].mxu1 %v39975_v23  ;;  %35409 = vmatprep.mubr.f32.mxu0 %v17207_v56  ;;  %v31051_v56 = vld [vmem:[%s39391_s24 + $0xd1] sm:$0xff]  ;;  %v40212_v54 = vand.u32 4294901760, %v2019_v42 }
  0x95   : > { %37047 = vmatpush3.bf16.msra.mxu1 %v39983_v52  ;;  %33633 = vmatprep.mubr.f32.mxu1 %v39987_v55  ;;  %v40200_v29 = vsub.f32 %v31053_v17, %v2031_v59 }
  0x96   : > { %33640 = vmatprep.subr.mxu1 %v39968_v57  ;;  %37639 = vmatpush3.bf16.msra.mxu0 %v37636_v20  ;;  %v2034_v20 = vand.u32 4294901760, %v31054_v9 }
  0x97   : > { %35410 = vmatmul.mubr.f32.gmra.mrb[2].mxu0 %v17217_v1  ;;  %35416 = vmatprep.subr.mxu0 %v17242_v35  ;;  %v45674_v1 = vand.u32 4294901760, %v39975_v23 }
  0x98   : > { %33634 = vmatmul.mubr.f32.gmra.mrb[2].mxu1 %v40017_v41  ;;  %35418 = vmatprep.mubr.f32.mxu0 %v40052_v38  ;;  %v40202_v23 = vsub.f32 %v31054_v9, %v2034_v20 }
  0x99   : > { %33641 = vmatpush3.msra.mxu1 %v39968_v57  ;;  %33642 = vmatprep.mubr.f32.mxu1 %v45673_v8  ;;  %v2022_v8 = vsel %vm145_vm1, %v31051_v56, 0  ;;  %v2141_v56 = vand.u32 4294901760, %v40200_v29 }
  0x9a   : > { %37049 = vmatprep.subr.bf16.mxu1 %v37048_v51  ;;  %35417 = vmatpush3.msra.mxu0 %v17242_v35  ;;  %v45675_v35 = vand.u32 4294901760, %v39987_v55  ;;  %v2028_v55 = vsel %vm158_vm0, %v31055_v50, 0  ;;  %v40219_v17 = vand.u32 4294901760, %v2022_v8  ;;  %v2148_v50 = vand.u32 4294901760, %v40202_v23 }
  0x9b   : > { %35419 = vmatmul.mubr.f32.vlgmr.msra.gmra.mrb[0].mxu0 %v40072_v32  ;;  %37641 = vmatprep.subr.bf16.mxu0 %v37640_v12 }
  0x9c   : > { %33643 = vmatmul.mubr.f32.vlgmr.msra.gmra.mrb[0].mxu1 %v45674_v1  ;;  %35421 = vmatprep.mubr.f32.mxu0 %v40085_v62  ;;  %v31052_v1 = vld [vmem:[%s39391_s24 + $0xe1] sm:$0xff] }
  0x9d   : > { %37051 = vmatpush3.bf16.msra.mxu1 %v37048_v51  ;;  %33645 = vmatprep.mubr.f32.mxu1 %v45675_v35  ;;  %v45676_v51 = vand.u32 4294901760, %v40017_v41  ;;  %v2025_v9 = vsel %vm145_vm1, %v31052_v1, 0  ;;  %v40224_v41 = vand.u32 4294901760, %v2028_v55  ;;  %v40243_v1 = vsub.f32 %v2022_v8, %v40219_v17 }
  0x9e   : > { %33652 = vmatprep.subr.mxu1 %v40035_v33  ;;  %37643 = vmatpush3.bf16.msra.mxu0 %v37640_v12  ;;  %v40217_v12 = vsub.f32 %v2016_v22, %v40196_v40  ;;  %v40235_v22 = vand.u32 4294901760, %v2025_v9 }
  0x9f   : > { %35422 = vmatmul.mubr.f32.gmra.mrb[2].mxu0 %v40099_v11  ;;  %35428 = vmatprep.subr.mxu0 %v40124_v49 }
  0xa0   : > { %33646 = vmatmul.mubr.f32.gmra.mrb[2].mxu1 %v45676_v51  ;;  %35430 = vmatprep.mubr.f32.mxu0 %v40083_v0  ;;  %v45658_v35 = vand.u32 4294901760, %v40217_v12  ;;  %v40272_v51 = vld [vmem:[%s45635_s1 + $0x2a0] sm:$0xff]  ;;  %v2120_v0 = vand.u32 4294901760, %v40243_v1 }
  0xa1   : > { %33653 = vmatpush3.msra.mxu1 %v40035_v33  ;;  %33654 = vmatprep.mubr.f32.mxu1 %v39942_v7  ;;  %v40233_v33 = vsub.f32 %v2019_v42, %v40212_v54  ;;  %v2142_v42 = vsub.f32 %v40200_v29, %v2141_v56 }
  0xa2   : > { %37053 = vmatprep.subr.bf16.mxu1 %v39983_v52  ;;  %35429 = vmatpush3.msra.mxu0 %v40124_v49  ;;  %v40239_v49 = vpack.c.bf16 %v2034_v20, %v2031_v59  ;;  %v40254_v59 = vsub.f32 %v2028_v55, %v40224_v41  ;;  %v37648_v20 = vpack.c.bf16 %v17233_v46, %v17226_v2 }
  0xa3   : > { %35431 = vmatmul.mubr.f32.vlgmr.msra.gmra.mrb[0].mxu0 %v40096_v47  ;;  %37645 = vmatprep.subr.bf16.mxu0 %v40109_v63  ;;  %v45657_v8 = vand.u32 4294901760, %v40233_v33  ;;  %v40267_v55 = vsub.f32 %v2025_v9, %v40235_v22  ;;  %v2101_v10 = vsub.f32 %v40217_v12, %v45658_v35  ;;  %v2143_v2 = vand.u32 4294901760, %v2142_v42  ;;  %v31230_v9 = vld [vmem:[%s39391_s24 + $0x40] sm:$0xff]  ;;  %v31234_v47 = vld [vmem:[%s45635_s1 + $0x2b0] sm:$0x7f] }
  0xa4   : > { %33655 = vmatmul.mubr.f32.vlgmr.msra.gmra.mrb[0].mxu1 %v39954_v16  ;;  %35433 = vmatprep.mubr.f32.mxu0 %v40104_v37  ;;  %v17738_v37 = vsel %vm145_vm1, %v31230_v9, 0 }
  0xa5   : > { %37055 = vmatpush3.bf16.msra.mxu1 %v39983_v52  ;;  %33657 = vmatprep.mubr.f32.mxu1 %v39963_v4  ;;  %v2149_v52 = vsub.f32 %v40202_v23, %v2148_v50  ;;  %v2111_v42 = vsub.f32 %v40233_v33, %v45657_v8 }
  0xa6   : > { %33664 = vmatprep.subr.mxu1 %v39968_v57  ;;  %37647 = vmatpush3.bf16.msra.mxu0 %v40109_v63 }
  0xa7   : > { %35434 = vmatmul.mubr.f32.gmra.mrb[2].mxu0 %v40121_v34  ;;  %35440 = vmatprep.subr.mxu0 %v40093_v15  ;;  %v2150_v46 = vand.u32 4294901760, %v2149_v52  ;;  %v2130_v52 = vand.u32 4294901760, %v40267_v55 }
  0xa8   : > { %33658 = vmatmul.mubr.f32.gmra.mrb[2].mxu1 %v39979_v53  ;;  %35442 = vmatprep.mubr.f32.mxu0 %v17185_v43  ;;  %v40288_v43 = vand.u32 4294901760, %v40254_v59 }
  0xa9   : > { %33665 = vmatpush3.msra.mxu1 %v39968_v57  ;;  %33666 = vmatprep.mubr.f32.mxu1 %v39942_v7  ;;  %v17747_v7 = vand.u32 4294901760, %v40272_v51  ;;  %v17750_v57 = vand.u32 4294901760, %v40277_v19  ;;  %v37060_v8 = vpack.c.bf16 %v2150_v46, %v2143_v2  ;;  %v2112_v2 = vand.u32 4294901760, %v2111_v42 }
  0xaa   : > { %37057 = vmatprep.subr.bf16.mxu1 %v40239_v49  ;;  %35441 = vmatpush3.msra.mxu0 %v40093_v15  ;;  %v2156_v35 = vsub.f32 %v40254_v59, %v40288_v43  ;;  %v2131_v34 = vsub.f32 %v40267_v55, %v2130_v52 }
  0xab   : > { %35443 = vmatmul.mubr.f32.vlgmr.msra.gmra.mrb[0].mxu0 %v17195_v18  ;;  %37649 = vmatprep.subr.bf16.mxu0 %v37648_v20  ;;  %v2102_v18 = vand.u32 4294901760, %v2101_v10  ;;  %v40320_v10 = vsub.f32 %v40272_v51, %v17747_v7  ;;  %v40323_v9 = vsub.f32 %v40277_v19, %v17750_v57 }
  0xac   : > { %33667 = vmatmul.mubr.f32.vlgmr.msra.gmra.mrb[0].mxu1 %v39954_v16  ;;  %35445 = vmatprep.mubr.f32.mxu0 %v17205_v60  ;;  %v2121_v16 = vsub.f32 %v40243_v1, %v2120_v0  ;;  %v31231_v60 = vld [vmem:[%s39391_s24 + $0x50] sm:$0xff]  ;;  %v2157_v19 = vand.u32 4294901760, %v2156_v35 }
  0xad   : > { %37059 = vmatpush3.bf16.msra.mxu1 %v40239_v49  ;;  %33669 = vmatprep.mubr.f32.mxu1 %v39963_v4  ;;  %v17744_v4 = vsel %vm158_vm0, %v31234_v47, 0  ;;  %v17857_v46 = vand.u32 4294901760, %v40320_v10  ;;  %v17864_v42 = vand.u32 4294901760, %v40323_v9 }
  0xae   : > { %33676 = vmatprep.subr.mxu1 %v40224_v41  ;;  %37651 = vmatpush3.bf16.msra.mxu0 %v37648_v20  ;;  %v17741_v20 = vsel %vm145_vm1, %v31231_v60, 0  ;;  %v2122_v51 = vand.u32 4294901760, %v2121_v16  ;;  %v2132_v60 = vand.u32 4294901760, %v2131_v34 }
  0xaf   : > { %35446 = vmatmul.mubr.f32.gmra.mrb[2].mxu0 %v17215_v5  ;;  %35452 = vmatprep.subr.mxu0 %v40140_v26  ;;  %v40330_v5 = vand.u32 4294901760, %v17738_v37  ;;  %v40341_v47 = vand.u32 4294901760, %v17741_v20 }
  0xb0   : > { %33670 = vmatmul.mubr.f32.gmra.mrb[2].mxu1 %v39979_v53  ;;  %35454 = vmatprep.mubr.f32.mxu0 %v40052_v38  ;;  %v40335_v53 = vand.u32 4294901760, %v17744_v4 }
  0xb1   : > { %33677 = vmatpush3.msra.mxu1 %v40224_v41  ;;  %33678 = vmatprep.mubr.f32.mxu1 %v2102_v18  ;;  %v40345_v35 = vsub.f32 %v17738_v37, %v40330_v5  ;;  %v40350_v18 = vpack.c.bf16 %v17750_v57, %v17747_v7  ;;  %v17865_v37 = vsub.f32 %v40323_v9, %v17864_v42 }
  0xb2   : > { %37061 = vmatprep.subr.bf16.mxu1 %v37060_v8  ;;  %35453 = vmatpush3.msra.mxu0 %v40140_v26  ;;  %v37064_v26 = vpack.c.bf16 %v40202_v23, %v40200_v29  ;;  %v40353_v16 = vsub.f32 %v17744_v4, %v40335_v53  ;;  %v45677_v29 = vand.u32 4294901760, %v40217_v12  ;;  %v2636_v23 = vld [vmem:[%s39391_s24 + $0x12] sm:$0xff] }
  0xb3   : > { %35455 = vmatmul.mubr.f32.vlgmr.msra.gmra.mrb[0].mxu0 %v40072_v32  ;;  %37653 = vmatprep.subr.bf16.mxu0 %v40109_v63  ;;  %v17866_v57 = vand.u32 4294901760, %v17865_v37  ;;  %v45678_v37 = vand.u32 4294901760, %v40233_v33 }
  0xb4   : > { %33679 = vmatmul.mubr.f32.vlgmr.msra.gmra.mrb[0].mxu1 %v2112_v2  ;;  %35457 = vmatprep.mubr.f32.mxu0 %v40085_v62  ;;  %v40364_v2 = vsub.f32 %v17741_v20, %v40341_v47  ;;  %v40374_v34 = vand.u32 4294901760, %v40353_v16 }
  0xb5   : > { %37063 = vmatpush3.bf16.msra.mxu1 %v37060_v8  ;;  %33681 = vmatprep.mubr.f32.mxu1 %v2122_v51  ;;  %v17858_v8 = vsub.f32 %v40320_v10, %v17857_v46 }
  0xb6   : > { %33688 = vmatprep.subr.mxu1 %v2157_v19  ;;  %37655 = vmatpush3.bf16.msra.mxu0 %v40109_v63  ;;  %v17836_v63 = vand.u32 4294901760, %v40345_v35  ;;  %v17846_v4 = vand.u32 4294901760, %v40364_v2 }
  0xb7   : > { %35458 = vmatmul.mubr.f32.gmra.mrb[2].mxu0 %v40099_v11  ;;  %35464 = vmatprep.subr.mxu0 %v40093_v15  ;;  %v17859_v7 = vand.u32 4294901760, %v17858_v8  ;;  %v2637_v8 = vld [vmem:[%s39391_s24 + $0x22] sm:$0xff] }
  0xb8   : > { %33682 = vmatmul.mubr.f32.gmra.mrb[2].mxu1 %v2132_v60  ;;  %35466 = vmatprep.mubr.f32.mxu0 %v40052_v38  ;;  %v17837_v38 = vsub.f32 %v40345_v35, %v17836_v63  ;;  %v2635_v60 = vld [vmem:[%s39391_s24 + $0x2] sm:$0xff] }
  0xb9   : > { %33689 = vmatpush3.msra.mxu1 %v2157_v19  ;;  %33690 = vmatprep.mubr.f32.mxu1 %v40196_v40  ;;  %v31057_v19 = vld [vmem:[%s45635_s1 + $0x68] sm:$0xff] }
  0xba   : > { %37065 = vmatprep.subr.bf16.mxu1 %v37064_v26  ;;  %35465 = vmatpush3.msra.mxu0 %v40093_v15  ;;  %v17872_v15 = vsub.f32 %v40353_v16, %v40374_v34  ;;  %v17838_v20 = vand.u32 4294901760, %v17837_v38 }
  0xbb   : > { %35467 = vmatmul.mubr.f32.vlgmr.msra.gmra.mrb[0].mxu0 %v40072_v32  ;;  %37657 = vmatprep.subr.bf16.mxu0 %v40350_v18  ;;  %v37660_v32 = vpack.c.bf16 %v17866_v57, %v17859_v7  ;;  %v2647_v7 = vsel %vm145_vm1, %v2636_v23, 0 }
  0xbc   : > { %33691 = vmatmul.mubr.f32.vlgmr.msra.gmra.mrb[0].mxu1 %v40212_v54  ;;  %35469 = vmatprep.mubr.f32.mxu0 %v40085_v62  ;;  %v17847_v62 = vsub.f32 %v40364_v2, %v17846_v4  ;;  %v17873_v51 = vand.u32 4294901760, %v17872_v15 }
  0xbd   : > { %37067 = vmatpush3.bf16.msra.mxu1 %v37064_v26  ;;  %33693 = vmatprep.mubr.f32.mxu1 %v40219_v17  ;;  %v2644_v26 = vsel %vm145_vm1, %v2635_v60, 0  ;;  %v37672_v60 = vpack.c.bf16 %v17864_v42, %v17857_v46  ;;  %v31238_v42 = vld [vmem:[%s39391_s24 + $0xe0] sm:$0xff] }
  0xbe   : > { %33700 = vmatprep.subr.mxu1 %v40254_v59  ;;  %37659 = vmatpush3.bf16.msra.mxu0 %v40350_v18  ;;  %v40433_v57 = vand.u32 4294901760, %v2644_v26 }
  0xbf   : > { %35470 = vmatmul.mubr.f32.gmra.mrb[2].mxu0 %v40099_v11  ;;  %35476 = vmatprep.subr.mxu0 %v40335_v53  ;;  %v17848_v11 = vand.u32 4294901760, %v17847_v62  ;;  %v2638_v62 = vld [vmem:[%s39391_s24 + $0x32] sm:$0xff] }
  0xc0   : > { %33694 = vmatmul.mubr.f32.gmra.mrb[2].mxu1 %v40235_v22  ;;  %35478 = vmatprep.mubr.f32.mxu0 %v39829_v21  ;;  %v37072_v21 = vpack.c.bf16 %v2148_v50, %v2141_v56  ;;  %v2662_v50 = vand.u32 4294901760, %v31057_v19 }
  0xc1   : > { %33701 = vmatpush3.msra.mxu1 %v40254_v59  ;;  %33702 = vmatprep.mubr.f32.mxu1 %v40217_v12  ;;  %v31056_v59 = vld [vmem:[%s45635_s1 + $0x60] sm:$0xff]  ;;  %v31058_v12 = vld [vmem:[%s45635_s1 + $0x70] sm:$0x7f] }
  0xc2   : > { %37069 = vmatprep.subr.bf16.mxu1 %v40239_v49  ;;  %35477 = vmatpush3.msra.mxu0 %v40335_v53  ;;  %v2659_v56 = vand.u32 4294901760, %v31056_v59  ;;  %v2656_v15 = vsel %vm158_vm0, %v31058_v12, 0 }
  0xc3   : > { %35479 = vmatmul.mubr.f32.vlgmr.msra.gmra.mrb[0].mxu0 %v39843_v39  ;;  %37661 = vmatprep.subr.bf16.mxu0 %v37660_v32  ;;  %v37664_v39 = vpack.c.bf16 %v40323_v9, %v40320_v10  ;;  %v40513_v10 = vld [vmem:[%s45635_s1 + $0x2c0] sm:$0xff] }
  0xc4   : > { %33703 = vmatmul.mubr.f32.vlgmr.msra.gmra.mrb[0].mxu1 %v40233_v33  ;;  %35481 = vmatprep.mubr.f32.mxu0 %v17838_v20  ;;  %v40436_v38 = vsub.f32 %v31056_v59, %v2659_v56  ;;  %v40438_v33 = vsub.f32 %v31057_v19, %v2662_v50  ;;  %v31237_v19 = vld [vmem:[%s39391_s24 + $0xd0] sm:$0xff]  ;;  %v18380_v12 = vand.u32 4294901760, %v40513_v10 }
  0xc5   : > { %37071 = vmatpush3.bf16.msra.mxu1 %v40239_v49  ;;  %33705 = vmatprep.mubr.f32.mxu1 %v40243_v1  ;;  %v40445_v1 = vand.u32 4294901760, %v2647_v7  ;;  %v18362_v46 = vsel %vm145_vm1, %v31237_v19, 0 }
  0xc6   : > { %33712 = vmatprep.subr.mxu1 %v40224_v41  ;;  %37663 = vmatpush3.bf16.msra.mxu0 %v37660_v32  ;;  %v2650_v32 = vsel %vm145_vm1, %v2637_v8, 0 }
  0xc7   : > { %35482 = vmatmul.mubr.f32.gmra.mrb[2].mxu0 %v17848_v11  ;;  %35488 = vmatprep.subr.mxu0 %v17873_v51  ;;  %v40455_v20 = vand.u32 4294901760, %v2650_v32  ;;  %v2653_v11 = vsel %vm145_vm1, %v2638_v62, 0  ;;  %v18365_v62 = vsel %vm145_vm1, %v31238_v42, 0  ;;  %v40565_v42 = vsub.f32 %v40513_v10, %v18380_v12 }
  0xc8   : > { %33706 = vmatmul.mubr.f32.gmra.mrb[2].mxu1 %v40267_v55  ;;  %35490 = vmatprep.mubr.f32.mxu0 %v39701_v31  ;;  %v2769_v55 = vand.u32 4294901760, %v40436_v38 }
  0xc9   : > { %33713 = vmatpush3.msra.mxu1 %v40224_v41  ;;  %33714 = vmatprep.mubr.f32.mxu1 %v45677_v29 }
  0xca   : > { %37073 = vmatprep.subr.bf16.mxu1 %v37072_v21  ;;  %35489 = vmatpush3.msra.mxu0 %v17873_v51  ;;  %v40460_v51 = vand.u32 4294901760, %v2656_v15 }
  0xcb   : > { %35491 = vmatmul.mubr.f32.vlgmr.msra.gmra.mrb[0].mxu0 %v39717_v36  ;;  %37665 = vmatprep.subr.bf16.mxu0 %v37664_v39 }
  0xcc   : > { %33715 = vmatmul.mubr.f32.vlgmr.msra.gmra.mrb[0].mxu1 %v45678_v37  ;;  %35493 = vmatprep.mubr.f32.mxu0 %v40330_v5  ;;  %v40490_v59 = vsub.f32 %v2656_v15, %v40460_v51 }
  0xcd   : > { %37075 = vmatpush3.bf16.msra.mxu1 %v37072_v21  ;;  %33717 = vmatprep.mubr.f32.mxu1 %v2120_v0  ;;  %v40453_v0 = vsub.f32 %v2644_v26, %v40433_v57  ;;  %v40479_v21 = vsub.f32 %v2650_v32, %v40455_v20  ;;  %v40542_v32 = vand.u32 4294901760, %v18362_v46 }
  0xce   : > { %33724 = vmatprep.subr.mxu1 %v40288_v43  ;;  %37667 = vmatpush3.bf16.msra.mxu0 %v37664_v39  ;;  %v2770_v39 = vsub.f32 %v40436_v38, %v2769_v55  ;;  %v40526_v8 = vand.u32 4294901760, %v40490_v59 }
  0xcf   : > { %35494 = vmatmul.mubr.f32.gmra.mrb[2].mxu0 %v40341_v47  ;;  %35500 = vmatprep.subr.mxu0 %v40353_v16  ;;  %v2748_v9 = vand.u32 4294901760, %v40479_v21 }
  0xd0   : > { %33718 = vmatmul.mubr.f32.gmra.mrb[2].mxu1 %v2130_v52  ;;  %35502 = vmatprep.mubr.f32.mxu0 %v39725_v44  ;;  %v2776_v44 = vand.u32 4294901760, %v40438_v33  ;;  %v40471_v52 = vand.u32 4294901760, %v2653_v11 }
  0xd1   : > { %33725 = vmatpush3.msra.mxu1 %v40288_v43  ;;  %33726 = vmatprep.mubr.f32.mxu1 %v40196_v40  ;;  %v40467_v43 = vsub.f32 %v2647_v7, %v40445_v1  ;;  %v31243_v7 = vld [vmem:[%s45635_s1 + $0x2c8] sm:$0x7f] }
  0xd2   : > { %37077 = vmatprep.subr.bf16.mxu1 %v40239_v49  ;;  %35501 = vmatpush3.msra.mxu0 %v40353_v16  ;;  %v40475_v16 = vpack.c.bf16 %v2662_v50, %v2659_v56  ;;  %v40503_v23 = vsub.f32 %v2653_v11, %v40471_v52  ;;  %v40508_v56 = vld [vmem:[%s45635_s1 + $0x2b8] sm:$0xff]  ;;  %v2771_v50 = vand.u32 4294901760, %v2770_v39  ;;  %v2749_v11 = vsub.f32 %v40479_v21, %v2748_v9  ;;  %v31240_v39 = vld [vmem:[%s39391_s24 + $0x100] sm:$0xff] }
  0xd3   : > { %35503 = vmatmul.mubr.f32.vlgmr.msra.gmra.mrb[0].mxu0 %v39755_v45  ;;  %37669 = vmatprep.subr.bf16.mxu0 %v40350_v18  ;;  %v2728_v45 = vand.u32 4294901760, %v40453_v0  ;;  %v2738_v29 = vand.u32 4294901760, %v40467_v43  ;;  %v18377_v37 = vand.u32 4294901760, %v40508_v56 }
  0xd4   : > { %33727 = vmatmul.mubr.f32.vlgmr.msra.gmra.mrb[0].mxu1 %v40212_v54  ;;  %35505 = vmatprep.mubr.f32.mxu0 %v40345_v35 }
  0xd5   : > { %37079 = vmatpush3.bf16.msra.mxu1 %v40239_v49  ;;  %33729 = vmatprep.mubr.f32.mxu1 %v40219_v17  ;;  %v2777_v49 = vsub.f32 %v40438_v33, %v2776_v44 }
  0xd6   : > { %33736 = vmatprep.subr.mxu1 %v40224_v41  ;;  %37671 = vmatpush3.bf16.msra.mxu0 %v40350_v18 }
  0xd7   : > { %35506 = vmatmul.mubr.f32.gmra.mrb[2].mxu0 %v40364_v2  ;;  %35512 = vmatprep.subr.mxu0 %v40335_v53  ;;  %v2778_v26 = vand.u32 4294901760, %v2777_v49  ;;  %v18374_v49 = vsel %vm158_vm0, %v31243_v7, 0  ;;  %v40573_v2 = vsub.f32 %v18362_v46, %v40542_v32 }
  0xd8   : > { %33730 = vmatmul.mubr.f32.gmra.mrb[2].mxu1 %v40235_v22  ;;  %35514 = vmatprep.mubr.f32.mxu0 %v39768_v6  ;;  %v2729_v6 = vsub.f32 %v40453_v0, %v2728_v45 }
  0xd9   : > { %33737 = vmatpush3.msra.mxu1 %v40224_v41  ;;  %33738 = vmatprep.mubr.f32.mxu1 %v40196_v40  ;;  %v31239_v41 = vld [vmem:[%s39391_s24 + $0xf0] sm:$0xff]  ;;  %v2739_v40 = vsub.f32 %v40467_v43, %v2738_v29  ;;  %v37084_v35 = vpack.c.bf16 %v2778_v26, %v2771_v50  ;;  %v18371_v50 = vsel %vm145_vm1, %v31240_v39, 0 }
  0xda   : > { %37081 = vmatprep.subr.bf16.mxu1 %v40475_v16  ;;  %35513 = vmatpush3.msra.mxu0 %v40335_v53  ;;  %v2730_v15 = vand.u32 4294901760, %v2729_v6  ;;  %v40562_v6 = vsub.f32 %v40508_v56, %v18377_v37  ;;  %v2750_v56 = vand.u32 4294901760, %v2749_v11  ;;  %v40599_v11 = vpack.c.bf16 %v18380_v12, %v18377_v37 }
  0xdb   : > { %35515 = vmatmul.mubr.f32.vlgmr.msra.gmra.mrb[0].mxu0 %v39789_v30  ;;  %37673 = vmatprep.subr.bf16.mxu0 %v37672_v60  ;;  %v2758_v30 = vand.u32 4294901760, %v40503_v23  ;;  %v2740_v19 = vand.u32 4294901760, %v2739_v40  ;;  %v40589_v40 = vand.u32 4294901760, %v18371_v50 }
  0xdc   : > { %33739 = vmatmul.mubr.f32.vlgmr.msra.gmra.mrb[0].mxu1 %v40212_v54  ;;  %35517 = vmatprep.mubr.f32.mxu0 %v17836_v63  ;;  %v18368_v54 = vsel %vm145_vm1, %v31239_v41, 0  ;;  %v2784_v63 = vsub.f32 %v40490_v59, %v40526_v8  ;;  %v18487_v26 = vand.u32 4294901760, %v40562_v6  ;;  %v18494_v41 = vand.u32 4294901760, %v40565_v42 }
  0xdd   : > { %37083 = vmatpush3.bf16.msra.mxu1 %v40475_v16  ;;  %33741 = vmatprep.mubr.f32.mxu1 %v40219_v17  ;;  %v40559_v17 = vand.u32 4294901760, %v18365_v62 }
  0xde   : > { %33748 = vmatprep.subr.mxu1 %v40460_v51  ;;  %37675 = vmatpush3.bf16.msra.mxu0 %v37672_v60  ;;  %v2759_v60 = vsub.f32 %v40503_v23, %v2758_v30  ;;  %v2785_v10 = vand.u32 4294901760, %v2784_v63  ;;  %v18495_v63 = vsub.f32 %v40565_v42, %v18494_v41 }
  0xdf   : > { %35518 = vmatmul.mubr.f32.gmra.mrb[2].mxu0 %v17846_v4  ;;  %35524 = vmatprep.subr.mxu0 %v40374_v34  ;;  %v40575_v4 = vand.u32 4294901760, %v18368_v54  ;;  %v40585_v46 = vsub.f32 %v18365_v62, %v40559_v17  ;;  %v37088_v62 = vpack.c.bf16 %v40438_v33, %v40436_v38  ;;  %v31060_v38 = vld [vmem:[%s39391_s24 + $0xc2] sm:$0xff] }
  0xe0   : > { %33742 = vmatmul.mubr.f32.gmra.mrb[2].mxu1 %v40235_v22  ;;  %35526 = vmatprep.mubr.f32.mxu0 %v39701_v31  ;;  %v40580_v22 = vand.u32 4294901760, %v18374_v49  ;;  %v2760_v7 = vand.u32 4294901760, %v2759_v60  ;;  %v18496_v60 = vand.u32 4294901760, %v18495_v63  ;;  %v37688_v63 = vpack.c.bf16 %v40565_v42, %v40562_v6  ;;  %v31245_v42 = vld [vmem:[%s39391_s24 + $0x31] sm:$0xff] }
  0xe1   : > { %33749 = vmatpush3.msra.mxu1 %v40460_v51  ;;  %33750 = vmatprep.mubr.f32.mxu1 %v2730_v15  ;;  %v40594_v15 = vsub.f32 %v18368_v54, %v40575_v4  ;;  %v18456_v54 = vand.u32 4294901760, %v40585_v46 }
  0xe2   : > { %37085 = vmatprep.subr.bf16.mxu1 %v37084_v35  ;;  %35525 = vmatpush3.msra.mxu0 %v40374_v34  ;;  %v18446_v34 = vand.u32 4294901760, %v40573_v2  ;;  %v40602_v39 = vsub.f32 %v18374_v49, %v40580_v22 }
  0xe3   : > { %35527 = vmatmul.mubr.f32.vlgmr.msra.gmra.mrb[0].mxu0 %v39717_v36  ;;  %37677 = vmatprep.subr.bf16.mxu0 %v40350_v18  ;;  %v18466_v12 = vand.u32 4294901760, %v40594_v15 }
  0xe4   : > { %33751 = vmatmul.mubr.f32.vlgmr.msra.gmra.mrb[0].mxu1 %v2740_v19  ;;  %35529 = vmatprep.mubr.f32.mxu0 %v40330_v5  ;;  %v18447_v37 = vsub.f32 %v40573_v2, %v18446_v34  ;;  %v40624_v49 = vand.u32 4294901760, %v40602_v39 }
  0xe5   : > { %37087 = vmatpush3.bf16.msra.mxu1 %v37084_v35  ;;  %33753 = vmatprep.mubr.f32.mxu1 %v2750_v56  ;;  %v18488_v35 = vsub.f32 %v40562_v6, %v18487_v26  ;;  %v18467_v56 = vsub.f32 %v40594_v15, %v18466_v12  ;;  %v40768_v6 = vld [vmem:[%s45635_s1 + $0x2d8] sm:$0xff] }
  0xe6   : > { %33760 = vmatprep.subr.mxu1 %v2785_v10  ;;  %37679 = vmatpush3.bf16.msra.mxu0 %v40350_v18  ;;  %v40614_v18 = vsub.f32 %v18371_v50, %v40589_v40 }
  0xe7   : > { %35530 = vmatmul.mubr.f32.gmra.mrb[2].mxu0 %v40341_v47  ;;  %35536 = vmatprep.subr.mxu0 %v40335_v53  ;;  %v18489_v19 = vand.u32 4294901760, %v18488_v35 }
  0xe8   : > { %33754 = vmatmul.mubr.f32.gmra.mrb[2].mxu1 %v2760_v7  ;;  %35538 = vmatprep.mubr.f32.mxu0 %v39701_v31  ;;  %v18457_v31 = vsub.f32 %v40585_v46, %v18456_v54  ;;  %v18476_v50 = vand.u32 4294901760, %v40614_v18  ;;  %v18502_v7 = vsub.f32 %v40602_v39, %v40624_v49 }
  0xe9   : > { %33761 = vmatpush3.msra.mxu1 %v2785_v10  ;;  %33762 = vmatprep.mubr.f32.mxu1 %v40433_v57  ;;  %v37684_v10 = vpack.c.bf16 %v18496_v60, %v18489_v19  ;;  %v31059_v19 = vld [vmem:[%s39391_s24 + $0xb2] sm:$0xff] }
  0xea   : > { %37089 = vmatprep.subr.bf16.mxu1 %v37088_v62  ;;  %35537 = vmatpush3.msra.mxu0 %v40335_v53  ;;  %v18448_v53 = vand.u32 4294901760, %v18447_v37  ;;  %v18503_v35 = vand.u32 4294901760, %v18502_v7  ;;  %v31063_v37 = vld [vmem:[%s45635_s1 + $0x78] sm:$0xff] }
  0xeb   : > { %35539 = vmatmul.mubr.f32.vlgmr.msra.gmra.mrb[0].mxu0 %v39717_v36  ;;  %37681 = vmatprep.subr.bf16.mxu0 %v40599_v11  ;;  %v18458_v36 = vand.u32 4294901760, %v18457_v31  ;;  %v31064_v31 = vld [vmem:[%s45635_s1 + $0x80] sm:$0xff]  ;;  %v3287_v33 = vand.u32 4294901760, %v31063_v37  ;;  %v31061_v60 = vld [vmem:[%s39391_s24 + $0xd2] sm:$0xff] }
  0xec   : > { %33763 = vmatmul.mubr.f32.vlgmr.msra.gmra.mrb[0].mxu1 %v40445_v1  ;;  %35541 = vmatprep.mubr.f32.mxu0 %v40330_v5  ;;  %v18477_v5 = vsub.f32 %v40614_v18, %v18476_v50 }
  0xed   : > { %37091 = vmatpush3.bf16.msra.mxu1 %v37088_v62  ;;  %33765 = vmatprep.mubr.f32.mxu1 %v40455_v20  ;;  %v18468_v62 = vand.u32 4294901760, %v18467_v56  ;;  %v31062_v56 = vld [vmem:[%s39391_s24 + $0xe2] sm:$0xff] }
  0xee   : > { %33772 = vmatprep.subr.mxu1 %v40490_v59  ;;  %37683 = vmatpush3.bf16.msra.mxu0 %v40599_v11 }
  0xef   : > { %35542 = vmatmul.mubr.f32.gmra.mrb[2].mxu0 %v40341_v47  ;;  %35548 = vmatprep.subr.mxu0 %v40580_v22  ;;  %v18478_v47 = vand.u32 4294901760, %v18477_v5 }
  0xf0   : > { %33766 = vmatmul.mubr.f32.gmra.mrb[2].mxu1 %v40471_v52  ;;  %35550 = vmatprep.mubr.f32.mxu0 %v18448_v53 }
  0xf1   : > { %33773 = vmatpush3.msra.mxu1 %v40490_v59  ;;  %33774 = vmatprep.mubr.f32.mxu1 %v40453_v0  ;;  %v37096_v59 = vpack.c.bf16 %v2776_v44, %v2769_v55  ;;  %v3290_v55 = vand.u32 4294901760, %v31064_v31  ;;  %v3272_v44 = vsel %vm145_vm1, %v31059_v19, 0  ;;  %v31065_v0 = vld [vmem:[%s45635_s1 + $0x88] sm:$0x7f]  ;;  %v37696_v19 = vpack.c.bf16 %v18494_v41, %v18487_v26 }
  0xf2   : > { %37093 = vmatprep.subr.bf16.mxu1 %v40475_v16  ;;  %35549 = vmatpush3.msra.mxu0 %v40580_v22  ;;  %v40687_v53 = vand.u32 4294901760, %v3272_v44 }
  0xf3   : > { %35551 = vmatmul.mubr.f32.vlgmr.msra.gmra.mrb[0].mxu0 %v18458_v36  ;;  %37685 = vmatprep.subr.bf16.mxu0 %v37684_v10  ;;  %v3278_v36 = vsel %vm145_vm1, %v31061_v60, 0 }
  0xf4   : > { %33775 = vmatmul.mubr.f32.vlgmr.msra.gmra.mrb[0].mxu1 %v40467_v43  ;;  %35553 = vmatprep.mubr.f32.mxu0 %v18468_v62  ;;  %v40691_v43 = vsub.f32 %v31063_v37, %v3287_v33  ;;  %v40708_v5 = vsub.f32 %v3272_v44, %v40687_v53  ;;  %v40710_v7 = vand.u32 4294901760, %v3278_v36 }
  0xf5   : > { %37095 = vmatpush3.bf16.msra.mxu1 %v40475_v16  ;;  %33777 = vmatprep.mubr.f32.mxu1 %v40479_v21 }
  0xf6   : > { %33784 = vmatprep.subr.mxu1 %v40460_v51  ;;  %37687 = vmatpush3.bf16.msra.mxu0 %v37684_v10  ;;  %v3284_v10 = vsel %vm158_vm0, %v31065_v0, 0 }
  0xf7   : > { %35554 = vmatmul.mubr.f32.gmra.mrb[2].mxu0 %v18478_v47  ;;  %35560 = vmatprep.subr.mxu0 %v18503_v35  ;;  %v40714_v62 = vand.u32 4294901760, %v3284_v10 }
  0xf8   : > { %33778 = vmatmul.mubr.f32.gmra.mrb[2].mxu1 %v40503_v23  ;;  %35562 = vmatprep.mubr.f32.mxu0 %v40542_v32  ;;  %v3397_v23 = vand.u32 4294901760, %v40691_v43 }
  0xf9   : > { %33785 = vmatpush3.msra.mxu1 %v40460_v51  ;;  %33786 = vmatprep.mubr.f32.mxu1 %v2728_v45  ;;  %v3275_v45 = vsel %vm145_vm1, %v31060_v38, 0  ;;  %v40744_v37 = vsub.f32 %v3284_v10, %v40714_v62 }
  0xfa   : > { %37097 = vmatprep.subr.bf16.mxu1 %v37096_v59  ;;  %35561 = vmatpush3.msra.mxu0 %v18503_v35  ;;  %v40699_v21 = vand.u32 4294901760, %v3275_v45  ;;  %v3356_v35 = vand.u32 4294901760, %v40708_v5 }
  0xfb   : > { %35563 = vmatmul.mubr.f32.vlgmr.msra.gmra.mrb[0].mxu0 %v40559_v17  ;;  %37689 = vmatprep.subr.bf16.mxu0 %v37688_v63  ;;  %v40781_v60 = vand.u32 4294901760, %v40744_v37 }
  0xfc   : > { %33787 = vmatmul.mubr.f32.vlgmr.msra.gmra.mrb[0].mxu1 %v2738_v29  ;;  %35565 = vmatprep.mubr.f32.mxu0 %v40575_v4  ;;  %v40693_v29 = vsub.f32 %v31064_v31, %v3290_v55  ;;  %v31244_v31 = vld [vmem:[%s39391_s24 + $0x21] sm:$0xff]  ;;  %v3357_v26 = vsub.f32 %v40708_v5, %v3356_v35 }
  0xfd   : > { %37099 = vmatpush3.bf16.msra.mxu1 %v37096_v59  ;;  %33789 = vmatprep.mubr.f32.mxu1 %v2748_v9  ;;  %v3281_v9 = vsel %vm145_vm1, %v31062_v56, 0  ;;  %v40733_v59 = vsub.f32 %v3278_v36, %v40710_v7  ;;  %v18990_v44 = vsel %vm145_vm1, %v31244_v31, 0  ;;  %v19008_v56 = vand.u32 4294901760, %v40768_v6 }
  0xfe   : > { %33796 = vmatprep.subr.mxu1 %v40526_v8  ;;  %37691 = vmatpush3.bf16.msra.mxu0 %v37688_v63  ;;  %v40723_v47 = vand.u32 4294901760, %v3281_v9  ;;  %v3398_v63 = vsub.f32 %v40691_v43, %v3397_v23  ;;  %v18993_v36 = vsel %vm145_vm1, %v31245_v42, 0  ;;  %v40796_v10 = vand.u32 4294901760, %v18990_v44 }
  0xff   : > { %35566 = vmatmul.mubr.f32.gmra.mrb[2].mxu0 %v40589_v40  ;;  %35572 = vmatprep.subr.mxu0 %v40602_v39  ;;  %v3376_v41 = vand.u32 4294901760, %v40733_v59 }
 0x100   : > { %33790 = vmatmul.mubr.f32.gmra.mrb[2].mxu1 %v2758_v30  ;;  %35574 = vmatprep.mubr.f32.mxu0 %v40573_v2  ;;  %v3404_v30 = vand.u32 4294901760, %v40693_v29  ;;  %v3399_v2 = vand.u32 4294901760, %v3398_v63  ;;  %v31247_v63 = vld [vmem:[%s39391_s24 + $0x51] sm:$0xff] }
 0x101   : > { %33797 = vmatpush3.msra.mxu1 %v40526_v8  ;;  %33798 = vmatprep.mubr.f32.mxu1 %v40433_v57  ;;  %v40721_v8 = vsub.f32 %v3275_v45, %v40699_v21 }
 0x102   : > { %37101 = vmatprep.subr.bf16.mxu1 %v40475_v16  ;;  %35573 = vmatpush3.msra.mxu0 %v40602_v39  ;;  %v40729_v39 = vpack.c.bf16 %v3290_v55, %v3287_v33  ;;  %v40755_v33 = vsub.f32 %v3281_v9, %v40723_v47  ;;  %v40760_v55 = vld [vmem:[%s45635_s1 + $0x2d0] sm:$0xff]  ;;  %v31250_v9 = vld [vmem:[%s45635_s1 + $0x2e0] sm:$0x7f] }
 0x103   : > { %35575 = vmatmul.mubr.f32.vlgmr.msra.gmra.mrb[0].mxu0 %v40585_v46  ;;  %37693 = vmatprep.subr.bf16.mxu0 %v40599_v11  ;;  %v3366_v38 = vand.u32 4294901760, %v40721_v8  ;;  %v3358_v46 = vand.u32 4294901760, %v3357_v26  ;;  %v40829_v26 = vsub.f32 %v18990_v44, %v40796_v10 }
 0x104   : > { %33799 = vmatmul.mubr.f32.vlgmr.msra.gmra.mrb[0].mxu1 %v40445_v1  ;;  %35577 = vmatprep.mubr.f32.mxu0 %v40594_v15  ;;  %v3386_v45 = vand.u32 4294901760, %v40755_v33 }
 0x105   : > { %37103 = vmatpush3.bf16.msra.mxu1 %v40475_v16  ;;  %33801 = vmatprep.mubr.f32.mxu1 %v40455_v20  ;;  %v3405_v16 = vsub.f32 %v40693_v29, %v3404_v30  ;;  %v3367_v0 = vsub.f32 %v40721_v8, %v3366_v38 }
 0x106   : > { %33808 = vmatprep.subr.mxu1 %v40460_v51  ;;  %37695 = vmatpush3.bf16.msra.mxu0 %v40599_v11  ;;  %v3387_v42 = vsub.f32 %v40755_v33, %v3386_v45 }
 0x107   : > { %35578 = vmatmul.mubr.f32.gmra.mrb[2].mxu0 %v40614_v18  ;;  %35584 = vmatprep.subr.mxu0 %v40580_v22  ;;  %v3368_v31 = vand.u32 4294901760, %v3367_v0 }
 0x108   : > { %33802 = vmatmul.mubr.f32.gmra.mrb[2].mxu1 %v40471_v52  ;;  %35586 = vmatprep.mubr.f32.mxu0 %v18446_v34  ;;  %v3406_v34 = vand.u32 4294901760, %v3405_v16 }
 0x109   : > { %33809 = vmatpush3.msra.mxu1 %v40460_v51  ;;  %33810 = vmatprep.mubr.f32.mxu1 %v40433_v57  ;;  %v19005_v51 = vand.u32 4294901760, %v40760_v55  ;;  %v31246_v57 = vld [vmem:[%s39391_s24 + $0x41] sm:$0xff] }
 0x10a   : > { %37105 = vmatprep.subr.bf16.mxu1 %v40729_v39  ;;  %35585 = vmatpush3.msra.mxu0 %v40580_v22  ;;  %v37108_v15 = vpack.c.bf16 %v3406_v34, %v3399_v2 }
 0x10b   : > { %35587 = vmatmul.mubr.f32.vlgmr.msra.gmra.mrb[0].mxu0 %v18456_v54  ;;  %37697 = vmatprep.subr.bf16.mxu0 %v37696_v19  ;;  %v3377_v54 = vsub.f32 %v40733_v59, %v3376_v41  ;;  %v40814_v16 = vsub.f32 %v40760_v55, %v19005_v51  ;;  %v19002_v55 = vsel %vm158_vm0, %v31250_v9, 0  ;;  %v40855_v9 = vpack.c.bf16 %v19008_v56, %v19005_v51 }
 0x10c   : > { %33811 = vmatmul.mubr.f32.vlgmr.msra.gmra.mrb[0].mxu1 %v40445_v1  ;;  %35589 = vmatprep.mubr.f32.mxu0 %v18466_v12  ;;  %v18996_v1 = vsel %vm145_vm1, %v31246_v57, 0  ;;  %v3412_v12 = vsub.f32 %v40744_v37, %v40781_v60  ;;  %v40842_v44 = vand.u32 4294901760, %v19002_v55 }
 0x10d   : > { %37107 = vmatpush3.bf16.msra.mxu1 %v40729_v39  ;;  %33813 = vmatprep.mubr.f32.mxu1 %v40455_v20  ;;  %v40811_v20 = vand.u32 4294901760, %v18993_v36  ;;  %v40831_v18 = vand.u32 4294901760, %v18996_v1  ;;  %v3378_v2 = vand.u32 4294901760, %v3377_v54  ;;  %v19115_v34 = vand.u32 4294901760, %v40814_v16 }
 0x10e   : > { %33820 = vmatprep.subr.mxu1 %v40714_v62  ;;  %37699 = vmatpush3.bf16.msra.mxu0 %v37696_v19  ;;  %v40823_v19 = vsub.f32 %v40768_v6, %v19008_v56  ;;  %v3413_v6 = vand.u32 4294901760, %v3412_v12  ;;  %v37112_v54 = vpack.c.bf16 %v40693_v29, %v40691_v43  ;;  %v3892_v43 = vld [vmem:[%s39391_s24 + $0x13] sm:$0xff] }
 0x10f   : > { %35590 = vmatmul.mubr.f32.gmra.mrb[2].mxu0 %v18476_v50  ;;  %35596 = vmatprep.subr.mxu0 %v40624_v49  ;;  %v18999_v50 = vsel %vm145_vm1, %v31247_v63, 0  ;;  %v19116_v12 = vsub.f32 %v40814_v16, %v19115_v34 }
 0x110   : > { %33814 = vmatmul.mubr.f32.gmra.mrb[2].mxu1 %v40471_v52  ;;  %35598 = vmatprep.mubr.f32.mxu0 %v40542_v32  ;;  %v40837_v52 = vsub.f32 %v18993_v36, %v40811_v20  ;;  %v19122_v57 = vand.u32 4294901760, %v40823_v19  ;;  %v40845_v0 = vand.u32 4294901760, %v18999_v50  ;;  %v40850_v36 = vsub.f32 %v18996_v1, %v40831_v18 }
 0x111   : > { %33821 = vmatpush3.msra.mxu1 %v40714_v62  ;;  %33822 = vmatprep.mubr.f32.mxu1 %v3358_v46  ;;  %v3388_v46 = vand.u32 4294901760, %v3387_v42 }
 0x112   : > { %37109 = vmatprep.subr.bf16.mxu1 %v37108_v15  ;;  %35597 = vmatpush3.msra.mxu0 %v40624_v49  ;;  %v19074_v49 = vand.u32 4294901760, %v40829_v26  ;;  %v19084_v63 = vand.u32 4294901760, %v40837_v52  ;;  %v19123_v1 = vsub.f32 %v40823_v19, %v19122_v57  ;;  %v19094_v56 = vand.u32 4294901760, %v40850_v36 }
 0x113   : > { %35599 = vmatmul.mubr.f32.vlgmr.msra.gmra.mrb[0].mxu0 %v40559_v17  ;;  %37701 = vmatprep.subr.bf16.mxu0 %v40599_v11 }
 0x114   : > { %33823 = vmatmul.mubr.f32.vlgmr.msra.gmra.mrb[0].mxu1 %v3368_v31  ;;  %35601 = vmatprep.mubr.f32.mxu0 %v40575_v4  ;;  %v19075_v51 = vsub.f32 %v40829_v26, %v19074_v49  ;;  %v19085_v31 = vsub.f32 %v40837_v52, %v19084_v63  ;;  %v19124_v42 = vand.u32 4294901760, %v19123_v1  ;;  %v37712_v1 = vpack.c.bf16 %v40823_v19, %v40814_v16  ;;  %v41024_v16 = vld [vmem:[%s45635_s1 + $0x2f0] sm:$0xff]  ;;  %v31252_v19 = vld [vmem:[%s39391_s24 + $0xe1] sm:$0xff] }
 0x115   : > { %37111 = vmatpush3.bf16.msra.mxu1 %v37108_v15  ;;  %33825 = vmatprep.mubr.f32.mxu1 %v3378_v2  ;;  %v40867_v15 = vsub.f32 %v18999_v50, %v40845_v0  ;;  %v19095_v2 = vsub.f32 %v40850_v36, %v19094_v56 }
 0x116   : > { %33832 = vmatprep.subr.mxu1 %v3413_v6  ;;  %37703 = vmatpush3.bf16.msra.mxu0 %v40599_v11  ;;  %v40870_v11 = vsub.f32 %v19002_v55, %v40842_v44 }
 0x117   : > { %35602 = vmatmul.mubr.f32.gmra.mrb[2].mxu0 %v40589_v40  ;;  %35608 = vmatprep.subr.mxu0 %v40580_v22  ;;  %v19104_v55 = vand.u32 4294901760, %v40867_v15 }
 0x118   : > { %33826 = vmatmul.mubr.f32.gmra.mrb[2].mxu1 %v3388_v46  ;;  %35610 = vmatprep.mubr.f32.mxu0 %v40542_v32  ;;  %v19117_v32 = vand.u32 4294901760, %v19116_v12  ;;  %v40886_v50 = vand.u32 4294901760, %v40870_v11 }
 0x119   : > { %33833 = vmatpush3.msra.mxu1 %v3413_v6  ;;  %33834 = vmatprep.mubr.f32.mxu1 %v40687_v53 }
 0x11a   : > { %37113 = vmatprep.subr.bf16.mxu1 %v37112_v54  ;;  %35609 = vmatpush3.msra.mxu0 %v40580_v22  ;;  %v19076_v22 = vand.u32 4294901760, %v19075_v51  ;;  %v37708_v6 = vpack.c.bf16 %v19124_v42, %v19117_v32  ;;  %v19130_v46 = vsub.f32 %v40870_v11, %v40886_v50  ;;  %v31066_v51 = vld [vmem:[%s45635_s1 + $0x90] sm:$0xff]  ;;  %v3891_v32 = vld [vmem:[%s39391_s24 + $0x3] sm:$0xff] }
 0x11b   : > { %35611 = vmatmul.mubr.f32.vlgmr.msra.gmra.mrb[0].mxu0 %v40559_v17  ;;  %37705 = vmatprep.subr.bf16.mxu0 %v40855_v9  ;;  %v19086_v17 = vand.u32 4294901760, %v19085_v31  ;;  %v31067_v31 = vld [vmem:[%s45635_s1 + $0x98] sm:$0xff]  ;;  %v3915_v29 = vand.u32 4294901760, %v31066_v51  ;;  %v3893_v42 = vld [vmem:[%s39391_s24 + $0x23] sm:$0xff] }
 0x11c   : > { %33835 = vmatmul.mubr.f32.vlgmr.msra.gmra.mrb[0].mxu1 %v40699_v21  ;;  %35613 = vmatprep.mubr.f32.mxu0 %v40575_v4  ;;  %v19105_v4 = vsub.f32 %v40867_v15, %v19104_v55  ;;  %v19131_v12 = vand.u32 4294901760, %v19130_v46 }
 0x11d   : > { %37115 = vmatpush3.bf16.msra.mxu1 %v37112_v54  ;;  %33837 = vmatprep.mubr.f32.mxu1 %v40710_v7  ;;  %v19096_v54 = vand.u32 4294901760, %v19095_v2  ;;  %v3894_v2 = vld [vmem:[%s39391_s24 + $0x33] sm:$0xff] }
 0x11e   : > { %33844 = vmatprep.subr.mxu1 %v40744_v37  ;;  %37707 = vmatpush3.bf16.msra.mxu0 %v40855_v9 }
 0x11f   : > { %35614 = vmatmul.mubr.f32.gmra.mrb[2].mxu0 %v40589_v40  ;;  %35620 = vmatprep.subr.mxu0 %v40842_v44  ;;  %v19106_v40 = vand.u32 4294901760, %v19105_v4 }
 0x120   : > { %33838 = vmatmul.mubr.f32.gmra.mrb[2].mxu1 %v40723_v47  ;;  %35622 = vmatprep.mubr.f32.mxu0 %v19076_v22 }
 0x121   : > { %33845 = vmatpush3.msra.mxu1 %v40744_v37  ;;  %33846 = vmatprep.mubr.f32.mxu1 %v40708_v5  ;;  %v37120_v37 = vpack.c.bf16 %v3404_v30, %v3397_v23  ;;  %v3918_v23 = vand.u32 4294901760, %v31067_v31  ;;  %v3900_v30 = vsel %vm145_vm1, %v3891_v32, 0  ;;  %v31068_v5 = vld [vmem:[%s45635_s1 + $0xa0] sm:$0x7f]  ;;  %v37720_v32 = vpack.c.bf16 %v19122_v57, %v19115_v34 }
 0x122   : > { %37117 = vmatprep.subr.bf16.mxu1 %v40729_v39  ;;  %35621 = vmatpush3.msra.mxu0 %v40842_v44  ;;  %v40943_v22 = vand.u32 4294901760, %v3900_v30 }
 0x123   : > { %35623 = vmatmul.mubr.f32.vlgmr.msra.gmra.mrb[0].mxu0 %v19086_v17  ;;  %37709 = vmatprep.subr.bf16.mxu0 %v37708_v6  ;;  %v3906_v17 = vsel %vm145_vm1, %v3893_v42, 0 }
 0x124   : > { %33847 = vmatmul.mubr.f32.vlgmr.msra.gmra.mrb[0].mxu1 %v40721_v8  ;;  %35625 = vmatprep.mubr.f32.mxu0 %v19096_v54  ;;  %v40947_v8 = vsub.f32 %v31066_v51, %v3915_v29  ;;  %v40964_v4 = vsub.f32 %v3900_v30, %v40943_v22  ;;  %v40966_v46 = vand.u32 4294901760, %v3906_v17 }
 0x125   : > { %37119 = vmatpush3.bf16.msra.mxu1 %v40729_v39  ;;  %33849 = vmatprep.mubr.f32.mxu1 %v40733_v59 }
 0x126   : > { %33856 = vmatprep.subr.mxu1 %v40714_v62  ;;  %37711 = vmatpush3.bf16.msra.mxu0 %v37708_v6  ;;  %v3912_v6 = vsel %vm158_vm0, %v31068_v5, 0 }
 0x127   : > { %35626 = vmatmul.mubr.f32.gmra.mrb[2].mxu0 %v19106_v40  ;;  %35632 = vmatprep.subr.mxu0 %v19131_v12  ;;  %v40970_v54 = vand.u32 4294901760, %v3912_v6 }
 0x128   : > { %33850 = vmatmul.mubr.f32.gmra.mrb[2].mxu1 %v40755_v33  ;;  %35634 = vmatprep.mubr.f32.mxu0 %v40796_v10  ;;  %v4025_v33 = vand.u32 4294901760, %v40947_v8 }
 0x129   : > { %33857 = vmatpush3.msra.mxu1 %v40714_v62  ;;  %33858 = vmatprep.mubr.f32.mxu1 %v3356_v35  ;;  %v3903_v35 = vsel %vm145_vm1, %v3892_v43, 0  ;;  %v41000_v51 = vsub.f32 %v3912_v6, %v40970_v54 }
 0x12a   : > { %37121 = vmatprep.subr.bf16.mxu1 %v37120_v37  ;;  %35633 = vmatpush3.msra.mxu0 %v19131_v12  ;;  %v40955_v59 = vand.u32 4294901760, %v3903_v35  ;;  %v3984_v12 = vand.u32 4294901760, %v40964_v4 }
 0x12b   : > { %35635 = vmatmul.mubr.f32.vlgmr.msra.gmra.mrb[0].mxu0 %v40811_v20  ;;  %37713 = vmatprep.subr.bf16.mxu0 %v37712_v1  ;;  %v41037_v42 = vand.u32 4294901760, %v41000_v51 }
 0x12c   : > { %33859 = vmatmul.mubr.f32.vlgmr.msra.gmra.mrb[0].mxu1 %v3366_v38  ;;  %35637 = vmatprep.mubr.f32.mxu0 %v40831_v18  ;;  %v40949_v38 = vsub.f32 %v31067_v31, %v3918_v23  ;;  %v31251_v31 = vld [vmem:[%s39391_s24 + $0xd1] sm:$0xff]  ;;  %v3985_v34 = vsub.f32 %v40964_v4, %v3984_v12 }
 0x12d   : > { %37123 = vmatpush3.bf16.msra.mxu1 %v37120_v37  ;;  %33861 = vmatprep.mubr.f32.mxu1 %v3376_v41  ;;  %v3909_v41 = vsel %vm145_vm1, %v3894_v2, 0  ;;  %v40989_v37 = vsub.f32 %v3906_v17, %v40966_v46  ;;  %v19618_v30 = vsel %vm145_vm1, %v31251_v31, 0  ;;  %v19636_v2 = vand.u32 4294901760, %v41024_v16 }
 0x12e   : > { %33868 = vmatprep.subr.mxu1 %v40781_v60  ;;  %37715 = vmatpush3.bf16.msra.mxu0 %v37712_v1  ;;  %v40979_v40 = vand.u32 4294901760, %v3909_v41  ;;  %v4026_v1 = vsub.f32 %v40947_v8, %v4025_v33  ;;  %v19621_v17 = vsel %vm145_vm1, %v31252_v19, 0  ;;  %v41052_v6 = vand.u32 4294901760, %v19618_v30 }
 0x12f   : > { %35638 = vmatmul.mubr.f32.gmra.mrb[2].mxu0 %v40845_v0  ;;  %35644 = vmatprep.subr.mxu0 %v40870_v11  ;;  %v4004_v57 = vand.u32 4294901760, %v40989_v37 }
 0x130   : > { %33862 = vmatmul.mubr.f32.gmra.mrb[2].mxu1 %v3386_v45  ;;  %35646 = vmatprep.mubr.f32.mxu0 %v40829_v26  ;;  %v4032_v45 = vand.u32 4294901760, %v40949_v38  ;;  %v4027_v26 = vand.u32 4294901760, %v4026_v1  ;;  %v31254_v1 = vld [vmem:[%s39391_s24 + $0x101] sm:$0xff] }
 0x131   : > { %33869 = vmatpush3.msra.mxu1 %v40781_v60  ;;  %33870 = vmatprep.mubr.f32.mxu1 %v40687_v53  ;;  %v40977_v60 = vsub.f32 %v3903_v35, %v40955_v59 }
 0x132   : > { %37125 = vmatprep.subr.bf16.mxu1 %v40729_v39  ;;  %35645 = vmatpush3.msra.mxu0 %v40870_v11  ;;  %v40985_v11 = vpack.c.bf16 %v3918_v23, %v3915_v29  ;;  %v41011_v29 = vsub.f32 %v3909_v41, %v40979_v40  ;;  %v41016_v23 = vld [vmem:[%s45635_s1 + $0x2e8] sm:$0xff]  ;;  %v31257_v41 = vld [vmem:[%s45635_s1 + $0x2f8] sm:$0x7f] }
 0x133   : > { %35647 = vmatmul.mubr.f32.vlgmr.msra.gmra.mrb[0].mxu0 %v40837_v52  ;;  %37717 = vmatprep.subr.bf16.mxu0 %v40855_v9  ;;  %v3994_v43 = vand.u32 4294901760, %v40977_v60  ;;  %v3986_v52 = vand.u32 4294901760, %v3985_v34  ;;  %v41085_v34 = vsub.f32 %v19618_v30, %v41052_v6 }
 0x134   : > { %33871 = vmatmul.mubr.f32.vlgmr.msra.gmra.mrb[0].mxu1 %v40699_v21  ;;  %35649 = vmatprep.mubr.f32.mxu0 %v40850_v36  ;;  %v4014_v35 = vand.u32 4294901760, %v41011_v29 }
 0x135   : > { %37127 = vmatpush3.bf16.msra.mxu1 %v40729_v39  ;;  %33873 = vmatprep.mubr.f32.mxu1 %v40710_v7  ;;  %v4033_v39 = vsub.f32 %v40949_v38, %v4032_v45  ;;  %v3995_v5 = vsub.f32 %v40977_v60, %v3994_v43 }
 0x136   : > { %33880 = vmatprep.subr.mxu1 %v40714_v62  ;;  %37719 = vmatpush3.bf16.msra.mxu0 %v40855_v9  ;;  %v4015_v19 = vsub.f32 %v41011_v29, %v4014_v35 }
 0x137   : > { %35650 = vmatmul.mubr.f32.gmra.mrb[2].mxu0 %v40867_v15  ;;  %35656 = vmatprep.subr.mxu0 %v40842_v44  ;;  %v3996_v31 = vand.u32 4294901760, %v3995_v5 }
 0x138   : > { %33874 = vmatmul.mubr.f32.gmra.mrb[2].mxu1 %v40723_v47  ;;  %35658 = vmatprep.mubr.f32.mxu0 %v19074_v49  ;;  %v4034_v49 = vand.u32 4294901760, %v4033_v39 }
 0x139   : > { %33881 = vmatpush3.msra.mxu1 %v40714_v62  ;;  %33882 = vmatprep.mubr.f32.mxu1 %v40687_v53  ;;  %v19633_v62 = vand.u32 4294901760, %v41016_v23  ;;  %v31253_v53 = vld [vmem:[%s39391_s24 + $0xf1] sm:$0xff] }
 0x13a   : > { %37129 = vmatprep.subr.bf16.mxu1 %v40985_v11  ;;  %35657 = vmatpush3.msra.mxu0 %v40842_v44  ;;  %v37132_v36 = vpack.c.bf16 %v4034_v49, %v4027_v26 }
 0x13b   : > { %35659 = vmatmul.mubr.f32.vlgmr.msra.gmra.mrb[0].mxu0 %v19084_v63  ;;  %37721 = vmatprep.subr.bf16.mxu0 %v37720_v32  ;;  %v4005_v63 = vsub.f32 %v40989_v37, %v4004_v57  ;;  %v41070_v39 = vsub.f32 %v41016_v23, %v19633_v62  ;;  %v19630_v23 = vsel %vm158_vm0, %v31257_v41, 0  ;;  %v41111_v41 = vpack.c.bf16 %v19636_v2, %v19633_v62 }
 0x13c   : > { %33883 = vmatmul.mubr.f32.vlgmr.msra.gmra.mrb[0].mxu1 %v40699_v21  ;;  %35661 = vmatprep.mubr.f32.mxu0 %v19094_v56  ;;  %v19624_v21 = vsel %vm145_vm1, %v31253_v53, 0  ;;  %v4040_v56 = vsub.f32 %v41000_v51, %v41037_v42  ;;  %v41098_v30 = vand.u32 4294901760, %v19630_v23 }
 0x13d   : > { %37131 = vmatpush3.bf16.msra.mxu1 %v40985_v11  ;;  %33885 = vmatprep.mubr.f32.mxu1 %v40710_v7  ;;  %v41067_v7 = vand.u32 4294901760, %v19621_v17  ;;  %v41087_v15 = vand.u32 4294901760, %v19624_v21  ;;  %v4006_v26 = vand.u32 4294901760, %v4005_v63  ;;  %v19743_v49 = vand.u32 4294901760, %v41070_v39 }
 0x13e   : > { %33892 = vmatprep.subr.mxu1 %v40970_v54  ;;  %37723 = vmatpush3.bf16.msra.mxu0 %v37720_v32  ;;  %v41079_v32 = vsub.f32 %v41024_v16, %v19636_v2  ;;  %v4041_v16 = vand.u32 4294901760, %v4040_v56  ;;  %v37136_v63 = vpack.c.bf16 %v40949_v38, %v40947_v8  ;;  %v31071_v8 = vld [vmem:[%s39391_s24 + $0x170] sm:$0xff] }
 0x13f   : > { %35662 = vmatmul.mubr.f32.gmra.mrb[2].mxu0 %v19104_v55  ;;  %35668 = vmatprep.subr.mxu0 %v40886_v50  ;;  %v19627_v55 = vsel %vm145_vm1, %v31254_v1, 0  ;;  %v19744_v56 = vsub.f32 %v41070_v39, %v19743_v49 }
 0x140   : > { %33886 = vmatmul.mubr.f32.gmra.mrb[2].mxu1 %v40723_v47  ;;  %35670 = vmatprep.mubr.f32.mxu0 %v40796_v10  ;;  %v41093_v47 = vsub.f32 %v19621_v17, %v41067_v7  ;;  %v19750_v53 = vand.u32 4294901760, %v41079_v32  ;;  %v41101_v5 = vand.u32 4294901760, %v19627_v55  ;;  %v41106_v17 = vsub.f32 %v19624_v21, %v41087_v15 }
 0x141   : > { %33893 = vmatpush3.msra.mxu1 %v40970_v54  ;;  %33894 = vmatprep.mubr.f32.mxu1 %v3986_v52  ;;  %v4016_v52 = vand.u32 4294901760, %v4015_v19 }
 0x142   : > { %37133 = vmatprep.subr.bf16.mxu1 %v37132_v36  ;;  %35669 = vmatpush3.msra.mxu0 %v40886_v50  ;;  %v19702_v50 = vand.u32 4294901760, %v41085_v34  ;;  %v19712_v1 = vand.u32 4294901760, %v41093_v47  ;;  %v19751_v21 = vsub.f32 %v41079_v32, %v19750_v53  ;;  %v19722_v2 = vand.u32 4294901760, %v41106_v17 }
 0x143   : > { %35671 = vmatmul.mubr.f32.vlgmr.msra.gmra.mrb[0].mxu0 %v40811_v20  ;;  %37725 = vmatprep.subr.bf16.mxu0 %v40855_v9 }
 0x144   : > { %33895 = vmatmul.mubr.f32.vlgmr.msra.gmra.mrb[0].mxu1 %v3996_v31  ;;  %35673 = vmatprep.mubr.f32.mxu0 %v40831_v18  ;;  %v19703_v62 = vsub.f32 %v41085_v34, %v19702_v50  ;;  %v19713_v31 = vsub.f32 %v41093_v47, %v19712_v1  ;;  %v19752_v19 = vand.u32 4294901760, %v19751_v21  ;;  %v37736_v21 = vpack.c.bf16 %v41079_v32, %v41070_v39  ;;  %v41280_v39 = vld [vmem:[%s45635_s1 + $0x308] sm:$0xff]  ;;  %v31259_v32 = vld [vmem:[%s39391_s24 + $0x32] sm:$0xff] }
 0x145   : > { %37135 = vmatpush3.bf16.msra.mxu1 %v37132_v36  ;;  %33897 = vmatprep.mubr.f32.mxu1 %v4006_v26  ;;  %v41123_v36 = vsub.f32 %v19627_v55, %v41101_v5  ;;  %v19723_v26 = vsub.f32 %v41106_v17, %v19722_v2 }
 0x146   : > { %33904 = vmatprep.subr.mxu1 %v4041_v16  ;;  %37727 = vmatpush3.bf16.msra.mxu0 %v40855_v9  ;;  %v41126_v9 = vsub.f32 %v19630_v23, %v41098_v30 }
 0x147   : > { %35674 = vmatmul.mubr.f32.gmra.mrb[2].mxu0 %v40845_v0  ;;  %35680 = vmatprep.subr.mxu0 %v40842_v44  ;;  %v19732_v23 = vand.u32 4294901760, %v41123_v36 }
 0x148   : > { %33898 = vmatmul.mubr.f32.gmra.mrb[2].mxu1 %v4016_v52  ;;  %35682 = vmatprep.mubr.f32.mxu0 %v40796_v10  ;;  %v19745_v10 = vand.u32 4294901760, %v19744_v56  ;;  %v41142_v55 = vand.u32 4294901760, %v41126_v9 }
 0x149   : > { %33905 = vmatpush3.msra.mxu1 %v4041_v16  ;;  %33906 = vmatprep.mubr.f32.mxu1 %v40943_v22 }
 0x14a   : > { %37137 = vmatprep.subr.bf16.mxu1 %v37136_v63  ;;  %35681 = vmatpush3.msra.mxu0 %v40842_v44  ;;  %v19704_v44 = vand.u32 4294901760, %v19703_v62  ;;  %v37732_v16 = vpack.c.bf16 %v19752_v19, %v19745_v10  ;;  %v19758_v52 = vsub.f32 %v41126_v9, %v41142_v55  ;;  %v31074_v62 = vld [vmem:[%s45635_s1 + $0xa8] sm:$0xff]  ;;  %v31070_v10 = vld [vmem:[%s39391_s24 + $0x160] sm:$0xff] }
 0x14b   : > { %35683 = vmatmul.mubr.f32.vlgmr.msra.gmra.mrb[0].mxu0 %v40811_v20  ;;  %37729 = vmatprep.subr.bf16.mxu0 %v41111_v41  ;;  %v19714_v20 = vand.u32 4294901760, %v19713_v31  ;;  %v31075_v31 = vld [vmem:[%s45635_s1 + $0xb0] sm:$0xff]  ;;  %v4545_v38 = vand.u32 4294901760, %v31074_v62  ;;  %v31072_v19 = vld [vmem:[%s39391_s24 + $0x180] sm:$0xff] }
 0x14c   : > { %33907 = vmatmul.mubr.f32.vlgmr.msra.gmra.mrb[0].mxu1 %v40955_v59  ;;  %35685 = vmatprep.mubr.f32.mxu0 %v40831_v18  ;;  %v19733_v18 = vsub.f32 %v41123_v36, %v19732_v23  ;;  %v19759_v56 = vand.u32 4294901760, %v19758_v52 }
 0x14d   : > { %37139 = vmatpush3.bf16.msra.mxu1 %v37136_v63  ;;  %33909 = vmatprep.mubr.f32.mxu1 %v40966_v46  ;;  %v19724_v63 = vand.u32 4294901760, %v19723_v26  ;;  %v31073_v26 = vld [vmem:[%s39391_s24 + $0x190] sm:$0xff] }
 0x14e   : > { %33916 = vmatprep.subr.mxu1 %v41000_v51  ;;  %37731 = vmatpush3.bf16.msra.mxu0 %v41111_v41 }
 0x14f   : > { %35686 = vmatmul.mubr.f32.gmra.mrb[2].mxu0 %v40845_v0  ;;  %35692 = vmatprep.subr.mxu0 %v41098_v30  ;;  %v19734_v0 = vand.u32 4294901760, %v19733_v18 }
 0x150   : > { %33910 = vmatmul.mubr.f32.gmra.mrb[2].mxu1 %v40979_v40  ;;  %35694 = vmatprep.mubr.f32.mxu0 %v19704_v44 }
 0x151   : > { %33917 = vmatpush3.msra.mxu1 %v41000_v51  ;;  %33918 = vmatprep.mubr.f32.mxu1 %v40964_v4  ;;  %v37144_v51 = vpack.c.bf16 %v4032_v45, %v4025_v33  ;;  %v4548_v33 = vand.u32 4294901760, %v31075_v31  ;;  %v4530_v45 = vsel %vm145_vm1, %v31070_v10, 0  ;;  %v31076_v4 = vld [vmem:[%s45635_s1 + $0xb8] sm:$0x7f]  ;;  %v37744_v10 = vpack.c.bf16 %v19750_v53, %v19743_v49 }
 0x152   : > { %37141 = vmatprep.subr.bf16.mxu1 %v40985_v11  ;;  %35693 = vmatpush3.msra.mxu0 %v41098_v30  ;;  %v41199_v44 = vand.u32 4294901760, %v4530_v45 }
 0x153   : > { %35695 = vmatmul.mubr.f32.vlgmr.msra.gmra.mrb[0].mxu0 %v19714_v20  ;;  %37733 = vmatprep.subr.bf16.mxu0 %v37732_v16  ;;  %v4536_v20 = vsel %vm145_vm1, %v31072_v19, 0 }
 0x154   : > { %33919 = vmatmul.mubr.f32.vlgmr.msra.gmra.mrb[0].mxu1 %v40977_v60  ;;  %35697 = vmatprep.mubr.f32.mxu0 %v19724_v63  ;;  %v41203_v60 = vsub.f32 %v31074_v62, %v4545_v38  ;;  %v41220_v18 = vsub.f32 %v4530_v45, %v41199_v44  ;;  %v41222_v52 = vand.u32 4294901760, %v4536_v20 }
 0x155   : > { %37143 = vmatpush3.bf16.msra.mxu1 %v40985_v11  ;;  %33921 = vmatprep.mubr.f32.mxu1 %v40989_v37 }
 0x156   : > { %33928 = vmatprep.subr.mxu1 %v40970_v54  ;;  %37735 = vmatpush3.bf16.msra.mxu0 %v37732_v16  ;;  %v4542_v16 = vsel %vm158_vm0, %v31076_v4, 0 }
 0x157   : > { %35698 = vmatmul.mubr.f32.gmra.mrb[2].mxu0 %v19734_v0  ;;  %35704 = vmatprep.subr.mxu0 %v19759_v56  ;;  %v41226_v63 = vand.u32 4294901760, %v4542_v16 }
 0x158   : > { %33922 = vmatmul.mubr.f32.gmra.mrb[2].mxu1 %v41011_v29  ;;  %35706 = vmatprep.mubr.f32.mxu0 %v41052_v6  ;;  %v4655_v29 = vand.u32 4294901760, %v41203_v60 }
 0x159   : > { %33929 = vmatpush3.msra.mxu1 %v40970_v54  ;;  %33930 = vmatprep.mubr.f32.mxu1 %v3984_v12  ;;  %v4533_v12 = vsel %vm145_vm1, %v31071_v8, 0  ;;  %v41256_v62 = vsub.f32 %v4542_v16, %v41226_v63 }
 0x15a   : > { %37145 = vmatprep.subr.bf16.mxu1 %v37144_v51  ;;  %35705 = vmatpush3.msra.mxu0 %v19759_v56  ;;  %v41211_v37 = vand.u32 4294901760, %v4533_v12  ;;  %v4614_v56 = vand.u32 4294901760, %v41220_v18 }
 0x15b   : > { %35707 = vmatmul.mubr.f32.vlgmr.msra.gmra.mrb[0].mxu0 %v41067_v7  ;;  %37737 = vmatprep.subr.bf16.mxu0 %v37736_v21  ;;  %v41293_v19 = vand.u32 4294901760, %v41256_v62 }
 0x15c   : > { %33931 = vmatmul.mubr.f32.vlgmr.msra.gmra.mrb[0].mxu1 %v3994_v43  ;;  %35709 = vmatprep.mubr.f32.mxu0 %v41087_v15  ;;  %v41205_v43 = vsub.f32 %v31075_v31, %v4548_v33  ;;  %v31258_v31 = vld [vmem:[%s39391_s24 + $0x22] sm:$0xff]  ;;  %v4615_v49 = vsub.f32 %v41220_v18, %v4614_v56 }
 0x15d   : > { %37147 = vmatpush3.bf16.msra.mxu1 %v37144_v51  ;;  %33933 = vmatprep.mubr.f32.mxu1 %v4004_v57  ;;  %v4539_v57 = vsel %vm145_vm1, %v31073_v26, 0  ;;  %v41245_v51 = vsub.f32 %v4536_v20, %v41222_v52  ;;  %v20246_v45 = vsel %vm145_vm1, %v31258_v31, 0  ;;  %v20264_v26 = vand.u32 4294901760, %v41280_v39 }
 0x15e   : > { %33940 = vmatprep.subr.mxu1 %v41037_v42  ;;  %37739 = vmatpush3.bf16.msra.mxu0 %v37736_v21  ;;  %v41235_v0 = vand.u32 4294901760, %v4539_v57  ;;  %v4656_v21 = vsub.f32 %v41203_v60, %v4655_v29  ;;  %v20249_v20 = vsel %vm145_vm1, %v31259_v32, 0  ;;  %v41308_v16 = vand.u32 4294901760, %v20246_v45 }
 0x15f   : > { %35710 = vmatmul.mubr.f32.gmra.mrb[2].mxu0 %v41101_v5  ;;  %35716 = vmatprep.subr.mxu0 %v41126_v9  ;;  %v4634_v53 = vand.u32 4294901760, %v41245_v51 }
 0x160   : > { %33934 = vmatmul.mubr.f32.gmra.mrb[2].mxu1 %v4014_v35  ;;  %35718 = vmatprep.mubr.f32.mxu0 %v41085_v34  ;;  %v4662_v35 = vand.u32 4294901760, %v41205_v43  ;;  %v4657_v34 = vand.u32 4294901760, %v4656_v21  ;;  %v31261_v21 = vld [vmem:[%s39391_s24 + $0x52] sm:$0xff] }
 0x161   : > { %33941 = vmatpush3.msra.mxu1 %v41037_v42  ;;  %33942 = vmatprep.mubr.f32.mxu1 %v40943_v22  ;;  %v41233_v42 = vsub.f32 %v4533_v12, %v41211_v37 }
 0x162   : > { %37149 = vmatprep.subr.bf16.mxu1 %v40985_v11  ;;  %35717 = vmatpush3.msra.mxu0 %v41126_v9  ;;  %v41241_v9 = vpack.c.bf16 %v4548_v33, %v4545_v38  ;;  %v41267_v38 = vsub.f32 %v4539_v57, %v41235_v0  ;;  %v41272_v33 = vld [vmem:[%s45635_s1 + $0x300] sm:$0xff]  ;;  %v31264_v57 = vld [vmem:[%s45635_s1 + $0x310] sm:$0x7f] }
 0x163   : > { %35719 = vmatmul.mubr.f32.vlgmr.msra.gmra.mrb[0].mxu0 %v41093_v47  ;;  %37741 = vmatprep.subr.bf16.mxu0 %v41111_v41  ;;  %v4624_v8 = vand.u32 4294901760, %v41233_v42  ;;  %v4616_v47 = vand.u32 4294901760, %v4615_v49  ;;  %v41341_v49 = vsub.f32 %v20246_v45, %v41308_v16 }
 0x164   : > { %33943 = vmatmul.mubr.f32.vlgmr.msra.gmra.mrb[0].mxu1 %v40955_v59  ;;  %35721 = vmatprep.mubr.f32.mxu0 %v41106_v17  ;;  %v4644_v12 = vand.u32 4294901760, %v41267_v38 }
 0x165   : > { %37151 = vmatpush3.bf16.msra.mxu1 %v40985_v11  ;;  %33945 = vmatprep.mubr.f32.mxu1 %v40966_v46  ;;  %v4663_v11 = vsub.f32 %v41205_v43, %v4662_v35  ;;  %v4625_v4 = vsub.f32 %v41233_v42, %v4624_v8 }
 0x166   : > { %33952 = vmatprep.subr.mxu1 %v40970_v54  ;;  %37743 = vmatpush3.bf16.msra.mxu0 %v41111_v41  ;;  %v4645_v32 = vsub.f32 %v41267_v38, %v4644_v12 }
 0x167   : > { %35722 = vmatmul.mubr.f32.gmra.mrb[2].mxu0 %v41123_v36  ;;  %35728 = vmatprep.subr.mxu0 %v41098_v30  ;;  %v4626_v31 = vand.u32 4294901760, %v4625_v4 }
 0x168   : > { %33946 = vmatmul.mubr.f32.gmra.mrb[2].mxu1 %v40979_v40  ;;  %35730 = vmatprep.mubr.f32.mxu0 %v19702_v50  ;;  %v4664_v50 = vand.u32 4294901760, %v4663_v11 }
 0x169   : > { %33953 = vmatpush3.msra.mxu1 %v40970_v54  ;;  %33954 = vmatprep.mubr.f32.mxu1 %v40943_v22  ;;  %v20261_v54 = vand.u32 4294901760, %v41272_v33  ;;  %v31260_v22 = vld [vmem:[%s39391_s24 + $0x42] sm:$0xff] }
 0x16a   : > { %37153 = vmatprep.subr.bf16.mxu1 %v41241_v9  ;;  %35729 = vmatpush3.msra.mxu0 %v41098_v30  ;;  %v37156_v17 = vpack.c.bf16 %v4664_v50, %v4657_v34 }
 0x16b   : > { %35731 = vmatmul.mubr.f32.vlgmr.msra.gmra.mrb[0].mxu0 %v19712_v1  ;;  %37745 = vmatprep.subr.bf16.mxu0 %v37744_v10  ;;  %v4635_v1 = vsub.f32 %v41245_v51, %v4634_v53  ;;  %v41326_v11 = vsub.f32 %v41272_v33, %v20261_v54  ;;  %v20258_v33 = vsel %vm158_vm0, %v31264_v57, 0  ;;  %v41367_v57 = vpack.c.bf16 %v20264_v26, %v20261_v54 }
 0x16c   : > { %33955 = vmatmul.mubr.f32.vlgmr.msra.gmra.mrb[0].mxu1 %v40955_v59  ;;  %35733 = vmatprep.mubr.f32.mxu0 %v19722_v2  ;;  %v20252_v59 = vsel %vm145_vm1, %v31260_v22, 0  ;;  %v4670_v2 = vsub.f32 %v41256_v62, %v41293_v19  ;;  %v41354_v45 = vand.u32 4294901760, %v20258_v33 }
 0x16d   : > { %37155 = vmatpush3.bf16.msra.mxu1 %v41241_v9  ;;  %33957 = vmatprep.mubr.f32.mxu1 %v40966_v46  ;;  %v41323_v46 = vand.u32 4294901760, %v20249_v20  ;;  %v41343_v36 = vand.u32 4294901760, %v20252_v59  ;;  %v4636_v34 = vand.u32 4294901760, %v4635_v1  ;;  %v20371_v50 = vand.u32 4294901760, %v41326_v11 }
 0x16e   : > { %33964 = vmatprep.subr.mxu1 %v41226_v63  ;;  %37747 = vmatpush3.bf16.msra.mxu0 %v37744_v10  ;;  %v41335_v10 = vsub.f32 %v41280_v39, %v20264_v26  ;;  %v4671_v39 = vand.u32 4294901760, %v4670_v2  ;;  %v37160_v1 = vpack.c.bf16 %v41205_v43, %v41203_v60  ;;  %v31079_v60 = vld [vmem:[%s39391_s24 + $0x220] sm:$0xff] }
 0x16f   : > { %35734 = vmatmul.mubr.f32.gmra.mrb[2].mxu0 %v19732_v23  ;;  %35740 = vmatprep.subr.mxu0 %v41142_v55  ;;  %v20255_v23 = vsel %vm145_vm1, %v31261_v21, 0  ;;  %v20372_v2 = vsub.f32 %v41326_v11, %v20371_v50 }
 0x170   : > { %33958 = vmatmul.mubr.f32.gmra.mrb[2].mxu1 %v40979_v40  ;;  %35742 = vmatprep.mubr.f32.mxu0 %v41052_v6  ;;  %v41349_v40 = vsub.f32 %v20249_v20, %v41323_v46  ;;  %v20378_v22 = vand.u32 4294901760, %v41335_v10  ;;  %v41357_v4 = vand.u32 4294901760, %v20255_v23  ;;  %v41362_v20 = vsub.f32 %v20252_v59, %v41343_v36 }
 0x171   : > { %33965 = vmatpush3.msra.mxu1 %v41226_v63  ;;  %33966 = vmatprep.mubr.f32.mxu1 %v4616_v47  ;;  %v4646_v47 = vand.u32 4294901760, %v4645_v32 }
 0x172   : > { %37157 = vmatprep.subr.bf16.mxu1 %v37156_v17  ;;  %35741 = vmatpush3.msra.mxu0 %v41142_v55  ;;  %v20330_v55 = vand.u32 4294901760, %v41341_v49  ;;  %v20340_v21 = vand.u32 4294901760, %v41349_v40  ;;  %v20379_v59 = vsub.f32 %v41335_v10, %v20378_v22  ;;  %v20350_v26 = vand.u32 4294901760, %v41362_v20 }
 0x173   : > { %35743 = vmatmul.mubr.f32.vlgmr.msra.gmra.mrb[0].mxu0 %v41067_v7  ;;  %37749 = vmatprep.subr.bf16.mxu0 %v41111_v41 }
 0x174   : > { %33967 = vmatmul.mubr.f32.vlgmr.msra.gmra.mrb[0].mxu1 %v4626_v31  ;;  %35745 = vmatprep.mubr.f32.mxu0 %v41087_v15  ;;  %v20331_v54 = vsub.f32 %v41341_v49, %v20330_v55  ;;  %v20341_v31 = vsub.f32 %v41349_v40, %v20340_v21  ;;  %v20380_v32 = vand.u32 4294901760, %v20379_v59  ;;  %v37760_v59 = vpack.c.bf16 %v41335_v10, %v41326_v11  ;;  %v41536_v11 = vld [vmem:[%s45635_s1 + $0x320] sm:$0xff] }
 0x175   : > { %37159 = vmatpush3.bf16.msra.mxu1 %v37156_v17  ;;  %33969 = vmatprep.mubr.f32.mxu1 %v4636_v34  ;;  %v41379_v17 = vsub.f32 %v20255_v23, %v41357_v4  ;;  %v20351_v34 = vsub.f32 %v41362_v20, %v20350_v26  ;;  %v31266_v10 = vld [vmem:[%s39391_s24 + $0xe2] sm:$0xff] }
 0x176   : > { %33976 = vmatprep.subr.mxu1 %v4671_v39  ;;  %37751 = vmatpush3.bf16.msra.mxu0 %v41111_v41  ;;  %v41382_v41 = vsub.f32 %v20258_v33, %v41354_v45 }
 0x177   : > { %35746 = vmatmul.mubr.f32.gmra.mrb[2].mxu0 %v41101_v5  ;;  %35752 = vmatprep.subr.mxu0 %v41098_v30  ;;  %v20360_v33 = vand.u32 4294901760, %v41379_v17 }
 0x178   : > { %33970 = vmatmul.mubr.f32.gmra.mrb[2].mxu1 %v4646_v47  ;;  %35754 = vmatprep.mubr.f32.mxu0 %v41052_v6  ;;  %v20373_v6 = vand.u32 4294901760, %v20372_v2  ;;  %v41398_v23 = vand.u32 4294901760, %v41382_v41 }
 0x179   : > { %33977 = vmatpush3.msra.mxu1 %v4671_v39  ;;  %33978 = vmatprep.mubr.f32.mxu1 %v41199_v44 }
 0x17a   : > { %37161 = vmatprep.subr.bf16.mxu1 %v37160_v1  ;;  %35753 = vmatpush3.msra.mxu0 %v41098_v30  ;;  %v20332_v30 = vand.u32 4294901760, %v20331_v54  ;;  %v37756_v39 = vpack.c.bf16 %v20380_v32, %v20373_v6  ;;  %v20386_v47 = vsub.f32 %v41382_v41, %v41398_v23  ;;  %v31082_v54 = vld [vmem:[%s45635_s1 + $0xc0] sm:$0xff]  ;;  %v31078_v6 = vld [vmem:[%s39391_s24 + $0x210] sm:$0xff] }
 0x17b   : > { %35755 = vmatmul.mubr.f32.vlgmr.msra.gmra.mrb[0].mxu0 %v41067_v7  ;;  %37753 = vmatprep.subr.bf16.mxu0 %v41367_v57  ;;  %v20342_v7 = vand.u32 4294901760, %v20341_v31  ;;  %v31083_v31 = vld [vmem:[%s45635_s1 + $0xc8] sm:$0xff]  ;;  %v5175_v43 = vand.u32 4294901760, %v31082_v54  ;;  %v31080_v32 = vld [vmem:[%s39391_s24 + $0x230] sm:$0xff] }
 0x17c   : > { %33979 = vmatmul.mubr.f32.vlgmr.msra.gmra.mrb[0].mxu1 %v41211_v37  ;;  %35757 = vmatprep.mubr.f32.mxu0 %v41087_v15  ;;  %v20361_v15 = vsub.f32 %v41379_v17, %v20360_v33  ;;  %v20387_v2 = vand.u32 4294901760, %v20386_v47 }
 0x17d   : > { %37163 = vmatpush3.bf16.msra.mxu1 %v37160_v1  ;;  %33981 = vmatprep.mubr.f32.mxu1 %v41222_v52  ;;  %v20352_v1 = vand.u32 4294901760, %v20351_v34  ;;  %v31081_v34 = vld [vmem:[%s39391_s24 + $0x240] sm:$0xff] }
 0x17e   : > { %33988 = vmatprep.subr.mxu1 %v41256_v62  ;;  %37755 = vmatpush3.bf16.msra.mxu0 %v41367_v57 }
 0x17f   : > { %35758 = vmatmul.mubr.f32.gmra.mrb[2].mxu0 %v41101_v5  ;;  %35764 = vmatprep.subr.mxu0 %v41354_v45  ;;  %v20362_v5 = vand.u32 4294901760, %v20361_v15 }
 0x180   : > { %33982 = vmatmul.mubr.f32.gmra.mrb[2].mxu1 %v41235_v0  ;;  %35766 = vmatprep.mubr.f32.mxu0 %v20332_v30 }
 0x181   : > { %33989 = vmatpush3.msra.mxu1 %v41256_v62  ;;  %33990 = vmatprep.mubr.f32.mxu1 %v41220_v18  ;;  %v37168_v62 = vpack.c.bf16 %v4662_v35, %v4655_v29  ;;  %v5178_v29 = vand.u32 4294901760, %v31083_v31  ;;  %v5160_v35 = vsel %vm145_vm1, %v31078_v6, 0  ;;  %v31084_v18 = vld [vmem:[%s45635_s1 + $0xd0] sm:$0x7f]  ;;  %v37768_v6 = vpack.c.bf16 %v20378_v22, %v20371_v50 }
 0x182   : > { %37165 = vmatprep.subr.bf16.mxu1 %v41241_v9  ;;  %35765 = vmatpush3.msra.mxu0 %v41354_v45  ;;  %v41455_v30 = vand.u32 4294901760, %v5160_v35 }
 0x183   : > { %35767 = vmatmul.mubr.f32.vlgmr.msra.gmra.mrb[0].mxu0 %v20342_v7  ;;  %37757 = vmatprep.subr.bf16.mxu0 %v37756_v39  ;;  %v5166_v7 = vsel %vm145_vm1, %v31080_v32, 0 }
 0x184   : > { %33991 = vmatmul.mubr.f32.vlgmr.msra.gmra.mrb[0].mxu1 %v41233_v42  ;;  %35769 = vmatprep.mubr.f32.mxu0 %v20352_v1  ;;  %v41459_v42 = vsub.f32 %v31082_v54, %v5175_v43  ;;  %v41476_v15 = vsub.f32 %v5160_v35, %v41455_v30  ;;  %v41478_v47 = vand.u32 4294901760, %v5166_v7 }
 0x185   : > { %37167 = vmatpush3.bf16.msra.mxu1 %v41241_v9  ;;  %33993 = vmatprep.mubr.f32.mxu1 %v41245_v51 }
 0x186   : > { %34000 = vmatprep.subr.mxu1 %v41226_v63  ;;  %37759 = vmatpush3.bf16.msra.mxu0 %v37756_v39  ;;  %v5172_v39 = vsel %vm158_vm0, %v31084_v18, 0 }
 0x187   : > { %35770 = vmatmul.mubr.f32.gmra.mrb[2].mxu0 %v20362_v5  ;;  %35776 = vmatprep.subr.mxu0 %v20387_v2  ;;  %v41482_v1 = vand.u32 4294901760, %v5172_v39 }
 0x188   : > { %33994 = vmatmul.mubr.f32.gmra.mrb[2].mxu1 %v41267_v38  ;;  %35778 = vmatprep.mubr.f32.mxu0 %v41308_v16  ;;  %v5285_v38 = vand.u32 4294901760, %v41459_v42 }
 0x189   : > { %34001 = vmatpush3.msra.mxu1 %v41226_v63  ;;  %34002 = vmatprep.mubr.f32.mxu1 %v4614_v56  ;;  %v5163_v56 = vsel %vm145_vm1, %v31079_v60, 0  ;;  %v41512_v54 = vsub.f32 %v5172_v39, %v41482_v1 }
 0x18a   : > { %37169 = vmatprep.subr.bf16.mxu1 %v37168_v62  ;;  %35777 = vmatpush3.msra.mxu0 %v20387_v2  ;;  %v41467_v51 = vand.u32 4294901760, %v5163_v56  ;;  %v5244_v2 = vand.u32 4294901760, %v41476_v15 }
 0x18b   : > { %35779 = vmatmul.mubr.f32.vlgmr.msra.gmra.mrb[0].mxu0 %v41323_v46  ;;  %37761 = vmatprep.subr.bf16.mxu0 %v37760_v59  ;;  %v41549_v32 = vand.u32 4294901760, %v41512_v54 }
 0x18c   : > { %34003 = vmatmul.mubr.f32.vlgmr.msra.gmra.mrb[0].mxu1 %v4624_v8  ;;  %35781 = vmatprep.mubr.f32.mxu0 %v41343_v36  ;;  %v41461_v8 = vsub.f32 %v31083_v31, %v5178_v29  ;;  %v31265_v31 = vld [vmem:[%s39391_s24 + $0xd2] sm:$0xff]  ;;  %v5245_v50 = vsub.f32 %v41476_v15, %v5244_v2 }
 0x18d   : > { %37171 = vmatpush3.bf16.msra.mxu1 %v37168_v62  ;;  %34005 = vmatprep.mubr.f32.mxu1 %v4634_v53  ;;  %v5169_v53 = vsel %vm145_vm1, %v31081_v34, 0  ;;  %v41501_v62 = vsub.f32 %v5166_v7, %v41478_v47  ;;  %v20874_v35 = vsel %vm145_vm1, %v31265_v31, 0  ;;  %v20892_v34 = vand.u32 4294901760, %v41536_v11 }
 0x18e   : > { %34012 = vmatprep.subr.mxu1 %v41293_v19  ;;  %37763 = vmatpush3.bf16.msra.mxu0 %v37760_v59  ;;  %v41491_v5 = vand.u32 4294901760, %v5169_v53  ;;  %v5286_v59 = vsub.f32 %v41459_v42, %v5285_v38  ;;  %v20877_v7 = vsel %vm145_vm1, %v31266_v10, 0  ;;  %v41564_v39 = vand.u32 4294901760, %v20874_v35 }
 0x18f   : > { %35782 = vmatmul.mubr.f32.gmra.mrb[2].mxu0 %v41357_v4  ;;  %35788 = vmatprep.subr.mxu0 %v41382_v41  ;;  %v5264_v22 = vand.u32 4294901760, %v41501_v62 }
 0x190   : > { %34006 = vmatmul.mubr.f32.gmra.mrb[2].mxu1 %v4644_v12  ;;  %35790 = vmatprep.mubr.f32.mxu0 %v41341_v49  ;;  %v5292_v12 = vand.u32 4294901760, %v41461_v8  ;;  %v5287_v49 = vand.u32 4294901760, %v5286_v59  ;;  %v31268_v59 = vld [vmem:[%s39391_s24 + $0x102] sm:$0xff] }
 0x191   : > { %34013 = vmatpush3.msra.mxu1 %v41293_v19  ;;  %34014 = vmatprep.mubr.f32.mxu1 %v41199_v44  ;;  %v41489_v19 = vsub.f32 %v5163_v56, %v41467_v51 }
 0x192   : > { %37173 = vmatprep.subr.bf16.mxu1 %v41241_v9  ;;  %35789 = vmatpush3.msra.mxu0 %v41382_v41  ;;  %v41497_v41 = vpack.c.bf16 %v5178_v29, %v5175_v43  ;;  %v41523_v43 = vsub.f32 %v5169_v53, %v41491_v5  ;;  %v41528_v29 = vld [vmem:[%s45635_s1 + $0x318] sm:$0xff]  ;;  %v31271_v53 = vld [vmem:[%s45635_s1 + $0x328] sm:$0x7f] }
 0x193   : > { %35791 = vmatmul.mubr.f32.vlgmr.msra.gmra.mrb[0].mxu0 %v41349_v40  ;;  %37765 = vmatprep.subr.bf16.mxu0 %v41367_v57  ;;  %v5254_v60 = vand.u32 4294901760, %v41489_v19  ;;  %v5246_v40 = vand.u32 4294901760, %v5245_v50  ;;  %v41597_v50 = vsub.f32 %v20874_v35, %v41564_v39 }
 0x194   : > { %34015 = vmatmul.mubr.f32.vlgmr.msra.gmra.mrb[0].mxu1 %v41211_v37  ;;  %35793 = vmatprep.mubr.f32.mxu0 %v41362_v20  ;;  %v5274_v56 = vand.u32 4294901760, %v41523_v43 }
 0x195   : > { %37175 = vmatpush3.bf16.msra.mxu1 %v41241_v9  ;;  %34017 = vmatprep.mubr.f32.mxu1 %v41222_v52  ;;  %v5293_v9 = vsub.f32 %v41461_v8, %v5292_v12  ;;  %v5255_v18 = vsub.f32 %v41489_v19, %v5254_v60 }
 0x196   : > { %34024 = vmatprep.subr.mxu1 %v41226_v63  ;;  %37767 = vmatpush3.bf16.msra.mxu0 %v41367_v57  ;;  %v5275_v10 = vsub.f32 %v41523_v43, %v5274_v56 }
 0x197   : > { %35794 = vmatmul.mubr.f32.gmra.mrb[2].mxu0 %v41379_v17  ;;  %35800 = vmatprep.subr.mxu0 %v41354_v45  ;;  %v5256_v31 = vand.u32 4294901760, %v5255_v18 }
 0x198   : > { %34018 = vmatmul.mubr.f32.gmra.mrb[2].mxu1 %v41235_v0  ;;  %35802 = vmatprep.mubr.f32.mxu0 %v20330_v55  ;;  %v5294_v55 = vand.u32 4294901760, %v5293_v9 }
 0x199   : > { %34025 = vmatpush3.msra.mxu1 %v41226_v63  ;;  %34026 = vmatprep.mubr.f32.mxu1 %v41199_v44  ;;  %v20889_v63 = vand.u32 4294901760, %v41528_v29  ;;  %v31267_v44 = vld [vmem:[%s39391_s24 + $0xf2] sm:$0xff] }
 0x19a   : > { %37177 = vmatprep.subr.bf16.mxu1 %v41497_v41  ;;  %35801 = vmatpush3.msra.mxu0 %v41354_v45  ;;  %v37180_v20 = vpack.c.bf16 %v5294_v55, %v5287_v49 }
 0x19b   : > { %35803 = vmatmul.mubr.f32.vlgmr.msra.gmra.mrb[0].mxu0 %v20340_v21  ;;  %37769 = vmatprep.subr.bf16.mxu0 %v37768_v6  ;;  %v5265_v21 = vsub.f32 %v41501_v62, %v5264_v22  ;;  %v41582_v9 = vsub.f32 %v41528_v29, %v20889_v63  ;;  %v20886_v29 = vsel %vm158_vm0, %v31271_v53, 0  ;;  %v41623_v53 = vpack.c.bf16 %v20892_v34, %v20889_v63 }
 0x19c   : > { %34027 = vmatmul.mubr.f32.vlgmr.msra.gmra.mrb[0].mxu1 %v41211_v37  ;;  %35805 = vmatprep.mubr.f32.mxu0 %v20350_v26  ;;  %v20880_v37 = vsel %vm145_vm1, %v31267_v44, 0  ;;  %v5300_v26 = vsub.f32 %v41512_v54, %v41549_v32  ;;  %v41610_v35 = vand.u32 4294901760, %v20886_v29 }
 0x19d   : > { %37179 = vmatpush3.bf16.msra.mxu1 %v41497_v41  ;;  %34029 = vmatprep.mubr.f32.mxu1 %v41222_v52  ;;  %v41579_v52 = vand.u32 4294901760, %v20877_v7  ;;  %v41599_v17 = vand.u32 4294901760, %v20880_v37  ;;  %v5266_v49 = vand.u32 4294901760, %v5265_v21  ;;  %v20999_v55 = vand.u32 4294901760, %v41582_v9 }
 0x19e   : > { %34036 = vmatprep.subr.mxu1 %v41482_v1  ;;  %37771 = vmatpush3.bf16.msra.mxu0 %v37768_v6  ;;  %v41591_v6 = vsub.f32 %v41536_v11, %v20892_v34  ;;  %v5301_v11 = vand.u32 4294901760, %v5300_v26  ;;  %v37184_v21 = vpack.c.bf16 %v41461_v8, %v41459_v42  ;;  %v31086_v42 = vld [vmem:[%s39391_s24 + $0x171] sm:$0xff] }
 0x19f   : > { %35806 = vmatmul.mubr.f32.gmra.mrb[2].mxu0 %v20360_v33  ;;  %35812 = vmatprep.subr.mxu0 %v41398_v23  ;;  %v20883_v33 = vsel %vm145_vm1, %v31268_v59, 0  ;;  %v21000_v26 = vsub.f32 %v41582_v9, %v20999_v55 }
 0x1a0   : > { %34030 = vmatmul.mubr.f32.gmra.mrb[2].mxu1 %v41235_v0  ;;  %35814 = vmatprep.mubr.f32.mxu0 %v41308_v16  ;;  %v41605_v0 = vsub.f32 %v20877_v7, %v41579_v52  ;;  %v21006_v44 = vand.u32 4294901760, %v41591_v6  ;;  %v41613_v18 = vand.u32 4294901760, %v20883_v33  ;;  %v41618_v7 = vsub.f32 %v20880_v37, %v41599_v17 }
 0x1a1   : > { %34037 = vmatpush3.msra.mxu1 %v41482_v1  ;;  %34038 = vmatprep.mubr.f32.mxu1 %v5246_v40  ;;  %v5276_v40 = vand.u32 4294901760, %v5275_v10 }
 0x1a2   : > { %37181 = vmatprep.subr.bf16.mxu1 %v37180_v20  ;;  %35813 = vmatpush3.msra.mxu0 %v41398_v23  ;;  %v20958_v23 = vand.u32 4294901760, %v41597_v50  ;;  %v20968_v59 = vand.u32 4294901760, %v41605_v0  ;;  %v21007_v37 = vsub.f32 %v41591_v6, %v21006_v44  ;;  %v20978_v34 = vand.u32 4294901760, %v41618_v7 }
 0x1a3   : > { %35815 = vmatmul.mubr.f32.vlgmr.msra.gmra.mrb[0].mxu0 %v41323_v46  ;;  %37773 = vmatprep.subr.bf16.mxu0 %v41367_v57 }
 0x1a4   : > { %34039 = vmatmul.mubr.f32.vlgmr.msra.gmra.mrb[0].mxu1 %v5256_v31  ;;  %35817 = vmatprep.mubr.f32.mxu0 %v41343_v36  ;;  %v20959_v63 = vsub.f32 %v41597_v50, %v20958_v23  ;;  %v20969_v31 = vsub.f32 %v41605_v0, %v20968_v59  ;;  %v21008_v10 = vand.u32 4294901760, %v21007_v37  ;;  %v37784_v37 = vpack.c.bf16 %v41591_v6, %v41582_v9  ;;  %v41792_v9 = vld [vmem:[%s45635_s1 + $0x338] sm:$0xff] }
 0x1a5   : > { %37183 = vmatpush3.bf16.msra.mxu1 %v37180_v20  ;;  %34041 = vmatprep.mubr.f32.mxu1 %v5266_v49  ;;  %v41635_v20 = vsub.f32 %v20883_v33, %v41613_v18  ;;  %v20979_v49 = vsub.f32 %v41618_v7, %v20978_v34  ;;  %v31273_v6 = vld [vmem:[%s39391_s24 + $0x33] sm:$0xff] }
 0x1a6   : > { %34048 = vmatprep.subr.mxu1 %v5301_v11  ;;  %37775 = vmatpush3.bf16.msra.mxu0 %v41367_v57  ;;  %v41638_v57 = vsub.f32 %v20886_v29, %v41610_v35 }
 0x1a7   : > { %35818 = vmatmul.mubr.f32.gmra.mrb[2].mxu0 %v41357_v4  ;;  %35824 = vmatprep.subr.mxu0 %v41354_v45  ;;  %v20988_v29 = vand.u32 4294901760, %v41635_v20 }
 0x1a8   : > { %34042 = vmatmul.mubr.f32.gmra.mrb[2].mxu1 %v5276_v40  ;;  %35826 = vmatprep.mubr.f32.mxu0 %v41308_v16  ;;  %v21001_v16 = vand.u32 4294901760, %v21000_v26  ;;  %v41654_v33 = vand.u32 4294901760, %v41638_v57 }
 0x1a9   : > { %34049 = vmatpush3.msra.mxu1 %v5301_v11  ;;  %34050 = vmatprep.mubr.f32.mxu1 %v41455_v30 }
 0x1aa   : > { %37185 = vmatprep.subr.bf16.mxu1 %v37184_v21  ;;  %35825 = vmatpush3.msra.mxu0 %v41354_v45  ;;  %v20960_v45 = vand.u32 4294901760, %v20959_v63  ;;  %v37780_v11 = vpack.c.bf16 %v21008_v10, %v21001_v16  ;;  %v21014_v40 = vsub.f32 %v41638_v57, %v41654_v33  ;;  %v31089_v63 = vld [vmem:[%s45635_s1 + $0xd8] sm:$0xff]  ;;  %v31085_v16 = vld [vmem:[%s39391_s24 + $0x161] sm:$0xff] }
 0x1ab   : > { %35827 = vmatmul.mubr.f32.vlgmr.msra.gmra.mrb[0].mxu0 %v41323_v46  ;;  %37777 = vmatprep.subr.bf16.mxu0 %v41623_v53  ;;  %v20970_v46 = vand.u32 4294901760, %v20969_v31  ;;  %v31090_v31 = vld [vmem:[%s45635_s1 + $0xe0] sm:$0xff]  ;;  %v5803_v8 = vand.u32 4294901760, %v31089_v63 }
 0x1ac   : > { %34051 = vmatmul.mubr.f32.vlgmr.msra.gmra.mrb[0].mxu1 %v41467_v51  ;;  %35829 = vmatprep.mubr.f32.mxu0 %v41343_v36  ;;  %v20989_v36 = vsub.f32 %v41635_v20, %v20988_v29  ;;  %v21015_v26 = vand.u32 4294901760, %v21014_v40  ;;  %v31087_v10 = vld [vmem:[%s39391_s24 + $0x181] sm:$0xff] }
 0x1ad   : > { %37187 = vmatpush3.bf16.msra.mxu1 %v37184_v21  ;;  %34053 = vmatprep.mubr.f32.mxu1 %v41478_v47  ;;  %v20980_v21 = vand.u32 4294901760, %v20979_v49  ;;  %v31088_v49 = vld [vmem:[%s39391_s24 + $0x191] sm:$0xff] }
 0x1ae   : > { %34060 = vmatprep.subr.mxu1 %v41512_v54  ;;  %37779 = vmatpush3.bf16.msra.mxu0 %v41623_v53 }
 0x1af   : > { %35830 = vmatmul.mubr.f32.gmra.mrb[2].mxu0 %v41357_v4  ;;  %35836 = vmatprep.subr.mxu0 %v41610_v35  ;;  %v20990_v4 = vand.u32 4294901760, %v20989_v36 }
 0x1b0   : > { %34054 = vmatmul.mubr.f32.gmra.mrb[2].mxu1 %v41491_v5  ;;  %35838 = vmatprep.mubr.f32.mxu0 %v20960_v45 }
 0x1b1   : > { %34061 = vmatpush3.msra.mxu1 %v41512_v54  ;;  %34062 = vmatprep.mubr.f32.mxu1 %v41476_v15  ;;  %v37192_v54 = vpack.c.bf16 %v5292_v12, %v5285_v38  ;;  %v5806_v38 = vand.u32 4294901760, %v31090_v31  ;;  %v5788_v12 = vsel %vm145_vm1, %v31085_v16, 0  ;;  %v31091_v15 = vld [vmem:[%s45635_s1 + $0xe8] sm:$0x7f]  ;;  %v37792_v16 = vpack.c.bf16 %v21006_v44, %v20999_v55 }
 0x1b2   : > { %37189 = vmatprep.subr.bf16.mxu1 %v41497_v41  ;;  %35837 = vmatpush3.msra.mxu0 %v41610_v35  ;;  %v41711_v45 = vand.u32 4294901760, %v5788_v12 }
 0x1b3   : > { %35839 = vmatmul.mubr.f32.vlgmr.msra.gmra.mrb[0].mxu0 %v20970_v46  ;;  %37781 = vmatprep.subr.bf16.mxu0 %v37780_v11  ;;  %v5794_v46 = vsel %vm145_vm1, %v31087_v10, 0 }
 0x1b4   : > { %34063 = vmatmul.mubr.f32.vlgmr.msra.gmra.mrb[0].mxu1 %v41489_v19  ;;  %35841 = vmatprep.mubr.f32.mxu0 %v20980_v21  ;;  %v41715_v19 = vsub.f32 %v31089_v63, %v5803_v8  ;;  %v41732_v36 = vsub.f32 %v5788_v12, %v41711_v45  ;;  %v41734_v40 = vand.u32 4294901760, %v5794_v46 }
 0x1b5   : > { %37191 = vmatpush3.bf16.msra.mxu1 %v41497_v41  ;;  %34065 = vmatprep.mubr.f32.mxu1 %v41501_v62 }
 0x1b6   : > { %34072 = vmatprep.subr.mxu1 %v41482_v1  ;;  %37783 = vmatpush3.bf16.msra.mxu0 %v37780_v11  ;;  %v5800_v11 = vsel %vm158_vm0, %v31091_v15, 0 }
 0x1b7   : > { %35842 = vmatmul.mubr.f32.gmra.mrb[2].mxu0 %v20990_v4  ;;  %35848 = vmatprep.subr.mxu0 %v21015_v26  ;;  %v41738_v21 = vand.u32 4294901760, %v5800_v11 }
 0x1b8   : > { %34066 = vmatmul.mubr.f32.gmra.mrb[2].mxu1 %v41523_v43  ;;  %35850 = vmatprep.mubr.f32.mxu0 %v41564_v39  ;;  %v5913_v43 = vand.u32 4294901760, %v41715_v19 }
 0x1b9   : > { %34073 = vmatpush3.msra.mxu1 %v41482_v1  ;;  %34074 = vmatprep.mubr.f32.mxu1 %v5244_v2  ;;  %v5791_v2 = vsel %vm145_vm1, %v31086_v42, 0  ;;  %v41768_v63 = vsub.f32 %v5800_v11, %v41738_v21 }
 0x1ba   : > { %37193 = vmatprep.subr.bf16.mxu1 %v37192_v54  ;;  %35849 = vmatpush3.msra.mxu0 %v21015_v26  ;;  %v41723_v62 = vand.u32 4294901760, %v5791_v2  ;;  %v5872_v26 = vand.u32 4294901760, %v41732_v36 }
 0x1bb   : > { %35851 = vmatmul.mubr.f32.vlgmr.msra.gmra.mrb[0].mxu0 %v41579_v52  ;;  %37785 = vmatprep.subr.bf16.mxu0 %v37784_v37  ;;  %v41805_v10 = vand.u32 4294901760, %v41768_v63 }
 0x1bc   : > { %34075 = vmatmul.mubr.f32.vlgmr.msra.gmra.mrb[0].mxu1 %v5254_v60  ;;  %35853 = vmatprep.mubr.f32.mxu0 %v41599_v17  ;;  %v41717_v60 = vsub.f32 %v31090_v31, %v5806_v38  ;;  %v31272_v31 = vld [vmem:[%s39391_s24 + $0x23] sm:$0xff]  ;;  %v5873_v55 = vsub.f32 %v41732_v36, %v5872_v26 }
 0x1bd   : > { %37195 = vmatpush3.bf16.msra.mxu1 %v37192_v54  ;;  %34077 = vmatprep.mubr.f32.mxu1 %v5264_v22  ;;  %v5797_v22 = vsel %vm145_vm1, %v31088_v49, 0  ;;  %v41757_v54 = vsub.f32 %v5794_v46, %v41734_v40  ;;  %v21502_v12 = vsel %vm145_vm1, %v31272_v31, 0  ;;  %v21520_v49 = vand.u32 4294901760, %v41792_v9 }
 0x1be   : > { %34084 = vmatprep.subr.mxu1 %v41549_v32  ;;  %37787 = vmatpush3.bf16.msra.mxu0 %v37784_v37  ;;  %v41747_v4 = vand.u32 4294901760, %v5797_v22  ;;  %v5914_v37 = vsub.f32 %v41715_v19, %v5913_v43  ;;  %v21505_v46 = vsel %vm145_vm1, %v31273_v6, 0  ;;  %v41820_v11 = vand.u32 4294901760, %v21502_v12 }
 0x1bf   : > { %35854 = vmatmul.mubr.f32.gmra.mrb[2].mxu0 %v41613_v18  ;;  %35860 = vmatprep.subr.mxu0 %v41638_v57  ;;  %v5892_v44 = vand.u32 4294901760, %v41757_v54 }
 0x1c0   : > { %34078 = vmatmul.mubr.f32.gmra.mrb[2].mxu1 %v5274_v56  ;;  %35862 = vmatprep.mubr.f32.mxu0 %v41597_v50  ;;  %v5920_v56 = vand.u32 4294901760, %v41717_v60  ;;  %v5915_v50 = vand.u32 4294901760, %v5914_v37  ;;  %v31275_v37 = vld [vmem:[%s39391_s24 + $0x53] sm:$0xff] }
 0x1c1   : > { %34085 = vmatpush3.msra.mxu1 %v41549_v32  ;;  %34086 = vmatprep.mubr.f32.mxu1 %v41455_v30  ;;  %v41745_v32 = vsub.f32 %v5791_v2, %v41723_v62 }
 0x1c2   : > { %37197 = vmatprep.subr.bf16.mxu1 %v41497_v41  ;;  %35861 = vmatpush3.msra.mxu0 %v41638_v57  ;;  %v41753_v57 = vpack.c.bf16 %v5806_v38, %v5803_v8  ;;  %v41779_v8 = vsub.f32 %v5797_v22, %v41747_v4  ;;  %v41784_v38 = vld [vmem:[%s45635_s1 + $0x330] sm:$0xff]  ;;  %v31278_v22 = vld [vmem:[%s45635_s1 + $0x340] sm:$0x7f] }
 0x1c3   : > { %35863 = vmatmul.mubr.f32.vlgmr.msra.gmra.mrb[0].mxu0 %v41605_v0  ;;  %37789 = vmatprep.subr.bf16.mxu0 %v41623_v53  ;;  %v5882_v42 = vand.u32 4294901760, %v41745_v32  ;;  %v5874_v0 = vand.u32 4294901760, %v5873_v55  ;;  %v41853_v55 = vsub.f32 %v21502_v12, %v41820_v11 }
 0x1c4   : > { %34087 = vmatmul.mubr.f32.vlgmr.msra.gmra.mrb[0].mxu1 %v41467_v51  ;;  %35865 = vmatprep.mubr.f32.mxu0 %v41618_v7  ;;  %v5902_v2 = vand.u32 4294901760, %v41779_v8 }
 0x1c5   : > { %37199 = vmatpush3.bf16.msra.mxu1 %v41497_v41  ;;  %34089 = vmatprep.mubr.f32.mxu1 %v41478_v47  ;;  %v5921_v41 = vsub.f32 %v41717_v60, %v5920_v56  ;;  %v5883_v15 = vsub.f32 %v41745_v32, %v5882_v42 }
 0x1c6   : > { %34096 = vmatprep.subr.mxu1 %v41482_v1  ;;  %37791 = vmatpush3.bf16.msra.mxu0 %v41623_v53  ;;  %v5903_v6 = vsub.f32 %v41779_v8, %v5902_v2 }
 0x1c7   : > { %35866 = vmatmul.mubr.f32.gmra.mrb[2].mxu0 %v41635_v20  ;;  %35872 = vmatprep.subr.mxu0 %v41610_v35  ;;  %v5884_v31 = vand.u32 4294901760, %v5883_v15 }
 0x1c8   : > { %34090 = vmatmul.mubr.f32.gmra.mrb[2].mxu1 %v41491_v5  ;;  %35874 = vmatprep.mubr.f32.mxu0 %v20958_v23  ;;  %v5922_v23 = vand.u32 4294901760, %v5921_v41 }
 0x1c9   : > { %34097 = vmatpush3.msra.mxu1 %v41482_v1  ;;  %34098 = vmatprep.mubr.f32.mxu1 %v41455_v30  ;;  %v21517_v1 = vand.u32 4294901760, %v41784_v38  ;;  %v31274_v30 = vld [vmem:[%s39391_s24 + $0x43] sm:$0xff] }
 0x1ca   : > { %37201 = vmatprep.subr.bf16.mxu1 %v41753_v57  ;;  %35873 = vmatpush3.msra.mxu0 %v41610_v35  ;;  %v37204_v7 = vpack.c.bf16 %v5922_v23, %v5915_v50 }
 0x1cb   : > { %35875 = vmatmul.mubr.f32.vlgmr.msra.gmra.mrb[0].mxu0 %v20968_v59  ;;  %37793 = vmatprep.subr.bf16.mxu0 %v37792_v16  ;;  %v5893_v59 = vsub.f32 %v41757_v54, %v5892_v44  ;;  %v41838_v41 = vsub.f32 %v41784_v38, %v21517_v1  ;;  %v21514_v38 = vsel %vm158_vm0, %v31278_v22, 0  ;;  %v41879_v22 = vpack.c.bf16 %v21520_v49, %v21517_v1 }
 0x1cc   : > { %34099 = vmatmul.mubr.f32.vlgmr.msra.gmra.mrb[0].mxu1 %v41467_v51  ;;  %35877 = vmatprep.mubr.f32.mxu0 %v20978_v34  ;;  %v21508_v51 = vsel %vm145_vm1, %v31274_v30, 0  ;;  %v5928_v34 = vsub.f32 %v41768_v63, %v41805_v10  ;;  %v41866_v12 = vand.u32 4294901760, %v21514_v38 }
 0x1cd   : > { %37203 = vmatpush3.bf16.msra.mxu1 %v41753_v57  ;;  %34101 = vmatprep.mubr.f32.mxu1 %v41478_v47  ;;  %v41835_v47 = vand.u32 4294901760, %v21505_v46  ;;  %v41855_v20 = vand.u32 4294901760, %v21508_v51  ;;  %v5894_v50 = vand.u32 4294901760, %v5893_v59  ;;  %v21627_v23 = vand.u32 4294901760, %v41838_v41 }
 0x1ce   : > { %34108 = vmatprep.subr.mxu1 %v41738_v21  ;;  %37795 = vmatpush3.bf16.msra.mxu0 %v37792_v16  ;;  %v41847_v16 = vsub.f32 %v41792_v9, %v21520_v49  ;;  %v5929_v9 = vand.u32 4294901760, %v5928_v34  ;;  %v37208_v59 = vpack.c.bf16 %v41717_v60, %v41715_v19  ;;  %v31093_v19 = vld [vmem:[%s39391_s24 + $0x221] sm:$0xff] }
 0x1cf   : > { %35878 = vmatmul.mubr.f32.gmra.mrb[2].mxu0 %v20988_v29  ;;  %35884 = vmatprep.subr.mxu0 %v41654_v33  ;;  %v21511_v29 = vsel %vm145_vm1, %v31275_v37, 0  ;;  %v21628_v34 = vsub.f32 %v41838_v41, %v21627_v23 }
 0x1d0   : > { %34102 = vmatmul.mubr.f32.gmra.mrb[2].mxu1 %v41491_v5  ;;  %35886 = vmatprep.mubr.f32.mxu0 %v41564_v39  ;;  %v41861_v5 = vsub.f32 %v21505_v46, %v41835_v47  ;;  %v21634_v30 = vand.u32 4294901760, %v41847_v16  ;;  %v41869_v15 = vand.u32 4294901760, %v21511_v29  ;;  %v41874_v46 = vsub.f32 %v21508_v51, %v41855_v20 }
 0x1d1   : > { %34109 = vmatpush3.msra.mxu1 %v41738_v21  ;;  %34110 = vmatprep.mubr.f32.mxu1 %v5874_v0  ;;  %v5904_v0 = vand.u32 4294901760, %v5903_v6 }
 0x1d2   : > { %37205 = vmatprep.subr.bf16.mxu1 %v37204_v7  ;;  %35885 = vmatpush3.msra.mxu0 %v41654_v33  ;;  %v21586_v33 = vand.u32 4294901760, %v41853_v55  ;;  %v21596_v37 = vand.u32 4294901760, %v41861_v5  ;;  %v21635_v51 = vsub.f32 %v41847_v16, %v21634_v30  ;;  %v21606_v49 = vand.u32 4294901760, %v41874_v46 }
 0x1d3   : > { %35887 = vmatmul.mubr.f32.vlgmr.msra.gmra.mrb[0].mxu0 %v41579_v52  ;;  %37797 = vmatprep.subr.bf16.mxu0 %v41623_v53 }
 0x1d4   : > { %34111 = vmatmul.mubr.f32.vlgmr.msra.gmra.mrb[0].mxu1 %v5884_v31  ;;  %35889 = vmatprep.mubr.f32.mxu0 %v41599_v17  ;;  %v21587_v1 = vsub.f32 %v41853_v55, %v21586_v33  ;;  %v21597_v31 = vsub.f32 %v41861_v5, %v21596_v37  ;;  %v21636_v6 = vand.u32 4294901760, %v21635_v51  ;;  %v37808_v51 = vpack.c.bf16 %v41847_v16, %v41838_v41  ;;  %v42048_v41 = vld [vmem:[%s45635_s1 + $0x350] sm:$0xff] }
 0x1d5   : > { %37207 = vmatpush3.bf16.msra.mxu1 %v37204_v7  ;;  %34113 = vmatprep.mubr.f32.mxu1 %v5894_v50  ;;  %v41891_v7 = vsub.f32 %v21511_v29, %v41869_v15  ;;  %v21607_v50 = vsub.f32 %v41874_v46, %v21606_v49  ;;  %v31282_v16 = vld [vmem:[%s39391_s24 + $0x190] sm:$0xff] }
 0x1d6   : > { %34120 = vmatprep.subr.mxu1 %v5929_v9  ;;  %37799 = vmatpush3.bf16.msra.mxu0 %v41623_v53  ;;  %v41894_v53 = vsub.f32 %v21514_v38, %v41866_v12 }
 0x1d7   : > { %35890 = vmatmul.mubr.f32.gmra.mrb[2].mxu0 %v41613_v18  ;;  %35896 = vmatprep.subr.mxu0 %v41610_v35  ;;  %v21616_v38 = vand.u32 4294901760, %v41891_v7 }
 0x1d8   : > { %34114 = vmatmul.mubr.f32.gmra.mrb[2].mxu1 %v5904_v0  ;;  %35898 = vmatprep.mubr.f32.mxu0 %v41564_v39  ;;  %v21629_v39 = vand.u32 4294901760, %v21628_v34  ;;  %v41910_v29 = vand.u32 4294901760, %v41894_v53 }
 0x1d9   : > { %34121 = vmatpush3.msra.mxu1 %v5929_v9  ;;  %34122 = vmatprep.mubr.f32.mxu1 %v41711_v45 }
 0x1da   : > { %37209 = vmatprep.subr.bf16.mxu1 %v37208_v59  ;;  %35897 = vmatpush3.msra.mxu0 %v41610_v35  ;;  %v21588_v35 = vand.u32 4294901760, %v21587_v1  ;;  %v37804_v9 = vpack.c.bf16 %v21636_v6, %v21629_v39  ;;  %v21642_v0 = vsub.f32 %v41894_v53, %v41910_v29  ;;  %v31096_v1 = vld [vmem:[%s45635_s1 + $0xf0] sm:$0xff] }
 0x1db   : > { %35899 = vmatmul.mubr.f32.vlgmr.msra.gmra.mrb[0].mxu0 %v41579_v52  ;;  %37801 = vmatprep.subr.bf16.mxu0 %v41879_v22  ;;  %v21598_v52 = vand.u32 4294901760, %v21597_v31  ;;  %v31097_v31 = vld [vmem:[%s45635_s1 + $0xf8] sm:$0xff]  ;;  %v6431_v60 = vand.u32 4294901760, %v31096_v1 }
 0x1dc   : > { %34123 = vmatmul.mubr.f32.vlgmr.msra.gmra.mrb[0].mxu1 %v41723_v62  ;;  %35901 = vmatprep.mubr.f32.mxu0 %v41599_v17  ;;  %v21617_v17 = vsub.f32 %v41891_v7, %v21616_v38  ;;  %v21643_v34 = vand.u32 4294901760, %v21642_v0  ;;  %v31092_v39 = vld [vmem:[%s39391_s24 + $0x211] sm:$0xff] }
 0x1dd   : > { %37211 = vmatpush3.bf16.msra.mxu1 %v37208_v59  ;;  %34125 = vmatprep.mubr.f32.mxu1 %v41734_v40  ;;  %v21608_v59 = vand.u32 4294901760, %v21607_v50  ;;  %v31094_v6 = vld [vmem:[%s39391_s24 + $0x231] sm:$0xff]  ;;  %v31095_v50 = vld [vmem:[%s39391_s24 + $0x241] sm:$0xff] }
 0x1de   : > { %34132 = vmatprep.subr.mxu1 %v41768_v63  ;;  %37803 = vmatpush3.bf16.msra.mxu0 %v41879_v22 }
 0x1df   : > { %35902 = vmatmul.mubr.f32.gmra.mrb[2].mxu0 %v41613_v18  ;;  %35908 = vmatprep.subr.mxu0 %v41866_v12  ;;  %v21618_v18 = vand.u32 4294901760, %v21617_v17 }
 0x1e0   : > { %34126 = vmatmul.mubr.f32.gmra.mrb[2].mxu1 %v41747_v4  ;;  %35910 = vmatprep.mubr.f32.mxu0 %v21588_v35 }
 0x1e1   : > { %34133 = vmatpush3.msra.mxu1 %v41768_v63  ;;  %34134 = vmatprep.mubr.f32.mxu1 %v41732_v36  ;;  %v37216_v63 = vpack.c.bf16 %v5920_v56, %v5913_v43  ;;  %v6434_v43 = vand.u32 4294901760, %v31097_v31  ;;  %v6416_v56 = vsel %vm145_vm1, %v31092_v39, 0  ;;  %v31098_v36 = vld [vmem:[%s45635_s1 + $0x100] sm:$0x7f]  ;;  %v37816_v39 = vpack.c.bf16 %v21634_v30, %v21627_v23 }
 0x1e2   : > { %37213 = vmatprep.subr.bf16.mxu1 %v41753_v57  ;;  %35909 = vmatpush3.msra.mxu0 %v41866_v12  ;;  %v41967_v35 = vand.u32 4294901760, %v6416_v56 }
 0x1e3   : > { %35911 = vmatmul.mubr.f32.vlgmr.msra.gmra.mrb[0].mxu0 %v21598_v52  ;;  %37805 = vmatprep.subr.bf16.mxu0 %v37804_v9  ;;  %v6422_v52 = vsel %vm145_vm1, %v31094_v6, 0 }
 0x1e4   : > { %34135 = vmatmul.mubr.f32.vlgmr.msra.gmra.mrb[0].mxu1 %v41745_v32  ;;  %35913 = vmatprep.mubr.f32.mxu0 %v21608_v59  ;;  %v41971_v32 = vsub.f32 %v31096_v1, %v6431_v60  ;;  %v41988_v17 = vsub.f32 %v6416_v56, %v41967_v35  ;;  %v41990_v0 = vand.u32 4294901760, %v6422_v52 }
 0x1e5   : > { %37215 = vmatpush3.bf16.msra.mxu1 %v41753_v57  ;;  %34137 = vmatprep.mubr.f32.mxu1 %v41757_v54 }
 0x1e6   : > { %34144 = vmatprep.subr.mxu1 %v41738_v21  ;;  %37807 = vmatpush3.bf16.msra.mxu0 %v37804_v9  ;;  %v6428_v9 = vsel %vm158_vm0, %v31098_v36, 0 }
 0x1e7   : > { %35914 = vmatmul.mubr.f32.gmra.mrb[2].mxu0 %v21618_v18  ;;  %35920 = vmatprep.subr.mxu0 %v21643_v34  ;;  %v41994_v59 = vand.u32 4294901760, %v6428_v9 }
 0x1e8   : > { %34138 = vmatmul.mubr.f32.gmra.mrb[2].mxu1 %v41779_v8  ;;  %35922 = vmatprep.mubr.f32.mxu0 %v41820_v11  ;;  %v6541_v8 = vand.u32 4294901760, %v41971_v32 }
 0x1e9   : > { %34145 = vmatpush3.msra.mxu1 %v41738_v21  ;;  %34146 = vmatprep.mubr.f32.mxu1 %v5872_v26  ;;  %v6419_v26 = vsel %vm145_vm1, %v31093_v19, 0  ;;  %v42024_v1 = vsub.f32 %v6428_v9, %v41994_v59 }
 0x1ea   : > { %37217 = vmatprep.subr.bf16.mxu1 %v37216_v63  ;;  %35921 = vmatpush3.msra.mxu0 %v21643_v34  ;;  %v41979_v54 = vand.u32 4294901760, %v6419_v26  ;;  %v6500_v34 = vand.u32 4294901760, %v41988_v17 }
 0x1eb   : > { %35923 = vmatmul.mubr.f32.vlgmr.msra.gmra.mrb[0].mxu0 %v41835_v47  ;;  %37809 = vmatprep.subr.bf16.mxu0 %v37808_v51  ;;  %v42061_v6 = vand.u32 4294901760, %v42024_v1 }
 0x1ec   : > { %34147 = vmatmul.mubr.f32.vlgmr.msra.gmra.mrb[0].mxu1 %v5882_v42  ;;  %35925 = vmatprep.mubr.f32.mxu0 %v41855_v20  ;;  %v41973_v42 = vsub.f32 %v31097_v31, %v6434_v43  ;;  %v31281_v31 = vld [vmem:[%s39391_s24 + $0x180] sm:$0xff]  ;;  %v6501_v23 = vsub.f32 %v41988_v17, %v6500_v34 }
 0x1ed   : > { %37219 = vmatpush3.bf16.msra.mxu1 %v37216_v63  ;;  %34149 = vmatprep.mubr.f32.mxu1 %v5892_v44  ;;  %v6425_v44 = vsel %vm145_vm1, %v31095_v50, 0  ;;  %v42013_v63 = vsub.f32 %v6422_v52, %v41990_v0  ;;  %v22132_v56 = vsel %vm145_vm1, %v31281_v31, 0  ;;  %v22150_v50 = vand.u32 4294901760, %v42048_v41 }
 0x1ee   : > { %34156 = vmatprep.subr.mxu1 %v41805_v10  ;;  %37811 = vmatpush3.bf16.msra.mxu0 %v37808_v51  ;;  %v42003_v18 = vand.u32 4294901760, %v6425_v44  ;;  %v6542_v51 = vsub.f32 %v41971_v32, %v6541_v8  ;;  %v22135_v52 = vsel %vm145_vm1, %v31282_v16, 0  ;;  %v42076_v9 = vand.u32 4294901760, %v22132_v56 }
 0x1ef   : > { %35926 = vmatmul.mubr.f32.gmra.mrb[2].mxu0 %v41869_v15  ;;  %35932 = vmatprep.subr.mxu0 %v41894_v53  ;;  %v6520_v30 = vand.u32 4294901760, %v42013_v63 }
 0x1f0   : > { %34150 = vmatmul.mubr.f32.gmra.mrb[2].mxu1 %v5902_v2  ;;  %35934 = vmatprep.mubr.f32.mxu0 %v41853_v55  ;;  %v6548_v2 = vand.u32 4294901760, %v41973_v42  ;;  %v6543_v55 = vand.u32 4294901760, %v6542_v51  ;;  %v31284_v51 = vld [vmem:[%s39391_s24 + $0x1b0] sm:$0xff] }
 0x1f1   : > { %34157 = vmatpush3.msra.mxu1 %v41805_v10  ;;  %34158 = vmatprep.mubr.f32.mxu1 %v41711_v45  ;;  %v42001_v10 = vsub.f32 %v6419_v26, %v41979_v54 }
 0x1f2   : > { %37221 = vmatprep.subr.bf16.mxu1 %v41753_v57  ;;  %35933 = vmatpush3.msra.mxu0 %v41894_v53  ;;  %v42009_v53 = vpack.c.bf16 %v6434_v43, %v6431_v60  ;;  %v42035_v60 = vsub.f32 %v6425_v44, %v42003_v18  ;;  %v42040_v43 = vld [vmem:[%s45635_s1 + $0x348] sm:$0xff]  ;;  %v31287_v44 = vld [vmem:[%s45635_s1 + $0x358] sm:$0x7f] }
 0x1f3   : > { %35935 = vmatmul.mubr.f32.vlgmr.msra.gmra.mrb[0].mxu0 %v41861_v5  ;;  %37813 = vmatprep.subr.bf16.mxu0 %v41879_v22  ;;  %v6510_v19 = vand.u32 4294901760, %v42001_v10  ;;  %v6502_v5 = vand.u32 4294901760, %v6501_v23  ;;  %v42109_v23 = vsub.f32 %v22132_v56, %v42076_v9 }
 0x1f4   : > { %34159 = vmatmul.mubr.f32.vlgmr.msra.gmra.mrb[0].mxu1 %v41723_v62  ;;  %35937 = vmatprep.mubr.f32.mxu0 %v41874_v46  ;;  %v6530_v26 = vand.u32 4294901760, %v42035_v60 }
 0x1f5   : > { %37223 = vmatpush3.bf16.msra.mxu1 %v41753_v57  ;;  %34161 = vmatprep.mubr.f32.mxu1 %v41734_v40  ;;  %v6549_v57 = vsub.f32 %v41973_v42, %v6548_v2  ;;  %v6511_v36 = vsub.f32 %v42001_v10, %v6510_v19 }
 0x1f6   : > { %34168 = vmatprep.subr.mxu1 %v41738_v21  ;;  %37815 = vmatpush3.bf16.msra.mxu0 %v41879_v22  ;;  %v6531_v16 = vsub.f32 %v42035_v60, %v6530_v26 }
 0x1f7   : > { %35938 = vmatmul.mubr.f32.gmra.mrb[2].mxu0 %v41891_v7  ;;  %35944 = vmatprep.subr.mxu0 %v41866_v12  ;;  %v6512_v31 = vand.u32 4294901760, %v6511_v36 }
 0x1f8   : > { %34162 = vmatmul.mubr.f32.gmra.mrb[2].mxu1 %v41747_v4  ;;  %35946 = vmatprep.mubr.f32.mxu0 %v21586_v33  ;;  %v6550_v33 = vand.u32 4294901760, %v6549_v57 }
 0x1f9   : > { %34169 = vmatpush3.msra.mxu1 %v41738_v21  ;;  %34170 = vmatprep.mubr.f32.mxu1 %v41711_v45  ;;  %v22147_v21 = vand.u32 4294901760, %v42040_v43  ;;  %v31283_v45 = vld [vmem:[%s39391_s24 + $0x1a0] sm:$0xff] }
 0x1fa   : > { %37225 = vmatprep.subr.bf16.mxu1 %v42009_v53  ;;  %35945 = vmatpush3.msra.mxu0 %v41866_v12  ;;  %v37228_v46 = vpack.c.bf16 %v6550_v33, %v6543_v55 }
 0x1fb   : > { %35947 = vmatmul.mubr.f32.vlgmr.msra.gmra.mrb[0].mxu0 %v21596_v37  ;;  %37817 = vmatprep.subr.bf16.mxu0 %v37816_v39  ;;  %v6521_v37 = vsub.f32 %v42013_v63, %v6520_v30  ;;  %v42094_v57 = vsub.f32 %v42040_v43, %v22147_v21  ;;  %v22144_v43 = vsel %vm158_vm0, %v31287_v44, 0  ;;  %v42135_v44 = vpack.c.bf16 %v22150_v50, %v22147_v21 }
 0x1fc   : > { %34171 = vmatmul.mubr.f32.vlgmr.msra.gmra.mrb[0].mxu1 %v41723_v62  ;;  %35949 = vmatprep.mubr.f32.mxu0 %v21606_v49  ;;  %v22138_v62 = vsel %vm145_vm1, %v31283_v45, 0  ;;  %v6556_v49 = vsub.f32 %v42024_v1, %v42061_v6  ;;  %v42122_v56 = vand.u32 4294901760, %v22144_v43 }
 0x1fd   : > { %37227 = vmatpush3.bf16.msra.mxu1 %v42009_v53  ;;  %34173 = vmatprep.mubr.f32.mxu1 %v41734_v40  ;;  %v42091_v40 = vand.u32 4294901760, %v22135_v52  ;;  %v42111_v7 = vand.u32 4294901760, %v22138_v62  ;;  %v6522_v55 = vand.u32 4294901760, %v6521_v37  ;;  %v22257_v33 = vand.u32 4294901760, %v42094_v57 }
 0x1fe   : > { %34180 = vmatprep.subr.mxu1 %v41994_v59  ;;  %37819 = vmatpush3.bf16.msra.mxu0 %v37816_v39  ;;  %v42103_v39 = vsub.f32 %v42048_v41, %v22150_v50  ;;  %v6557_v41 = vand.u32 4294901760, %v6556_v49  ;;  %v37232_v37 = vpack.c.bf16 %v41973_v42, %v41971_v32  ;;  %v31100_v32 = vld [vmem:[%s39391_s24 + $0x172] sm:$0xff] }
 0x1ff   : > { %35950 = vmatmul.mubr.f32.gmra.mrb[2].mxu0 %v21616_v38  ;;  %35956 = vmatprep.subr.mxu0 %v41910_v29  ;;  %v22141_v38 = vsel %vm145_vm1, %v31284_v51, 0  ;;  %v22258_v49 = vsub.f32 %v42094_v57, %v22257_v33 }
 0x200   : > { %34174 = vmatmul.mubr.f32.gmra.mrb[2].mxu1 %v41747_v4  ;;  %35958 = vmatprep.mubr.f32.mxu0 %v41820_v11  ;;  %v42117_v4 = vsub.f32 %v22135_v52, %v42091_v40  ;;  %v22264_v45 = vand.u32 4294901760, %v42103_v39  ;;  %v42125_v36 = vand.u32 4294901760, %v22141_v38  ;;  %v42130_v52 = vsub.f32 %v22138_v62, %v42111_v7 }
 0x201   : > { %34181 = vmatpush3.msra.mxu1 %v41994_v59  ;;  %34182 = vmatprep.mubr.f32.mxu1 %v6502_v5  ;;  %v6532_v5 = vand.u32 4294901760, %v6531_v16 }
 0x202   : > { %37229 = vmatprep.subr.bf16.mxu1 %v37228_v46  ;;  %35957 = vmatpush3.msra.mxu0 %v41910_v29  ;;  %v22216_v29 = vand.u32 4294901760, %v42109_v23  ;;  %v22226_v51 = vand.u32 4294901760, %v42117_v4  ;;  %v22265_v62 = vsub.f32 %v42103_v39, %v22264_v45  ;;  %v22236_v50 = vand.u32 4294901760, %v42130_v52 }
 0x203   : > { %35959 = vmatmul.mubr.f32.vlgmr.msra.gmra.mrb[0].mxu0 %v41835_v47  ;;  %37821 = vmatprep.subr.bf16.mxu0 %v41879_v22 }
 0x204   : > { %34183 = vmatmul.mubr.f32.vlgmr.msra.gmra.mrb[0].mxu1 %v6512_v31  ;;  %35961 = vmatprep.mubr.f32.mxu0 %v41855_v20  ;;  %v22217_v21 = vsub.f32 %v42109_v23, %v22216_v29  ;;  %v22227_v31 = vsub.f32 %v42117_v4, %v22226_v51  ;;  %v22266_v16 = vand.u32 4294901760, %v22265_v62  ;;  %v37832_v62 = vpack.c.bf16 %v42103_v39, %v42094_v57  ;;  %v42304_v57 = vld [vmem:[%s45635_s1 + $0x368] sm:$0xff]  ;;  %v31291_v39 = vld [vmem:[%s39391_s24 + $0x240] sm:$0xff] }
 0x205   : > { %37231 = vmatpush3.bf16.msra.mxu1 %v37228_v46  ;;  %34185 = vmatprep.mubr.f32.mxu1 %v6522_v55  ;;  %v42147_v46 = vsub.f32 %v22141_v38, %v42125_v36  ;;  %v22237_v55 = vsub.f32 %v42130_v52, %v22236_v50 }
 0x206   : > { %34192 = vmatprep.subr.mxu1 %v6557_v41  ;;  %37823 = vmatpush3.bf16.msra.mxu0 %v41879_v22  ;;  %v42150_v22 = vsub.f32 %v22144_v43, %v42122_v56 }
 0x207   : > { %35962 = vmatmul.mubr.f32.gmra.mrb[2].mxu0 %v41869_v15  ;;  %35968 = vmatprep.subr.mxu0 %v41866_v12  ;;  %v22246_v43 = vand.u32 4294901760, %v42147_v46 }
 0x208   : > { %34186 = vmatmul.mubr.f32.gmra.mrb[2].mxu1 %v6532_v5  ;;  %35970 = vmatprep.mubr.f32.mxu0 %v41820_v11  ;;  %v22259_v11 = vand.u32 4294901760, %v22258_v49  ;;  %v42166_v38 = vand.u32 4294901760, %v42150_v22 }
 0x209   : > { %34193 = vmatpush3.msra.mxu1 %v6557_v41  ;;  %34194 = vmatprep.mubr.f32.mxu1 %v41967_v35 }
 0x20a   : > { %37233 = vmatprep.subr.bf16.mxu1 %v37232_v37  ;;  %35969 = vmatpush3.msra.mxu0 %v41866_v12  ;;  %v22218_v12 = vand.u32 4294901760, %v22217_v21  ;;  %v37828_v41 = vpack.c.bf16 %v22266_v16, %v22259_v11  ;;  %v22272_v5 = vsub.f32 %v42150_v22, %v42166_v38  ;;  %v31103_v21 = vld [vmem:[%s45635_s1 + $0x108] sm:$0xff] }
 0x20b   : > { %35971 = vmatmul.mubr.f32.vlgmr.msra.gmra.mrb[0].mxu0 %v41835_v47  ;;  %37825 = vmatprep.subr.bf16.mxu0 %v42135_v44  ;;  %v22228_v47 = vand.u32 4294901760, %v22227_v31  ;;  %v31104_v31 = vld [vmem:[%s45635_s1 + $0x110] sm:$0xff]  ;;  %v31099_v11 = vld [vmem:[%s39391_s24 + $0x162] sm:$0xff]  ;;  %v7059_v42 = vand.u32 4294901760, %v31103_v21 }
 0x20c   : > { %34195 = vmatmul.mubr.f32.vlgmr.msra.gmra.mrb[0].mxu1 %v41979_v54  ;;  %35973 = vmatprep.mubr.f32.mxu0 %v41855_v20  ;;  %v22247_v20 = vsub.f32 %v42147_v46, %v22246_v43  ;;  %v22273_v49 = vand.u32 4294901760, %v22272_v5  ;;  %v31101_v16 = vld [vmem:[%s39391_s24 + $0x182] sm:$0xff] }
 0x20d   : > { %37235 = vmatpush3.bf16.msra.mxu1 %v37232_v37  ;;  %34197 = vmatprep.mubr.f32.mxu1 %v41990_v0  ;;  %v22238_v37 = vand.u32 4294901760, %v22237_v55  ;;  %v31102_v55 = vld [vmem:[%s39391_s24 + $0x192] sm:$0xff] }
 0x20e   : > { %34204 = vmatprep.subr.mxu1 %v42024_v1  ;;  %37827 = vmatpush3.bf16.msra.mxu0 %v42135_v44 }
 0x20f   : > { %35974 = vmatmul.mubr.f32.gmra.mrb[2].mxu0 %v41869_v15  ;;  %35980 = vmatprep.subr.mxu0 %v42122_v56  ;;  %v22248_v15 = vand.u32 4294901760, %v22247_v20 }
 0x210   : > { %34198 = vmatmul.mubr.f32.gmra.mrb[2].mxu1 %v42003_v18  ;;  %35982 = vmatprep.mubr.f32.mxu0 %v22218_v12 }
 0x211   : > { %34205 = vmatpush3.msra.mxu1 %v42024_v1  ;;  %34206 = vmatprep.mubr.f32.mxu1 %v41988_v17  ;;  %v37240_v1 = vpack.c.bf16 %v6548_v2, %v6541_v8  ;;  %v7062_v8 = vand.u32 4294901760, %v31104_v31  ;;  %v7044_v2 = vsel %vm145_vm1, %v31099_v11, 0  ;;  %v31105_v17 = vld [vmem:[%s45635_s1 + $0x118] sm:$0x7f]  ;;  %v37840_v11 = vpack.c.bf16 %v22264_v45, %v22257_v33 }
 0x212   : > { %37237 = vmatprep.subr.bf16.mxu1 %v42009_v53  ;;  %35981 = vmatpush3.msra.mxu0 %v42122_v56  ;;  %v42223_v12 = vand.u32 4294901760, %v7044_v2 }
 0x213   : > { %35983 = vmatmul.mubr.f32.vlgmr.msra.gmra.mrb[0].mxu0 %v22228_v47  ;;  %37829 = vmatprep.subr.bf16.mxu0 %v37828_v41  ;;  %v7050_v47 = vsel %vm145_vm1, %v31101_v16, 0 }
 0x214   : > { %34207 = vmatmul.mubr.f32.vlgmr.msra.gmra.mrb[0].mxu1 %v42001_v10  ;;  %35985 = vmatprep.mubr.f32.mxu0 %v22238_v37  ;;  %v42227_v10 = vsub.f32 %v31103_v21, %v7059_v42  ;;  %v42244_v20 = vsub.f32 %v7044_v2, %v42223_v12  ;;  %v42246_v5 = vand.u32 4294901760, %v7050_v47 }
 0x215   : > { %37239 = vmatpush3.bf16.msra.mxu1 %v42009_v53  ;;  %34209 = vmatprep.mubr.f32.mxu1 %v42013_v63 }
 0x216   : > { %34216 = vmatprep.subr.mxu1 %v41994_v59  ;;  %37831 = vmatpush3.bf16.msra.mxu0 %v37828_v41  ;;  %v7056_v41 = vsel %vm158_vm0, %v31105_v17, 0 }
 0x217   : > { %35986 = vmatmul.mubr.f32.gmra.mrb[2].mxu0 %v22248_v15  ;;  %35992 = vmatprep.subr.mxu0 %v22273_v49  ;;  %v42250_v37 = vand.u32 4294901760, %v7056_v41 }
 0x218   : > { %34210 = vmatmul.mubr.f32.gmra.mrb[2].mxu1 %v42035_v60  ;;  %35994 = vmatprep.mubr.f32.mxu0 %v42076_v9  ;;  %v7169_v60 = vand.u32 4294901760, %v42227_v10 }
 0x219   : > { %34217 = vmatpush3.msra.mxu1 %v41994_v59  ;;  %34218 = vmatprep.mubr.f32.mxu1 %v6500_v34  ;;  %v7047_v34 = vsel %vm145_vm1, %v31100_v32, 0  ;;  %v42280_v21 = vsub.f32 %v7056_v41, %v42250_v37 }
 0x21a   : > { %37241 = vmatprep.subr.bf16.mxu1 %v37240_v1  ;;  %35993 = vmatpush3.msra.mxu0 %v22273_v49  ;;  %v42235_v63 = vand.u32 4294901760, %v7047_v34  ;;  %v7128_v49 = vand.u32 4294901760, %v42244_v20 }
 0x21b   : > { %35995 = vmatmul.mubr.f32.vlgmr.msra.gmra.mrb[0].mxu0 %v42091_v40  ;;  %37833 = vmatprep.subr.bf16.mxu0 %v37832_v62  ;;  %v42317_v16 = vand.u32 4294901760, %v42280_v21 }
 0x21c   : > { %34219 = vmatmul.mubr.f32.vlgmr.msra.gmra.mrb[0].mxu1 %v6510_v19  ;;  %35997 = vmatprep.mubr.f32.mxu0 %v42111_v7  ;;  %v42229_v19 = vsub.f32 %v31104_v31, %v7062_v8  ;;  %v31290_v31 = vld [vmem:[%s39391_s24 + $0x230] sm:$0xff]  ;;  %v7129_v33 = vsub.f32 %v42244_v20, %v7128_v49 }
 0x21d   : > { %37243 = vmatpush3.bf16.msra.mxu1 %v37240_v1  ;;  %34221 = vmatprep.mubr.f32.mxu1 %v6520_v30  ;;  %v7053_v30 = vsel %vm145_vm1, %v31102_v55, 0  ;;  %v42269_v1 = vsub.f32 %v7050_v47, %v42246_v5  ;;  %v22762_v2 = vsel %vm145_vm1, %v31290_v31, 0  ;;  %v22780_v55 = vand.u32 4294901760, %v42304_v57 }
 0x21e   : > { %34228 = vmatprep.subr.mxu1 %v42061_v6  ;;  %37835 = vmatpush3.bf16.msra.mxu0 %v37832_v62  ;;  %v42259_v15 = vand.u32 4294901760, %v7053_v30  ;;  %v7170_v62 = vsub.f32 %v42227_v10, %v7169_v60  ;;  %v22765_v47 = vsel %vm145_vm1, %v31291_v39, 0  ;;  %v42332_v41 = vand.u32 4294901760, %v22762_v2 }
 0x21f   : > { %35998 = vmatmul.mubr.f32.gmra.mrb[2].mxu0 %v42125_v36  ;;  %36004 = vmatprep.subr.mxu0 %v42150_v22  ;;  %v7148_v45 = vand.u32 4294901760, %v42269_v1 }
 0x220   : > { %34222 = vmatmul.mubr.f32.gmra.mrb[2].mxu1 %v6530_v26  ;;  %36006 = vmatprep.mubr.f32.mxu0 %v42109_v23  ;;  %v7176_v26 = vand.u32 4294901760, %v42229_v19  ;;  %v7171_v23 = vand.u32 4294901760, %v7170_v62  ;;  %v31293_v62 = vld [vmem:[%s39391_s24 + $0x260] sm:$0xff] }
 0x221   : > { %34229 = vmatpush3.msra.mxu1 %v42061_v6  ;;  %34230 = vmatprep.mubr.f32.mxu1 %v41967_v35  ;;  %v42257_v6 = vsub.f32 %v7047_v34, %v42235_v63 }
 0x222   : > { %37245 = vmatprep.subr.bf16.mxu1 %v42009_v53  ;;  %36005 = vmatpush3.msra.mxu0 %v42150_v22  ;;  %v42265_v22 = vpack.c.bf16 %v7062_v8, %v7059_v42  ;;  %v42291_v42 = vsub.f32 %v7053_v30, %v42259_v15  ;;  %v42296_v8 = vld [vmem:[%s45635_s1 + $0x360] sm:$0xff]  ;;  %v31296_v30 = vld [vmem:[%s45635_s1 + $0x370] sm:$0x7f] }
 0x223   : > { %36007 = vmatmul.mubr.f32.vlgmr.msra.gmra.mrb[0].mxu0 %v42117_v4  ;;  %37837 = vmatprep.subr.bf16.mxu0 %v42135_v44  ;;  %v7138_v32 = vand.u32 4294901760, %v42257_v6  ;;  %v7130_v4 = vand.u32 4294901760, %v7129_v33  ;;  %v42365_v33 = vsub.f32 %v22762_v2, %v42332_v41 }
 0x224   : > { %34231 = vmatmul.mubr.f32.vlgmr.msra.gmra.mrb[0].mxu1 %v41979_v54  ;;  %36009 = vmatprep.mubr.f32.mxu0 %v42130_v52  ;;  %v7158_v34 = vand.u32 4294901760, %v42291_v42 }
 0x225   : > { %37247 = vmatpush3.bf16.msra.mxu1 %v42009_v53  ;;  %34233 = vmatprep.mubr.f32.mxu1 %v41990_v0  ;;  %v7177_v53 = vsub.f32 %v42229_v19, %v7176_v26  ;;  %v7139_v17 = vsub.f32 %v42257_v6, %v7138_v32 }
 0x226   : > { %34240 = vmatprep.subr.mxu1 %v41994_v59  ;;  %37839 = vmatpush3.bf16.msra.mxu0 %v42135_v44  ;;  %v7159_v39 = vsub.f32 %v42291_v42, %v7158_v34 }
 0x227   : > { %36010 = vmatmul.mubr.f32.gmra.mrb[2].mxu0 %v42147_v46  ;;  %36016 = vmatprep.subr.mxu0 %v42122_v56  ;;  %v7140_v31 = vand.u32 4294901760, %v7139_v17 }
 0x228   : > { %34234 = vmatmul.mubr.f32.gmra.mrb[2].mxu1 %v42003_v18  ;;  %36018 = vmatprep.mubr.f32.mxu0 %v22216_v29  ;;  %v7178_v29 = vand.u32 4294901760, %v7177_v53 }
 0x229   : > { %34241 = vmatpush3.msra.mxu1 %v41994_v59  ;;  %34242 = vmatprep.mubr.f32.mxu1 %v41967_v35  ;;  %v22777_v59 = vand.u32 4294901760, %v42296_v8  ;;  %v31292_v35 = vld [vmem:[%s39391_s24 + $0x250] sm:$0xff] }
 0x22a   : > { %37249 = vmatprep.subr.bf16.mxu1 %v42265_v22  ;;  %36017 = vmatpush3.msra.mxu0 %v42122_v56  ;;  %v37252_v52 = vpack.c.bf16 %v7178_v29, %v7171_v23 }
 0x22b   : > { %36019 = vmatmul.mubr.f32.vlgmr.msra.gmra.mrb[0].mxu0 %v22226_v51  ;;  %37841 = vmatprep.subr.bf16.mxu0 %v37840_v11  ;;  %v7149_v51 = vsub.f32 %v42269_v1, %v7148_v45  ;;  %v42350_v53 = vsub.f32 %v42296_v8, %v22777_v59  ;;  %v22774_v8 = vsel %vm158_vm0, %v31296_v30, 0  ;;  %v42391_v30 = vpack.c.bf16 %v22780_v55, %v22777_v59 }
 0x22c   : > { %34243 = vmatmul.mubr.f32.vlgmr.msra.gmra.mrb[0].mxu1 %v41979_v54  ;;  %36021 = vmatprep.mubr.f32.mxu0 %v22236_v50  ;;  %v22768_v54 = vsel %vm145_vm1, %v31292_v35, 0  ;;  %v7184_v50 = vsub.f32 %v42280_v21, %v42317_v16  ;;  %v42378_v2 = vand.u32 4294901760, %v22774_v8 }
 0x22d   : > { %37251 = vmatpush3.bf16.msra.mxu1 %v42265_v22  ;;  %34245 = vmatprep.mubr.f32.mxu1 %v41990_v0  ;;  %v42347_v0 = vand.u32 4294901760, %v22765_v47  ;;  %v42367_v46 = vand.u32 4294901760, %v22768_v54  ;;  %v7150_v23 = vand.u32 4294901760, %v7149_v51  ;;  %v22887_v29 = vand.u32 4294901760, %v42350_v53 }
 0x22e   : > { %34252 = vmatprep.subr.mxu1 %v42250_v37  ;;  %37843 = vmatpush3.bf16.msra.mxu0 %v37840_v11  ;;  %v42359_v11 = vsub.f32 %v42304_v57, %v22780_v55  ;;  %v7185_v57 = vand.u32 4294901760, %v7184_v50  ;;  %v37256_v51 = vpack.c.bf16 %v42229_v19, %v42227_v10  ;;  %v31107_v10 = vld [vmem:[%s39391_s24 + $0x222] sm:$0xff] }
 0x22f   : > { %36022 = vmatmul.mubr.f32.gmra.mrb[2].mxu0 %v22246_v43  ;;  %36028 = vmatprep.subr.mxu0 %v42166_v38  ;;  %v22771_v43 = vsel %vm145_vm1, %v31293_v62, 0  ;;  %v22888_v50 = vsub.f32 %v42350_v53, %v22887_v29 }
 0x230   : > { %34246 = vmatmul.mubr.f32.gmra.mrb[2].mxu1 %v42003_v18  ;;  %36030 = vmatprep.mubr.f32.mxu0 %v42076_v9  ;;  %v42373_v18 = vsub.f32 %v22765_v47, %v42347_v0  ;;  %v22894_v35 = vand.u32 4294901760, %v42359_v11  ;;  %v42381_v17 = vand.u32 4294901760, %v22771_v43  ;;  %v42386_v47 = vsub.f32 %v22768_v54, %v42367_v46 }
 0x231   : > { %34253 = vmatpush3.msra.mxu1 %v42250_v37  ;;  %34254 = vmatprep.mubr.f32.mxu1 %v7130_v4  ;;  %v7160_v4 = vand.u32 4294901760, %v7159_v39 }
 0x232   : > { %37253 = vmatprep.subr.bf16.mxu1 %v37252_v52  ;;  %36029 = vmatpush3.msra.mxu0 %v42166_v38  ;;  %v22846_v38 = vand.u32 4294901760, %v42365_v33  ;;  %v22856_v62 = vand.u32 4294901760, %v42373_v18  ;;  %v22895_v54 = vsub.f32 %v42359_v11, %v22894_v35  ;;  %v22866_v55 = vand.u32 4294901760, %v42386_v47 }
 0x233   : > { %36031 = vmatmul.mubr.f32.vlgmr.msra.gmra.mrb[0].mxu0 %v42091_v40  ;;  %37845 = vmatprep.subr.bf16.mxu0 %v42135_v44 }
 0x234   : > { %34255 = vmatmul.mubr.f32.vlgmr.msra.gmra.mrb[0].mxu1 %v7140_v31  ;;  %36033 = vmatprep.mubr.f32.mxu0 %v42111_v7  ;;  %v22847_v59 = vsub.f32 %v42365_v33, %v22846_v38  ;;  %v22857_v31 = vsub.f32 %v42373_v18, %v22856_v62  ;;  %v22896_v39 = vand.u32 4294901760, %v22895_v54  ;;  %v37856_v54 = vpack.c.bf16 %v42359_v11, %v42350_v53  ;;  %v42560_v53 = vld [vmem:[%s45635_s1 + $0x380] sm:$0xff]  ;;  %v31298_v11 = vld [vmem:[%s39391_s24 + $0x191] sm:$0xff] }
 0x235   : > { %37255 = vmatpush3.bf16.msra.mxu1 %v37252_v52  ;;  %34257 = vmatprep.mubr.f32.mxu1 %v7150_v23  ;;  %v42403_v52 = vsub.f32 %v22771_v43, %v42381_v17  ;;  %v22867_v23 = vsub.f32 %v42386_v47, %v22866_v55 }
 0x236   : > { %34264 = vmatprep.subr.mxu1 %v7185_v57  ;;  %37847 = vmatpush3.bf16.msra.mxu0 %v42135_v44  ;;  %v42406_v44 = vsub.f32 %v22774_v8, %v42378_v2 }
 0x237   : > { %36034 = vmatmul.mubr.f32.gmra.mrb[2].mxu0 %v42125_v36  ;;  %36040 = vmatprep.subr.mxu0 %v42122_v56  ;;  %v22876_v8 = vand.u32 4294901760, %v42403_v52 }
 0x238   : > { %34258 = vmatmul.mubr.f32.gmra.mrb[2].mxu1 %v7160_v4  ;;  %36042 = vmatprep.mubr.f32.mxu0 %v42076_v9  ;;  %v22889_v9 = vand.u32 4294901760, %v22888_v50  ;;  %v42422_v43 = vand.u32 4294901760, %v42406_v44 }
 0x239   : > { %34265 = vmatpush3.msra.mxu1 %v7185_v57  ;;  %34266 = vmatprep.mubr.f32.mxu1 %v42223_v12 }
 0x23a   : > { %37257 = vmatprep.subr.bf16.mxu1 %v37256_v51  ;;  %36041 = vmatpush3.msra.mxu0 %v42122_v56  ;;  %v22848_v56 = vand.u32 4294901760, %v22847_v59  ;;  %v37852_v57 = vpack.c.bf16 %v22896_v39, %v22889_v9  ;;  %v22902_v4 = vsub.f32 %v42406_v44, %v42422_v43  ;;  %v31110_v59 = vld [vmem:[%s45635_s1 + $0x120] sm:$0xff]  ;;  %v31106_v9 = vld [vmem:[%s39391_s24 + $0x212] sm:$0xff] }
 0x23b   : > { %36043 = vmatmul.mubr.f32.vlgmr.msra.gmra.mrb[0].mxu0 %v42091_v40  ;;  %37849 = vmatprep.subr.bf16.mxu0 %v42391_v30  ;;  %v22858_v40 = vand.u32 4294901760, %v22857_v31  ;;  %v31111_v31 = vld [vmem:[%s45635_s1 + $0x128] sm:$0xff]  ;;  %v7687_v19 = vand.u32 4294901760, %v31110_v59  ;;  %v31108_v39 = vld [vmem:[%s39391_s24 + $0x232] sm:$0xff] }
 0x23c   : > { %34267 = vmatmul.mubr.f32.vlgmr.msra.gmra.mrb[0].mxu1 %v42235_v63  ;;  %36045 = vmatprep.mubr.f32.mxu0 %v42111_v7  ;;  %v22877_v7 = vsub.f32 %v42403_v52, %v22876_v8  ;;  %v22903_v50 = vand.u32 4294901760, %v22902_v4 }
 0x23d   : > { %37259 = vmatpush3.bf16.msra.mxu1 %v37256_v51  ;;  %34269 = vmatprep.mubr.f32.mxu1 %v42246_v5  ;;  %v22868_v51 = vand.u32 4294901760, %v22867_v23  ;;  %v31109_v23 = vld [vmem:[%s39391_s24 + $0x242] sm:$0xff] }
 0x23e   : > { %34276 = vmatprep.subr.mxu1 %v42280_v21  ;;  %37851 = vmatpush3.bf16.msra.mxu0 %v42391_v30 }
 0x23f   : > { %36046 = vmatmul.mubr.f32.gmra.mrb[2].mxu0 %v42125_v36  ;;  %36052 = vmatprep.subr.mxu0 %v42378_v2  ;;  %v22878_v36 = vand.u32 4294901760, %v22877_v7 }
 0x240   : > { %34270 = vmatmul.mubr.f32.gmra.mrb[2].mxu1 %v42259_v15  ;;  %36054 = vmatprep.mubr.f32.mxu0 %v22848_v56 }
 0x241   : > { %34277 = vmatpush3.msra.mxu1 %v42280_v21  ;;  %34278 = vmatprep.mubr.f32.mxu1 %v42244_v20  ;;  %v37264_v21 = vpack.c.bf16 %v7176_v26, %v7169_v60  ;;  %v7690_v60 = vand.u32 4294901760, %v31111_v31  ;;  %v7672_v26 = vsel %vm145_vm1, %v31106_v9, 0  ;;  %v31112_v20 = vld [vmem:[%s45635_s1 + $0x130] sm:$0x7f]  ;;  %v37864_v9 = vpack.c.bf16 %v22894_v35, %v22887_v29 }
 0x242   : > { %37261 = vmatprep.subr.bf16.mxu1 %v42265_v22  ;;  %36053 = vmatpush3.msra.mxu0 %v42378_v2  ;;  %v42479_v56 = vand.u32 4294901760, %v7672_v26 }
 0x243   : > { %36055 = vmatmul.mubr.f32.vlgmr.msra.gmra.mrb[0].mxu0 %v22858_v40  ;;  %37853 = vmatprep.subr.bf16.mxu0 %v37852_v57  ;;  %v7678_v40 = vsel %vm145_vm1, %v31108_v39, 0 }
 0x244   : > { %34279 = vmatmul.mubr.f32.vlgmr.msra.gmra.mrb[0].mxu1 %v42257_v6  ;;  %36057 = vmatprep.mubr.f32.mxu0 %v22868_v51  ;;  %v42483_v6 = vsub.f32 %v31110_v59, %v7687_v19  ;;  %v42500_v7 = vsub.f32 %v7672_v26, %v42479_v56  ;;  %v42502_v4 = vand.u32 4294901760, %v7678_v40 }
 0x245   : > { %37263 = vmatpush3.bf16.msra.mxu1 %v42265_v22  ;;  %34281 = vmatprep.mubr.f32.mxu1 %v42269_v1 }
 0x246   : > { %34288 = vmatprep.subr.mxu1 %v42250_v37  ;;  %37855 = vmatpush3.bf16.msra.mxu0 %v37852_v57  ;;  %v7684_v57 = vsel %vm158_vm0, %v31112_v20, 0 }
 0x247   : > { %36058 = vmatmul.mubr.f32.gmra.mrb[2].mxu0 %v22878_v36  ;;  %36064 = vmatprep.subr.mxu0 %v22903_v50  ;;  %v42506_v51 = vand.u32 4294901760, %v7684_v57 }
 0x248   : > { %34282 = vmatmul.mubr.f32.gmra.mrb[2].mxu1 %v42291_v42  ;;  %36066 = vmatprep.mubr.f32.mxu0 %v42332_v41  ;;  %v7797_v42 = vand.u32 4294901760, %v42483_v6 }
 0x249   : > { %34289 = vmatpush3.msra.mxu1 %v42250_v37  ;;  %34290 = vmatprep.mubr.f32.mxu1 %v7128_v49  ;;  %v7675_v49 = vsel %vm145_vm1, %v31107_v10, 0  ;;  %v42536_v59 = vsub.f32 %v7684_v57, %v42506_v51 }
 0x24a   : > { %37265 = vmatprep.subr.bf16.mxu1 %v37264_v21  ;;  %36065 = vmatpush3.msra.mxu0 %v22903_v50  ;;  %v42491_v1 = vand.u32 4294901760, %v7675_v49  ;;  %v7756_v50 = vand.u32 4294901760, %v42500_v7 }
 0x24b   : > { %36067 = vmatmul.mubr.f32.vlgmr.msra.gmra.mrb[0].mxu0 %v42347_v0  ;;  %37857 = vmatprep.subr.bf16.mxu0 %v37856_v54  ;;  %v42573_v39 = vand.u32 4294901760, %v42536_v59 }
 0x24c   : > { %34291 = vmatmul.mubr.f32.vlgmr.msra.gmra.mrb[0].mxu1 %v7138_v32  ;;  %36069 = vmatprep.mubr.f32.mxu0 %v42367_v46  ;;  %v42485_v32 = vsub.f32 %v31111_v31, %v7690_v60  ;;  %v31297_v31 = vld [vmem:[%s39391_s24 + $0x181] sm:$0xff]  ;;  %v7757_v29 = vsub.f32 %v42500_v7, %v7756_v50 }
 0x24d   : > { %37267 = vmatpush3.bf16.msra.mxu1 %v37264_v21  ;;  %34293 = vmatprep.mubr.f32.mxu1 %v7148_v45  ;;  %v7681_v45 = vsel %vm145_vm1, %v31109_v23, 0  ;;  %v42525_v21 = vsub.f32 %v7678_v40, %v42502_v4  ;;  %v23390_v26 = vsel %vm145_vm1, %v31297_v31, 0  ;;  %v23408_v23 = vand.u32 4294901760, %v42560_v53 }
 0x24e   : > { %34300 = vmatprep.subr.mxu1 %v42317_v16  ;;  %37859 = vmatpush3.bf16.msra.mxu0 %v37856_v54  ;;  %v42515_v36 = vand.u32 4294901760, %v7681_v45  ;;  %v7798_v54 = vsub.f32 %v42483_v6, %v7797_v42  ;;  %v23393_v40 = vsel %vm145_vm1, %v31298_v11, 0  ;;  %v42588_v57 = vand.u32 4294901760, %v23390_v26 }
 0x24f   : > { %36070 = vmatmul.mubr.f32.gmra.mrb[2].mxu0 %v42381_v17  ;;  %36076 = vmatprep.subr.mxu0 %v42406_v44  ;;  %v7776_v35 = vand.u32 4294901760, %v42525_v21 }
 0x250   : > { %34294 = vmatmul.mubr.f32.gmra.mrb[2].mxu1 %v7158_v34  ;;  %36078 = vmatprep.mubr.f32.mxu0 %v42365_v33  ;;  %v7804_v34 = vand.u32 4294901760, %v42485_v32  ;;  %v7799_v33 = vand.u32 4294901760, %v7798_v54  ;;  %v31300_v54 = vld [vmem:[%s39391_s24 + $0x1b1] sm:$0xff] }
 0x251   : > { %34301 = vmatpush3.msra.mxu1 %v42317_v16  ;;  %34302 = vmatprep.mubr.f32.mxu1 %v42223_v12  ;;  %v42513_v16 = vsub.f32 %v7675_v49, %v42491_v1 }
 0x252   : > { %37269 = vmatprep.subr.bf16.mxu1 %v42265_v22  ;;  %36077 = vmatpush3.msra.mxu0 %v42406_v44  ;;  %v42521_v44 = vpack.c.bf16 %v7690_v60, %v7687_v19  ;;  %v42547_v19 = vsub.f32 %v7681_v45, %v42515_v36  ;;  %v42552_v60 = vld [vmem:[%s45635_s1 + $0x378] sm:$0xff]  ;;  %v31303_v45 = vld [vmem:[%s45635_s1 + $0x388] sm:$0x7f] }
 0x253   : > { %36079 = vmatmul.mubr.f32.vlgmr.msra.gmra.mrb[0].mxu0 %v42373_v18  ;;  %37861 = vmatprep.subr.bf16.mxu0 %v42391_v30  ;;  %v7766_v10 = vand.u32 4294901760, %v42513_v16  ;;  %v7758_v18 = vand.u32 4294901760, %v7757_v29  ;;  %v42621_v29 = vsub.f32 %v23390_v26, %v42588_v57 }
 0x254   : > { %34303 = vmatmul.mubr.f32.vlgmr.msra.gmra.mrb[0].mxu1 %v42235_v63  ;;  %36081 = vmatprep.mubr.f32.mxu0 %v42386_v47  ;;  %v7786_v49 = vand.u32 4294901760, %v42547_v19 }
 0x255   : > { %37271 = vmatpush3.bf16.msra.mxu1 %v42265_v22  ;;  %34305 = vmatprep.mubr.f32.mxu1 %v42246_v5  ;;  %v7805_v22 = vsub.f32 %v42485_v32, %v7804_v34  ;;  %v7767_v20 = vsub.f32 %v42513_v16, %v7766_v10 }
 0x256   : > { %34312 = vmatprep.subr.mxu1 %v42250_v37  ;;  %37863 = vmatpush3.bf16.msra.mxu0 %v42391_v30  ;;  %v7787_v11 = vsub.f32 %v42547_v19, %v7786_v49 }
 0x257   : > { %36082 = vmatmul.mubr.f32.gmra.mrb[2].mxu0 %v42403_v52  ;;  %36088 = vmatprep.subr.mxu0 %v42378_v2  ;;  %v7768_v31 = vand.u32 4294901760, %v7767_v20 }
 0x258   : > { %34306 = vmatmul.mubr.f32.gmra.mrb[2].mxu1 %v42259_v15  ;;  %36090 = vmatprep.mubr.f32.mxu0 %v22846_v38  ;;  %v7806_v38 = vand.u32 4294901760, %v7805_v22 }
 0x259   : > { %34313 = vmatpush3.msra.mxu1 %v42250_v37  ;;  %34314 = vmatprep.mubr.f32.mxu1 %v42223_v12  ;;  %v23405_v37 = vand.u32 4294901760, %v42552_v60  ;;  %v31299_v12 = vld [vmem:[%s39391_s24 + $0x1a1] sm:$0xff] }
 0x25a   : > { %37273 = vmatprep.subr.bf16.mxu1 %v42521_v44  ;;  %36089 = vmatpush3.msra.mxu0 %v42378_v2  ;;  %v37276_v47 = vpack.c.bf16 %v7806_v38, %v7799_v33 }
 0x25b   : > { %36091 = vmatmul.mubr.f32.vlgmr.msra.gmra.mrb[0].mxu0 %v22856_v62  ;;  %37865 = vmatprep.subr.bf16.mxu0 %v37864_v9  ;;  %v7777_v62 = vsub.f32 %v42525_v21, %v7776_v35  ;;  %v42606_v22 = vsub.f32 %v42552_v60, %v23405_v37  ;;  %v23402_v60 = vsel %vm158_vm0, %v31303_v45, 0  ;;  %v42647_v45 = vpack.c.bf16 %v23408_v23, %v23405_v37 }
 0x25c   : > { %34315 = vmatmul.mubr.f32.vlgmr.msra.gmra.mrb[0].mxu1 %v42235_v63  ;;  %36093 = vmatprep.mubr.f32.mxu0 %v22866_v55  ;;  %v23396_v63 = vsel %vm145_vm1, %v31299_v12, 0  ;;  %v7812_v55 = vsub.f32 %v42536_v59, %v42573_v39  ;;  %v42634_v26 = vand.u32 4294901760, %v23402_v60 }
 0x25d   : > { %37275 = vmatpush3.bf16.msra.mxu1 %v42521_v44  ;;  %34317 = vmatprep.mubr.f32.mxu1 %v42246_v5  ;;  %v42603_v5 = vand.u32 4294901760, %v23393_v40  ;;  %v42623_v52 = vand.u32 4294901760, %v23396_v63  ;;  %v7778_v33 = vand.u32 4294901760, %v7777_v62  ;;  %v23515_v38 = vand.u32 4294901760, %v42606_v22 }
 0x25e   : > { %34324 = vmatprep.subr.mxu1 %v42506_v51  ;;  %37867 = vmatpush3.bf16.msra.mxu0 %v37864_v9  ;;  %v42615_v9 = vsub.f32 %v42560_v53, %v23408_v23  ;;  %v7813_v53 = vand.u32 4294901760, %v7812_v55  ;;  %v37280_v62 = vpack.c.bf16 %v42485_v32, %v42483_v6  ;;  %v31114_v6 = vld [vmem:[%s39391_s24 + $0x173] sm:$0xff] }
 0x25f   : > { %36094 = vmatmul.mubr.f32.gmra.mrb[2].mxu0 %v22876_v8  ;;  %36100 = vmatprep.subr.mxu0 %v42422_v43  ;;  %v23399_v8 = vsel %vm145_vm1, %v31300_v54, 0  ;;  %v23516_v55 = vsub.f32 %v42606_v22, %v23515_v38 }
 0x260   : > { %34318 = vmatmul.mubr.f32.gmra.mrb[2].mxu1 %v42259_v15  ;;  %36102 = vmatprep.mubr.f32.mxu0 %v42332_v41  ;;  %v42629_v15 = vsub.f32 %v23393_v40, %v42603_v5  ;;  %v23522_v12 = vand.u32 4294901760, %v42615_v9  ;;  %v42637_v20 = vand.u32 4294901760, %v23399_v8  ;;  %v42642_v40 = vsub.f32 %v23396_v63, %v42623_v52 }
 0x261   : > { %34325 = vmatpush3.msra.mxu1 %v42506_v51  ;;  %34326 = vmatprep.mubr.f32.mxu1 %v7758_v18  ;;  %v7788_v18 = vand.u32 4294901760, %v7787_v11 }
 0x262   : > { %37277 = vmatprep.subr.bf16.mxu1 %v37276_v47  ;;  %36101 = vmatpush3.msra.mxu0 %v42422_v43  ;;  %v23474_v43 = vand.u32 4294901760, %v42621_v29  ;;  %v23484_v54 = vand.u32 4294901760, %v42629_v15  ;;  %v23523_v63 = vsub.f32 %v42615_v9, %v23522_v12  ;;  %v23494_v23 = vand.u32 4294901760, %v42642_v40 }
 0x263   : > { %36103 = vmatmul.mubr.f32.vlgmr.msra.gmra.mrb[0].mxu0 %v42347_v0  ;;  %37869 = vmatprep.subr.bf16.mxu0 %v42391_v30 }
 0x264   : > { %34327 = vmatmul.mubr.f32.vlgmr.msra.gmra.mrb[0].mxu1 %v7768_v31  ;;  %36105 = vmatprep.mubr.f32.mxu0 %v42367_v46  ;;  %v23475_v37 = vsub.f32 %v42621_v29, %v23474_v43  ;;  %v23485_v31 = vsub.f32 %v42629_v15, %v23484_v54  ;;  %v23524_v11 = vand.u32 4294901760, %v23523_v63  ;;  %v37880_v63 = vpack.c.bf16 %v42615_v9, %v42606_v22  ;;  %v42816_v22 = vld [vmem:[%s45635_s1 + $0x398] sm:$0xff]  ;;  %v31305_v9 = vld [vmem:[%s39391_s24 + $0x241] sm:$0xff] }
 0x265   : > { %37279 = vmatpush3.bf16.msra.mxu1 %v37276_v47  ;;  %34329 = vmatprep.mubr.f32.mxu1 %v7778_v33  ;;  %v42659_v47 = vsub.f32 %v23399_v8, %v42637_v20  ;;  %v23495_v33 = vsub.f32 %v42642_v40, %v23494_v23 }
 0x266   : > { %34336 = vmatprep.subr.mxu1 %v7813_v53  ;;  %37871 = vmatpush3.bf16.msra.mxu0 %v42391_v30  ;;  %v42662_v30 = vsub.f32 %v23402_v60, %v42634_v26 }
 0x267   : > { %36106 = vmatmul.mubr.f32.gmra.mrb[2].mxu0 %v42381_v17  ;;  %36112 = vmatprep.subr.mxu0 %v42378_v2  ;;  %v23504_v60 = vand.u32 4294901760, %v42659_v47 }
 0x268   : > { %34330 = vmatmul.mubr.f32.gmra.mrb[2].mxu1 %v7788_v18  ;;  %36114 = vmatprep.mubr.f32.mxu0 %v42332_v41  ;;  %v23517_v41 = vand.u32 4294901760, %v23516_v55  ;;  %v42678_v8 = vand.u32 4294901760, %v42662_v30 }
 0x269   : > { %34337 = vmatpush3.msra.mxu1 %v7813_v53  ;;  %34338 = vmatprep.mubr.f32.mxu1 %v42479_v56 }
 0x26a   : > { %37281 = vmatprep.subr.bf16.mxu1 %v37280_v62  ;;  %36113 = vmatpush3.msra.mxu0 %v42378_v2  ;;  %v23476_v2 = vand.u32 4294901760, %v23475_v37  ;;  %v37876_v53 = vpack.c.bf16 %v23524_v11, %v23517_v41  ;;  %v23530_v18 = vsub.f32 %v42662_v30, %v42678_v8  ;;  %v31117_v37 = vld [vmem:[%s45635_s1 + $0x138] sm:$0xff]  ;;  %v31113_v41 = vld [vmem:[%s39391_s24 + $0x163] sm:$0xff] }
 0x26b   : > { %36115 = vmatmul.mubr.f32.vlgmr.msra.gmra.mrb[0].mxu0 %v42347_v0  ;;  %37873 = vmatprep.subr.bf16.mxu0 %v42647_v45  ;;  %v23486_v0 = vand.u32 4294901760, %v23485_v31  ;;  %v31118_v31 = vld [vmem:[%s45635_s1 + $0x140] sm:$0xff]  ;;  %v8315_v32 = vand.u32 4294901760, %v31117_v37 }
 0x26c   : > { %34339 = vmatmul.mubr.f32.vlgmr.msra.gmra.mrb[0].mxu1 %v42491_v1  ;;  %36117 = vmatprep.mubr.f32.mxu0 %v42367_v46  ;;  %v23505_v46 = vsub.f32 %v42659_v47, %v23504_v60  ;;  %v23531_v55 = vand.u32 4294901760, %v23530_v18  ;;  %v31115_v11 = vld [vmem:[%s39391_s24 + $0x183] sm:$0xff] }
 0x26d   : > { %37283 = vmatpush3.bf16.msra.mxu1 %v37280_v62  ;;  %34341 = vmatprep.mubr.f32.mxu1 %v42502_v4  ;;  %v23496_v62 = vand.u32 4294901760, %v23495_v33  ;;  %v31116_v33 = vld [vmem:[%s39391_s24 + $0x193] sm:$0xff] }
 0x26e   : > { %34348 = vmatprep.subr.mxu1 %v42536_v59  ;;  %37875 = vmatpush3.bf16.msra.mxu0 %v42647_v45 }
 0x26f   : > { %36118 = vmatmul.mubr.f32.gmra.mrb[2].mxu0 %v42381_v17  ;;  %36124 = vmatprep.subr.mxu0 %v42634_v26  ;;  %v23506_v17 = vand.u32 4294901760, %v23505_v46 }
 0x270   : > { %34342 = vmatmul.mubr.f32.gmra.mrb[2].mxu1 %v42515_v36  ;;  %36126 = vmatprep.mubr.f32.mxu0 %v23476_v2 }
 0x271   : > { %34349 = vmatpush3.msra.mxu1 %v42536_v59  ;;  %34350 = vmatprep.mubr.f32.mxu1 %v42500_v7  ;;  %v37288_v59 = vpack.c.bf16 %v7804_v34, %v7797_v42  ;;  %v8318_v42 = vand.u32 4294901760, %v31118_v31  ;;  %v8300_v34 = vsel %vm145_vm1, %v31113_v41, 0  ;;  %v31119_v7 = vld [vmem:[%s45635_s1 + $0x148] sm:$0x7f]  ;;  %v37888_v41 = vpack.c.bf16 %v23522_v12, %v23515_v38 }
 0x272   : > { %37285 = vmatprep.subr.bf16.mxu1 %v42521_v44  ;;  %36125 = vmatpush3.msra.mxu0 %v42634_v26  ;;  %v42735_v2 = vand.u32 4294901760, %v8300_v34 }
 0x273   : > { %36127 = vmatmul.mubr.f32.vlgmr.msra.gmra.mrb[0].mxu0 %v23486_v0  ;;  %37877 = vmatprep.subr.bf16.mxu0 %v37876_v53  ;;  %v8306_v0 = vsel %vm145_vm1, %v31115_v11, 0 }
 0x274   : > { %34351 = vmatmul.mubr.f32.vlgmr.msra.gmra.mrb[0].mxu1 %v42513_v16  ;;  %36129 = vmatprep.mubr.f32.mxu0 %v23496_v62  ;;  %v42739_v16 = vsub.f32 %v31117_v37, %v8315_v32  ;;  %v42756_v46 = vsub.f32 %v8300_v34, %v42735_v2  ;;  %v42758_v18 = vand.u32 4294901760, %v8306_v0 }
 0x275   : > { %37287 = vmatpush3.bf16.msra.mxu1 %v42521_v44  ;;  %34353 = vmatprep.mubr.f32.mxu1 %v42525_v21 }
 0x276   : > { %34360 = vmatprep.subr.mxu1 %v42506_v51  ;;  %37879 = vmatpush3.bf16.msra.mxu0 %v37876_v53  ;;  %v8312_v53 = vsel %vm158_vm0, %v31119_v7, 0 }
 0x277   : > { %36130 = vmatmul.mubr.f32.gmra.mrb[2].mxu0 %v23506_v17  ;;  %36136 = vmatprep.subr.mxu0 %v23531_v55  ;;  %v42762_v62 = vand.u32 4294901760, %v8312_v53 }
 0x278   : > { %34354 = vmatmul.mubr.f32.gmra.mrb[2].mxu1 %v42547_v19  ;;  %36138 = vmatprep.mubr.f32.mxu0 %v42588_v57  ;;  %v8425_v19 = vand.u32 4294901760, %v42739_v16 }
 0x279   : > { %34361 = vmatpush3.msra.mxu1 %v42506_v51  ;;  %34362 = vmatprep.mubr.f32.mxu1 %v7756_v50  ;;  %v8303_v50 = vsel %vm145_vm1, %v31114_v6, 0  ;;  %v42792_v37 = vsub.f32 %v8312_v53, %v42762_v62 }
 0x27a   : > { %37289 = vmatprep.subr.bf16.mxu1 %v37288_v59  ;;  %36137 = vmatpush3.msra.mxu0 %v23531_v55  ;;  %v42747_v21 = vand.u32 4294901760, %v8303_v50  ;;  %v8384_v55 = vand.u32 4294901760, %v42756_v46 }
 0x27b   : > { %36139 = vmatmul.mubr.f32.vlgmr.msra.gmra.mrb[0].mxu0 %v42603_v5  ;;  %37881 = vmatprep.subr.bf16.mxu0 %v37880_v63  ;;  %v42829_v11 = vand.u32 4294901760, %v42792_v37 }
 0x27c   : > { %34363 = vmatmul.mubr.f32.vlgmr.msra.gmra.mrb[0].mxu1 %v7766_v10  ;;  %36141 = vmatprep.mubr.f32.mxu0 %v42623_v52  ;;  %v42741_v10 = vsub.f32 %v31118_v31, %v8318_v42  ;;  %v31304_v31 = vld [vmem:[%s39391_s24 + $0x231] sm:$0xff]  ;;  %v8385_v38 = vsub.f32 %v42756_v46, %v8384_v55 }
 0x27d   : > { %37291 = vmatpush3.bf16.msra.mxu1 %v37288_v59  ;;  %34365 = vmatprep.mubr.f32.mxu1 %v7776_v35  ;;  %v8309_v35 = vsel %vm145_vm1, %v31116_v33, 0  ;;  %v42781_v59 = vsub.f32 %v8306_v0, %v42758_v18  ;;  %v24018_v34 = vsel %vm145_vm1, %v31304_v31, 0  ;;  %v24036_v33 = vand.u32 4294901760, %v42816_v22 }
 0x27e   : > { %34372 = vmatprep.subr.mxu1 %v42573_v39  ;;  %37883 = vmatpush3.bf16.msra.mxu0 %v37880_v63  ;;  %v42771_v17 = vand.u32 4294901760, %v8309_v35  ;;  %v8426_v63 = vsub.f32 %v42739_v16, %v8425_v19  ;;  %v24021_v0 = vsel %vm145_vm1, %v31305_v9, 0  ;;  %v42844_v53 = vand.u32 4294901760, %v24018_v34 }
 0x27f   : > { %36142 = vmatmul.mubr.f32.gmra.mrb[2].mxu0 %v42637_v20  ;;  %36148 = vmatprep.subr.mxu0 %v42662_v30  ;;  %v8404_v12 = vand.u32 4294901760, %v42781_v59 }
 0x280   : > { %34366 = vmatmul.mubr.f32.gmra.mrb[2].mxu1 %v7786_v49  ;;  %36150 = vmatprep.mubr.f32.mxu0 %v42621_v29  ;;  %v8432_v49 = vand.u32 4294901760, %v42741_v10  ;;  %v8427_v29 = vand.u32 4294901760, %v8426_v63  ;;  %v31307_v63 = vld [vmem:[%s39391_s24 + $0x261] sm:$0xff] }
 0x281   : > { %34373 = vmatpush3.msra.mxu1 %v42573_v39  ;;  %34374 = vmatprep.mubr.f32.mxu1 %v42479_v56  ;;  %v42769_v39 = vsub.f32 %v8303_v50, %v42747_v21 }
 0x282   : > { %37293 = vmatprep.subr.bf16.mxu1 %v42521_v44  ;;  %36149 = vmatpush3.msra.mxu0 %v42662_v30  ;;  %v42777_v30 = vpack.c.bf16 %v8318_v42, %v8315_v32  ;;  %v42803_v32 = vsub.f32 %v8309_v35, %v42771_v17  ;;  %v42808_v42 = vld [vmem:[%s45635_s1 + $0x390] sm:$0xff]  ;;  %v31310_v35 = vld [vmem:[%s45635_s1 + $0x3a0] sm:$0x7f] }
 0x283   : > { %36151 = vmatmul.mubr.f32.vlgmr.msra.gmra.mrb[0].mxu0 %v42629_v15  ;;  %37885 = vmatprep.subr.bf16.mxu0 %v42647_v45  ;;  %v8394_v6 = vand.u32 4294901760, %v42769_v39  ;;  %v8386_v15 = vand.u32 4294901760, %v8385_v38  ;;  %v42877_v38 = vsub.f32 %v24018_v34, %v42844_v53 }
 0x284   : > { %34375 = vmatmul.mubr.f32.vlgmr.msra.gmra.mrb[0].mxu1 %v42491_v1  ;;  %36153 = vmatprep.mubr.f32.mxu0 %v42642_v40  ;;  %v8414_v50 = vand.u32 4294901760, %v42803_v32 }
 0x285   : > { %37295 = vmatpush3.bf16.msra.mxu1 %v42521_v44  ;;  %34377 = vmatprep.mubr.f32.mxu1 %v42502_v4  ;;  %v8433_v44 = vsub.f32 %v42741_v10, %v8432_v49  ;;  %v8395_v7 = vsub.f32 %v42769_v39, %v8394_v6 }
 0x286   : > { %34384 = vmatprep.subr.mxu1 %v42506_v51  ;;  %37887 = vmatpush3.bf16.msra.mxu0 %v42647_v45  ;;  %v8415_v9 = vsub.f32 %v42803_v32, %v8414_v50 }
 0x287   : > { %36154 = vmatmul.mubr.f32.gmra.mrb[2].mxu0 %v42659_v47  ;;  %36160 = vmatprep.subr.mxu0 %v42634_v26  ;;  %v8396_v31 = vand.u32 4294901760, %v8395_v7 }
 0x288   : > { %34378 = vmatmul.mubr.f32.gmra.mrb[2].mxu1 %v42515_v36  ;;  %36162 = vmatprep.mubr.f32.mxu0 %v23474_v43  ;;  %v8434_v43 = vand.u32 4294901760, %v8433_v44 }
 0x289   : > { %34385 = vmatpush3.msra.mxu1 %v42506_v51  ;;  %34386 = vmatprep.mubr.f32.mxu1 %v42479_v56  ;;  %v24033_v51 = vand.u32 4294901760, %v42808_v42  ;;  %v31306_v56 = vld [vmem:[%s39391_s24 + $0x251] sm:$0xff] }
 0x28a   : > { %37297 = vmatprep.subr.bf16.mxu1 %v42777_v30  ;;  %36161 = vmatpush3.msra.mxu0 %v42634_v26  ;;  %v37300_v40 = vpack.c.bf16 %v8434_v43, %v8427_v29 }
 0x28b   : > { %36163 = vmatmul.mubr.f32.vlgmr.msra.gmra.mrb[0].mxu0 %v23484_v54  ;;  %37889 = vmatprep.subr.bf16.mxu0 %v37888_v41  ;;  %v8405_v54 = vsub.f32 %v42781_v59, %v8404_v12  ;;  %v42862_v44 = vsub.f32 %v42808_v42, %v24033_v51  ;;  %v24030_v42 = vsel %vm158_vm0, %v31310_v35, 0  ;;  %v42903_v35 = vpack.c.bf16 %v24036_v33, %v24033_v51 }
 0x28c   : > { %34387 = vmatmul.mubr.f32.vlgmr.msra.gmra.mrb[0].mxu1 %v42491_v1  ;;  %36165 = vmatprep.mubr.f32.mxu0 %v23494_v23  ;;  %v24024_v1 = vsel %vm145_vm1, %v31306_v56, 0  ;;  %v8440_v23 = vsub.f32 %v42792_v37, %v42829_v11  ;;  %v42890_v34 = vand.u32 4294901760, %v24030_v42 }
 0x28d   : > { %37299 = vmatpush3.bf16.msra.mxu1 %v42777_v30  ;;  %34389 = vmatprep.mubr.f32.mxu1 %v42502_v4  ;;  %v42859_v4 = vand.u32 4294901760, %v24021_v0  ;;  %v42879_v47 = vand.u32 4294901760, %v24024_v1  ;;  %v8406_v29 = vand.u32 4294901760, %v8405_v54  ;;  %v24143_v43 = vand.u32 4294901760, %v42862_v44 }
 0x28e   : > { %34396 = vmatprep.subr.mxu1 %v42762_v62  ;;  %37891 = vmatpush3.bf16.msra.mxu0 %v37888_v41  ;;  %v42871_v41 = vsub.f32 %v42816_v22, %v24036_v33  ;;  %v8441_v22 = vand.u32 4294901760, %v8440_v23  ;;  %v37304_v54 = vpack.c.bf16 %v42741_v10, %v42739_v16  ;;  %v31123_v16 = vld [vmem:[%s39391_s24 + $0x20] sm:$0xff] }
 0x28f   : > { %36166 = vmatmul.mubr.f32.gmra.mrb[2].mxu0 %v23504_v60  ;;  %36172 = vmatprep.subr.mxu0 %v42678_v8  ;;  %v24027_v60 = vsel %vm145_vm1, %v31307_v63, 0  ;;  %v24144_v23 = vsub.f32 %v42862_v44, %v24143_v43 }
 0x290   : > { %34390 = vmatmul.mubr.f32.gmra.mrb[2].mxu1 %v42515_v36  ;;  %36174 = vmatprep.mubr.f32.mxu0 %v42588_v57  ;;  %v42885_v36 = vsub.f32 %v24021_v0, %v42859_v4  ;;  %v24150_v56 = vand.u32 4294901760, %v42871_v41  ;;  %v42893_v7 = vand.u32 4294901760, %v24027_v60  ;;  %v42898_v0 = vsub.f32 %v24024_v1, %v42879_v47 }
 0x291   : > { %34397 = vmatpush3.msra.mxu1 %v42762_v62  ;;  %34398 = vmatprep.mubr.f32.mxu1 %v8386_v15  ;;  %v8416_v15 = vand.u32 4294901760, %v8415_v9 }
 0x292   : > { %37301 = vmatprep.subr.bf16.mxu1 %v37300_v40  ;;  %36173 = vmatpush3.msra.mxu0 %v42678_v8  ;;  %v24102_v8 = vand.u32 4294901760, %v42877_v38  ;;  %v24112_v63 = vand.u32 4294901760, %v42885_v36  ;;  %v24151_v1 = vsub.f32 %v42871_v41, %v24150_v56  ;;  %v24122_v33 = vand.u32 4294901760, %v42898_v0 }
 0x293   : > { %36175 = vmatmul.mubr.f32.vlgmr.msra.gmra.mrb[0].mxu0 %v42603_v5  ;;  %37893 = vmatprep.subr.bf16.mxu0 %v42647_v45 }
 0x294   : > { %34399 = vmatmul.mubr.f32.vlgmr.msra.gmra.mrb[0].mxu1 %v8396_v31  ;;  %36177 = vmatprep.mubr.f32.mxu0 %v42623_v52  ;;  %v24103_v51 = vsub.f32 %v42877_v38, %v24102_v8  ;;  %v24113_v31 = vsub.f32 %v42885_v36, %v24112_v63  ;;  %v24152_v9 = vand.u32 4294901760, %v24151_v1  ;;  %v37904_v1 = vpack.c.bf16 %v42871_v41, %v42862_v44  ;;  %v43072_v44 = vld [vmem:[%s45635_s1 + $0x3b0] sm:$0xff] }
 0x295   : > { %37303 = vmatpush3.bf16.msra.mxu1 %v37300_v40  ;;  %34401 = vmatprep.mubr.f32.mxu1 %v8406_v29  ;;  %v42915_v40 = vsub.f32 %v24027_v60, %v42893_v7  ;;  %v24123_v29 = vsub.f32 %v42898_v0, %v24122_v33  ;;  %v31312_v41 = vld [vmem:[%s39391_s24 + $0x192] sm:$0xff] }
 0x296   : > { %34408 = vmatprep.subr.mxu1 %v8441_v22  ;;  %37895 = vmatpush3.bf16.msra.mxu0 %v42647_v45  ;;  %v42918_v45 = vsub.f32 %v24030_v42, %v42890_v34 }
 0x297   : > { %36178 = vmatmul.mubr.f32.gmra.mrb[2].mxu0 %v42637_v20  ;;  %36184 = vmatprep.subr.mxu0 %v42634_v26  ;;  %v24132_v42 = vand.u32 4294901760, %v42915_v40 }
 0x298   : > { %34402 = vmatmul.mubr.f32.gmra.mrb[2].mxu1 %v8416_v15  ;;  %36186 = vmatprep.mubr.f32.mxu0 %v42588_v57  ;;  %v24145_v57 = vand.u32 4294901760, %v24144_v23  ;;  %v42934_v60 = vand.u32 4294901760, %v42918_v45 }
 0x299   : > { %34409 = vmatpush3.msra.mxu1 %v8441_v22  ;;  %34410 = vmatprep.mubr.f32.mxu1 %v42735_v2 }
 0x29a   : > { %37305 = vmatprep.subr.bf16.mxu1 %v37304_v54  ;;  %36185 = vmatpush3.msra.mxu0 %v42634_v26  ;;  %v24104_v26 = vand.u32 4294901760, %v24103_v51  ;;  %v37900_v22 = vpack.c.bf16 %v24152_v9, %v24145_v57  ;;  %v24158_v15 = vsub.f32 %v42918_v45, %v42934_v60  ;;  %v31126_v51 = vld [vmem:[%s45635_s1 + $0x150] sm:$0xff] }
 0x29b   : > { %36187 = vmatmul.mubr.f32.vlgmr.msra.gmra.mrb[0].mxu0 %v42603_v5  ;;  %37897 = vmatprep.subr.bf16.mxu0 %v42903_v35  ;;  %v24114_v5 = vand.u32 4294901760, %v24113_v31  ;;  %v31127_v31 = vld [vmem:[%s45635_s1 + $0x158] sm:$0xff]  ;;  %v31122_v57 = vld [vmem:[%s39391_s24 + $0x10] sm:$0xff]  ;;  %v8946_v10 = vand.u32 4294901760, %v31126_v51 }
 0x29c   : > { %34411 = vmatmul.mubr.f32.vlgmr.msra.gmra.mrb[0].mxu1 %v42747_v21  ;;  %36189 = vmatprep.mubr.f32.mxu0 %v42623_v52  ;;  %v24133_v52 = vsub.f32 %v42915_v40, %v24132_v42  ;;  %v24159_v23 = vand.u32 4294901760, %v24158_v15  ;;  %v31124_v9 = vld [vmem:[%s39391_s24 + $0x30] sm:$0xff] }
 0x29d   : > { %37307 = vmatpush3.bf16.msra.mxu1 %v37304_v54  ;;  %34413 = vmatprep.mubr.f32.mxu1 %v42758_v18  ;;  %v24124_v54 = vand.u32 4294901760, %v24123_v29  ;;  %v31125_v29 = vld [vmem:[%s39391_s24 + $0x40] sm:$0xff] }
 0x29e   : > { %34420 = vmatprep.subr.mxu1 %v42792_v37  ;;  %37899 = vmatpush3.bf16.msra.mxu0 %v42903_v35 }
 0x29f   : > { %36190 = vmatmul.mubr.f32.gmra.mrb[2].mxu0 %v42637_v20  ;;  %36196 = vmatprep.subr.mxu0 %v42890_v34  ;;  %v24134_v20 = vand.u32 4294901760, %v24133_v52 }
 0x2a0   : > { %34414 = vmatmul.mubr.f32.gmra.mrb[2].mxu1 %v42771_v17  ;;  %36198 = vmatprep.mubr.f32.mxu0 %v24104_v26 }
 0x2a1   : > { %34421 = vmatpush3.msra.mxu1 %v42792_v37  ;;  %34422 = vmatprep.mubr.f32.mxu1 %v42756_v46  ;;  %v37312_v37 = vpack.c.bf16 %v8432_v49, %v8425_v19  ;;  %v8949_v19 = vand.u32 4294901760, %v31127_v31  ;;  %v8931_v49 = vsel %vm145_vm1, %v31122_v57, 0  ;;  %v31128_v46 = vld [vmem:[%s45635_s1 + $0x160] sm:$0x7f]  ;;  %v37912_v57 = vpack.c.bf16 %v24150_v56, %v24143_v43 }
 0x2a2   : > { %37309 = vmatprep.subr.bf16.mxu1 %v42777_v30  ;;  %36197 = vmatpush3.msra.mxu0 %v42890_v34  ;;  %v42991_v26 = vand.u32 4294901760, %v8931_v49 }
 0x2a3   : > { %36199 = vmatmul.mubr.f32.vlgmr.msra.gmra.mrb[0].mxu0 %v24114_v5  ;;  %37901 = vmatprep.subr.bf16.mxu0 %v37900_v22  ;;  %v8937_v5 = vsel %vm145_vm1, %v31124_v9, 0 }
 0x2a4   : > { %34423 = vmatmul.mubr.f32.vlgmr.msra.gmra.mrb[0].mxu1 %v42769_v39  ;;  %36201 = vmatprep.mubr.f32.mxu0 %v24124_v54  ;;  %v42995_v39 = vsub.f32 %v31126_v51, %v8946_v10  ;;  %v43012_v52 = vsub.f32 %v8931_v49, %v42991_v26  ;;  %v43014_v15 = vand.u32 4294901760, %v8937_v5 }
 0x2a5   : > { %37311 = vmatpush3.bf16.msra.mxu1 %v42777_v30  ;;  %34425 = vmatprep.mubr.f32.mxu1 %v42781_v59 }
 0x2a6   : > { %34432 = vmatprep.subr.mxu1 %v42762_v62  ;;  %37903 = vmatpush3.bf16.msra.mxu0 %v37900_v22  ;;  %v8943_v22 = vsel %vm158_vm0, %v31128_v46, 0 }
 0x2a7   : > { %36202 = vmatmul.mubr.f32.gmra.mrb[2].mxu0 %v24134_v20  ;;  %36208 = vmatprep.subr.mxu0 %v24159_v23  ;;  %v43018_v54 = vand.u32 4294901760, %v8943_v22 }
 0x2a8   : > { %34426 = vmatmul.mubr.f32.gmra.mrb[2].mxu1 %v42803_v32  ;;  %36210 = vmatprep.mubr.f32.mxu0 %v42844_v53  ;;  %v9056_v32 = vand.u32 4294901760, %v42995_v39 }
 0x2a9   : > { %34433 = vmatpush3.msra.mxu1 %v42762_v62  ;;  %34434 = vmatprep.mubr.f32.mxu1 %v8384_v55  ;;  %v8934_v55 = vsel %vm145_vm1, %v31123_v16, 0  ;;  %v43048_v51 = vsub.f32 %v8943_v22, %v43018_v54 }
 0x2aa   : > { %37313 = vmatprep.subr.bf16.mxu1 %v37312_v37  ;;  %36209 = vmatpush3.msra.mxu0 %v24159_v23  ;;  %v43003_v59 = vand.u32 4294901760, %v8934_v55  ;;  %v9015_v23 = vand.u32 4294901760, %v43012_v52 }
 0x2ab   : > { %36211 = vmatmul.mubr.f32.vlgmr.msra.gmra.mrb[0].mxu0 %v42859_v4  ;;  %37905 = vmatprep.subr.bf16.mxu0 %v37904_v1  ;;  %v43085_v9 = vand.u32 4294901760, %v43048_v51 }
 0x2ac   : > { %34435 = vmatmul.mubr.f32.vlgmr.msra.gmra.mrb[0].mxu1 %v8394_v6  ;;  %36213 = vmatprep.mubr.f32.mxu0 %v42879_v47  ;;  %v42997_v6 = vsub.f32 %v31127_v31, %v8949_v19  ;;  %v31311_v31 = vld [vmem:[%s39391_s24 + $0x182] sm:$0xff]  ;;  %v9016_v43 = vsub.f32 %v43012_v52, %v9015_v23 }
 0x2ad   : > { %37315 = vmatpush3.bf16.msra.mxu1 %v37312_v37  ;;  %34437 = vmatprep.mubr.f32.mxu1 %v8404_v12  ;;  %v8940_v12 = vsel %vm145_vm1, %v31125_v29, 0  ;;  %v43037_v37 = vsub.f32 %v8937_v5, %v43014_v15  ;;  %v24646_v49 = vsel %vm145_vm1, %v31311_v31, 0  ;;  %v24664_v29 = vand.u32 4294901760, %v43072_v44 }
 0x2ae   : > { %34444 = vmatprep.subr.mxu1 %v42829_v11  ;;  %37907 = vmatpush3.bf16.msra.mxu0 %v37904_v1  ;;  %v43027_v20 = vand.u32 4294901760, %v8940_v12  ;;  %v9057_v1 = vsub.f32 %v42995_v39, %v9056_v32  ;;  %v24649_v5 = vsel %vm145_vm1, %v31312_v41, 0  ;;  %v43100_v22 = vand.u32 4294901760, %v24646_v49 }
 0x2af   : > { %36214 = vmatmul.mubr.f32.gmra.mrb[2].mxu0 %v42893_v7  ;;  %36220 = vmatprep.subr.mxu0 %v42918_v45  ;;  %v9035_v56 = vand.u32 4294901760, %v43037_v37 }
 0x2b0   : > { %34438 = vmatmul.mubr.f32.gmra.mrb[2].mxu1 %v8414_v50  ;;  %36222 = vmatprep.mubr.f32.mxu0 %v42877_v38  ;;  %v9063_v50 = vand.u32 4294901760, %v42997_v6  ;;  %v9058_v38 = vand.u32 4294901760, %v9057_v1  ;;  %v31314_v1 = vld [vmem:[%s39391_s24 + $0x1b2] sm:$0xff] }
 0x2b1   : > { %34445 = vmatpush3.msra.mxu1 %v42829_v11  ;;  %34446 = vmatprep.mubr.f32.mxu1 %v42735_v2  ;;  %v43025_v11 = vsub.f32 %v8934_v55, %v43003_v59 }
 0x2b2   : > { %37317 = vmatprep.subr.bf16.mxu1 %v42777_v30  ;;  %36221 = vmatpush3.msra.mxu0 %v42918_v45  ;;  %v43033_v45 = vpack.c.bf16 %v8949_v19, %v8946_v10  ;;  %v43059_v10 = vsub.f32 %v8940_v12, %v43027_v20  ;;  %v43064_v19 = vld [vmem:[%s45635_s1 + $0x3a8] sm:$0xff]  ;;  %v31317_v12 = vld [vmem:[%s45635_s1 + $0x3b8] sm:$0x7f] }
 0x2b3   : > { %36223 = vmatmul.mubr.f32.vlgmr.msra.gmra.mrb[0].mxu0 %v42885_v36  ;;  %37909 = vmatprep.subr.bf16.mxu0 %v42903_v35  ;;  %v9025_v16 = vand.u32 4294901760, %v43025_v11  ;;  %v9017_v36 = vand.u32 4294901760, %v9016_v43  ;;  %v43133_v43 = vsub.f32 %v24646_v49, %v43100_v22 }
 0x2b4   : > { %34447 = vmatmul.mubr.f32.vlgmr.msra.gmra.mrb[0].mxu1 %v42747_v21  ;;  %36225 = vmatprep.mubr.f32.mxu0 %v42898_v0  ;;  %v9045_v55 = vand.u32 4294901760, %v43059_v10 }
 0x2b5   : > { %37319 = vmatpush3.bf16.msra.mxu1 %v42777_v30  ;;  %34449 = vmatprep.mubr.f32.mxu1 %v42758_v18  ;;  %v9064_v30 = vsub.f32 %v42997_v6, %v9063_v50  ;;  %v9026_v46 = vsub.f32 %v43025_v11, %v9025_v16 }
 0x2b6   : > { %34456 = vmatprep.subr.mxu1 %v42762_v62  ;;  %37911 = vmatpush3.bf16.msra.mxu0 %v42903_v35  ;;  %v9046_v41 = vsub.f32 %v43059_v10, %v9045_v55 }
 0x2b7   : > { %36226 = vmatmul.mubr.f32.gmra.mrb[2].mxu0 %v42915_v40  ;;  %36232 = vmatprep.subr.mxu0 %v42890_v34  ;;  %v9027_v31 = vand.u32 4294901760, %v9026_v46 }
 0x2b8   : > { %34450 = vmatmul.mubr.f32.gmra.mrb[2].mxu1 %v42771_v17  ;;  %36234 = vmatprep.mubr.f32.mxu0 %v24102_v8  ;;  %v9065_v8 = vand.u32 4294901760, %v9064_v30 }
 0x2b9   : > { %34457 = vmatpush3.msra.mxu1 %v42762_v62  ;;  %34458 = vmatprep.mubr.f32.mxu1 %v42735_v2  ;;  %v24661_v62 = vand.u32 4294901760, %v43064_v19  ;;  %v31313_v2 = vld [vmem:[%s39391_s24 + $0x1a2] sm:$0xff] }
 0x2ba   : > { %37321 = vmatprep.subr.bf16.mxu1 %v43033_v45  ;;  %36233 = vmatpush3.msra.mxu0 %v42890_v34  ;;  %v37324_v0 = vpack.c.bf16 %v9065_v8, %v9058_v38 }
 0x2bb   : > { %36235 = vmatmul.mubr.f32.vlgmr.msra.gmra.mrb[0].mxu0 %v24112_v63  ;;  %37913 = vmatprep.subr.bf16.mxu0 %v37912_v57  ;;  %v9036_v63 = vsub.f32 %v43037_v37, %v9035_v56  ;;  %v43118_v30 = vsub.f32 %v43064_v19, %v24661_v62  ;;  %v24658_v19 = vsel %vm158_vm0, %v31317_v12, 0  ;;  %v43159_v12 = vpack.c.bf16 %v24664_v29, %v24661_v62 }
 0x2bc   : > { %34459 = vmatmul.mubr.f32.vlgmr.msra.gmra.mrb[0].mxu1 %v42747_v21  ;;  %36237 = vmatprep.mubr.f32.mxu0 %v24122_v33  ;;  %v24652_v21 = vsel %vm145_vm1, %v31313_v2, 0  ;;  %v9071_v33 = vsub.f32 %v43048_v51, %v43085_v9  ;;  %v43146_v49 = vand.u32 4294901760, %v24658_v19 }
 0x2bd   : > { %37323 = vmatpush3.bf16.msra.mxu1 %v43033_v45  ;;  %34461 = vmatprep.mubr.f32.mxu1 %v42758_v18  ;;  %v43115_v18 = vand.u32 4294901760, %v24649_v5  ;;  %v43135_v40 = vand.u32 4294901760, %v24652_v21  ;;  %v9037_v38 = vand.u32 4294901760, %v9036_v63  ;;  %v24771_v8 = vand.u32 4294901760, %v43118_v30 }
 0x2be   : > { %34468 = vmatprep.subr.mxu1 %v43018_v54  ;;  %37915 = vmatpush3.bf16.msra.mxu0 %v37912_v57  ;;  %v43127_v57 = vsub.f32 %v43072_v44, %v24664_v29  ;;  %v9072_v44 = vand.u32 4294901760, %v9071_v33  ;;  %v37328_v63 = vpack.c.bf16 %v42997_v6, %v42995_v39  ;;  %v31132_v39 = vld [vmem:[%s39391_s24 + $0xd0] sm:$0xff] }
 0x2bf   : > { %36238 = vmatmul.mubr.f32.gmra.mrb[2].mxu0 %v24132_v42  ;;  %36244 = vmatprep.subr.mxu0 %v42934_v60  ;;  %v24655_v42 = vsel %vm145_vm1, %v31314_v1, 0  ;;  %v24772_v33 = vsub.f32 %v43118_v30, %v24771_v8 }
 0x2c0   : > { %34462 = vmatmul.mubr.f32.gmra.mrb[2].mxu1 %v42771_v17  ;;  %36246 = vmatprep.mubr.f32.mxu0 %v42844_v53  ;;  %v43141_v17 = vsub.f32 %v24649_v5, %v43115_v18  ;;  %v24778_v2 = vand.u32 4294901760, %v43127_v57  ;;  %v43149_v46 = vand.u32 4294901760, %v24655_v42  ;;  %v43154_v5 = vsub.f32 %v24652_v21, %v43135_v40 }
 0x2c1   : > { %34469 = vmatpush3.msra.mxu1 %v43018_v54  ;;  %34470 = vmatprep.mubr.f32.mxu1 %v9017_v36  ;;  %v9047_v36 = vand.u32 4294901760, %v9046_v41 }
 0x2c2   : > { %37325 = vmatprep.subr.bf16.mxu1 %v37324_v0  ;;  %36245 = vmatpush3.msra.mxu0 %v42934_v60  ;;  %v24730_v60 = vand.u32 4294901760, %v43133_v43  ;;  %v24740_v1 = vand.u32 4294901760, %v43141_v17  ;;  %v24779_v21 = vsub.f32 %v43127_v57, %v24778_v2  ;;  %v24750_v29 = vand.u32 4294901760, %v43154_v5 }
 0x2c3   : > { %36247 = vmatmul.mubr.f32.vlgmr.msra.gmra.mrb[0].mxu0 %v42859_v4  ;;  %37917 = vmatprep.subr.bf16.mxu0 %v42903_v35 }
 0x2c4   : > { %34471 = vmatmul.mubr.f32.vlgmr.msra.gmra.mrb[0].mxu1 %v9027_v31  ;;  %36249 = vmatprep.mubr.f32.mxu0 %v42879_v47  ;;  %v24731_v62 = vsub.f32 %v43133_v43, %v24730_v60  ;;  %v24741_v31 = vsub.f32 %v43141_v17, %v24740_v1  ;;  %v24780_v41 = vand.u32 4294901760, %v24779_v21  ;;  %v37928_v21 = vpack.c.bf16 %v43127_v57, %v43118_v30  ;;  %v43328_v30 = vld [vmem:[%s45635_s1 + $0x3c8] sm:$0xff] }
 0x2c5   : > { %37327 = vmatpush3.bf16.msra.mxu1 %v37324_v0  ;;  %34473 = vmatprep.mubr.f32.mxu1 %v9037_v38  ;;  %v43171_v0 = vsub.f32 %v24655_v42, %v43149_v46  ;;  %v24751_v38 = vsub.f32 %v43154_v5, %v24750_v29  ;;  %v31319_v57 = vld [vmem:[%s39391_s24 + $0x242] sm:$0xff] }
 0x2c6   : > { %34480 = vmatprep.subr.mxu1 %v9072_v44  ;;  %37919 = vmatpush3.bf16.msra.mxu0 %v42903_v35  ;;  %v43174_v35 = vsub.f32 %v24658_v19, %v43146_v49 }
 0x2c7   : > { %36250 = vmatmul.mubr.f32.gmra.mrb[2].mxu0 %v42893_v7  ;;  %36256 = vmatprep.subr.mxu0 %v42890_v34  ;;  %v24760_v19 = vand.u32 4294901760, %v43171_v0 }
 0x2c8   : > { %34474 = vmatmul.mubr.f32.gmra.mrb[2].mxu1 %v9047_v36  ;;  %36258 = vmatprep.mubr.f32.mxu0 %v42844_v53  ;;  %v24773_v53 = vand.u32 4294901760, %v24772_v33  ;;  %v43190_v42 = vand.u32 4294901760, %v43174_v35 }
 0x2c9   : > { %34481 = vmatpush3.msra.mxu1 %v9072_v44  ;;  %34482 = vmatprep.mubr.f32.mxu1 %v42991_v26 }
 0x2ca   : > { %37329 = vmatprep.subr.bf16.mxu1 %v37328_v63  ;;  %36257 = vmatpush3.msra.mxu0 %v42890_v34  ;;  %v24732_v34 = vand.u32 4294901760, %v24731_v62  ;;  %v37924_v44 = vpack.c.bf16 %v24780_v41, %v24773_v53  ;;  %v24786_v36 = vsub.f32 %v43174_v35, %v43190_v42  ;;  %v31135_v62 = vld [vmem:[%s45635_s1 + $0x168] sm:$0xff]  ;;  %v31131_v53 = vld [vmem:[%s39391_s24 + $0xc0] sm:$0xff] }
 0x2cb   : > { %36259 = vmatmul.mubr.f32.vlgmr.msra.gmra.mrb[0].mxu0 %v42859_v4  ;;  %37921 = vmatprep.subr.bf16.mxu0 %v43159_v12  ;;  %v24742_v4 = vand.u32 4294901760, %v24741_v31  ;;  %v31136_v31 = vld [vmem:[%s45635_s1 + $0x170] sm:$0xff]  ;;  %v9576_v6 = vand.u32 4294901760, %v31135_v62  ;;  %v31133_v41 = vld [vmem:[%s39391_s24 + $0xe0] sm:$0xff] }
 0x2cc   : > { %34483 = vmatmul.mubr.f32.vlgmr.msra.gmra.mrb[0].mxu1 %v43003_v59  ;;  %36261 = vmatprep.mubr.f32.mxu0 %v42879_v47  ;;  %v24761_v47 = vsub.f32 %v43171_v0, %v24760_v19  ;;  %v24787_v33 = vand.u32 4294901760, %v24786_v36 }
 0x2cd   : > { %37331 = vmatpush3.bf16.msra.mxu1 %v37328_v63  ;;  %34485 = vmatprep.mubr.f32.mxu1 %v43014_v15  ;;  %v24752_v63 = vand.u32 4294901760, %v24751_v38  ;;  %v31134_v38 = vld [vmem:[%s39391_s24 + $0xf0] sm:$0xff] }
 0x2ce   : > { %34492 = vmatprep.subr.mxu1 %v43048_v51  ;;  %37923 = vmatpush3.bf16.msra.mxu0 %v43159_v12 }
 0x2cf   : > { %36262 = vmatmul.mubr.f32.gmra.mrb[2].mxu0 %v42893_v7  ;;  %36268 = vmatprep.subr.mxu0 %v43146_v49  ;;  %v24762_v7 = vand.u32 4294901760, %v24761_v47 }
 0x2d0   : > { %34486 = vmatmul.mubr.f32.gmra.mrb[2].mxu1 %v43027_v20  ;;  %36270 = vmatprep.mubr.f32.mxu0 %v24732_v34 }
 0x2d1   : > { %34493 = vmatpush3.msra.mxu1 %v43048_v51  ;;  %34494 = vmatprep.mubr.f32.mxu1 %v43012_v52  ;;  %v37336_v51 = vpack.c.bf16 %v9063_v50, %v9056_v32  ;;  %v9579_v32 = vand.u32 4294901760, %v31136_v31  ;;  %v9561_v50 = vsel %vm145_vm1, %v31131_v53, 0  ;;  %v31137_v52 = vld [vmem:[%s45635_s1 + $0x178] sm:$0x7f]  ;;  %v37936_v53 = vpack.c.bf16 %v24778_v2, %v24771_v8 }
 0x2d2   : > { %37333 = vmatprep.subr.bf16.mxu1 %v43033_v45  ;;  %36269 = vmatpush3.msra.mxu0 %v43146_v49  ;;  %v43247_v34 = vand.u32 4294901760, %v9561_v50 }
 0x2d3   : > { %36271 = vmatmul.mubr.f32.vlgmr.msra.gmra.mrb[0].mxu0 %v24742_v4  ;;  %37925 = vmatprep.subr.bf16.mxu0 %v37924_v44  ;;  %v9567_v4 = vsel %vm145_vm1, %v31133_v41, 0 }
 0x2d4   : > { %34495 = vmatmul.mubr.f32.vlgmr.msra.gmra.mrb[0].mxu1 %v43025_v11  ;;  %36273 = vmatprep.mubr.f32.mxu0 %v24752_v63  ;;  %v43251_v11 = vsub.f32 %v31135_v62, %v9576_v6  ;;  %v43268_v47 = vsub.f32 %v9561_v50, %v43247_v34  ;;  %v43270_v36 = vand.u32 4294901760, %v9567_v4 }
 0x2d5   : > { %37335 = vmatpush3.bf16.msra.mxu1 %v43033_v45  ;;  %34497 = vmatprep.mubr.f32.mxu1 %v43037_v37 }
 0x2d6   : > { %34504 = vmatprep.subr.mxu1 %v43018_v54  ;;  %37927 = vmatpush3.bf16.msra.mxu0 %v37924_v44  ;;  %v9573_v44 = vsel %vm158_vm0, %v31137_v52, 0 }
 0x2d7   : > { %36274 = vmatmul.mubr.f32.gmra.mrb[2].mxu0 %v24762_v7  ;;  %36280 = vmatprep.subr.mxu0 %v24787_v33  ;;  %v43274_v63 = vand.u32 4294901760, %v9573_v44 }
 0x2d8   : > { %34498 = vmatmul.mubr.f32.gmra.mrb[2].mxu1 %v43059_v10  ;;  %36282 = vmatprep.mubr.f32.mxu0 %v43100_v22  ;;  %v9686_v10 = vand.u32 4294901760, %v43251_v11 }
 0x2d9   : > { %34505 = vmatpush3.msra.mxu1 %v43018_v54  ;;  %34506 = vmatprep.mubr.f32.mxu1 %v9015_v23  ;;  %v9564_v23 = vsel %vm145_vm1, %v31132_v39, 0  ;;  %v43304_v62 = vsub.f32 %v9573_v44, %v43274_v63 }
 0x2da   : > { %37337 = vmatprep.subr.bf16.mxu1 %v37336_v51  ;;  %36281 = vmatpush3.msra.mxu0 %v24787_v33  ;;  %v43259_v37 = vand.u32 4294901760, %v9564_v23  ;;  %v9645_v33 = vand.u32 4294901760, %v43268_v47 }
 0x2db   : > { %36283 = vmatmul.mubr.f32.vlgmr.msra.gmra.mrb[0].mxu0 %v43115_v18  ;;  %37929 = vmatprep.subr.bf16.mxu0 %v37928_v21  ;;  %v43341_v41 = vand.u32 4294901760, %v43304_v62 }
 0x2dc   : > { %34507 = vmatmul.mubr.f32.vlgmr.msra.gmra.mrb[0].mxu1 %v9025_v16  ;;  %36285 = vmatprep.mubr.f32.mxu0 %v43135_v40  ;;  %v43253_v16 = vsub.f32 %v31136_v31, %v9579_v32  ;;  %v31318_v31 = vld [vmem:[%s39391_s24 + $0x232] sm:$0xff]  ;;  %v9646_v8 = vsub.f32 %v43268_v47, %v9645_v33 }
 0x2dd   : > { %37339 = vmatpush3.bf16.msra.mxu1 %v37336_v51  ;;  %34509 = vmatprep.mubr.f32.mxu1 %v9035_v56  ;;  %v9570_v56 = vsel %vm145_vm1, %v31134_v38, 0  ;;  %v43293_v51 = vsub.f32 %v9567_v4, %v43270_v36  ;;  %v25274_v50 = vsel %vm145_vm1, %v31318_v31, 0  ;;  %v25292_v38 = vand.u32 4294901760, %v43328_v30 }
 0x2de   : > { %34516 = vmatprep.subr.mxu1 %v43085_v9  ;;  %37931 = vmatpush3.bf16.msra.mxu0 %v37928_v21  ;;  %v43283_v7 = vand.u32 4294901760, %v9570_v56  ;;  %v9687_v21 = vsub.f32 %v43251_v11, %v9686_v10  ;;  %v25277_v4 = vsel %vm145_vm1, %v31319_v57, 0  ;;  %v43356_v44 = vand.u32 4294901760, %v25274_v50 }
 0x2df   : > { %36286 = vmatmul.mubr.f32.gmra.mrb[2].mxu0 %v43149_v46  ;;  %36292 = vmatprep.subr.mxu0 %v43174_v35  ;;  %v9665_v2 = vand.u32 4294901760, %v43293_v51 }
 0x2e0   : > { %34510 = vmatmul.mubr.f32.gmra.mrb[2].mxu1 %v9045_v55  ;;  %36294 = vmatprep.mubr.f32.mxu0 %v43133_v43  ;;  %v9693_v55 = vand.u32 4294901760, %v43253_v16  ;;  %v9688_v43 = vand.u32 4294901760, %v9687_v21  ;;  %v31321_v21 = vld [vmem:[%s39391_s24 + $0x262] sm:$0xff] }
 0x2e1   : > { %34517 = vmatpush3.msra.mxu1 %v43085_v9  ;;  %34518 = vmatprep.mubr.f32.mxu1 %v42991_v26  ;;  %v43281_v9 = vsub.f32 %v9564_v23, %v43259_v37 }
 0x2e2   : > { %37341 = vmatprep.subr.bf16.mxu1 %v43033_v45  ;;  %36293 = vmatpush3.msra.mxu0 %v43174_v35  ;;  %v43289_v35 = vpack.c.bf16 %v9579_v32, %v9576_v6  ;;  %v43315_v6 = vsub.f32 %v9570_v56, %v43283_v7  ;;  %v43320_v32 = vld [vmem:[%s45635_s1 + $0x3c0] sm:$0xff]  ;;  %v31324_v56 = vld [vmem:[%s45635_s1 + $0x3d0] sm:$0x7f] }
 0x2e3   : > { %36295 = vmatmul.mubr.f32.vlgmr.msra.gmra.mrb[0].mxu0 %v43141_v17  ;;  %37933 = vmatprep.subr.bf16.mxu0 %v43159_v12  ;;  %v9655_v39 = vand.u32 4294901760, %v43281_v9  ;;  %v9647_v17 = vand.u32 4294901760, %v9646_v8  ;;  %v43389_v8 = vsub.f32 %v25274_v50, %v43356_v44 }
 0x2e4   : > { %34519 = vmatmul.mubr.f32.vlgmr.msra.gmra.mrb[0].mxu1 %v43003_v59  ;;  %36297 = vmatprep.mubr.f32.mxu0 %v43154_v5  ;;  %v9675_v23 = vand.u32 4294901760, %v43315_v6 }
 0x2e5   : > { %37343 = vmatpush3.bf16.msra.mxu1 %v43033_v45  ;;  %34521 = vmatprep.mubr.f32.mxu1 %v43014_v15  ;;  %v9694_v45 = vsub.f32 %v43253_v16, %v9693_v55  ;;  %v9656_v52 = vsub.f32 %v43281_v9, %v9655_v39 }
 0x2e6   : > { %34528 = vmatprep.subr.mxu1 %v43018_v54  ;;  %37935 = vmatpush3.bf16.msra.mxu0 %v43159_v12  ;;  %v9676_v57 = vsub.f32 %v43315_v6, %v9675_v23 }
 0x2e7   : > { %36298 = vmatmul.mubr.f32.gmra.mrb[2].mxu0 %v43171_v0  ;;  %36304 = vmatprep.subr.mxu0 %v43146_v49  ;;  %v9657_v31 = vand.u32 4294901760, %v9656_v52 }
 0x2e8   : > { %34522 = vmatmul.mubr.f32.gmra.mrb[2].mxu1 %v43027_v20  ;;  %36306 = vmatprep.mubr.f32.mxu0 %v24730_v60  ;;  %v9695_v60 = vand.u32 4294901760, %v9694_v45 }
 0x2e9   : > { %34529 = vmatpush3.msra.mxu1 %v43018_v54  ;;  %34530 = vmatprep.mubr.f32.mxu1 %v42991_v26  ;;  %v25289_v54 = vand.u32 4294901760, %v43320_v32  ;;  %v31320_v26 = vld [vmem:[%s39391_s24 + $0x252] sm:$0xff] }
 0x2ea   : > { %37345 = vmatprep.subr.bf16.mxu1 %v43289_v35  ;;  %36305 = vmatpush3.msra.mxu0 %v43146_v49  ;;  %v37348_v5 = vpack.c.bf16 %v9695_v60, %v9688_v43 }
 0x2eb   : > { %36307 = vmatmul.mubr.f32.vlgmr.msra.gmra.mrb[0].mxu0 %v24740_v1  ;;  %37937 = vmatprep.subr.bf16.mxu0 %v37936_v53  ;;  %v9666_v1 = vsub.f32 %v43293_v51, %v9665_v2  ;;  %v43374_v45 = vsub.f32 %v43320_v32, %v25289_v54  ;;  %v25286_v32 = vsel %vm158_vm0, %v31324_v56, 0  ;;  %v43415_v56 = vpack.c.bf16 %v25292_v38, %v25289_v54 }
 0x2ec   : > { %34531 = vmatmul.mubr.f32.vlgmr.msra.gmra.mrb[0].mxu1 %v43003_v59  ;;  %36309 = vmatprep.mubr.f32.mxu0 %v24750_v29  ;;  %v25280_v59 = vsel %vm145_vm1, %v31320_v26, 0  ;;  %v9701_v29 = vsub.f32 %v43304_v62, %v43341_v41  ;;  %v43402_v50 = vand.u32 4294901760, %v25286_v32 }
 0x2ed   : > { %37347 = vmatpush3.bf16.msra.mxu1 %v43289_v35  ;;  %34533 = vmatprep.mubr.f32.mxu1 %v43014_v15  ;;  %v43371_v15 = vand.u32 4294901760, %v25277_v4  ;;  %v43391_v0 = vand.u32 4294901760, %v25280_v59  ;;  %v9667_v43 = vand.u32 4294901760, %v9666_v1  ;;  %v25399_v60 = vand.u32 4294901760, %v43374_v45 }
 0x2ee   : > { %34540 = vmatprep.subr.mxu1 %v43274_v63  ;;  %37939 = vmatpush3.bf16.msra.mxu0 %v37936_v53  ;;  %v43383_v53 = vsub.f32 %v43328_v30, %v25292_v38  ;;  %v9702_v30 = vand.u32 4294901760, %v9701_v29  ;;  %v37352_v1 = vpack.c.bf16 %v43253_v16, %v43251_v11  ;;  %v31139_v11 = vld [vmem:[%s39391_s24 + $0x21] sm:$0xff] }
 0x2ef   : > { %36310 = vmatmul.mubr.f32.gmra.mrb[2].mxu0 %v24760_v19  ;;  %36316 = vmatprep.subr.mxu0 %v43190_v42  ;;  %v25283_v19 = vsel %vm145_vm1, %v31321_v21, 0  ;;  %v25400_v29 = vsub.f32 %v43374_v45, %v25399_v60 }
 0x2f0   : > { %34534 = vmatmul.mubr.f32.gmra.mrb[2].mxu1 %v43027_v20  ;;  %36318 = vmatprep.mubr.f32.mxu0 %v43100_v22  ;;  %v43397_v20 = vsub.f32 %v25277_v4, %v43371_v15  ;;  %v25406_v26 = vand.u32 4294901760, %v43383_v53  ;;  %v43405_v52 = vand.u32 4294901760, %v25283_v19  ;;  %v43410_v4 = vsub.f32 %v25280_v59, %v43391_v0 }
 0x2f1   : > { %34541 = vmatpush3.msra.mxu1 %v43274_v63  ;;  %34542 = vmatprep.mubr.f32.mxu1 %v9647_v17  ;;  %v9677_v17 = vand.u32 4294901760, %v9676_v57 }
 0x2f2   : > { %37349 = vmatprep.subr.bf16.mxu1 %v37348_v5  ;;  %36317 = vmatpush3.msra.mxu0 %v43190_v42  ;;  %v25358_v42 = vand.u32 4294901760, %v43389_v8  ;;  %v25368_v21 = vand.u32 4294901760, %v43397_v20  ;;  %v25407_v59 = vsub.f32 %v43383_v53, %v25406_v26  ;;  %v25378_v38 = vand.u32 4294901760, %v43410_v4 }
 0x2f3   : > { %36319 = vmatmul.mubr.f32.vlgmr.msra.gmra.mrb[0].mxu0 %v43115_v18  ;;  %37941 = vmatprep.subr.bf16.mxu0 %v43159_v12 }
 0x2f4   : > { %34543 = vmatmul.mubr.f32.vlgmr.msra.gmra.mrb[0].mxu1 %v9657_v31  ;;  %36321 = vmatprep.mubr.f32.mxu0 %v43135_v40  ;;  %v25359_v54 = vsub.f32 %v43389_v8, %v25358_v42  ;;  %v25369_v31 = vsub.f32 %v43397_v20, %v25368_v21  ;;  %v25408_v57 = vand.u32 4294901760, %v25407_v59  ;;  %v37952_v59 = vpack.c.bf16 %v43383_v53, %v43374_v45  ;;  %v43584_v45 = vld [vmem:[%s45635_s1 + $0x3e0] sm:$0xff]  ;;  %v31326_v53 = vld [vmem:[%s39391_s24 + $0x193] sm:$0xff] }
 0x2f5   : > { %37351 = vmatpush3.bf16.msra.mxu1 %v37348_v5  ;;  %34545 = vmatprep.mubr.f32.mxu1 %v9667_v43  ;;  %v43427_v5 = vsub.f32 %v25283_v19, %v43405_v52  ;;  %v25379_v43 = vsub.f32 %v43410_v4, %v25378_v38 }
 0x2f6   : > { %34552 = vmatprep.subr.mxu1 %v9702_v30  ;;  %37943 = vmatpush3.bf16.msra.mxu0 %v43159_v12  ;;  %v43430_v12 = vsub.f32 %v25286_v32, %v43402_v50 }
 0x2f7   : > { %36322 = vmatmul.mubr.f32.gmra.mrb[2].mxu0 %v43149_v46  ;;  %36328 = vmatprep.subr.mxu0 %v43146_v49  ;;  %v25388_v32 = vand.u32 4294901760, %v43427_v5 }
 0x2f8   : > { %34546 = vmatmul.mubr.f32.gmra.mrb[2].mxu1 %v9677_v17  ;;  %36330 = vmatprep.mubr.f32.mxu0 %v43100_v22  ;;  %v25401_v22 = vand.u32 4294901760, %v25400_v29  ;;  %v43446_v19 = vand.u32 4294901760, %v43430_v12 }
 0x2f9   : > { %34553 = vmatpush3.msra.mxu1 %v9702_v30  ;;  %34554 = vmatprep.mubr.f32.mxu1 %v43247_v34 }
 0x2fa   : > { %37353 = vmatprep.subr.bf16.mxu1 %v37352_v1  ;;  %36329 = vmatpush3.msra.mxu0 %v43146_v49  ;;  %v25360_v49 = vand.u32 4294901760, %v25359_v54  ;;  %v37948_v30 = vpack.c.bf16 %v25408_v57, %v25401_v22  ;;  %v25414_v17 = vsub.f32 %v43430_v12, %v43446_v19  ;;  %v31142_v54 = vld [vmem:[%s45635_s1 + $0x180] sm:$0xff]  ;;  %v31138_v22 = vld [vmem:[%s39391_s24 + $0x11] sm:$0xff] }
 0x2fb   : > { %36331 = vmatmul.mubr.f32.vlgmr.msra.gmra.mrb[0].mxu0 %v43115_v18  ;;  %37945 = vmatprep.subr.bf16.mxu0 %v43415_v56  ;;  %v25370_v18 = vand.u32 4294901760, %v25369_v31  ;;  %v31143_v31 = vld [vmem:[%s45635_s1 + $0x188] sm:$0xff]  ;;  %v10204_v16 = vand.u32 4294901760, %v31142_v54  ;;  %v31140_v57 = vld [vmem:[%s39391_s24 + $0x31] sm:$0xff] }
 0x2fc   : > { %34555 = vmatmul.mubr.f32.vlgmr.msra.gmra.mrb[0].mxu1 %v43259_v37  ;;  %36333 = vmatprep.mubr.f32.mxu0 %v43135_v40  ;;  %v25389_v40 = vsub.f32 %v43427_v5, %v25388_v32  ;;  %v25415_v29 = vand.u32 4294901760, %v25414_v17 }
 0x2fd   : > { %37355 = vmatpush3.bf16.msra.mxu1 %v37352_v1  ;;  %34557 = vmatprep.mubr.f32.mxu1 %v43270_v36  ;;  %v25380_v1 = vand.u32 4294901760, %v25379_v43  ;;  %v31141_v43 = vld [vmem:[%s39391_s24 + $0x41] sm:$0xff] }
 0x2fe   : > { %34564 = vmatprep.subr.mxu1 %v43304_v62  ;;  %37947 = vmatpush3.bf16.msra.mxu0 %v43415_v56 }
 0x2ff   : > { %36334 = vmatmul.mubr.f32.gmra.mrb[2].mxu0 %v43149_v46  ;;  %36340 = vmatprep.subr.mxu0 %v43402_v50  ;;  %v25390_v46 = vand.u32 4294901760, %v25389_v40 }
 0x300   : > { %34558 = vmatmul.mubr.f32.gmra.mrb[2].mxu1 %v43283_v7  ;;  %36342 = vmatprep.mubr.f32.mxu0 %v25360_v49 }
 0x301   : > { %34565 = vmatpush3.msra.mxu1 %v43304_v62  ;;  %34566 = vmatprep.mubr.f32.mxu1 %v43268_v47  ;;  %v37360_v62 = vpack.c.bf16 %v9693_v55, %v9686_v10  ;;  %v10207_v10 = vand.u32 4294901760, %v31143_v31  ;;  %v10189_v55 = vsel %vm145_vm1, %v31138_v22, 0  ;;  %v31144_v47 = vld [vmem:[%s45635_s1 + $0x190] sm:$0x7f]  ;;  %v37960_v22 = vpack.c.bf16 %v25406_v26, %v25399_v60 }
 0x302   : > { %37357 = vmatprep.subr.bf16.mxu1 %v43289_v35  ;;  %36341 = vmatpush3.msra.mxu0 %v43402_v50  ;;  %v43503_v49 = vand.u32 4294901760, %v10189_v55 }
 0x303   : > { %36343 = vmatmul.mubr.f32.vlgmr.msra.gmra.mrb[0].mxu0 %v25370_v18  ;;  %37949 = vmatprep.subr.bf16.mxu0 %v37948_v30  ;;  %v10195_v18 = vsel %vm145_vm1, %v31140_v57, 0 }
 0x304   : > { %34567 = vmatmul.mubr.f32.vlgmr.msra.gmra.mrb[0].mxu1 %v43281_v9  ;;  %36345 = vmatprep.mubr.f32.mxu0 %v25380_v1  ;;  %v43507_v9 = vsub.f32 %v31142_v54, %v10204_v16  ;;  %v43524_v40 = vsub.f32 %v10189_v55, %v43503_v49  ;;  %v43526_v17 = vand.u32 4294901760, %v10195_v18 }
 0x305   : > { %37359 = vmatpush3.bf16.msra.mxu1 %v43289_v35  ;;  %34569 = vmatprep.mubr.f32.mxu1 %v43293_v51 }
 0x306   : > { %34576 = vmatprep.subr.mxu1 %v43274_v63  ;;  %37951 = vmatpush3.bf16.msra.mxu0 %v37948_v30  ;;  %v10201_v30 = vsel %vm158_vm0, %v31144_v47, 0 }
 0x307   : > { %36346 = vmatmul.mubr.f32.gmra.mrb[2].mxu0 %v25390_v46  ;;  %36352 = vmatprep.subr.mxu0 %v25415_v29  ;;  %v43530_v1 = vand.u32 4294901760, %v10201_v30 }
 0x308   : > { %34570 = vmatmul.mubr.f32.gmra.mrb[2].mxu1 %v43315_v6  ;;  %36354 = vmatprep.mubr.f32.mxu0 %v43356_v44  ;;  %v10314_v6 = vand.u32 4294901760, %v43507_v9 }
 0x309   : > { %34577 = vmatpush3.msra.mxu1 %v43274_v63  ;;  %34578 = vmatprep.mubr.f32.mxu1 %v9645_v33  ;;  %v10192_v33 = vsel %vm145_vm1, %v31139_v11, 0  ;;  %v43560_v54 = vsub.f32 %v10201_v30, %v43530_v1 }
 0x30a   : > { %37361 = vmatprep.subr.bf16.mxu1 %v37360_v62  ;;  %36353 = vmatpush3.msra.mxu0 %v25415_v29  ;;  %v43515_v51 = vand.u32 4294901760, %v10192_v33  ;;  %v10273_v29 = vand.u32 4294901760, %v43524_v40 }
 0x30b   : > { %36355 = vmatmul.mubr.f32.vlgmr.msra.gmra.mrb[0].mxu0 %v43371_v15  ;;  %37953 = vmatprep.subr.bf16.mxu0 %v37952_v59  ;;  %v43597_v57 = vand.u32 4294901760, %v43560_v54 }
 0x30c   : > { %34579 = vmatmul.mubr.f32.vlgmr.msra.gmra.mrb[0].mxu1 %v9655_v39  ;;  %36357 = vmatprep.mubr.f32.mxu0 %v43391_v0  ;;  %v43509_v39 = vsub.f32 %v31143_v31, %v10207_v10  ;;  %v31325_v31 = vld [vmem:[%s39391_s24 + $0x183] sm:$0xff]  ;;  %v10274_v60 = vsub.f32 %v43524_v40, %v10273_v29 }
 0x30d   : > { %37363 = vmatpush3.bf16.msra.mxu1 %v37360_v62  ;;  %34581 = vmatprep.mubr.f32.mxu1 %v9665_v2  ;;  %v10198_v2 = vsel %vm145_vm1, %v31141_v43, 0  ;;  %v43549_v62 = vsub.f32 %v10195_v18, %v43526_v17  ;;  %v25902_v55 = vsel %vm145_vm1, %v31325_v31, 0  ;;  %v25920_v43 = vand.u32 4294901760, %v43584_v45 }
 0x30e   : > { %34588 = vmatprep.subr.mxu1 %v43341_v41  ;;  %37955 = vmatpush3.bf16.msra.mxu0 %v37952_v59  ;;  %v43539_v46 = vand.u32 4294901760, %v10198_v2  ;;  %v10315_v59 = vsub.f32 %v43507_v9, %v10314_v6  ;;  %v25905_v18 = vsel %vm145_vm1, %v31326_v53, 0  ;;  %v43612_v30 = vand.u32 4294901760, %v25902_v55 }
 0x30f   : > { %36358 = vmatmul.mubr.f32.gmra.mrb[2].mxu0 %v43405_v52  ;;  %36364 = vmatprep.subr.mxu0 %v43430_v12  ;;  %v10293_v26 = vand.u32 4294901760, %v43549_v62 }
 0x310   : > { %34582 = vmatmul.mubr.f32.gmra.mrb[2].mxu1 %v9675_v23  ;;  %36366 = vmatprep.mubr.f32.mxu0 %v43389_v8  ;;  %v10321_v23 = vand.u32 4294901760, %v43509_v39  ;;  %v10316_v8 = vand.u32 4294901760, %v10315_v59  ;;  %v31328_v59 = vld [vmem:[%s39391_s24 + $0x1b3] sm:$0xff] }
 0x311   : > { %34589 = vmatpush3.msra.mxu1 %v43341_v41  ;;  %34590 = vmatprep.mubr.f32.mxu1 %v43247_v34  ;;  %v43537_v41 = vsub.f32 %v10192_v33, %v43515_v51 }
 0x312   : > { %37365 = vmatprep.subr.bf16.mxu1 %v43289_v35  ;;  %36365 = vmatpush3.msra.mxu0 %v43430_v12  ;;  %v43545_v12 = vpack.c.bf16 %v10207_v10, %v10204_v16  ;;  %v43571_v16 = vsub.f32 %v10198_v2, %v43539_v46  ;;  %v43576_v10 = vld [vmem:[%s45635_s1 + $0x3d8] sm:$0xff]  ;;  %v31331_v2 = vld [vmem:[%s45635_s1 + $0x3e8] sm:$0x7f] }
 0x313   : > { %36367 = vmatmul.mubr.f32.vlgmr.msra.gmra.mrb[0].mxu0 %v43397_v20  ;;  %37957 = vmatprep.subr.bf16.mxu0 %v43415_v56  ;;  %v10283_v11 = vand.u32 4294901760, %v43537_v41  ;;  %v10275_v20 = vand.u32 4294901760, %v10274_v60  ;;  %v43645_v60 = vsub.f32 %v25902_v55, %v43612_v30 }
 0x314   : > { %34591 = vmatmul.mubr.f32.vlgmr.msra.gmra.mrb[0].mxu1 %v43259_v37  ;;  %36369 = vmatprep.mubr.f32.mxu0 %v43410_v4  ;;  %v10303_v33 = vand.u32 4294901760, %v43571_v16 }
 0x315   : > { %37367 = vmatpush3.bf16.msra.mxu1 %v43289_v35  ;;  %34593 = vmatprep.mubr.f32.mxu1 %v43270_v36  ;;  %v10322_v35 = vsub.f32 %v43509_v39, %v10321_v23  ;;  %v10284_v47 = vsub.f32 %v43537_v41, %v10283_v11 }
 0x316   : > { %34600 = vmatprep.subr.mxu1 %v43274_v63  ;;  %37959 = vmatpush3.bf16.msra.mxu0 %v43415_v56  ;;  %v10304_v53 = vsub.f32 %v43571_v16, %v10303_v33 }
 0x317   : > { %36370 = vmatmul.mubr.f32.gmra.mrb[2].mxu0 %v43427_v5  ;;  %36376 = vmatprep.subr.mxu0 %v43402_v50  ;;  %v10285_v31 = vand.u32 4294901760, %v10284_v47 }
 0x318   : > { %34594 = vmatmul.mubr.f32.gmra.mrb[2].mxu1 %v43283_v7  ;;  %36378 = vmatprep.mubr.f32.mxu0 %v25358_v42  ;;  %v10323_v42 = vand.u32 4294901760, %v10322_v35 }
 0x319   : > { %34601 = vmatpush3.msra.mxu1 %v43274_v63  ;;  %34602 = vmatprep.mubr.f32.mxu1 %v43247_v34  ;;  %v25917_v63 = vand.u32 4294901760, %v43576_v10  ;;  %v31327_v34 = vld [vmem:[%s39391_s24 + $0x1a3] sm:$0xff] }
 0x31a   : > { %37369 = vmatprep.subr.bf16.mxu1 %v43545_v12  ;;  %36377 = vmatpush3.msra.mxu0 %v43402_v50  ;;  %v37372_v4 = vpack.c.bf16 %v10323_v42, %v10316_v8 }
 0x31b   : > { %36379 = vmatmul.mubr.f32.vlgmr.msra.gmra.mrb[0].mxu0 %v25368_v21  ;;  %37961 = vmatprep.subr.bf16.mxu0 %v37960_v22  ;;  %v10294_v21 = vsub.f32 %v43549_v62, %v10293_v26  ;;  %v43630_v35 = vsub.f32 %v43576_v10, %v25917_v63  ;;  %v25914_v10 = vsel %vm158_vm0, %v31331_v2, 0  ;;  %v43671_v2 = vpack.c.bf16 %v25920_v43, %v25917_v63 }
 0x31c   : > { %34603 = vmatmul.mubr.f32.vlgmr.msra.gmra.mrb[0].mxu1 %v43259_v37  ;;  %36381 = vmatprep.mubr.f32.mxu0 %v25378_v38  ;;  %v25908_v37 = vsel %vm145_vm1, %v31327_v34, 0  ;;  %v10329_v38 = vsub.f32 %v43560_v54, %v43597_v57  ;;  %v43658_v55 = vand.u32 4294901760, %v25914_v10 }
 0x31d   : > { %37371 = vmatpush3.bf16.msra.mxu1 %v43545_v12  ;;  %34605 = vmatprep.mubr.f32.mxu1 %v43270_v36  ;;  %v43627_v36 = vand.u32 4294901760, %v25905_v18  ;;  %v43647_v5 = vand.u32 4294901760, %v25908_v37  ;;  %v10295_v8 = vand.u32 4294901760, %v10294_v21  ;;  %v26027_v42 = vand.u32 4294901760, %v43630_v35 }
 0x31e   : > { %34612 = vmatprep.subr.mxu1 %v43530_v1  ;;  %37963 = vmatpush3.bf16.msra.mxu0 %v37960_v22  ;;  %v43639_v22 = vsub.f32 %v43584_v45, %v25920_v43  ;;  %v10330_v45 = vand.u32 4294901760, %v10329_v38  ;;  %v37376_v21 = vpack.c.bf16 %v43509_v39, %v43507_v9  ;;  %v31146_v9 = vld [vmem:[%s39391_s24 + $0xd1] sm:$0xff] }
 0x31f   : > { %36382 = vmatmul.mubr.f32.gmra.mrb[2].mxu0 %v25388_v32  ;;  %36388 = vmatprep.subr.mxu0 %v43446_v19  ;;  %v25911_v32 = vsel %vm145_vm1, %v31328_v59, 0  ;;  %v26028_v38 = vsub.f32 %v43630_v35, %v26027_v42 }
 0x320   : > { %34606 = vmatmul.mubr.f32.gmra.mrb[2].mxu1 %v43283_v7  ;;  %36390 = vmatprep.mubr.f32.mxu0 %v43356_v44  ;;  %v43653_v7 = vsub.f32 %v25905_v18, %v43627_v36  ;;  %v26034_v34 = vand.u32 4294901760, %v43639_v22  ;;  %v43661_v47 = vand.u32 4294901760, %v25911_v32  ;;  %v43666_v18 = vsub.f32 %v25908_v37, %v43647_v5 }
 0x321   : > { %34613 = vmatpush3.msra.mxu1 %v43530_v1  ;;  %34614 = vmatprep.mubr.f32.mxu1 %v10275_v20  ;;  %v10305_v20 = vand.u32 4294901760, %v10304_v53 }
 0x322   : > { %37373 = vmatprep.subr.bf16.mxu1 %v37372_v4  ;;  %36389 = vmatpush3.msra.mxu0 %v43446_v19  ;;  %v25986_v19 = vand.u32 4294901760, %v43645_v60  ;;  %v25996_v59 = vand.u32 4294901760, %v43653_v7  ;;  %v26035_v37 = vsub.f32 %v43639_v22, %v26034_v34  ;;  %v26006_v43 = vand.u32 4294901760, %v43666_v18 }
 0x323   : > { %36391 = vmatmul.mubr.f32.vlgmr.msra.gmra.mrb[0].mxu0 %v43371_v15  ;;  %37965 = vmatprep.subr.bf16.mxu0 %v43415_v56 }
 0x324   : > { %34615 = vmatmul.mubr.f32.vlgmr.msra.gmra.mrb[0].mxu1 %v10285_v31  ;;  %36393 = vmatprep.mubr.f32.mxu0 %v43391_v0  ;;  %v25987_v63 = vsub.f32 %v43645_v60, %v25986_v19  ;;  %v25997_v31 = vsub.f32 %v43653_v7, %v25996_v59  ;;  %v26036_v53 = vand.u32 4294901760, %v26035_v37  ;;  %v37976_v37 = vpack.c.bf16 %v43639_v22, %v43630_v35  ;;  %v43840_v35 = vld [vmem:[%s45635_s1 + $0x3f8] sm:$0xff]  ;;  %v31335_v22 = vld [vmem:[%s39391_s24 + $0x40] sm:$0xff] }
 0x325   : > { %37375 = vmatpush3.bf16.msra.mxu1 %v37372_v4  ;;  %34617 = vmatprep.mubr.f32.mxu1 %v10295_v8  ;;  %v43683_v4 = vsub.f32 %v25911_v32, %v43661_v47  ;;  %v26007_v8 = vsub.f32 %v43666_v18, %v26006_v43 }
 0x326   : > { %34624 = vmatprep.subr.mxu1 %v10330_v45  ;;  %37967 = vmatpush3.bf16.msra.mxu0 %v43415_v56  ;;  %v43686_v56 = vsub.f32 %v25914_v10, %v43658_v55 }
 0x327   : > { %36394 = vmatmul.mubr.f32.gmra.mrb[2].mxu0 %v43405_v52  ;;  %36400 = vmatprep.subr.mxu0 %v43402_v50  ;;  %v26016_v10 = vand.u32 4294901760, %v43683_v4 }
 0x328   : > { %34618 = vmatmul.mubr.f32.gmra.mrb[2].mxu1 %v10305_v20  ;;  %36402 = vmatprep.mubr.f32.mxu0 %v43356_v44  ;;  %v26029_v44 = vand.u32 4294901760, %v26028_v38  ;;  %v43702_v32 = vand.u32 4294901760, %v43686_v56 }
 0x329   : > { %34625 = vmatpush3.msra.mxu1 %v10330_v45  ;;  %34626 = vmatprep.mubr.f32.mxu1 %v43503_v49 }
 0x32a   : > { %37377 = vmatprep.subr.bf16.mxu1 %v37376_v21  ;;  %36401 = vmatpush3.msra.mxu0 %v43402_v50  ;;  %v25988_v50 = vand.u32 4294901760, %v25987_v63  ;;  %v37972_v45 = vpack.c.bf16 %v26036_v53, %v26029_v44  ;;  %v26042_v20 = vsub.f32 %v43686_v56, %v43702_v32  ;;  %v31149_v63 = vld [vmem:[%s45635_s1 + $0x198] sm:$0xff]  ;;  %v31145_v44 = vld [vmem:[%s39391_s24 + $0xc1] sm:$0xff] }
 0x32b   : > { %36403 = vmatmul.mubr.f32.vlgmr.msra.gmra.mrb[0].mxu0 %v43371_v15  ;;  %37969 = vmatprep.subr.bf16.mxu0 %v43671_v2  ;;  %v25998_v15 = vand.u32 4294901760, %v25997_v31  ;;  %v31150_v31 = vld [vmem:[%s45635_s1 + $0x1a0] sm:$0xff]  ;;  %v10832_v39 = vand.u32 4294901760, %v31149_v63 }
 0x32c   : > { %34627 = vmatmul.mubr.f32.vlgmr.msra.gmra.mrb[0].mxu1 %v43515_v51  ;;  %36405 = vmatprep.mubr.f32.mxu0 %v43391_v0  ;;  %v26017_v0 = vsub.f32 %v43683_v4, %v26016_v10  ;;  %v26043_v38 = vand.u32 4294901760, %v26042_v20  ;;  %v31147_v53 = vld [vmem:[%s39391_s24 + $0xe1] sm:$0xff] }
 0x32d   : > { %37379 = vmatpush3.bf16.msra.mxu1 %v37376_v21  ;;  %34629 = vmatprep.mubr.f32.mxu1 %v43526_v17  ;;  %v26008_v21 = vand.u32 4294901760, %v26007_v8  ;;  %v31148_v8 = vld [vmem:[%s39391_s24 + $0xf1] sm:$0xff] }
 0x32e   : > { %34636 = vmatprep.subr.mxu1 %v43560_v54  ;;  %37971 = vmatpush3.bf16.msra.mxu0 %v43671_v2 }
 0x32f   : > { %36406 = vmatmul.mubr.f32.gmra.mrb[2].mxu0 %v43405_v52  ;;  %36412 = vmatprep.subr.mxu0 %v43658_v55  ;;  %v26018_v52 = vand.u32 4294901760, %v26017_v0 }
 0x330   : > { %34630 = vmatmul.mubr.f32.gmra.mrb[2].mxu1 %v43539_v46  ;;  %36414 = vmatprep.mubr.f32.mxu0 %v25988_v50 }
 0x331   : > { %34637 = vmatpush3.msra.mxu1 %v43560_v54  ;;  %34638 = vmatprep.mubr.f32.mxu1 %v43524_v40  ;;  %v37384_v54 = vpack.c.bf16 %v10321_v23, %v10314_v6  ;;  %v10835_v6 = vand.u32 4294901760, %v31150_v31  ;;  %v10817_v23 = vsel %vm145_vm1, %v31145_v44, 0  ;;  %v31151_v40 = vld [vmem:[%s45635_s1 + $0x1a8] sm:$0x7f]  ;;  %v37984_v44 = vpack.c.bf16 %v26034_v34, %v26027_v42 }
 0x332   : > { %37381 = vmatprep.subr.bf16.mxu1 %v43545_v12  ;;  %36413 = vmatpush3.msra.mxu0 %v43658_v55  ;;  %v43759_v50 = vand.u32 4294901760, %v10817_v23 }
 0x333   : > { %36415 = vmatmul.mubr.f32.vlgmr.msra.gmra.mrb[0].mxu0 %v25998_v15  ;;  %37973 = vmatprep.subr.bf16.mxu0 %v37972_v45  ;;  %v10823_v15 = vsel %vm145_vm1, %v31147_v53, 0 }
 0x334   : > { %34639 = vmatmul.mubr.f32.vlgmr.msra.gmra.mrb[0].mxu1 %v43537_v41  ;;  %36417 = vmatprep.mubr.f32.mxu0 %v26008_v21  ;;  %v43763_v41 = vsub.f32 %v31149_v63, %v10832_v39  ;;  %v43780_v0 = vsub.f32 %v10817_v23, %v43759_v50  ;;  %v43782_v20 = vand.u32 4294901760, %v10823_v15 }
 0x335   : > { %37383 = vmatpush3.bf16.msra.mxu1 %v43545_v12  ;;  %34641 = vmatprep.mubr.f32.mxu1 %v43549_v62 }
 0x336   : > { %34648 = vmatprep.subr.mxu1 %v43530_v1  ;;  %37975 = vmatpush3.bf16.msra.mxu0 %v37972_v45  ;;  %v10829_v45 = vsel %vm158_vm0, %v31151_v40, 0 }
 0x337   : > { %36418 = vmatmul.mubr.f32.gmra.mrb[2].mxu0 %v26018_v52  ;;  %36424 = vmatprep.subr.mxu0 %v26043_v38  ;;  %v43786_v21 = vand.u32 4294901760, %v10829_v45 }
 0x338   : > { %34642 = vmatmul.mubr.f32.gmra.mrb[2].mxu1 %v43571_v16  ;;  %36426 = vmatprep.mubr.f32.mxu0 %v43612_v30  ;;  %v10942_v16 = vand.u32 4294901760, %v43763_v41 }
 0x339   : > { %34649 = vmatpush3.msra.mxu1 %v43530_v1  ;;  %34650 = vmatprep.mubr.f32.mxu1 %v10273_v29  ;;  %v10820_v29 = vsel %vm145_vm1, %v31146_v9, 0  ;;  %v43816_v63 = vsub.f32 %v10829_v45, %v43786_v21 }
 0x33a   : > { %37385 = vmatprep.subr.bf16.mxu1 %v37384_v54  ;;  %36425 = vmatpush3.msra.mxu0 %v26043_v38  ;;  %v43771_v62 = vand.u32 4294901760, %v10820_v29  ;;  %v10901_v38 = vand.u32 4294901760, %v43780_v0 }
 0x33b   : > { %36427 = vmatmul.mubr.f32.vlgmr.msra.gmra.mrb[0].mxu0 %v43627_v36  ;;  %37977 = vmatprep.subr.bf16.mxu0 %v37976_v37  ;;  %v43853_v53 = vand.u32 4294901760, %v43816_v63 }
 0x33c   : > { %34651 = vmatmul.mubr.f32.vlgmr.msra.gmra.mrb[0].mxu1 %v10283_v11  ;;  %36429 = vmatprep.mubr.f32.mxu0 %v43647_v5  ;;  %v43765_v11 = vsub.f32 %v31150_v31, %v10835_v6  ;;  %v31334_v31 = vld [vmem:[%s39391_s24 + $0x30] sm:$0xff]  ;;  %v10902_v42 = vsub.f32 %v43780_v0, %v10901_v38 }
 0x33d   : > { %37387 = vmatpush3.bf16.msra.mxu1 %v37384_v54  ;;  %34653 = vmatprep.mubr.f32.mxu1 %v10293_v26  ;;  %v10826_v26 = vsel %vm145_vm1, %v31148_v8, 0  ;;  %v43805_v54 = vsub.f32 %v10823_v15, %v43782_v20  ;;  %v26533_v23 = vsel %vm145_vm1, %v31334_v31, 0  ;;  %v26551_v8 = vand.u32 4294901760, %v43840_v35 }
 0x33e   : > { %34660 = vmatprep.subr.mxu1 %v43597_v57  ;;  %37979 = vmatpush3.bf16.msra.mxu0 %v37976_v37  ;;  %v43795_v52 = vand.u32 4294901760, %v10826_v26  ;;  %v10943_v37 = vsub.f32 %v43763_v41, %v10942_v16  ;;  %v26536_v15 = vsel %vm145_vm1, %v31335_v22, 0  ;;  %v43868_v45 = vand.u32 4294901760, %v26533_v23 }
 0x33f   : > { %36430 = vmatmul.mubr.f32.gmra.mrb[2].mxu0 %v43661_v47  ;;  %36436 = vmatprep.subr.mxu0 %v43686_v56  ;;  %v10921_v34 = vand.u32 4294901760, %v43805_v54 }
 0x340   : > { %34654 = vmatmul.mubr.f32.gmra.mrb[2].mxu1 %v10303_v33  ;;  %36438 = vmatprep.mubr.f32.mxu0 %v43645_v60  ;;  %v10949_v33 = vand.u32 4294901760, %v43765_v11  ;;  %v10944_v60 = vand.u32 4294901760, %v10943_v37  ;;  %v31337_v37 = vld [vmem:[%s39391_s24 + $0x60] sm:$0xff] }
 0x341   : > { %34661 = vmatpush3.msra.mxu1 %v43597_v57  ;;  %34662 = vmatprep.mubr.f32.mxu1 %v43503_v49  ;;  %v43793_v57 = vsub.f32 %v10820_v29, %v43771_v62 }
 0x342   : > { %37389 = vmatprep.subr.bf16.mxu1 %v43545_v12  ;;  %36437 = vmatpush3.msra.mxu0 %v43686_v56  ;;  %v43801_v56 = vpack.c.bf16 %v10835_v6, %v10832_v39  ;;  %v43827_v39 = vsub.f32 %v10826_v26, %v43795_v52  ;;  %v43832_v6 = vld [vmem:[%s45635_s1 + $0x3f0] sm:$0xff]  ;;  %v31340_v26 = vld [vmem:[%s45635_s1 + $0x400] sm:$0x7f] }
 0x343   : > { %36439 = vmatmul.mubr.f32.vlgmr.msra.gmra.mrb[0].mxu0 %v43653_v7  ;;  %37981 = vmatprep.subr.bf16.mxu0 %v43671_v2  ;;  %v10911_v9 = vand.u32 4294901760, %v43793_v57  ;;  %v10903_v7 = vand.u32 4294901760, %v10902_v42  ;;  %v43901_v42 = vsub.f32 %v26533_v23, %v43868_v45 }
 0x344   : > { %34663 = vmatmul.mubr.f32.vlgmr.msra.gmra.mrb[0].mxu1 %v43515_v51  ;;  %36441 = vmatprep.mubr.f32.mxu0 %v43666_v18  ;;  %v10931_v29 = vand.u32 4294901760, %v43827_v39 }
 0x345   : > { %37391 = vmatpush3.bf16.msra.mxu1 %v43545_v12  ;;  %34665 = vmatprep.mubr.f32.mxu1 %v43526_v17  ;;  %v10950_v12 = vsub.f32 %v43765_v11, %v10949_v33  ;;  %v10912_v40 = vsub.f32 %v43793_v57, %v10911_v9 }
 0x346   : > { %34672 = vmatprep.subr.mxu1 %v43530_v1  ;;  %37983 = vmatpush3.bf16.msra.mxu0 %v43671_v2  ;;  %v10932_v22 = vsub.f32 %v43827_v39, %v10931_v29 }
 0x347   : > { %36442 = vmatmul.mubr.f32.gmra.mrb[2].mxu0 %v43683_v4  ;;  %36448 = vmatprep.subr.mxu0 %v43658_v55  ;;  %v10913_v31 = vand.u32 4294901760, %v10912_v40 }
 0x348   : > { %34666 = vmatmul.mubr.f32.gmra.mrb[2].mxu1 %v43539_v46  ;;  %36450 = vmatprep.mubr.f32.mxu0 %v25986_v19  ;;  %v10951_v19 = vand.u32 4294901760, %v10950_v12 }
 0x349   : > { %34673 = vmatpush3.msra.mxu1 %v43530_v1  ;;  %34674 = vmatprep.mubr.f32.mxu1 %v43503_v49  ;;  %v26548_v1 = vand.u32 4294901760, %v43832_v6  ;;  %v31336_v49 = vld [vmem:[%s39391_s24 + $0x50] sm:$0xff] }
 0x34a   : > { %37393 = vmatprep.subr.bf16.mxu1 %v43801_v56  ;;  %36449 = vmatpush3.msra.mxu0 %v43658_v55  ;;  %v37396_v18 = vpack.c.bf16 %v10951_v19, %v10944_v60 }
 0x34b   : > { %36451 = vmatmul.mubr.f32.vlgmr.msra.gmra.mrb[0].mxu0 %v25996_v59  ;;  %37985 = vmatprep.subr.bf16.mxu0 %v37984_v44  ;;  %v10922_v59 = vsub.f32 %v43805_v54, %v10921_v34  ;;  %v43886_v12 = vsub.f32 %v43832_v6, %v26548_v1  ;;  %v26545_v6 = vsel %vm158_vm0, %v31340_v26, 0  ;;  %v43927_v26 = vpack.c.bf16 %v26551_v8, %v26548_v1 }
 0x34c   : > { %34675 = vmatmul.mubr.f32.vlgmr.msra.gmra.mrb[0].mxu1 %v43515_v51  ;;  %36453 = vmatprep.mubr.f32.mxu0 %v26006_v43  ;;  %v26539_v51 = vsel %vm145_vm1, %v31336_v49, 0  ;;  %v10957_v43 = vsub.f32 %v43816_v63, %v43853_v53  ;;  %v43914_v23 = vand.u32 4294901760, %v26545_v6 }
 0x34d   : > { %37395 = vmatpush3.bf16.msra.mxu1 %v43801_v56  ;;  %34677 = vmatprep.mubr.f32.mxu1 %v43526_v17  ;;  %v43883_v17 = vand.u32 4294901760, %v26536_v15  ;;  %v43903_v4 = vand.u32 4294901760, %v26539_v51  ;;  %v10923_v60 = vand.u32 4294901760, %v10922_v59  ;;  %v26658_v19 = vand.u32 4294901760, %v43886_v12 }
 0x34e   : > { %34684 = vmatprep.subr.mxu1 %v43786_v21  ;;  %37987 = vmatpush3.bf16.msra.mxu0 %v37984_v44  ;;  %v43895_v44 = vsub.f32 %v43840_v35, %v26551_v8  ;;  %v10958_v35 = vand.u32 4294901760, %v10957_v43  ;;  %v37400_v59 = vpack.c.bf16 %v43765_v11, %v43763_v41  ;;  %v31153_v41 = vld [vmem:[%s39391_s24 + $0x22] sm:$0xff] }
 0x34f   : > { %36454 = vmatmul.mubr.f32.gmra.mrb[2].mxu0 %v26016_v10  ;;  %36460 = vmatprep.subr.mxu0 %v43702_v32  ;;  %v26542_v10 = vsel %vm145_vm1, %v31337_v37, 0  ;;  %v26659_v43 = vsub.f32 %v43886_v12, %v26658_v19 }
 0x350   : > { %34678 = vmatmul.mubr.f32.gmra.mrb[2].mxu1 %v43539_v46  ;;  %36462 = vmatprep.mubr.f32.mxu0 %v43612_v30  ;;  %v43909_v46 = vsub.f32 %v26536_v15, %v43883_v17  ;;  %v26665_v49 = vand.u32 4294901760, %v43895_v44  ;;  %v43917_v40 = vand.u32 4294901760, %v26542_v10  ;;  %v43922_v15 = vsub.f32 %v26539_v51, %v43903_v4 }
 0x351   : > { %34685 = vmatpush3.msra.mxu1 %v43786_v21  ;;  %34686 = vmatprep.mubr.f32.mxu1 %v10903_v7  ;;  %v10933_v7 = vand.u32 4294901760, %v10932_v22 }
 0x352   : > { %37397 = vmatprep.subr.bf16.mxu1 %v37396_v18  ;;  %36461 = vmatpush3.msra.mxu0 %v43702_v32  ;;  %v26617_v32 = vand.u32 4294901760, %v43901_v42  ;;  %v26627_v37 = vand.u32 4294901760, %v43909_v46  ;;  %v26666_v51 = vsub.f32 %v43895_v44, %v26665_v49  ;;  %v26637_v8 = vand.u32 4294901760, %v43922_v15 }
 0x353   : > { %36463 = vmatmul.mubr.f32.vlgmr.msra.gmra.mrb[0].mxu0 %v43627_v36  ;;  %37989 = vmatprep.subr.bf16.mxu0 %v43671_v2 }
 0x354   : > { %34687 = vmatmul.mubr.f32.vlgmr.msra.gmra.mrb[0].mxu1 %v10913_v31  ;;  %36465 = vmatprep.mubr.f32.mxu0 %v43647_v5  ;;  %v26618_v1 = vsub.f32 %v43901_v42, %v26617_v32  ;;  %v26628_v31 = vsub.f32 %v43909_v46, %v26627_v37  ;;  %v26667_v22 = vand.u32 4294901760, %v26666_v51  ;;  %v38000_v51 = vpack.c.bf16 %v43895_v44, %v43886_v12  ;;  %v44096_v12 = vld [vmem:[%s45635_s1 + $0x410] sm:$0xff] }
 0x355   : > { %37399 = vmatpush3.bf16.msra.mxu1 %v37396_v18  ;;  %34689 = vmatprep.mubr.f32.mxu1 %v10923_v60  ;;  %v43939_v18 = vsub.f32 %v26542_v10, %v43917_v40  ;;  %v26638_v60 = vsub.f32 %v43922_v15, %v26637_v8  ;;  %v31344_v44 = vld [vmem:[%s39391_s24 + $0xf0] sm:$0xff] }
 0x356   : > { %34696 = vmatprep.subr.mxu1 %v10958_v35  ;;  %37991 = vmatpush3.bf16.msra.mxu0 %v43671_v2  ;;  %v43942_v2 = vsub.f32 %v26545_v6, %v43914_v23 }
 0x357   : > { %36466 = vmatmul.mubr.f32.gmra.mrb[2].mxu0 %v43661_v47  ;;  %36472 = vmatprep.subr.mxu0 %v43658_v55  ;;  %v26647_v6 = vand.u32 4294901760, %v43939_v18 }
 0x358   : > { %34690 = vmatmul.mubr.f32.gmra.mrb[2].mxu1 %v10933_v7  ;;  %36474 = vmatprep.mubr.f32.mxu0 %v43612_v30  ;;  %v26660_v30 = vand.u32 4294901760, %v26659_v43  ;;  %v43958_v10 = vand.u32 4294901760, %v43942_v2 }
 0x359   : > { %34697 = vmatpush3.msra.mxu1 %v10958_v35  ;;  %34698 = vmatprep.mubr.f32.mxu1 %v43759_v50 }
 0x35a   : > { %37401 = vmatprep.subr.bf16.mxu1 %v37400_v59  ;;  %36473 = vmatpush3.msra.mxu0 %v43658_v55  ;;  %v26619_v55 = vand.u32 4294901760, %v26618_v1  ;;  %v37996_v35 = vpack.c.bf16 %v26667_v22, %v26660_v30  ;;  %v26673_v7 = vsub.f32 %v43942_v2, %v43958_v10  ;;  %v31156_v1 = vld [vmem:[%s45635_s1 + $0x1b0] sm:$0xff] }
 0x35b   : > { %36475 = vmatmul.mubr.f32.vlgmr.msra.gmra.mrb[0].mxu0 %v43627_v36  ;;  %37993 = vmatprep.subr.bf16.mxu0 %v43927_v26  ;;  %v26629_v36 = vand.u32 4294901760, %v26628_v31  ;;  %v31157_v31 = vld [vmem:[%s45635_s1 + $0x1b8] sm:$0xff]  ;;  %v11460_v11 = vand.u32 4294901760, %v31156_v1 }
 0x35c   : > { %34699 = vmatmul.mubr.f32.vlgmr.msra.gmra.mrb[0].mxu1 %v43771_v62  ;;  %36477 = vmatprep.mubr.f32.mxu0 %v43647_v5  ;;  %v26648_v5 = vsub.f32 %v43939_v18, %v26647_v6  ;;  %v26674_v43 = vand.u32 4294901760, %v26673_v7  ;;  %v31152_v30 = vld [vmem:[%s39391_s24 + $0x12] sm:$0xff] }
 0x35d   : > { %37403 = vmatpush3.bf16.msra.mxu1 %v37400_v59  ;;  %34701 = vmatprep.mubr.f32.mxu1 %v43782_v20  ;;  %v26639_v59 = vand.u32 4294901760, %v26638_v60  ;;  %v31154_v22 = vld [vmem:[%s39391_s24 + $0x32] sm:$0xff]  ;;  %v31155_v60 = vld [vmem:[%s39391_s24 + $0x42] sm:$0xff] }
 0x35e   : > { %34708 = vmatprep.subr.mxu1 %v43816_v63  ;;  %37995 = vmatpush3.bf16.msra.mxu0 %v43927_v26 }
 0x35f   : > { %36478 = vmatmul.mubr.f32.gmra.mrb[2].mxu0 %v43661_v47  ;;  %36484 = vmatprep.subr.mxu0 %v43914_v23  ;;  %v26649_v47 = vand.u32 4294901760, %v26648_v5 }
 0x360   : > { %34702 = vmatmul.mubr.f32.gmra.mrb[2].mxu1 %v43795_v52  ;;  %36486 = vmatprep.mubr.f32.mxu0 %v26619_v55 }
 0x361   : > { %34709 = vmatpush3.msra.mxu1 %v43816_v63  ;;  %34710 = vmatprep.mubr.f32.mxu1 %v43780_v0  ;;  %v37408_v63 = vpack.c.bf16 %v10949_v33, %v10942_v16  ;;  %v11463_v16 = vand.u32 4294901760, %v31157_v31  ;;  %v11445_v33 = vsel %vm145_vm1, %v31152_v30, 0  ;;  %v31158_v0 = vld [vmem:[%s45635_s1 + $0x1c0] sm:$0x7f]  ;;  %v38008_v30 = vpack.c.bf16 %v26665_v49, %v26658_v19 }
 0x362   : > { %37405 = vmatprep.subr.bf16.mxu1 %v43801_v56  ;;  %36485 = vmatpush3.msra.mxu0 %v43914_v23  ;;  %v44015_v55 = vand.u32 4294901760, %v11445_v33 }
 0x363   : > { %36487 = vmatmul.mubr.f32.vlgmr.msra.gmra.mrb[0].mxu0 %v26629_v36  ;;  %37997 = vmatprep.subr.bf16.mxu0 %v37996_v35  ;;  %v11451_v36 = vsel %vm145_vm1, %v31154_v22, 0 }
 0x364   : > { %34711 = vmatmul.mubr.f32.vlgmr.msra.gmra.mrb[0].mxu1 %v43793_v57  ;;  %36489 = vmatprep.mubr.f32.mxu0 %v26639_v59  ;;  %v44019_v57 = vsub.f32 %v31156_v1, %v11460_v11  ;;  %v44036_v5 = vsub.f32 %v11445_v33, %v44015_v55  ;;  %v44038_v7 = vand.u32 4294901760, %v11451_v36 }
 0x365   : > { %37407 = vmatpush3.bf16.msra.mxu1 %v43801_v56  ;;  %34713 = vmatprep.mubr.f32.mxu1 %v43805_v54 }
 0x366   : > { %34720 = vmatprep.subr.mxu1 %v43786_v21  ;;  %37999 = vmatpush3.bf16.msra.mxu0 %v37996_v35  ;;  %v11457_v35 = vsel %vm158_vm0, %v31158_v0, 0 }
 0x367   : > { %36490 = vmatmul.mubr.f32.gmra.mrb[2].mxu0 %v26649_v47  ;;  %36496 = vmatprep.subr.mxu0 %v26674_v43  ;;  %v44042_v59 = vand.u32 4294901760, %v11457_v35 }
 0x368   : > { %34714 = vmatmul.mubr.f32.gmra.mrb[2].mxu1 %v43827_v39  ;;  %36498 = vmatprep.mubr.f32.mxu0 %v43868_v45  ;;  %v11570_v39 = vand.u32 4294901760, %v44019_v57 }
 0x369   : > { %34721 = vmatpush3.msra.mxu1 %v43786_v21  ;;  %34722 = vmatprep.mubr.f32.mxu1 %v10901_v38  ;;  %v11448_v38 = vsel %vm145_vm1, %v31153_v41, 0  ;;  %v44072_v1 = vsub.f32 %v11457_v35, %v44042_v59 }
 0x36a   : > { %37409 = vmatprep.subr.bf16.mxu1 %v37408_v63  ;;  %36497 = vmatpush3.msra.mxu0 %v26674_v43  ;;  %v44027_v54 = vand.u32 4294901760, %v11448_v38  ;;  %v11529_v43 = vand.u32 4294901760, %v44036_v5 }
 0x36b   : > { %36499 = vmatmul.mubr.f32.vlgmr.msra.gmra.mrb[0].mxu0 %v43883_v17  ;;  %38001 = vmatprep.subr.bf16.mxu0 %v38000_v51  ;;  %v44109_v22 = vand.u32 4294901760, %v44072_v1 }
 0x36c   : > { %34723 = vmatmul.mubr.f32.vlgmr.msra.gmra.mrb[0].mxu1 %v10911_v9  ;;  %36501 = vmatprep.mubr.f32.mxu0 %v43903_v4  ;;  %v44021_v9 = vsub.f32 %v31157_v31, %v11463_v16  ;;  %v31343_v31 = vld [vmem:[%s39391_s24 + $0xe0] sm:$0xff]  ;;  %v11530_v19 = vsub.f32 %v44036_v5, %v11529_v43 }
 0x36d   : > { %37411 = vmatpush3.bf16.msra.mxu1 %v37408_v63  ;;  %34725 = vmatprep.mubr.f32.mxu1 %v10921_v34  ;;  %v11454_v34 = vsel %vm145_vm1, %v31155_v60, 0  ;;  %v44061_v63 = vsub.f32 %v11451_v36, %v44038_v7  ;;  %v27163_v33 = vsel %vm145_vm1, %v31343_v31, 0  ;;  %v27181_v60 = vand.u32 4294901760, %v44096_v12 }
 0x36e   : > { %34732 = vmatprep.subr.mxu1 %v43853_v53  ;;  %38003 = vmatpush3.bf16.msra.mxu0 %v38000_v51  ;;  %v44051_v47 = vand.u32 4294901760, %v11454_v34  ;;  %v11571_v51 = vsub.f32 %v44019_v57, %v11570_v39  ;;  %v27166_v36 = vsel %vm145_vm1, %v31344_v44, 0  ;;  %v44124_v35 = vand.u32 4294901760, %v27163_v33 }
 0x36f   : > { %36502 = vmatmul.mubr.f32.gmra.mrb[2].mxu0 %v43917_v40  ;;  %36508 = vmatprep.subr.mxu0 %v43942_v2  ;;  %v11549_v49 = vand.u32 4294901760, %v44061_v63 }
 0x370   : > { %34726 = vmatmul.mubr.f32.gmra.mrb[2].mxu1 %v10931_v29  ;;  %36510 = vmatprep.mubr.f32.mxu0 %v43901_v42  ;;  %v11577_v29 = vand.u32 4294901760, %v44021_v9  ;;  %v11572_v42 = vand.u32 4294901760, %v11571_v51  ;;  %v31346_v51 = vld [vmem:[%s39391_s24 + $0x110] sm:$0xff] }
 0x371   : > { %34733 = vmatpush3.msra.mxu1 %v43853_v53  ;;  %34734 = vmatprep.mubr.f32.mxu1 %v43759_v50  ;;  %v44049_v53 = vsub.f32 %v11448_v38, %v44027_v54 }
 0x372   : > { %37413 = vmatprep.subr.bf16.mxu1 %v43801_v56  ;;  %36509 = vmatpush3.msra.mxu0 %v43942_v2  ;;  %v44057_v2 = vpack.c.bf16 %v11463_v16, %v11460_v11  ;;  %v44083_v11 = vsub.f32 %v11454_v34, %v44051_v47  ;;  %v44088_v16 = vld [vmem:[%s45635_s1 + $0x408] sm:$0xff]  ;;  %v31349_v34 = vld [vmem:[%s45635_s1 + $0x418] sm:$0x7f] }
 0x373   : > { %36511 = vmatmul.mubr.f32.vlgmr.msra.gmra.mrb[0].mxu0 %v43909_v46  ;;  %38005 = vmatprep.subr.bf16.mxu0 %v43927_v26  ;;  %v11539_v41 = vand.u32 4294901760, %v44049_v53  ;;  %v11531_v46 = vand.u32 4294901760, %v11530_v19  ;;  %v44157_v19 = vsub.f32 %v27163_v33, %v44124_v35 }
 0x374   : > { %34735 = vmatmul.mubr.f32.vlgmr.msra.gmra.mrb[0].mxu1 %v43771_v62  ;;  %36513 = vmatprep.mubr.f32.mxu0 %v43922_v15  ;;  %v11559_v38 = vand.u32 4294901760, %v44083_v11 }
 0x375   : > { %37415 = vmatpush3.bf16.msra.mxu1 %v43801_v56  ;;  %34737 = vmatprep.mubr.f32.mxu1 %v43782_v20  ;;  %v11578_v56 = vsub.f32 %v44021_v9, %v11577_v29  ;;  %v11540_v0 = vsub.f32 %v44049_v53, %v11539_v41 }
 0x376   : > { %34744 = vmatprep.subr.mxu1 %v43786_v21  ;;  %38007 = vmatpush3.bf16.msra.mxu0 %v43927_v26  ;;  %v11560_v44 = vsub.f32 %v44083_v11, %v11559_v38 }
 0x377   : > { %36514 = vmatmul.mubr.f32.gmra.mrb[2].mxu0 %v43939_v18  ;;  %36520 = vmatprep.subr.mxu0 %v43914_v23  ;;  %v11541_v31 = vand.u32 4294901760, %v11540_v0 }
 0x378   : > { %34738 = vmatmul.mubr.f32.gmra.mrb[2].mxu1 %v43795_v52  ;;  %36522 = vmatprep.mubr.f32.mxu0 %v26617_v32  ;;  %v11579_v32 = vand.u32 4294901760, %v11578_v56 }
 0x379   : > { %34745 = vmatpush3.msra.mxu1 %v43786_v21  ;;  %34746 = vmatprep.mubr.f32.mxu1 %v43759_v50  ;;  %v27178_v21 = vand.u32 4294901760, %v44088_v16  ;;  %v31345_v50 = vld [vmem:[%s39391_s24 + $0x100] sm:$0xff] }
 0x37a   : > { %37417 = vmatprep.subr.bf16.mxu1 %v44057_v2  ;;  %36521 = vmatpush3.msra.mxu0 %v43914_v23  ;;  %v37420_v15 = vpack.c.bf16 %v11579_v32, %v11572_v42 }
 0x37b   : > { %36523 = vmatmul.mubr.f32.vlgmr.msra.gmra.mrb[0].mxu0 %v26627_v37  ;;  %38009 = vmatprep.subr.bf16.mxu0 %v38008_v30  ;;  %v11550_v37 = vsub.f32 %v44061_v63, %v11549_v49  ;;  %v44142_v56 = vsub.f32 %v44088_v16, %v27178_v21  ;;  %v27175_v16 = vsel %vm158_vm0, %v31349_v34, 0  ;;  %v44183_v34 = vpack.c.bf16 %v27181_v60, %v27178_v21 }
 0x37c   : > { %34747 = vmatmul.mubr.f32.vlgmr.msra.gmra.mrb[0].mxu1 %v43771_v62  ;;  %36525 = vmatprep.mubr.f32.mxu0 %v26637_v8  ;;  %v27169_v62 = vsel %vm145_vm1, %v31345_v50, 0  ;;  %v11585_v8 = vsub.f32 %v44072_v1, %v44109_v22  ;;  %v44170_v33 = vand.u32 4294901760, %v27175_v16 }
 0x37d   : > { %37419 = vmatpush3.bf16.msra.mxu1 %v44057_v2  ;;  %34749 = vmatprep.mubr.f32.mxu1 %v43782_v20  ;;  %v44139_v20 = vand.u32 4294901760, %v27166_v36  ;;  %v44159_v18 = vand.u32 4294901760, %v27169_v62  ;;  %v11551_v42 = vand.u32 4294901760, %v11550_v37  ;;  %v27288_v32 = vand.u32 4294901760, %v44142_v56 }
 0x37e   : > { %34756 = vmatprep.subr.mxu1 %v44042_v59  ;;  %38011 = vmatpush3.bf16.msra.mxu0 %v38008_v30  ;;  %v44151_v30 = vsub.f32 %v44096_v12, %v27181_v60  ;;  %v11586_v12 = vand.u32 4294901760, %v11585_v8  ;;  %v37424_v37 = vpack.c.bf16 %v44021_v9, %v44019_v57  ;;  %v31160_v57 = vld [vmem:[%s39391_s24 + $0xd2] sm:$0xff] }
 0x37f   : > { %36526 = vmatmul.mubr.f32.gmra.mrb[2].mxu0 %v26647_v6  ;;  %36532 = vmatprep.subr.mxu0 %v43958_v10  ;;  %v27172_v6 = vsel %vm145_vm1, %v31346_v51, 0  ;;  %v27289_v8 = vsub.f32 %v44142_v56, %v27288_v32 }
 0x380   : > { %34750 = vmatmul.mubr.f32.gmra.mrb[2].mxu1 %v43795_v52  ;;  %36534 = vmatprep.mubr.f32.mxu0 %v43868_v45  ;;  %v44165_v52 = vsub.f32 %v27166_v36, %v44139_v20  ;;  %v27295_v50 = vand.u32 4294901760, %v44151_v30  ;;  %v44173_v0 = vand.u32 4294901760, %v27172_v6  ;;  %v44178_v36 = vsub.f32 %v27169_v62, %v44159_v18 }
 0x381   : > { %34757 = vmatpush3.msra.mxu1 %v44042_v59  ;;  %34758 = vmatprep.mubr.f32.mxu1 %v11531_v46  ;;  %v11561_v46 = vand.u32 4294901760, %v11560_v44 }
 0x382   : > { %37421 = vmatprep.subr.bf16.mxu1 %v37420_v15  ;;  %36533 = vmatpush3.msra.mxu0 %v43958_v10  ;;  %v27247_v10 = vand.u32 4294901760, %v44157_v19  ;;  %v27257_v51 = vand.u32 4294901760, %v44165_v52  ;;  %v27296_v62 = vsub.f32 %v44151_v30, %v27295_v50  ;;  %v27267_v60 = vand.u32 4294901760, %v44178_v36 }
 0x383   : > { %36535 = vmatmul.mubr.f32.vlgmr.msra.gmra.mrb[0].mxu0 %v43883_v17  ;;  %38013 = vmatprep.subr.bf16.mxu0 %v43927_v26 }
 0x384   : > { %34759 = vmatmul.mubr.f32.vlgmr.msra.gmra.mrb[0].mxu1 %v11541_v31  ;;  %36537 = vmatprep.mubr.f32.mxu0 %v43903_v4  ;;  %v27248_v21 = vsub.f32 %v44157_v19, %v27247_v10  ;;  %v27258_v31 = vsub.f32 %v44165_v52, %v27257_v51  ;;  %v27297_v44 = vand.u32 4294901760, %v27296_v62  ;;  %v38024_v62 = vpack.c.bf16 %v44151_v30, %v44142_v56  ;;  %v44352_v56 = vld [vmem:[%s45635_s1 + $0x428] sm:$0xff] }
 0x385   : > { %37423 = vmatpush3.bf16.msra.mxu1 %v37420_v15  ;;  %34761 = vmatprep.mubr.f32.mxu1 %v11551_v42  ;;  %v44195_v15 = vsub.f32 %v27172_v6, %v44173_v0  ;;  %v27268_v42 = vsub.f32 %v44178_v36, %v27267_v60  ;;  %v31351_v30 = vld [vmem:[%s39391_s24 + $0x41] sm:$0xff] }
 0x386   : > { %34768 = vmatprep.subr.mxu1 %v11586_v12  ;;  %38015 = vmatpush3.bf16.msra.mxu0 %v43927_v26  ;;  %v44198_v26 = vsub.f32 %v27175_v16, %v44170_v33 }
 0x387   : > { %36538 = vmatmul.mubr.f32.gmra.mrb[2].mxu0 %v43917_v40  ;;  %36544 = vmatprep.subr.mxu0 %v43914_v23  ;;  %v27277_v16 = vand.u32 4294901760, %v44195_v15 }
 0x388   : > { %34762 = vmatmul.mubr.f32.gmra.mrb[2].mxu1 %v11561_v46  ;;  %36546 = vmatprep.mubr.f32.mxu0 %v43868_v45  ;;  %v27290_v45 = vand.u32 4294901760, %v27289_v8  ;;  %v44214_v6 = vand.u32 4294901760, %v44198_v26 }
 0x389   : > { %34769 = vmatpush3.msra.mxu1 %v11586_v12  ;;  %34770 = vmatprep.mubr.f32.mxu1 %v44015_v55 }
 0x38a   : > { %37425 = vmatprep.subr.bf16.mxu1 %v37424_v37  ;;  %36545 = vmatpush3.msra.mxu0 %v43914_v23  ;;  %v27249_v23 = vand.u32 4294901760, %v27248_v21  ;;  %v38020_v12 = vpack.c.bf16 %v27297_v44, %v27290_v45  ;;  %v27303_v46 = vsub.f32 %v44198_v26, %v44214_v6  ;;  %v31163_v21 = vld [vmem:[%s45635_s1 + $0x1c8] sm:$0xff] }
 0x38b   : > { %36547 = vmatmul.mubr.f32.vlgmr.msra.gmra.mrb[0].mxu0 %v43883_v17  ;;  %38017 = vmatprep.subr.bf16.mxu0 %v44183_v34  ;;  %v27259_v17 = vand.u32 4294901760, %v27258_v31  ;;  %v31164_v31 = vld [vmem:[%s45635_s1 + $0x1d0] sm:$0xff]  ;;  %v31159_v45 = vld [vmem:[%s39391_s24 + $0xc2] sm:$0xff]  ;;  %v12088_v9 = vand.u32 4294901760, %v31163_v21 }
 0x38c   : > { %34771 = vmatmul.mubr.f32.vlgmr.msra.gmra.mrb[0].mxu1 %v44027_v54  ;;  %36549 = vmatprep.mubr.f32.mxu0 %v43903_v4  ;;  %v27278_v4 = vsub.f32 %v44195_v15, %v27277_v16  ;;  %v27304_v8 = vand.u32 4294901760, %v27303_v46  ;;  %v31161_v44 = vld [vmem:[%s39391_s24 + $0xe2] sm:$0xff] }
 0x38d   : > { %37427 = vmatpush3.bf16.msra.mxu1 %v37424_v37  ;;  %34773 = vmatprep.mubr.f32.mxu1 %v44038_v7  ;;  %v27269_v37 = vand.u32 4294901760, %v27268_v42  ;;  %v31162_v42 = vld [vmem:[%s39391_s24 + $0xf2] sm:$0xff] }
 0x38e   : > { %34780 = vmatprep.subr.mxu1 %v44072_v1  ;;  %38019 = vmatpush3.bf16.msra.mxu0 %v44183_v34 }
 0x38f   : > { %36550 = vmatmul.mubr.f32.gmra.mrb[2].mxu0 %v43917_v40  ;;  %36556 = vmatprep.subr.mxu0 %v44170_v33  ;;  %v27279_v40 = vand.u32 4294901760, %v27278_v4 }
 0x390   : > { %34774 = vmatmul.mubr.f32.gmra.mrb[2].mxu1 %v44051_v47  ;;  %36558 = vmatprep.mubr.f32.mxu0 %v27249_v23 }
 0x391   : > { %34781 = vmatpush3.msra.mxu1 %v44072_v1  ;;  %34782 = vmatprep.mubr.f32.mxu1 %v44036_v5  ;;  %v37432_v1 = vpack.c.bf16 %v11577_v29, %v11570_v39  ;;  %v12091_v39 = vand.u32 4294901760, %v31164_v31  ;;  %v12073_v29 = vsel %vm145_vm1, %v31159_v45, 0  ;;  %v31165_v5 = vld [vmem:[%s45635_s1 + $0x1d8] sm:$0x7f]  ;;  %v38032_v45 = vpack.c.bf16 %v27295_v50, %v27288_v32 }
 0x392   : > { %37429 = vmatprep.subr.bf16.mxu1 %v44057_v2  ;;  %36557 = vmatpush3.msra.mxu0 %v44170_v33  ;;  %v44271_v23 = vand.u32 4294901760, %v12073_v29 }
 0x393   : > { %36559 = vmatmul.mubr.f32.vlgmr.msra.gmra.mrb[0].mxu0 %v27259_v17  ;;  %38021 = vmatprep.subr.bf16.mxu0 %v38020_v12  ;;  %v12079_v17 = vsel %vm145_vm1, %v31161_v44, 0 }
 0x394   : > { %34783 = vmatmul.mubr.f32.vlgmr.msra.gmra.mrb[0].mxu1 %v44049_v53  ;;  %36561 = vmatprep.mubr.f32.mxu0 %v27269_v37  ;;  %v44275_v53 = vsub.f32 %v31163_v21, %v12088_v9  ;;  %v44292_v4 = vsub.f32 %v12073_v29, %v44271_v23  ;;  %v44294_v46 = vand.u32 4294901760, %v12079_v17 }
 0x395   : > { %37431 = vmatpush3.bf16.msra.mxu1 %v44057_v2  ;;  %34785 = vmatprep.mubr.f32.mxu1 %v44061_v63 }
 0x396   : > { %34792 = vmatprep.subr.mxu1 %v44042_v59  ;;  %38023 = vmatpush3.bf16.msra.mxu0 %v38020_v12  ;;  %v12085_v12 = vsel %vm158_vm0, %v31165_v5, 0 }
 0x397   : > { %36562 = vmatmul.mubr.f32.gmra.mrb[2].mxu0 %v27279_v40  ;;  %36568 = vmatprep.subr.mxu0 %v27304_v8  ;;  %v44298_v37 = vand.u32 4294901760, %v12085_v12 }
 0x398   : > { %34786 = vmatmul.mubr.f32.gmra.mrb[2].mxu1 %v44083_v11  ;;  %36570 = vmatprep.mubr.f32.mxu0 %v44124_v35  ;;  %v12198_v11 = vand.u32 4294901760, %v44275_v53 }
 0x399   : > { %34793 = vmatpush3.msra.mxu1 %v44042_v59  ;;  %34794 = vmatprep.mubr.f32.mxu1 %v11529_v43  ;;  %v12076_v43 = vsel %vm145_vm1, %v31160_v57, 0  ;;  %v44328_v21 = vsub.f32 %v12085_v12, %v44298_v37 }
 0x39a   : > { %37433 = vmatprep.subr.bf16.mxu1 %v37432_v1  ;;  %36569 = vmatpush3.msra.mxu0 %v27304_v8  ;;  %v44283_v63 = vand.u32 4294901760, %v12076_v43  ;;  %v12157_v8 = vand.u32 4294901760, %v44292_v4 }
 0x39b   : > { %36571 = vmatmul.mubr.f32.vlgmr.msra.gmra.mrb[0].mxu0 %v44139_v20  ;;  %38025 = vmatprep.subr.bf16.mxu0 %v38024_v62  ;;  %v44365_v44 = vand.u32 4294901760, %v44328_v21 }
 0x39c   : > { %34795 = vmatmul.mubr.f32.vlgmr.msra.gmra.mrb[0].mxu1 %v11539_v41  ;;  %36573 = vmatprep.mubr.f32.mxu0 %v44159_v18  ;;  %v44277_v41 = vsub.f32 %v31164_v31, %v12091_v39  ;;  %v31350_v31 = vld [vmem:[%s39391_s24 + $0x31] sm:$0xff]  ;;  %v12158_v32 = vsub.f32 %v44292_v4, %v12157_v8 }
 0x39d   : > { %37435 = vmatpush3.bf16.msra.mxu1 %v37432_v1  ;;  %34797 = vmatprep.mubr.f32.mxu1 %v11549_v49  ;;  %v12082_v49 = vsel %vm145_vm1, %v31162_v42, 0  ;;  %v44317_v1 = vsub.f32 %v12079_v17, %v44294_v46  ;;  %v27791_v29 = vsel %vm145_vm1, %v31350_v31, 0  ;;  %v27809_v42 = vand.u32 4294901760, %v44352_v56 }
 0x39e   : > { %34804 = vmatprep.subr.mxu1 %v44109_v22  ;;  %38027 = vmatpush3.bf16.msra.mxu0 %v38024_v62  ;;  %v44307_v40 = vand.u32 4294901760, %v12082_v49  ;;  %v12199_v62 = vsub.f32 %v44275_v53, %v12198_v11  ;;  %v27794_v17 = vsel %vm145_vm1, %v31351_v30, 0  ;;  %v44380_v12 = vand.u32 4294901760, %v27791_v29 }
 0x39f   : > { %36574 = vmatmul.mubr.f32.gmra.mrb[2].mxu0 %v44173_v0  ;;  %36580 = vmatprep.subr.mxu0 %v44198_v26  ;;  %v12177_v50 = vand.u32 4294901760, %v44317_v1 }
 0x3a0   : > { %34798 = vmatmul.mubr.f32.gmra.mrb[2].mxu1 %v11559_v38  ;;  %36582 = vmatprep.mubr.f32.mxu0 %v44157_v19  ;;  %v12205_v38 = vand.u32 4294901760, %v44277_v41  ;;  %v12200_v19 = vand.u32 4294901760, %v12199_v62  ;;  %v31353_v62 = vld [vmem:[%s39391_s24 + $0x61] sm:$0xff] }
 0x3a1   : > { %34805 = vmatpush3.msra.mxu1 %v44109_v22  ;;  %34806 = vmatprep.mubr.f32.mxu1 %v44015_v55  ;;  %v44305_v22 = vsub.f32 %v12076_v43, %v44283_v63 }
 0x3a2   : > { %37437 = vmatprep.subr.bf16.mxu1 %v44057_v2  ;;  %36581 = vmatpush3.msra.mxu0 %v44198_v26  ;;  %v44313_v26 = vpack.c.bf16 %v12091_v39, %v12088_v9  ;;  %v44339_v9 = vsub.f32 %v12082_v49, %v44307_v40  ;;  %v44344_v39 = vld [vmem:[%s45635_s1 + $0x420] sm:$0xff]  ;;  %v31356_v49 = vld [vmem:[%s45635_s1 + $0x430] sm:$0x7f] }
 0x3a3   : > { %36583 = vmatmul.mubr.f32.vlgmr.msra.gmra.mrb[0].mxu0 %v44165_v52  ;;  %38029 = vmatprep.subr.bf16.mxu0 %v44183_v34  ;;  %v12167_v57 = vand.u32 4294901760, %v44305_v22  ;;  %v12159_v52 = vand.u32 4294901760, %v12158_v32  ;;  %v44413_v32 = vsub.f32 %v27791_v29, %v44380_v12 }
 0x3a4   : > { %34807 = vmatmul.mubr.f32.vlgmr.msra.gmra.mrb[0].mxu1 %v44027_v54  ;;  %36585 = vmatprep.mubr.f32.mxu0 %v44178_v36  ;;  %v12187_v43 = vand.u32 4294901760, %v44339_v9 }
 0x3a5   : > { %37439 = vmatpush3.bf16.msra.mxu1 %v44057_v2  ;;  %34809 = vmatprep.mubr.f32.mxu1 %v44038_v7  ;;  %v12206_v2 = vsub.f32 %v44277_v41, %v12205_v38  ;;  %v12168_v5 = vsub.f32 %v44305_v22, %v12167_v57 }
 0x3a6   : > { %34816 = vmatprep.subr.mxu1 %v44042_v59  ;;  %38031 = vmatpush3.bf16.msra.mxu0 %v44183_v34  ;;  %v12188_v30 = vsub.f32 %v44339_v9, %v12187_v43 }
 0x3a7   : > { %36586 = vmatmul.mubr.f32.gmra.mrb[2].mxu0 %v44195_v15  ;;  %36592 = vmatprep.subr.mxu0 %v44170_v33  ;;  %v12169_v31 = vand.u32 4294901760, %v12168_v5 }
 0x3a8   : > { %34810 = vmatmul.mubr.f32.gmra.mrb[2].mxu1 %v44051_v47  ;;  %36594 = vmatprep.mubr.f32.mxu0 %v27247_v10  ;;  %v12207_v10 = vand.u32 4294901760, %v12206_v2 }
 0x3a9   : > { %34817 = vmatpush3.msra.mxu1 %v44042_v59  ;;  %34818 = vmatprep.mubr.f32.mxu1 %v44015_v55  ;;  %v27806_v59 = vand.u32 4294901760, %v44344_v39  ;;  %v31352_v55 = vld [vmem:[%s39391_s24 + $0x51] sm:$0xff] }
 0x3aa   : > { %37441 = vmatprep.subr.bf16.mxu1 %v44313_v26  ;;  %36593 = vmatpush3.msra.mxu0 %v44170_v33  ;;  %v37444_v36 = vpack.c.bf16 %v12207_v10, %v12200_v19 }
 0x3ab   : > { %36595 = vmatmul.mubr.f32.vlgmr.msra.gmra.mrb[0].mxu0 %v27257_v51  ;;  %38033 = vmatprep.subr.bf16.mxu0 %v38032_v45  ;;  %v12178_v51 = vsub.f32 %v44317_v1, %v12177_v50  ;;  %v44398_v2 = vsub.f32 %v44344_v39, %v27806_v59  ;;  %v27803_v39 = vsel %vm158_vm0, %v31356_v49, 0  ;;  %v44439_v49 = vpack.c.bf16 %v27809_v42, %v27806_v59 }
 0x3ac   : > { %34819 = vmatmul.mubr.f32.vlgmr.msra.gmra.mrb[0].mxu1 %v44027_v54  ;;  %36597 = vmatprep.mubr.f32.mxu0 %v27267_v60  ;;  %v27797_v54 = vsel %vm145_vm1, %v31352_v55, 0  ;;  %v12213_v60 = vsub.f32 %v44328_v21, %v44365_v44  ;;  %v44426_v29 = vand.u32 4294901760, %v27803_v39 }
 0x3ad   : > { %37443 = vmatpush3.bf16.msra.mxu1 %v44313_v26  ;;  %34821 = vmatprep.mubr.f32.mxu1 %v44038_v7  ;;  %v44395_v7 = vand.u32 4294901760, %v27794_v17  ;;  %v44415_v15 = vand.u32 4294901760, %v27797_v54  ;;  %v12179_v19 = vand.u32 4294901760, %v12178_v51  ;;  %v27916_v10 = vand.u32 4294901760, %v44398_v2 }
 0x3ae   : > { %34828 = vmatprep.subr.mxu1 %v44298_v37  ;;  %38035 = vmatpush3.bf16.msra.mxu0 %v38032_v45  ;;  %v44407_v45 = vsub.f32 %v44352_v56, %v27809_v42  ;;  %v12214_v56 = vand.u32 4294901760, %v12213_v60  ;;  %v37448_v51 = vpack.c.bf16 %v44277_v41, %v44275_v53  ;;  %v31167_v53 = vld [vmem:[%s39391_s24 + $0x23] sm:$0xff] }
 0x3af   : > { %36598 = vmatmul.mubr.f32.gmra.mrb[2].mxu0 %v27277_v16  ;;  %36604 = vmatprep.subr.mxu0 %v44214_v6  ;;  %v27800_v16 = vsel %vm145_vm1, %v31353_v62, 0  ;;  %v27917_v60 = vsub.f32 %v44398_v2, %v27916_v10 }
 0x3b0   : > { %34822 = vmatmul.mubr.f32.gmra.mrb[2].mxu1 %v44051_v47  ;;  %36606 = vmatprep.mubr.f32.mxu0 %v44124_v35  ;;  %v44421_v47 = vsub.f32 %v27794_v17, %v44395_v7  ;;  %v27923_v55 = vand.u32 4294901760, %v44407_v45  ;;  %v44429_v5 = vand.u32 4294901760, %v27800_v16  ;;  %v44434_v17 = vsub.f32 %v27797_v54, %v44415_v15 }
 0x3b1   : > { %34829 = vmatpush3.msra.mxu1 %v44298_v37  ;;  %34830 = vmatprep.mubr.f32.mxu1 %v12159_v52  ;;  %v12189_v52 = vand.u32 4294901760, %v12188_v30 }
 0x3b2   : > { %37445 = vmatprep.subr.bf16.mxu1 %v37444_v36  ;;  %36605 = vmatpush3.msra.mxu0 %v44214_v6  ;;  %v27875_v6 = vand.u32 4294901760, %v44413_v32  ;;  %v27885_v62 = vand.u32 4294901760, %v44421_v47  ;;  %v27924_v54 = vsub.f32 %v44407_v45, %v27923_v55  ;;  %v27895_v42 = vand.u32 4294901760, %v44434_v17 }
 0x3b3   : > { %36607 = vmatmul.mubr.f32.vlgmr.msra.gmra.mrb[0].mxu0 %v44139_v20  ;;  %38037 = vmatprep.subr.bf16.mxu0 %v44183_v34 }
 0x3b4   : > { %34831 = vmatmul.mubr.f32.vlgmr.msra.gmra.mrb[0].mxu1 %v12169_v31  ;;  %36609 = vmatprep.mubr.f32.mxu0 %v44159_v18  ;;  %v27876_v59 = vsub.f32 %v44413_v32, %v27875_v6  ;;  %v27886_v31 = vsub.f32 %v44421_v47, %v27885_v62  ;;  %v27925_v30 = vand.u32 4294901760, %v27924_v54  ;;  %v38048_v54 = vpack.c.bf16 %v44407_v45, %v44398_v2  ;;  %v44608_v2 = vld [vmem:[%s45635_s1 + $0x440] sm:$0xff]  ;;  %v31358_v45 = vld [vmem:[%s39391_s24 + $0xf1] sm:$0xff] }
 0x3b5   : > { %37447 = vmatpush3.bf16.msra.mxu1 %v37444_v36  ;;  %34833 = vmatprep.mubr.f32.mxu1 %v12179_v19  ;;  %v44451_v36 = vsub.f32 %v27800_v16, %v44429_v5  ;;  %v27896_v19 = vsub.f32 %v44434_v17, %v27895_v42 }
 0x3b6   : > { %34840 = vmatprep.subr.mxu1 %v12214_v56  ;;  %38039 = vmatpush3.bf16.msra.mxu0 %v44183_v34  ;;  %v44454_v34 = vsub.f32 %v27803_v39, %v44426_v29 }
 0x3b7   : > { %36610 = vmatmul.mubr.f32.gmra.mrb[2].mxu0 %v44173_v0  ;;  %36616 = vmatprep.subr.mxu0 %v44170_v33  ;;  %v27905_v39 = vand.u32 4294901760, %v44451_v36 }
 0x3b8   : > { %34834 = vmatmul.mubr.f32.gmra.mrb[2].mxu1 %v12189_v52  ;;  %36618 = vmatprep.mubr.f32.mxu0 %v44124_v35  ;;  %v27918_v35 = vand.u32 4294901760, %v27917_v60  ;;  %v44470_v16 = vand.u32 4294901760, %v44454_v34 }
 0x3b9   : > { %34841 = vmatpush3.msra.mxu1 %v12214_v56  ;;  %34842 = vmatprep.mubr.f32.mxu1 %v44271_v23 }
 0x3ba   : > { %37449 = vmatprep.subr.bf16.mxu1 %v37448_v51  ;;  %36617 = vmatpush3.msra.mxu0 %v44170_v33  ;;  %v27877_v33 = vand.u32 4294901760, %v27876_v59  ;;  %v38044_v56 = vpack.c.bf16 %v27925_v30, %v27918_v35  ;;  %v27931_v52 = vsub.f32 %v44454_v34, %v44470_v16  ;;  %v31170_v59 = vld [vmem:[%s45635_s1 + $0x1e0] sm:$0xff]  ;;  %v31166_v35 = vld [vmem:[%s39391_s24 + $0x13] sm:$0xff] }
 0x3bb   : > { %36619 = vmatmul.mubr.f32.vlgmr.msra.gmra.mrb[0].mxu0 %v44139_v20  ;;  %38041 = vmatprep.subr.bf16.mxu0 %v44439_v49  ;;  %v27887_v20 = vand.u32 4294901760, %v27886_v31  ;;  %v31171_v31 = vld [vmem:[%s45635_s1 + $0x1e8] sm:$0xff]  ;;  %v12716_v41 = vand.u32 4294901760, %v31170_v59  ;;  %v31168_v30 = vld [vmem:[%s39391_s24 + $0x33] sm:$0xff] }
 0x3bc   : > { %34843 = vmatmul.mubr.f32.vlgmr.msra.gmra.mrb[0].mxu1 %v44283_v63  ;;  %36621 = vmatprep.mubr.f32.mxu0 %v44159_v18  ;;  %v27906_v18 = vsub.f32 %v44451_v36, %v27905_v39  ;;  %v27932_v60 = vand.u32 4294901760, %v27931_v52 }
 0x3bd   : > { %37451 = vmatpush3.bf16.msra.mxu1 %v37448_v51  ;;  %34845 = vmatprep.mubr.f32.mxu1 %v44294_v46  ;;  %v27897_v51 = vand.u32 4294901760, %v27896_v19  ;;  %v31169_v19 = vld [vmem:[%s39391_s24 + $0x43] sm:$0xff] }
 0x3be   : > { %34852 = vmatprep.subr.mxu1 %v44328_v21  ;;  %38043 = vmatpush3.bf16.msra.mxu0 %v44439_v49 }
 0x3bf   : > { %36622 = vmatmul.mubr.f32.gmra.mrb[2].mxu0 %v44173_v0  ;;  %36628 = vmatprep.subr.mxu0 %v44426_v29  ;;  %v27907_v0 = vand.u32 4294901760, %v27906_v18 }
 0x3c0   : > { %34846 = vmatmul.mubr.f32.gmra.mrb[2].mxu1 %v44307_v40  ;;  %36630 = vmatprep.mubr.f32.mxu0 %v27877_v33 }
 0x3c1   : > { %34853 = vmatpush3.msra.mxu1 %v44328_v21  ;;  %34854 = vmatprep.mubr.f32.mxu1 %v44292_v4  ;;  %v37456_v21 = vpack.c.bf16 %v12205_v38, %v12198_v11  ;;  %v12719_v11 = vand.u32 4294901760, %v31171_v31  ;;  %v12701_v38 = vsel %vm145_vm1, %v31166_v35, 0  ;;  %v31172_v4 = vld [vmem:[%s45635_s1 + $0x1f0] sm:$0x7f]  ;;  %v38056_v35 = vpack.c.bf16 %v27923_v55, %v27916_v10 }
 0x3c2   : > { %37453 = vmatprep.subr.bf16.mxu1 %v44313_v26  ;;  %36629 = vmatpush3.msra.mxu0 %v44426_v29  ;;  %v44527_v33 = vand.u32 4294901760, %v12701_v38 }
 0x3c3   : > { %36631 = vmatmul.mubr.f32.vlgmr.msra.gmra.mrb[0].mxu0 %v27887_v20  ;;  %38045 = vmatprep.subr.bf16.mxu0 %v38044_v56  ;;  %v12707_v20 = vsel %vm145_vm1, %v31168_v30, 0 }
 0x3c4   : > { %34855 = vmatmul.mubr.f32.vlgmr.msra.gmra.mrb[0].mxu1 %v44305_v22  ;;  %36633 = vmatprep.mubr.f32.mxu0 %v27897_v51  ;;  %v44531_v22 = vsub.f32 %v31170_v59, %v12716_v41  ;;  %v44548_v18 = vsub.f32 %v12701_v38, %v44527_v33  ;;  %v44550_v52 = vand.u32 4294901760, %v12707_v20 }
 0x3c5   : > { %37455 = vmatpush3.bf16.msra.mxu1 %v44313_v26  ;;  %34857 = vmatprep.mubr.f32.mxu1 %v44317_v1 }
 0x3c6   : > { %34864 = vmatprep.subr.mxu1 %v44298_v37  ;;  %38047 = vmatpush3.bf16.msra.mxu0 %v38044_v56  ;;  %v12713_v56 = vsel %vm158_vm0, %v31172_v4, 0 }
 0x3c7   : > { %36634 = vmatmul.mubr.f32.gmra.mrb[2].mxu0 %v27907_v0  ;;  %36640 = vmatprep.subr.mxu0 %v27932_v60  ;;  %v44554_v51 = vand.u32 4294901760, %v12713_v56 }
 0x3c8   : > { %34858 = vmatmul.mubr.f32.gmra.mrb[2].mxu1 %v44339_v9  ;;  %36642 = vmatprep.mubr.f32.mxu0 %v44380_v12  ;;  %v12826_v9 = vand.u32 4294901760, %v44531_v22 }
 0x3c9   : > { %34865 = vmatpush3.msra.mxu1 %v44298_v37  ;;  %34866 = vmatprep.mubr.f32.mxu1 %v12157_v8  ;;  %v12704_v8 = vsel %vm145_vm1, %v31167_v53, 0  ;;  %v44584_v59 = vsub.f32 %v12713_v56, %v44554_v51 }
 0x3ca   : > { %37457 = vmatprep.subr.bf16.mxu1 %v37456_v21  ;;  %36641 = vmatpush3.msra.mxu0 %v27932_v60  ;;  %v44539_v1 = vand.u32 4294901760, %v12704_v8  ;;  %v12785_v60 = vand.u32 4294901760, %v44548_v18 }
 0x3cb   : > { %36643 = vmatmul.mubr.f32.vlgmr.msra.gmra.mrb[0].mxu0 %v44395_v7  ;;  %38049 = vmatprep.subr.bf16.mxu0 %v38048_v54  ;;  %v44621_v30 = vand.u32 4294901760, %v44584_v59 }
 0x3cc   : > { %34867 = vmatmul.mubr.f32.vlgmr.msra.gmra.mrb[0].mxu1 %v12167_v57  ;;  %36645 = vmatprep.mubr.f32.mxu0 %v44415_v15  ;;  %v44533_v57 = vsub.f32 %v31171_v31, %v12719_v11  ;;  %v31357_v31 = vld [vmem:[%s39391_s24 + $0xe1] sm:$0xff]  ;;  %v12786_v10 = vsub.f32 %v44548_v18, %v12785_v60 }
 0x3cd   : > { %37459 = vmatpush3.bf16.msra.mxu1 %v37456_v21  ;;  %34869 = vmatprep.mubr.f32.mxu1 %v12177_v50  ;;  %v12710_v50 = vsel %vm145_vm1, %v31169_v19, 0  ;;  %v44573_v21 = vsub.f32 %v12707_v20, %v44550_v52  ;;  %v28419_v38 = vsel %vm145_vm1, %v31357_v31, 0  ;;  %v28437_v19 = vand.u32 4294901760, %v44608_v2 }
 0x3ce   : > { %34876 = vmatprep.subr.mxu1 %v44365_v44  ;;  %38051 = vmatpush3.bf16.msra.mxu0 %v38048_v54  ;;  %v44563_v0 = vand.u32 4294901760, %v12710_v50  ;;  %v12827_v54 = vsub.f32 %v44531_v22, %v12826_v9  ;;  %v28422_v20 = vsel %vm145_vm1, %v31358_v45, 0  ;;  %v44636_v56 = vand.u32 4294901760, %v28419_v38 }
 0x3cf   : > { %36646 = vmatmul.mubr.f32.gmra.mrb[2].mxu0 %v44429_v5  ;;  %36652 = vmatprep.subr.mxu0 %v44454_v34  ;;  %v12805_v55 = vand.u32 4294901760, %v44573_v21 }
 0x3d0   : > { %34870 = vmatmul.mubr.f32.gmra.mrb[2].mxu1 %v12187_v43  ;;  %36654 = vmatprep.mubr.f32.mxu0 %v44413_v32  ;;  %v12833_v43 = vand.u32 4294901760, %v44533_v57  ;;  %v12828_v32 = vand.u32 4294901760, %v12827_v54  ;;  %v31360_v54 = vld [vmem:[%s39391_s24 + $0x111] sm:$0xff] }
 0x3d1   : > { %34877 = vmatpush3.msra.mxu1 %v44365_v44  ;;  %34878 = vmatprep.mubr.f32.mxu1 %v44271_v23  ;;  %v44561_v44 = vsub.f32 %v12704_v8, %v44539_v1 }
 0x3d2   : > { %37461 = vmatprep.subr.bf16.mxu1 %v44313_v26  ;;  %36653 = vmatpush3.msra.mxu0 %v44454_v34  ;;  %v44569_v34 = vpack.c.bf16 %v12719_v11, %v12716_v41  ;;  %v44595_v41 = vsub.f32 %v12710_v50, %v44563_v0  ;;  %v44600_v11 = vld [vmem:[%s45635_s1 + $0x438] sm:$0xff]  ;;  %v31363_v50 = vld [vmem:[%s45635_s1 + $0x448] sm:$0x7f] }
 0x3d3   : > { %36655 = vmatmul.mubr.f32.vlgmr.msra.gmra.mrb[0].mxu0 %v44421_v47  ;;  %38053 = vmatprep.subr.bf16.mxu0 %v44439_v49  ;;  %v12795_v53 = vand.u32 4294901760, %v44561_v44  ;;  %v12787_v47 = vand.u32 4294901760, %v12786_v10  ;;  %v44669_v10 = vsub.f32 %v28419_v38, %v44636_v56 }
 0x3d4   : > { %34879 = vmatmul.mubr.f32.vlgmr.msra.gmra.mrb[0].mxu1 %v44283_v63  ;;  %36657 = vmatprep.mubr.f32.mxu0 %v44434_v17  ;;  %v12815_v8 = vand.u32 4294901760, %v44595_v41 }
 0x3d5   : > { %37463 = vmatpush3.bf16.msra.mxu1 %v44313_v26  ;;  %34881 = vmatprep.mubr.f32.mxu1 %v44294_v46  ;;  %v12834_v26 = vsub.f32 %v44533_v57, %v12833_v43  ;;  %v12796_v4 = vsub.f32 %v44561_v44, %v12795_v53 }
 0x3d6   : > { %34888 = vmatprep.subr.mxu1 %v44298_v37  ;;  %38055 = vmatpush3.bf16.msra.mxu0 %v44439_v49  ;;  %v12816_v45 = vsub.f32 %v44595_v41, %v12815_v8 }
 0x3d7   : > { %36658 = vmatmul.mubr.f32.gmra.mrb[2].mxu0 %v44451_v36  ;;  %36664 = vmatprep.subr.mxu0 %v44426_v29  ;;  %v12797_v31 = vand.u32 4294901760, %v12796_v4 }
 0x3d8   : > { %34882 = vmatmul.mubr.f32.gmra.mrb[2].mxu1 %v44307_v40  ;;  %36666 = vmatprep.mubr.f32.mxu0 %v27875_v6  ;;  %v12835_v6 = vand.u32 4294901760, %v12834_v26 }
 0x3d9   : > { %34889 = vmatpush3.msra.mxu1 %v44298_v37  ;;  %34890 = vmatprep.mubr.f32.mxu1 %v44271_v23  ;;  %v28434_v37 = vand.u32 4294901760, %v44600_v11  ;;  %v31359_v23 = vld [vmem:[%s39391_s24 + $0x101] sm:$0xff] }
 0x3da   : > { %37465 = vmatprep.subr.bf16.mxu1 %v44569_v34  ;;  %36665 = vmatpush3.msra.mxu0 %v44426_v29  ;;  %v37468_v17 = vpack.c.bf16 %v12835_v6, %v12828_v32 }
 0x3db   : > { %36667 = vmatmul.mubr.f32.vlgmr.msra.gmra.mrb[0].mxu0 %v27885_v62  ;;  %38057 = vmatprep.subr.bf16.mxu0 %v38056_v35  ;;  %v12806_v62 = vsub.f32 %v44573_v21, %v12805_v55  ;;  %v44654_v26 = vsub.f32 %v44600_v11, %v28434_v37  ;;  %v28431_v11 = vsel %vm158_vm0, %v31363_v50, 0  ;;  %v44695_v50 = vpack.c.bf16 %v28437_v19, %v28434_v37 }
 0x3dc   : > { %34891 = vmatmul.mubr.f32.vlgmr.msra.gmra.mrb[0].mxu1 %v44283_v63  ;;  %36669 = vmatprep.mubr.f32.mxu0 %v27895_v42  ;;  %v28425_v63 = vsel %vm145_vm1, %v31359_v23, 0  ;;  %v12841_v42 = vsub.f32 %v44584_v59, %v44621_v30  ;;  %v44682_v38 = vand.u32 4294901760, %v28431_v11 }
 0x3dd   : > { %37467 = vmatpush3.bf16.msra.mxu1 %v44569_v34  ;;  %34893 = vmatprep.mubr.f32.mxu1 %v44294_v46  ;;  %v44651_v46 = vand.u32 4294901760, %v28422_v20  ;;  %v44671_v36 = vand.u32 4294901760, %v28425_v63  ;;  %v12807_v32 = vand.u32 4294901760, %v12806_v62  ;;  %v28544_v6 = vand.u32 4294901760, %v44654_v26 }
 0x3de   : > { %34900 = vmatprep.subr.mxu1 %v44554_v51  ;;  %38059 = vmatpush3.bf16.msra.mxu0 %v38056_v35  ;;  %v44663_v35 = vsub.f32 %v44608_v2, %v28437_v19  ;;  %v12842_v2 = vand.u32 4294901760, %v12841_v42  ;;  %v37472_v62 = vpack.c.bf16 %v44533_v57, %v44531_v22  ;;  %v31176_v22 = vld [vmem:[%s39391_s24 + $0x180] sm:$0xff] }
 0x3df   : > { %36670 = vmatmul.mubr.f32.gmra.mrb[2].mxu0 %v27905_v39  ;;  %36676 = vmatprep.subr.mxu0 %v44470_v16  ;;  %v28428_v39 = vsel %vm145_vm1, %v31360_v54, 0  ;;  %v28545_v42 = vsub.f32 %v44654_v26, %v28544_v6 }
 0x3e0   : > { %34894 = vmatmul.mubr.f32.gmra.mrb[2].mxu1 %v44307_v40  ;;  %36678 = vmatprep.mubr.f32.mxu0 %v44380_v12  ;;  %v44677_v40 = vsub.f32 %v28422_v20, %v44651_v46  ;;  %v28551_v23 = vand.u32 4294901760, %v44663_v35  ;;  %v44685_v4 = vand.u32 4294901760, %v28428_v39  ;;  %v44690_v20 = vsub.f32 %v28425_v63, %v44671_v36 }
 0x3e1   : > { %34901 = vmatpush3.msra.mxu1 %v44554_v51  ;;  %34902 = vmatprep.mubr.f32.mxu1 %v12787_v47  ;;  %v12817_v47 = vand.u32 4294901760, %v12816_v45 }
 0x3e2   : > { %37469 = vmatprep.subr.bf16.mxu1 %v37468_v17  ;;  %36677 = vmatpush3.msra.mxu0 %v44470_v16  ;;  %v28503_v16 = vand.u32 4294901760, %v44669_v10  ;;  %v28513_v54 = vand.u32 4294901760, %v44677_v40  ;;  %v28552_v63 = vsub.f32 %v44663_v35, %v28551_v23  ;;  %v28523_v19 = vand.u32 4294901760, %v44690_v20 }
 0x3e3   : > { %36679 = vmatmul.mubr.f32.vlgmr.msra.gmra.mrb[0].mxu0 %v44395_v7  ;;  %38061 = vmatprep.subr.bf16.mxu0 %v44439_v49 }
 0x3e4   : > { %34903 = vmatmul.mubr.f32.vlgmr.msra.gmra.mrb[0].mxu1 %v12797_v31  ;;  %36681 = vmatprep.mubr.f32.mxu0 %v44415_v15  ;;  %v28504_v37 = vsub.f32 %v44669_v10, %v28503_v16  ;;  %v28514_v31 = vsub.f32 %v44677_v40, %v28513_v54  ;;  %v28553_v45 = vand.u32 4294901760, %v28552_v63  ;;  %v38072_v63 = vpack.c.bf16 %v44663_v35, %v44654_v26  ;;  %v44864_v26 = vld [vmem:[%s45635_s1 + $0x458] sm:$0xff]  ;;  %v31365_v35 = vld [vmem:[%s39391_s24 + $0x42] sm:$0xff] }
 0x3e5   : > { %37471 = vmatpush3.bf16.msra.mxu1 %v37468_v17  ;;  %34905 = vmatprep.mubr.f32.mxu1 %v12807_v32  ;;  %v44707_v17 = vsub.f32 %v28428_v39, %v44685_v4  ;;  %v28524_v32 = vsub.f32 %v44690_v20, %v28523_v19 }
 0x3e6   : > { %34912 = vmatprep.subr.mxu1 %v12842_v2  ;;  %38063 = vmatpush3.bf16.msra.mxu0 %v44439_v49  ;;  %v44710_v49 = vsub.f32 %v28431_v11, %v44682_v38 }
 0x3e7   : > { %36682 = vmatmul.mubr.f32.gmra.mrb[2].mxu0 %v44429_v5  ;;  %36688 = vmatprep.subr.mxu0 %v44426_v29  ;;  %v28533_v11 = vand.u32 4294901760, %v44707_v17 }
 0x3e8   : > { %34906 = vmatmul.mubr.f32.gmra.mrb[2].mxu1 %v12817_v47  ;;  %36690 = vmatprep.mubr.f32.mxu0 %v44380_v12  ;;  %v28546_v12 = vand.u32 4294901760, %v28545_v42  ;;  %v44726_v39 = vand.u32 4294901760, %v44710_v49 }
 0x3e9   : > { %34913 = vmatpush3.msra.mxu1 %v12842_v2  ;;  %34914 = vmatprep.mubr.f32.mxu1 %v44527_v33 }
 0x3ea   : > { %37473 = vmatprep.subr.bf16.mxu1 %v37472_v62  ;;  %36689 = vmatpush3.msra.mxu0 %v44426_v29  ;;  %v28505_v29 = vand.u32 4294901760, %v28504_v37  ;;  %v38068_v2 = vpack.c.bf16 %v28553_v45, %v28546_v12  ;;  %v28559_v47 = vsub.f32 %v44710_v49, %v44726_v39  ;;  %v31179_v37 = vld [vmem:[%s45635_s1 + $0x1f8] sm:$0xff]  ;;  %v31175_v12 = vld [vmem:[%s39391_s24 + $0x170] sm:$0xff] }
 0x3eb   : > { %36691 = vmatmul.mubr.f32.vlgmr.msra.gmra.mrb[0].mxu0 %v44395_v7  ;;  %38065 = vmatprep.subr.bf16.mxu0 %v44695_v50  ;;  %v28515_v7 = vand.u32 4294901760, %v28514_v31  ;;  %v31180_v31 = vld [vmem:[%s45635_s1 + $0x200] sm:$0xff]  ;;  %v13346_v57 = vand.u32 4294901760, %v31179_v37  ;;  %v31177_v45 = vld [vmem:[%s39391_s24 + $0x190] sm:$0xff] }
 0x3ec   : > { %34915 = vmatmul.mubr.f32.vlgmr.msra.gmra.mrb[0].mxu1 %v44539_v1  ;;  %36693 = vmatprep.mubr.f32.mxu0 %v44415_v15  ;;  %v28534_v15 = vsub.f32 %v44707_v17, %v28533_v11  ;;  %v28560_v42 = vand.u32 4294901760, %v28559_v47 }
 0x3ed   : > { %37475 = vmatpush3.bf16.msra.mxu1 %v37472_v62  ;;  %34917 = vmatprep.mubr.f32.mxu1 %v44550_v52  ;;  %v28525_v62 = vand.u32 4294901760, %v28524_v32  ;;  %v31178_v32 = vld [vmem:[%s39391_s24 + $0x1a0] sm:$0xff] }
 0x3ee   : > { %34924 = vmatprep.subr.mxu1 %v44584_v59  ;;  %38067 = vmatpush3.bf16.msra.mxu0 %v44695_v50 }
 0x3ef   : > { %36694 = vmatmul.mubr.f32.gmra.mrb[2].mxu0 %v44429_v5  ;;  %36700 = vmatprep.subr.mxu0 %v44682_v38  ;;  %v28535_v5 = vand.u32 4294901760, %v28534_v15 }
 0x3f0   : > { %34918 = vmatmul.mubr.f32.gmra.mrb[2].mxu1 %v44563_v0  ;;  %36702 = vmatprep.mubr.f32.mxu0 %v28505_v29 }
 0x3f1   : > { %34925 = vmatpush3.msra.mxu1 %v44584_v59  ;;  %34926 = vmatprep.mubr.f32.mxu1 %v44548_v18  ;;  %v37480_v59 = vpack.c.bf16 %v12833_v43, %v12826_v9  ;;  %v13349_v9 = vand.u32 4294901760, %v31180_v31  ;;  %v13331_v43 = vsel %vm145_vm1, %v31175_v12, 0  ;;  %v31181_v18 = vld [vmem:[%s45635_s1 + $0x208] sm:$0x7f]  ;;  %v38080_v12 = vpack.c.bf16 %v28551_v23, %v28544_v6 }
 0x3f2   : > { %37477 = vmatprep.subr.bf16.mxu1 %v44569_v34  ;;  %36701 = vmatpush3.msra.mxu0 %v44682_v38  ;;  %v44783_v29 = vand.u32 4294901760, %v13331_v43 }
 0x3f3   : > { %36703 = vmatmul.mubr.f32.vlgmr.msra.gmra.mrb[0].mxu0 %v28515_v7  ;;  %38069 = vmatprep.subr.bf16.mxu0 %v38068_v2  ;;  %v13337_v7 = vsel %vm145_vm1, %v31177_v45, 0 }
 0x3f4   : > { %34927 = vmatmul.mubr.f32.vlgmr.msra.gmra.mrb[0].mxu1 %v44561_v44  ;;  %36705 = vmatprep.mubr.f32.mxu0 %v28525_v62  ;;  %v44787_v44 = vsub.f32 %v31179_v37, %v13346_v57  ;;  %v44804_v15 = vsub.f32 %v13331_v43, %v44783_v29  ;;  %v44806_v47 = vand.u32 4294901760, %v13337_v7 }
 0x3f5   : > { %37479 = vmatpush3.bf16.msra.mxu1 %v44569_v34  ;;  %34929 = vmatprep.mubr.f32.mxu1 %v44573_v21 }
 0x3f6   : > { %34936 = vmatprep.subr.mxu1 %v44554_v51  ;;  %38071 = vmatpush3.bf16.msra.mxu0 %v38068_v2  ;;  %v13343_v2 = vsel %vm158_vm0, %v31181_v18, 0 }
 0x3f7   : > { %36706 = vmatmul.mubr.f32.gmra.mrb[2].mxu0 %v28535_v5  ;;  %36712 = vmatprep.subr.mxu0 %v28560_v42  ;;  %v44810_v62 = vand.u32 4294901760, %v13343_v2 }
 0x3f8   : > { %34930 = vmatmul.mubr.f32.gmra.mrb[2].mxu1 %v44595_v41  ;;  %36714 = vmatprep.mubr.f32.mxu0 %v44636_v56  ;;  %v13456_v41 = vand.u32 4294901760, %v44787_v44 }
 0x3f9   : > { %34937 = vmatpush3.msra.mxu1 %v44554_v51  ;;  %34938 = vmatprep.mubr.f32.mxu1 %v12785_v60  ;;  %v13334_v60 = vsel %vm145_vm1, %v31176_v22, 0  ;;  %v44840_v37 = vsub.f32 %v13343_v2, %v44810_v62 }
 0x3fa   : > { %37481 = vmatprep.subr.bf16.mxu1 %v37480_v59  ;;  %36713 = vmatpush3.msra.mxu0 %v28560_v42  ;;  %v44795_v21 = vand.u32 4294901760, %v13334_v60  ;;  %v13415_v42 = vand.u32 4294901760, %v44804_v15 }
 0x3fb   : > { %36715 = vmatmul.mubr.f32.vlgmr.msra.gmra.mrb[0].mxu0 %v44651_v46  ;;  %38073 = vmatprep.subr.bf16.mxu0 %v38072_v63  ;;  %v44877_v45 = vand.u32 4294901760, %v44840_v37 }
 0x3fc   : > { %34939 = vmatmul.mubr.f32.vlgmr.msra.gmra.mrb[0].mxu1 %v12795_v53  ;;  %36717 = vmatprep.mubr.f32.mxu0 %v44671_v36  ;;  %v44789_v53 = vsub.f32 %v31180_v31, %v13349_v9  ;;  %v31364_v31 = vld [vmem:[%s39391_s24 + $0x32] sm:$0xff]  ;;  %v13416_v6 = vsub.f32 %v44804_v15, %v13415_v42 }
 0x3fd   : > { %37483 = vmatpush3.bf16.msra.mxu1 %v37480_v59  ;;  %34941 = vmatprep.mubr.f32.mxu1 %v12805_v55  ;;  %v13340_v55 = vsel %vm145_vm1, %v31178_v32, 0  ;;  %v44829_v59 = vsub.f32 %v13337_v7, %v44806_v47  ;;  %v29047_v43 = vsel %vm145_vm1, %v31364_v31, 0  ;;  %v29065_v32 = vand.u32 4294901760, %v44864_v26 }
 0x3fe   : > { %34948 = vmatprep.subr.mxu1 %v44621_v30  ;;  %38075 = vmatpush3.bf16.msra.mxu0 %v38072_v63  ;;  %v44819_v5 = vand.u32 4294901760, %v13340_v55  ;;  %v13457_v63 = vsub.f32 %v44787_v44, %v13456_v41  ;;  %v29050_v7 = vsel %vm145_vm1, %v31365_v35, 0  ;;  %v44892_v2 = vand.u32 4294901760, %v29047_v43 }
 0x3ff   : > { %36718 = vmatmul.mubr.f32.gmra.mrb[2].mxu0 %v44685_v4  ;;  %36724 = vmatprep.subr.mxu0 %v44710_v49  ;;  %v13435_v23 = vand.u32 4294901760, %v44829_v59 }
 0x400   : > { %34942 = vmatmul.mubr.f32.gmra.mrb[2].mxu1 %v12815_v8  ;;  %36726 = vmatprep.mubr.f32.mxu0 %v44669_v10  ;;  %v13463_v8 = vand.u32 4294901760, %v44789_v53  ;;  %v13458_v10 = vand.u32 4294901760, %v13457_v63  ;;  %v31367_v63 = vld [vmem:[%s39391_s24 + $0x62] sm:$0xff] }
 0x401   : > { %34949 = vmatpush3.msra.mxu1 %v44621_v30  ;;  %34950 = vmatprep.mubr.f32.mxu1 %v44527_v33  ;;  %v44817_v30 = vsub.f32 %v13334_v60, %v44795_v21 }
 0x402   : > { %37485 = vmatprep.subr.bf16.mxu1 %v44569_v34  ;;  %36725 = vmatpush3.msra.mxu0 %v44710_v49  ;;  %v44825_v49 = vpack.c.bf16 %v13349_v9, %v13346_v57  ;;  %v44851_v57 = vsub.f32 %v13340_v55, %v44819_v5  ;;  %v44856_v9 = vld [vmem:[%s45635_s1 + $0x450] sm:$0xff]  ;;  %v31370_v55 = vld [vmem:[%s45635_s1 + $0x460] sm:$0x7f] }
 0x403   : > { %36727 = vmatmul.mubr.f32.vlgmr.msra.gmra.mrb[0].mxu0 %v44677_v40  ;;  %38077 = vmatprep.subr.bf16.mxu0 %v44695_v50  ;;  %v13425_v22 = vand.u32 4294901760, %v44817_v30  ;;  %v13417_v40 = vand.u32 4294901760, %v13416_v6  ;;  %v44925_v6 = vsub.f32 %v29047_v43, %v44892_v2 }
 0x404   : > { %34951 = vmatmul.mubr.f32.vlgmr.msra.gmra.mrb[0].mxu1 %v44539_v1  ;;  %36729 = vmatprep.mubr.f32.mxu0 %v44690_v20  ;;  %v13445_v60 = vand.u32 4294901760, %v44851_v57 }
 0x405   : > { %37487 = vmatpush3.bf16.msra.mxu1 %v44569_v34  ;;  %34953 = vmatprep.mubr.f32.mxu1 %v44550_v52  ;;  %v13464_v34 = vsub.f32 %v44789_v53, %v13463_v8  ;;  %v13426_v18 = vsub.f32 %v44817_v30, %v13425_v22 }
 0x406   : > { %34960 = vmatprep.subr.mxu1 %v44554_v51  ;;  %38079 = vmatpush3.bf16.msra.mxu0 %v44695_v50  ;;  %v13446_v35 = vsub.f32 %v44851_v57, %v13445_v60 }
 0x407   : > { %36730 = vmatmul.mubr.f32.gmra.mrb[2].mxu0 %v44707_v17  ;;  %36736 = vmatprep.subr.mxu0 %v44682_v38  ;;  %v13427_v31 = vand.u32 4294901760, %v13426_v18 }
 0x408   : > { %34954 = vmatmul.mubr.f32.gmra.mrb[2].mxu1 %v44563_v0  ;;  %36738 = vmatprep.mubr.f32.mxu0 %v28503_v16  ;;  %v13465_v16 = vand.u32 4294901760, %v13464_v34 }
 0x409   : > { %34961 = vmatpush3.msra.mxu1 %v44554_v51  ;;  %34962 = vmatprep.mubr.f32.mxu1 %v44527_v33  ;;  %v29062_v51 = vand.u32 4294901760, %v44856_v9  ;;  %v31366_v33 = vld [vmem:[%s39391_s24 + $0x52] sm:$0xff] }
 0x40a   : > { %37489 = vmatprep.subr.bf16.mxu1 %v44825_v49  ;;  %36737 = vmatpush3.msra.mxu0 %v44682_v38  ;;  %v37492_v20 = vpack.c.bf16 %v13465_v16, %v13458_v10 }
 0x40b   : > { %36739 = vmatmul.mubr.f32.vlgmr.msra.gmra.mrb[0].mxu0 %v28513_v54  ;;  %38081 = vmatprep.subr.bf16.mxu0 %v38080_v12  ;;  %v13436_v54 = vsub.f32 %v44829_v59, %v13435_v23  ;;  %v44910_v34 = vsub.f32 %v44856_v9, %v29062_v51  ;;  %v29059_v9 = vsel %vm158_vm0, %v31370_v55, 0  ;;  %v44951_v55 = vpack.c.bf16 %v29065_v32, %v29062_v51 }
 0x40c   : > { %34963 = vmatmul.mubr.f32.vlgmr.msra.gmra.mrb[0].mxu1 %v44539_v1  ;;  %36741 = vmatprep.mubr.f32.mxu0 %v28523_v19  ;;  %v29053_v1 = vsel %vm145_vm1, %v31366_v33, 0  ;;  %v13471_v19 = vsub.f32 %v44840_v37, %v44877_v45  ;;  %v44938_v43 = vand.u32 4294901760, %v29059_v9 }
 0x40d   : > { %37491 = vmatpush3.bf16.msra.mxu1 %v44825_v49  ;;  %34965 = vmatprep.mubr.f32.mxu1 %v44550_v52  ;;  %v44907_v52 = vand.u32 4294901760, %v29050_v7  ;;  %v44927_v17 = vand.u32 4294901760, %v29053_v1  ;;  %v13437_v10 = vand.u32 4294901760, %v13436_v54  ;;  %v29172_v16 = vand.u32 4294901760, %v44910_v34 }
 0x40e   : > { %34972 = vmatprep.subr.mxu1 %v44810_v62  ;;  %38083 = vmatpush3.bf16.msra.mxu0 %v38080_v12  ;;  %v44919_v12 = vsub.f32 %v44864_v26, %v29065_v32  ;;  %v13472_v26 = vand.u32 4294901760, %v13471_v19  ;;  %v37496_v54 = vpack.c.bf16 %v44789_v53, %v44787_v44  ;;  %v31185_v44 = vld [vmem:[%s39391_s24 + $0x230] sm:$0xff] }
 0x40f   : > { %36742 = vmatmul.mubr.f32.gmra.mrb[2].mxu0 %v28533_v11  ;;  %36748 = vmatprep.subr.mxu0 %v44726_v39  ;;  %v29056_v11 = vsel %vm145_vm1, %v31367_v63, 0  ;;  %v29173_v19 = vsub.f32 %v44910_v34, %v29172_v16 }
 0x410   : > { %34966 = vmatmul.mubr.f32.gmra.mrb[2].mxu1 %v44563_v0  ;;  %36750 = vmatprep.mubr.f32.mxu0 %v44636_v56  ;;  %v44933_v0 = vsub.f32 %v29050_v7, %v44907_v52  ;;  %v29179_v33 = vand.u32 4294901760, %v44919_v12  ;;  %v44941_v18 = vand.u32 4294901760, %v29056_v11  ;;  %v44946_v7 = vsub.f32 %v29053_v1, %v44927_v17 }
 0x411   : > { %34973 = vmatpush3.msra.mxu1 %v44810_v62  ;;  %34974 = vmatprep.mubr.f32.mxu1 %v13417_v40  ;;  %v13447_v40 = vand.u32 4294901760, %v13446_v35 }
 0x412   : > { %37493 = vmatprep.subr.bf16.mxu1 %v37492_v20  ;;  %36749 = vmatpush3.msra.mxu0 %v44726_v39  ;;  %v29131_v39 = vand.u32 4294901760, %v44925_v6  ;;  %v29141_v63 = vand.u32 4294901760, %v44933_v0  ;;  %v29180_v1 = vsub.f32 %v44919_v12, %v29179_v33  ;;  %v29151_v32 = vand.u32 4294901760, %v44946_v7 }
 0x413   : > { %36751 = vmatmul.mubr.f32.vlgmr.msra.gmra.mrb[0].mxu0 %v44651_v46  ;;  %38085 = vmatprep.subr.bf16.mxu0 %v44695_v50 }
 0x414   : > { %34975 = vmatmul.mubr.f32.vlgmr.msra.gmra.mrb[0].mxu1 %v13427_v31  ;;  %36753 = vmatprep.mubr.f32.mxu0 %v44671_v36  ;;  %v29132_v51 = vsub.f32 %v44925_v6, %v29131_v39  ;;  %v29142_v31 = vsub.f32 %v44933_v0, %v29141_v63  ;;  %v29181_v35 = vand.u32 4294901760, %v29180_v1  ;;  %v38096_v1 = vpack.c.bf16 %v44919_v12, %v44910_v34  ;;  %v45120_v34 = vld [vmem:[%s45635_s1 + $0x470] sm:$0xff] }
 0x415   : > { %37495 = vmatpush3.bf16.msra.mxu1 %v37492_v20  ;;  %34977 = vmatprep.mubr.f32.mxu1 %v13437_v10  ;;  %v44963_v20 = vsub.f32 %v29056_v11, %v44941_v18  ;;  %v29152_v10 = vsub.f32 %v44946_v7, %v29151_v32  ;;  %v31372_v12 = vld [vmem:[%s39391_s24 + $0xf2] sm:$0xff] }
 0x416   : > { %34984 = vmatprep.subr.mxu1 %v13472_v26  ;;  %38087 = vmatpush3.bf16.msra.mxu0 %v44695_v50  ;;  %v44966_v50 = vsub.f32 %v29059_v9, %v44938_v43 }
 0x417   : > { %36754 = vmatmul.mubr.f32.gmra.mrb[2].mxu0 %v44685_v4  ;;  %36760 = vmatprep.subr.mxu0 %v44682_v38  ;;  %v29161_v9 = vand.u32 4294901760, %v44963_v20 }
 0x418   : > { %34978 = vmatmul.mubr.f32.gmra.mrb[2].mxu1 %v13447_v40  ;;  %36762 = vmatprep.mubr.f32.mxu0 %v44636_v56  ;;  %v29174_v56 = vand.u32 4294901760, %v29173_v19  ;;  %v44982_v11 = vand.u32 4294901760, %v44966_v50 }
 0x419   : > { %34985 = vmatpush3.msra.mxu1 %v13472_v26  ;;  %34986 = vmatprep.mubr.f32.mxu1 %v44783_v29 }
 0x41a   : > { %37497 = vmatprep.subr.bf16.mxu1 %v37496_v54  ;;  %36761 = vmatpush3.msra.mxu0 %v44682_v38  ;;  %v29133_v38 = vand.u32 4294901760, %v29132_v51  ;;  %v38092_v26 = vpack.c.bf16 %v29181_v35, %v29174_v56  ;;  %v29187_v40 = vsub.f32 %v44966_v50, %v44982_v11  ;;  %v31188_v51 = vld [vmem:[%s45635_s1 + $0x210] sm:$0xff]  ;;  %v31184_v56 = vld [vmem:[%s39391_s24 + $0x220] sm:$0xff] }
 0x41b   : > { %36763 = vmatmul.mubr.f32.vlgmr.msra.gmra.mrb[0].mxu0 %v44651_v46  ;;  %38089 = vmatprep.subr.bf16.mxu0 %v44951_v55  ;;  %v29143_v46 = vand.u32 4294901760, %v29142_v31  ;;  %v31189_v31 = vld [vmem:[%s45635_s1 + $0x218] sm:$0xff]  ;;  %v13976_v53 = vand.u32 4294901760, %v31188_v51  ;;  %v31186_v35 = vld [vmem:[%s39391_s24 + $0x240] sm:$0xff] }
 0x41c   : > { %34987 = vmatmul.mubr.f32.vlgmr.msra.gmra.mrb[0].mxu1 %v44795_v21  ;;  %36765 = vmatprep.mubr.f32.mxu0 %v44671_v36  ;;  %v29162_v36 = vsub.f32 %v44963_v20, %v29161_v9  ;;  %v29188_v19 = vand.u32 4294901760, %v29187_v40 }
 0x41d   : > { %37499 = vmatpush3.bf16.msra.mxu1 %v37496_v54  ;;  %34989 = vmatprep.mubr.f32.mxu1 %v44806_v47  ;;  %v29153_v54 = vand.u32 4294901760, %v29152_v10  ;;  %v31187_v10 = vld [vmem:[%s39391_s24 + $0x250] sm:$0xff] }
 0x41e   : > { %34996 = vmatprep.subr.mxu1 %v44840_v37  ;;  %38091 = vmatpush3.bf16.msra.mxu0 %v44951_v55 }
 0x41f   : > { %36766 = vmatmul.mubr.f32.gmra.mrb[2].mxu0 %v44685_v4  ;;  %36772 = vmatprep.subr.mxu0 %v44938_v43  ;;  %v29163_v4 = vand.u32 4294901760, %v29162_v36 }
 0x420   : > { %34990 = vmatmul.mubr.f32.gmra.mrb[2].mxu1 %v44819_v5  ;;  %36774 = vmatprep.mubr.f32.mxu0 %v29133_v38 }
 0x421   : > { %34997 = vmatpush3.msra.mxu1 %v44840_v37  ;;  %34998 = vmatprep.mubr.f32.mxu1 %v44804_v15  ;;  %v37504_v37 = vpack.c.bf16 %v13463_v8, %v13456_v41  ;;  %v13979_v41 = vand.u32 4294901760, %v31189_v31  ;;  %v13961_v8 = vsel %vm145_vm1, %v31184_v56, 0  ;;  %v31190_v15 = vld [vmem:[%s45635_s1 + $0x220] sm:$0x7f]  ;;  %v38104_v56 = vpack.c.bf16 %v29179_v33, %v29172_v16 }
 0x422   : > { %37501 = vmatprep.subr.bf16.mxu1 %v44825_v49  ;;  %36773 = vmatpush3.msra.mxu0 %v44938_v43  ;;  %v45039_v38 = vand.u32 4294901760, %v13961_v8 }
 0x423   : > { %36775 = vmatmul.mubr.f32.vlgmr.msra.gmra.mrb[0].mxu0 %v29143_v46  ;;  %38093 = vmatprep.subr.bf16.mxu0 %v38092_v26  ;;  %v13967_v46 = vsel %vm145_vm1, %v31186_v35, 0 }
 0x424   : > { %34999 = vmatmul.mubr.f32.vlgmr.msra.gmra.mrb[0].mxu1 %v44817_v30  ;;  %36777 = vmatprep.mubr.f32.mxu0 %v29153_v54  ;;  %v45043_v30 = vsub.f32 %v31188_v51, %v13976_v53  ;;  %v45060_v36 = vsub.f32 %v13961_v8, %v45039_v38  ;;  %v45062_v40 = vand.u32 4294901760, %v13967_v46 }
 0x425   : > { %37503 = vmatpush3.bf16.msra.mxu1 %v44825_v49  ;;  %35001 = vmatprep.mubr.f32.mxu1 %v44829_v59 }
 0x426   : > { %35008 = vmatprep.subr.mxu1 %v44810_v62  ;;  %38095 = vmatpush3.bf16.msra.mxu0 %v38092_v26  ;;  %v13973_v26 = vsel %vm158_vm0, %v31190_v15, 0 }
 0x427   : > { %36778 = vmatmul.mubr.f32.gmra.mrb[2].mxu0 %v29163_v4  ;;  %36784 = vmatprep.subr.mxu0 %v29188_v19  ;;  %v45066_v54 = vand.u32 4294901760, %v13973_v26 }
 0x428   : > { %35002 = vmatmul.mubr.f32.gmra.mrb[2].mxu1 %v44851_v57  ;;  %36786 = vmatprep.mubr.f32.mxu0 %v44892_v2  ;;  %v14086_v57 = vand.u32 4294901760, %v45043_v30 }
 0x429   : > { %35009 = vmatpush3.msra.mxu1 %v44810_v62  ;;  %35010 = vmatprep.mubr.f32.mxu1 %v13415_v42  ;;  %v13964_v42 = vsel %vm145_vm1, %v31185_v44, 0  ;;  %v45096_v51 = vsub.f32 %v13973_v26, %v45066_v54 }
 0x42a   : > { %37505 = vmatprep.subr.bf16.mxu1 %v37504_v37  ;;  %36785 = vmatpush3.msra.mxu0 %v29188_v19  ;;  %v45051_v59 = vand.u32 4294901760, %v13964_v42  ;;  %v14045_v19 = vand.u32 4294901760, %v45060_v36 }
 0x42b   : > { %36787 = vmatmul.mubr.f32.vlgmr.msra.gmra.mrb[0].mxu0 %v44907_v52  ;;  %38097 = vmatprep.subr.bf16.mxu0 %v38096_v1  ;;  %v45133_v35 = vand.u32 4294901760, %v45096_v51 }
 0x42c   : > { %35011 = vmatmul.mubr.f32.vlgmr.msra.gmra.mrb[0].mxu1 %v13425_v22  ;;  %36789 = vmatprep.mubr.f32.mxu0 %v44927_v17  ;;  %v45045_v22 = vsub.f32 %v31189_v31, %v13979_v41  ;;  %v31371_v31 = vld [vmem:[%s39391_s24 + $0xe2] sm:$0xff]  ;;  %v14046_v16 = vsub.f32 %v45060_v36, %v14045_v19 }
 0x42d   : > { %37507 = vmatpush3.bf16.msra.mxu1 %v37504_v37  ;;  %35013 = vmatprep.mubr.f32.mxu1 %v13435_v23  ;;  %v13970_v23 = vsel %vm145_vm1, %v31187_v10, 0  ;;  %v45085_v37 = vsub.f32 %v13967_v46, %v45062_v40  ;;  %v29675_v8 = vsel %vm145_vm1, %v31371_v31, 0  ;;  %v29693_v10 = vand.u32 4294901760, %v45120_v34 }
 0x42e   : > { %35020 = vmatprep.subr.mxu1 %v44877_v45  ;;  %38099 = vmatpush3.bf16.msra.mxu0 %v38096_v1  ;;  %v45075_v4 = vand.u32 4294901760, %v13970_v23  ;;  %v14087_v1 = vsub.f32 %v45043_v30, %v14086_v57  ;;  %v29678_v46 = vsel %vm145_vm1, %v31372_v12, 0  ;;  %v45148_v26 = vand.u32 4294901760, %v29675_v8 }
 0x42f   : > { %36790 = vmatmul.mubr.f32.gmra.mrb[2].mxu0 %v44941_v18  ;;  %36796 = vmatprep.subr.mxu0 %v44966_v50  ;;  %v14065_v33 = vand.u32 4294901760, %v45085_v37 }
 0x430   : > { %35014 = vmatmul.mubr.f32.gmra.mrb[2].mxu1 %v13445_v60  ;;  %36798 = vmatprep.mubr.f32.mxu0 %v44925_v6  ;;  %v14093_v60 = vand.u32 4294901760, %v45045_v22  ;;  %v14088_v6 = vand.u32 4294901760, %v14087_v1  ;;  %v31374_v1 = vld [vmem:[%s39391_s24 + $0x112] sm:$0xff] }
 0x431   : > { %35021 = vmatpush3.msra.mxu1 %v44877_v45  ;;  %35022 = vmatprep.mubr.f32.mxu1 %v44783_v29  ;;  %v45073_v45 = vsub.f32 %v13964_v42, %v45051_v59 }
 0x432   : > { %37509 = vmatprep.subr.bf16.mxu1 %v44825_v49  ;;  %36797 = vmatpush3.msra.mxu0 %v44966_v50  ;;  %v45081_v50 = vpack.c.bf16 %v13979_v41, %v13976_v53  ;;  %v45107_v53 = vsub.f32 %v13970_v23, %v45075_v4  ;;  %v45112_v41 = vld [vmem:[%s45635_s1 + $0x468] sm:$0xff]  ;;  %v31377_v23 = vld [vmem:[%s45635_s1 + $0x478] sm:$0x7f] }
 0x433   : > { %36799 = vmatmul.mubr.f32.vlgmr.msra.gmra.mrb[0].mxu0 %v44933_v0  ;;  %38101 = vmatprep.subr.bf16.mxu0 %v44951_v55  ;;  %v14055_v44 = vand.u32 4294901760, %v45073_v45  ;;  %v14047_v0 = vand.u32 4294901760, %v14046_v16  ;;  %v45181_v16 = vsub.f32 %v29675_v8, %v45148_v26 }
 0x434   : > { %35023 = vmatmul.mubr.f32.vlgmr.msra.gmra.mrb[0].mxu1 %v44795_v21  ;;  %36801 = vmatprep.mubr.f32.mxu0 %v44946_v7  ;;  %v14075_v42 = vand.u32 4294901760, %v45107_v53 }
 0x435   : > { %37511 = vmatpush3.bf16.msra.mxu1 %v44825_v49  ;;  %35025 = vmatprep.mubr.f32.mxu1 %v44806_v47  ;;  %v14094_v49 = vsub.f32 %v45045_v22, %v14093_v60  ;;  %v14056_v15 = vsub.f32 %v45073_v45, %v14055_v44 }
 0x436   : > { %35032 = vmatprep.subr.mxu1 %v44810_v62  ;;  %38103 = vmatpush3.bf16.msra.mxu0 %v44951_v55  ;;  %v14076_v12 = vsub.f32 %v45107_v53, %v14075_v42 }
 0x437   : > { %36802 = vmatmul.mubr.f32.gmra.mrb[2].mxu0 %v44963_v20  ;;  %36808 = vmatprep.subr.mxu0 %v44938_v43  ;;  %v14057_v31 = vand.u32 4294901760, %v14056_v15 }
 0x438   : > { %35026 = vmatmul.mubr.f32.gmra.mrb[2].mxu1 %v44819_v5  ;;  %36810 = vmatprep.mubr.f32.mxu0 %v29131_v39  ;;  %v14095_v39 = vand.u32 4294901760, %v14094_v49 }
 0x439   : > { %35033 = vmatpush3.msra.mxu1 %v44810_v62  ;;  %35034 = vmatprep.mubr.f32.mxu1 %v44783_v29  ;;  %v29690_v62 = vand.u32 4294901760, %v45112_v41  ;;  %v31373_v29 = vld [vmem:[%s39391_s24 + $0x102] sm:$0xff] }
 0x43a   : > { %37513 = vmatprep.subr.bf16.mxu1 %v45081_v50  ;;  %36809 = vmatpush3.msra.mxu0 %v44938_v43  ;;  %v37516_v7 = vpack.c.bf16 %v14095_v39, %v14088_v6 }
 0x43b   : > { %36811 = vmatmul.mubr.f32.vlgmr.msra.gmra.mrb[0].mxu0 %v29141_v63  ;;  %38105 = vmatprep.subr.bf16.mxu0 %v38104_v56  ;;  %v14066_v63 = vsub.f32 %v45085_v37, %v14065_v33  ;;  %v45166_v49 = vsub.f32 %v45112_v41, %v29690_v62  ;;  %v29687_v41 = vsel %vm158_vm0, %v31377_v23, 0  ;;  %v45207_v23 = vpack.c.bf16 %v29693_v10, %v29690_v62 }
 0x43c   : > { %35035 = vmatmul.mubr.f32.vlgmr.msra.gmra.mrb[0].mxu1 %v44795_v21  ;;  %36813 = vmatprep.mubr.f32.mxu0 %v29151_v32  ;;  %v29681_v21 = vsel %vm145_vm1, %v31373_v29, 0  ;;  %v14101_v32 = vsub.f32 %v45096_v51, %v45133_v35  ;;  %v45194_v8 = vand.u32 4294901760, %v29687_v41 }
 0x43d   : > { %37515 = vmatpush3.bf16.msra.mxu1 %v45081_v50  ;;  %35037 = vmatprep.mubr.f32.mxu1 %v44806_v47  ;;  %v45163_v47 = vand.u32 4294901760, %v29678_v46  ;;  %v45183_v20 = vand.u32 4294901760, %v29681_v21  ;;  %v14067_v6 = vand.u32 4294901760, %v14066_v63  ;;  %v29800_v39 = vand.u32 4294901760, %v45166_v49 }
 0x43e   : > { %35044 = vmatprep.subr.mxu1 %v45066_v54  ;;  %38107 = vmatpush3.bf16.msra.mxu0 %v38104_v56  ;;  %v45175_v56 = vsub.f32 %v45120_v34, %v29693_v10  ;;  %v14102_v34 = vand.u32 4294901760, %v14101_v32  ;;  %v37520_v63 = vpack.c.bf16 %v45045_v22, %v45043_v30  ;;  %v31192_v30 = vld [vmem:[%s39391_s24 + $0x181] sm:$0xff] }
 0x43f   : > { %36814 = vmatmul.mubr.f32.gmra.mrb[2].mxu0 %v29161_v9  ;;  %36820 = vmatprep.subr.mxu0 %v44982_v11  ;;  %v29684_v9 = vsel %vm145_vm1, %v31374_v1, 0  ;;  %v29801_v32 = vsub.f32 %v45166_v49, %v29800_v39 }
 0x440   : > { %35038 = vmatmul.mubr.f32.gmra.mrb[2].mxu1 %v44819_v5  ;;  %36822 = vmatprep.mubr.f32.mxu0 %v44892_v2  ;;  %v45189_v5 = vsub.f32 %v29678_v46, %v45163_v47  ;;  %v29807_v29 = vand.u32 4294901760, %v45175_v56  ;;  %v45197_v15 = vand.u32 4294901760, %v29684_v9  ;;  %v45202_v46 = vsub.f32 %v29681_v21, %v45183_v20 }
 0x441   : > { %35045 = vmatpush3.msra.mxu1 %v45066_v54  ;;  %35046 = vmatprep.mubr.f32.mxu1 %v14047_v0  ;;  %v14077_v0 = vand.u32 4294901760, %v14076_v12 }
 0x442   : > { %37517 = vmatprep.subr.bf16.mxu1 %v37516_v7  ;;  %36821 = vmatpush3.msra.mxu0 %v44982_v11  ;;  %v29759_v11 = vand.u32 4294901760, %v45181_v16  ;;  %v29769_v1 = vand.u32 4294901760, %v45189_v5  ;;  %v29808_v21 = vsub.f32 %v45175_v56, %v29807_v29  ;;  %v29779_v10 = vand.u32 4294901760, %v45202_v46 }
 0x443   : > { %36823 = vmatmul.mubr.f32.vlgmr.msra.gmra.mrb[0].mxu0 %v44907_v52  ;;  %38109 = vmatprep.subr.bf16.mxu0 %v44951_v55 }
 0x444   : > { %35047 = vmatmul.mubr.f32.vlgmr.msra.gmra.mrb[0].mxu1 %v14057_v31  ;;  %36825 = vmatprep.mubr.f32.mxu0 %v44927_v17  ;;  %v29760_v62 = vsub.f32 %v45181_v16, %v29759_v11  ;;  %v29770_v31 = vsub.f32 %v45189_v5, %v29769_v1  ;;  %v29809_v12 = vand.u32 4294901760, %v29808_v21  ;;  %v38120_v21 = vpack.c.bf16 %v45175_v56, %v45166_v49  ;;  %v45376_v49 = vld [vmem:[%s45635_s1 + $0x488] sm:$0xff] }
 0x445   : > { %37519 = vmatpush3.bf16.msra.mxu1 %v37516_v7  ;;  %35049 = vmatprep.mubr.f32.mxu1 %v14067_v6  ;;  %v45219_v7 = vsub.f32 %v29684_v9, %v45197_v15  ;;  %v29780_v6 = vsub.f32 %v45202_v46, %v29779_v10  ;;  %v31379_v56 = vld [vmem:[%s39391_s24 + $0x43] sm:$0xff] }
 0x446   : > { %35056 = vmatprep.subr.mxu1 %v14102_v34  ;;  %38111 = vmatpush3.bf16.msra.mxu0 %v44951_v55  ;;  %v45222_v55 = vsub.f32 %v29687_v41, %v45194_v8 }
 0x447   : > { %36826 = vmatmul.mubr.f32.gmra.mrb[2].mxu0 %v44941_v18  ;;  %36832 = vmatprep.subr.mxu0 %v44938_v43  ;;  %v29789_v41 = vand.u32 4294901760, %v45219_v7 }
 0x448   : > { %35050 = vmatmul.mubr.f32.gmra.mrb[2].mxu1 %v14077_v0  ;;  %36834 = vmatprep.mubr.f32.mxu0 %v44892_v2  ;;  %v29802_v2 = vand.u32 4294901760, %v29801_v32  ;;  %v45238_v9 = vand.u32 4294901760, %v45222_v55 }
 0x449   : > { %35057 = vmatpush3.msra.mxu1 %v14102_v34  ;;  %35058 = vmatprep.mubr.f32.mxu1 %v45039_v38 }
 0x44a   : > { %37521 = vmatprep.subr.bf16.mxu1 %v37520_v63  ;;  %36833 = vmatpush3.msra.mxu0 %v44938_v43  ;;  %v29761_v43 = vand.u32 4294901760, %v29760_v62  ;;  %v38116_v34 = vpack.c.bf16 %v29809_v12, %v29802_v2  ;;  %v29815_v0 = vsub.f32 %v45222_v55, %v45238_v9  ;;  %v31195_v62 = vld [vmem:[%s45635_s1 + $0x228] sm:$0xff]  ;;  %v31191_v2 = vld [vmem:[%s39391_s24 + $0x171] sm:$0xff] }
 0x44b   : > { %36835 = vmatmul.mubr.f32.vlgmr.msra.gmra.mrb[0].mxu0 %v44907_v52  ;;  %38113 = vmatprep.subr.bf16.mxu0 %v45207_v23  ;;  %v29771_v52 = vand.u32 4294901760, %v29770_v31  ;;  %v31196_v31 = vld [vmem:[%s45635_s1 + $0x230] sm:$0xff]  ;;  %v14604_v22 = vand.u32 4294901760, %v31195_v62 }
 0x44c   : > { %35059 = vmatmul.mubr.f32.vlgmr.msra.gmra.mrb[0].mxu1 %v45051_v59  ;;  %36837 = vmatprep.mubr.f32.mxu0 %v44927_v17  ;;  %v29790_v17 = vsub.f32 %v45219_v7, %v29789_v41  ;;  %v29816_v32 = vand.u32 4294901760, %v29815_v0  ;;  %v31193_v12 = vld [vmem:[%s39391_s24 + $0x191] sm:$0xff] }
 0x44d   : > { %37523 = vmatpush3.bf16.msra.mxu1 %v37520_v63  ;;  %35061 = vmatprep.mubr.f32.mxu1 %v45062_v40  ;;  %v29781_v63 = vand.u32 4294901760, %v29780_v6  ;;  %v31194_v6 = vld [vmem:[%s39391_s24 + $0x1a1] sm:$0xff] }
 0x44e   : > { %35068 = vmatprep.subr.mxu1 %v45096_v51  ;;  %38115 = vmatpush3.bf16.msra.mxu0 %v45207_v23 }
 0x44f   : > { %36838 = vmatmul.mubr.f32.gmra.mrb[2].mxu0 %v44941_v18  ;;  %36844 = vmatprep.subr.mxu0 %v45194_v8  ;;  %v29791_v18 = vand.u32 4294901760, %v29790_v17 }
 0x450   : > { %35062 = vmatmul.mubr.f32.gmra.mrb[2].mxu1 %v45075_v4  ;;  %36846 = vmatprep.mubr.f32.mxu0 %v29761_v43 }
 0x451   : > { %35069 = vmatpush3.msra.mxu1 %v45096_v51  ;;  %35070 = vmatprep.mubr.f32.mxu1 %v45060_v36  ;;  %v37528_v51 = vpack.c.bf16 %v14093_v60, %v14086_v57  ;;  %v14607_v57 = vand.u32 4294901760, %v31196_v31  ;;  %v14589_v60 = vsel %vm145_vm1, %v31191_v2, 0  ;;  %v31197_v36 = vld [vmem:[%s45635_s1 + $0x238] sm:$0x7f]  ;;  %v38128_v2 = vpack.c.bf16 %v29807_v29, %v29800_v39 }
 0x452   : > { %37525 = vmatprep.subr.bf16.mxu1 %v45081_v50  ;;  %36845 = vmatpush3.msra.mxu0 %v45194_v8  ;;  %v45295_v43 = vand.u32 4294901760, %v14589_v60 }
 0x453   : > { %36847 = vmatmul.mubr.f32.vlgmr.msra.gmra.mrb[0].mxu0 %v29771_v52  ;;  %38117 = vmatprep.subr.bf16.mxu0 %v38116_v34  ;;  %v14595_v52 = vsel %vm145_vm1, %v31193_v12, 0 }
 0x454   : > { %35071 = vmatmul.mubr.f32.vlgmr.msra.gmra.mrb[0].mxu1 %v45073_v45  ;;  %36849 = vmatprep.mubr.f32.mxu0 %v29781_v63  ;;  %v45299_v45 = vsub.f32 %v31195_v62, %v14604_v22  ;;  %v45316_v17 = vsub.f32 %v14589_v60, %v45295_v43  ;;  %v45318_v0 = vand.u32 4294901760, %v14595_v52 }
 0x455   : > { %37527 = vmatpush3.bf16.msra.mxu1 %v45081_v50  ;;  %35073 = vmatprep.mubr.f32.mxu1 %v45085_v37 }
 0x456   : > { %35080 = vmatprep.subr.mxu1 %v45066_v54  ;;  %38119 = vmatpush3.bf16.msra.mxu0 %v38116_v34  ;;  %v14601_v34 = vsel %vm158_vm0, %v31197_v36, 0 }
 0x457   : > { %36850 = vmatmul.mubr.f32.gmra.mrb[2].mxu0 %v29791_v18  ;;  %36856 = vmatprep.subr.mxu0 %v29816_v32  ;;  %v45322_v63 = vand.u32 4294901760, %v14601_v34 }
 0x458   : > { %35074 = vmatmul.mubr.f32.gmra.mrb[2].mxu1 %v45107_v53  ;;  %36858 = vmatprep.mubr.f32.mxu0 %v45148_v26  ;;  %v14714_v53 = vand.u32 4294901760, %v45299_v45 }
 0x459   : > { %35081 = vmatpush3.msra.mxu1 %v45066_v54  ;;  %35082 = vmatprep.mubr.f32.mxu1 %v14045_v19  ;;  %v14592_v19 = vsel %vm145_vm1, %v31192_v30, 0  ;;  %v45352_v62 = vsub.f32 %v14601_v34, %v45322_v63 }
 0x45a   : > { %37529 = vmatprep.subr.bf16.mxu1 %v37528_v51  ;;  %36857 = vmatpush3.msra.mxu0 %v29816_v32  ;;  %v45307_v37 = vand.u32 4294901760, %v14592_v19  ;;  %v14673_v32 = vand.u32 4294901760, %v45316_v17 }
 0x45b   : > { %36859 = vmatmul.mubr.f32.vlgmr.msra.gmra.mrb[0].mxu0 %v45163_v47  ;;  %38121 = vmatprep.subr.bf16.mxu0 %v38120_v21  ;;  %v45389_v12 = vand.u32 4294901760, %v45352_v62 }
 0x45c   : > { %35083 = vmatmul.mubr.f32.vlgmr.msra.gmra.mrb[0].mxu1 %v14055_v44  ;;  %36861 = vmatprep.mubr.f32.mxu0 %v45183_v20  ;;  %v45301_v44 = vsub.f32 %v31196_v31, %v14607_v57  ;;  %v31378_v31 = vld [vmem:[%s39391_s24 + $0x33] sm:$0xff]  ;;  %v14674_v39 = vsub.f32 %v45316_v17, %v14673_v32 }
 0x45d   : > { %37531 = vmatpush3.bf16.msra.mxu1 %v37528_v51  ;;  %35085 = vmatprep.mubr.f32.mxu1 %v14065_v33  ;;  %v14598_v33 = vsel %vm145_vm1, %v31194_v6, 0  ;;  %v45341_v51 = vsub.f32 %v14595_v52, %v45318_v0  ;;  %v30303_v60 = vsel %vm145_vm1, %v31378_v31, 0  ;;  %v30321_v6 = vand.u32 4294901760, %v45376_v49 }
 0x45e   : > { %35092 = vmatprep.subr.mxu1 %v45133_v35  ;;  %38123 = vmatpush3.bf16.msra.mxu0 %v38120_v21  ;;  %v45331_v18 = vand.u32 4294901760, %v14598_v33  ;;  %v14715_v21 = vsub.f32 %v45299_v45, %v14714_v53  ;;  %v30306_v52 = vsel %vm145_vm1, %v31379_v56, 0  ;;  %v45404_v34 = vand.u32 4294901760, %v30303_v60 }
 0x45f   : > { %36862 = vmatmul.mubr.f32.gmra.mrb[2].mxu0 %v45197_v15  ;;  %36868 = vmatprep.subr.mxu0 %v45222_v55  ;;  %v14693_v29 = vand.u32 4294901760, %v45341_v51 }
 0x460   : > { %35086 = vmatmul.mubr.f32.gmra.mrb[2].mxu1 %v14075_v42  ;;  %36870 = vmatprep.mubr.f32.mxu0 %v45181_v16  ;;  %v14721_v42 = vand.u32 4294901760, %v45301_v44  ;;  %v14716_v16 = vand.u32 4294901760, %v14715_v21  ;;  %v31381_v21 = vld [vmem:[%s39391_s24 + $0x63] sm:$0xff] }
 0x461   : > { %35093 = vmatpush3.msra.mxu1 %v45133_v35  ;;  %35094 = vmatprep.mubr.f32.mxu1 %v45039_v38  ;;  %v45329_v35 = vsub.f32 %v14592_v19, %v45307_v37 }
 0x462   : > { %37533 = vmatprep.subr.bf16.mxu1 %v45081_v50  ;;  %36869 = vmatpush3.msra.mxu0 %v45222_v55  ;;  %v45337_v55 = vpack.c.bf16 %v14607_v57, %v14604_v22  ;;  %v45363_v22 = vsub.f32 %v14598_v33, %v45331_v18  ;;  %v45368_v57 = vld [vmem:[%s45635_s1 + $0x480] sm:$0xff]  ;;  %v31384_v33 = vld [vmem:[%s45635_s1 + $0x490] sm:$0x7f] }
 0x463   : > { %36871 = vmatmul.mubr.f32.vlgmr.msra.gmra.mrb[0].mxu0 %v45189_v5  ;;  %38125 = vmatprep.subr.bf16.mxu0 %v45207_v23  ;;  %v14683_v30 = vand.u32 4294901760, %v45329_v35  ;;  %v14675_v5 = vand.u32 4294901760, %v14674_v39  ;;  %v45437_v39 = vsub.f32 %v30303_v60, %v45404_v34 }
 0x464   : > { %35095 = vmatmul.mubr.f32.vlgmr.msra.gmra.mrb[0].mxu1 %v45051_v59  ;;  %36873 = vmatprep.mubr.f32.mxu0 %v45202_v46  ;;  %v14703_v19 = vand.u32 4294901760, %v45363_v22 }
 0x465   : > { %37535 = vmatpush3.bf16.msra.mxu1 %v45081_v50  ;;  %35097 = vmatprep.mubr.f32.mxu1 %v45062_v40  ;;  %v14722_v50 = vsub.f32 %v45301_v44, %v14721_v42  ;;  %v14684_v36 = vsub.f32 %v45329_v35, %v14683_v30 }
 0x466   : > { %35104 = vmatprep.subr.mxu1 %v45066_v54  ;;  %38127 = vmatpush3.bf16.msra.mxu0 %v45207_v23  ;;  %v14704_v56 = vsub.f32 %v45363_v22, %v14703_v19 }
 0x467   : > { %36874 = vmatmul.mubr.f32.gmra.mrb[2].mxu0 %v45219_v7  ;;  %36880 = vmatprep.subr.mxu0 %v45194_v8  ;;  %v14685_v31 = vand.u32 4294901760, %v14684_v36 }
 0x468   : > { %35098 = vmatmul.mubr.f32.gmra.mrb[2].mxu1 %v45075_v4  ;;  %36882 = vmatprep.mubr.f32.mxu0 %v29759_v11  ;;  %v14723_v11 = vand.u32 4294901760, %v14722_v50 }
 0x469   : > { %35105 = vmatpush3.msra.mxu1 %v45066_v54  ;;  %35106 = vmatprep.mubr.f32.mxu1 %v45039_v38  ;;  %v30318_v54 = vand.u32 4294901760, %v45368_v57  ;;  %v31380_v38 = vld [vmem:[%s39391_s24 + $0x53] sm:$0xff]  ;;  %s31034_s24 = sshll.u32 %s31030_s10, 2 }
 0x46a   : > { %37537 = vmatprep.subr.bf16.mxu1 %v45337_v55  ;;  %36881 = vmatpush3.msra.mxu0 %v45194_v8  ;;  %v37540_v46 = vpack.c.bf16 %v14723_v11, %v14716_v16  ;;  %p120_p3 = scmp.lt.s32.totalorder %s31034_s24, 7 }
 0x46b   : > { %36883 = vmatmul.mubr.f32.vlgmr.msra.gmra.mrb[0].mxu0 %v29769_v1  ;;  %38129 = vmatprep.subr.bf16.mxu0 %v38128_v2  ;;  %v14694_v1 = vsub.f32 %v45341_v51, %v14693_v29  ;;  %v45422_v50 = vsub.f32 %v45368_v57, %v30318_v54  ;;  %v30315_v57 = vsel %vm158_vm0, %v31384_v33, 0  ;;  %v45463_v33 = vpack.c.bf16 %v30321_v6, %v30318_v54 }
 0x46c   : > { %35107 = vmatmul.mubr.f32.vlgmr.msra.gmra.mrb[0].mxu1 %v45051_v59  ;;  %36885 = vmatprep.mubr.f32.mxu0 %v29779_v10  ;;  %v30309_v59 = vsel %vm145_vm1, %v31380_v38, 0  ;;  %v14729_v10 = vsub.f32 %v45352_v62, %v45389_v12  ;;  %v45450_v60 = vand.u32 4294901760, %v30315_v57  ;;  %s45690_s24 = smov (!%p120_p3, %s31034_s24), 7 }
 0x46d   : > { %37539 = vmatpush3.bf16.msra.mxu1 %v45337_v55  ;;  %35109 = vmatprep.mubr.f32.mxu1 %v45062_v40  ;;  %v45419_v40 = vand.u32 4294901760, %v30306_v52  ;;  %v45439_v7 = vand.u32 4294901760, %v30309_v59  ;;  %v14695_v16 = vand.u32 4294901760, %v14694_v1  ;;  %v30428_v11 = vand.u32 4294901760, %v45422_v50  ;;  %s31035_s6 = sshll.u32 %s45690_s24, 3 }
 0x46e   : > { %35116 = vmatprep.subr.mxu1 %v45322_v63  ;;  %38131 = vmatpush3.bf16.msra.mxu0 %v38128_v2  ;;  %v45431_v2 = vsub.f32 %v45376_v49, %v30321_v6  ;;  %v14730_v49 = vand.u32 4294901760, %v14729_v10  ;;  %v37544_v1 = vpack.c.bf16 %v45301_v44, %v45299_v45  ;;  %v45679_v45 = vand.u32 4294901760, %v39417_v24  ;;  %s123_s11 = scalar_lea.vmem %s45636_s2, %s31035_s6 }
 0x46f   : > { %36886 = vmatmul.mubr.f32.gmra.mrb[2].mxu0 %v29789_v41  ;;  %36892 = vmatprep.subr.mxu0 %v45238_v9  ;;  %v30312_v41 = vsel %vm145_vm1, %v31381_v21, 0  ;;  %v30429_v10 = vsub.f32 %v45422_v50, %v30428_v11 }
 0x470   : > { %35110 = vmatmul.mubr.f32.gmra.mrb[2].mxu1 %v45075_v4  ;;  %36894 = vmatprep.mubr.f32.mxu0 %v45148_v26  ;;  %v45445_v4 = vsub.f32 %v30306_v52, %v45419_v40  ;;  %v30435_v38 = vand.u32 4294901760, %v45431_v2  ;;  %v45453_v36 = vand.u32 4294901760, %v30312_v41  ;;  %v45458_v52 = vsub.f32 %v30309_v59, %v45439_v7 }
 0x471   : > { %35117 = vmatpush3.msra.mxu1 %v45322_v63  ;;  %35118 = vmatprep.mubr.f32.mxu1 %v14675_v5  ;;  %v14705_v5 = vand.u32 4294901760, %v14704_v56  ;;  %v15343_v44 = vsub.f32 %v39417_v24, %v45679_v45 }
 0x472   : > { %37541 = vmatprep.subr.bf16.mxu1 %v37540_v46  ;;  %36893 = vmatpush3.msra.mxu0 %v45238_v9  ;;  %v30387_v9 = vand.u32 4294901760, %v45437_v39  ;;  %v30397_v21 = vand.u32 4294901760, %v45445_v4  ;;  %v30436_v59 = vsub.f32 %v45431_v2, %v30435_v38  ;;  %v30407_v6 = vand.u32 4294901760, %v45458_v52 }
 0x473   : > { %36895 = vmatmul.mubr.f32.vlgmr.msra.gmra.mrb[0].mxu0 %v45163_v47  ;;  %38133 = vmatprep.subr.bf16.mxu0 %v45207_v23 }
 0x474   : > { %35119 = vmatmul.mubr.f32.vlgmr.msra.gmra.mrb[0].mxu1 %v14685_v31  ;;  %36897 = vmatprep.mubr.f32.mxu0 %v45183_v20  ;;  %v30388_v54 = vsub.f32 %v45437_v39, %v30387_v9  ;;  %v30398_v31 = vsub.f32 %v45445_v4, %v30397_v21  ;;  %v30437_v56 = vand.u32 4294901760, %v30436_v59  ;;  %v38144_v59 = vpack.c.bf16 %v45431_v2, %v45422_v50  ;;  %v45685_v2 = vld [vmem:[#allocation2_spill] sm:$0xff] }
 0x475   : > { %37543 = vmatpush3.bf16.msra.mxu1 %v37540_v46  ;;  %35121 = vmatprep.mubr.f32.mxu1 %v14695_v16  ;;  %v45475_v46 = vsub.f32 %v30312_v41, %v45453_v36  ;;  %v30408_v16 = vsub.f32 %v45458_v52, %v30407_v6 }
 0x476   : > { %35128 = vmatprep.subr.mxu1 %v14730_v49  ;;  %38135 = vmatpush3.bf16.msra.mxu0 %v45207_v23  ;;  %v45478_v23 = vsub.f32 %v30315_v57, %v45450_v60 }
 0x477   : > { %36898 = vmatmul.mubr.f32.gmra.mrb[2].mxu0 %v45197_v15  ;;  %36904 = vmatprep.subr.mxu0 %v45194_v8  ;;  %v30417_v57 = vand.u32 4294901760, %v45475_v46 }
 0x478   : > { %35122 = vmatmul.mubr.f32.gmra.mrb[2].mxu1 %v14705_v5  ;;  %36906 = vmatprep.mubr.f32.mxu0 %v45148_v26  ;;  %v30430_v26 = vand.u32 4294901760, %v30429_v10  ;;  %v45494_v41 = vand.u32 4294901760, %v45478_v23 }
 0x479   : > { %35129 = vmatpush3.msra.mxu1 %v14730_v49  ;;  %35130 = vmatprep.mubr.f32.mxu1 %v45295_v43 }
 0x47a   : > { %37545 = vmatprep.subr.bf16.mxu1 %v37544_v1  ;;  %36905 = vmatpush3.msra.mxu0 %v45194_v8  ;;  %v30389_v8 = vand.u32 4294901760, %v30388_v54  ;;  %v38140_v49 = vpack.c.bf16 %v30437_v56, %v30430_v26  ;;  %v30443_v5 = vsub.f32 %v45478_v23, %v45494_v41 }
 0x47b   : > { %36907 = vmatmul.mubr.f32.vlgmr.msra.gmra.mrb[0].mxu0 %v45163_v47  ;;  %38137 = vmatprep.subr.bf16.mxu0 %v45463_v33  ;;  %v30399_v47 = vand.u32 4294901760, %v30398_v31 }
 0x47c   : > { %35131 = vmatmul.mubr.f32.vlgmr.msra.gmra.mrb[0].mxu1 %v45307_v37  ;;  %36909 = vmatprep.mubr.f32.mxu0 %v45183_v20  ;;  %v30418_v20 = vsub.f32 %v45475_v46, %v30417_v57  ;;  %v30444_v10 = vand.u32 4294901760, %v30443_v5 }
 0x47d   : > { %37547 = vmatpush3.bf16.msra.mxu1 %v37544_v1  ;;  %35133 = vmatprep.mubr.f32.mxu1 %v45318_v0  ;;  %v30409_v1 = vand.u32 4294901760, %v30408_v16 }
 0x47e   : > { %35140 = vmatprep.subr.mxu1 %v45352_v62  ;;  %38139 = vmatpush3.bf16.msra.mxu0 %v45463_v33 }
 0x47f   : > { %36910 = vmatmul.mubr.f32.gmra.mrb[2].mxu0 %v45197_v15  ;;  %36916 = vmatprep.subr.mxu0 %v45450_v60  ;;  %v30419_v15 = vand.u32 4294901760, %v30418_v20 }
 0x480   : > { %35134 = vmatmul.mubr.f32.gmra.mrb[2].mxu1 %v45331_v18  ;;  %36918 = vmatprep.mubr.f32.mxu0 %v30389_v8 }
 0x481   : > { %35141 = vmatpush3.msra.mxu1 %v45352_v62  ;;  %35142 = vmatprep.mubr.f32.mxu1 %v45316_v17  ;;  %v37552_v62 = vpack.c.bf16 %v14721_v42, %v14714_v53  ;;  %v45680_v17 = vand.u32 4294901760, %v39419_v25  ;;  %v38152_v42 = vpack.c.bf16 %v30435_v38, %v30428_v11 }
 0x482   : > { %37549 = vmatprep.subr.bf16.mxu1 %v45337_v55  ;;  %36917 = vmatpush3.msra.mxu0 %v45450_v60 }
 0x483   : > { %36919 = vmatmul.mubr.f32.vlgmr.msra.gmra.mrb[0].mxu0 %v30399_v47  ;;  %38141 = vmatprep.subr.bf16.mxu0 %v38140_v49  ;;  %v15350_v53 = vsub.f32 %v39419_v25, %v45680_v17 }
 0x484   : > { %35143 = vmatmul.mubr.f32.vlgmr.msra.gmra.mrb[0].mxu1 %v45329_v35  ;;  %36921 = vmatprep.mubr.f32.mxu0 %v30409_v1  ;;  %v45681_v35 = vand.u32 4294901760, %v39425_v27 }
 0x485   : > { %37551 = vmatpush3.bf16.msra.mxu1 %v45337_v55  ;;  %35145 = vmatprep.mubr.f32.mxu1 %v45341_v51  ;;  %v15351_v51 = vand.u32 4294901760, %v15350_v53 }
 0x486   : > { %35152 = vmatprep.subr.mxu1 %v45322_v63  ;;  %38143 = vmatpush3.bf16.msra.mxu0 %v38140_v49 }
 0x487   : > { %36922 = vmatmul.mubr.f32.gmra.mrb[2].mxu0 %v30419_v15  ;;  %36928 = vmatprep.subr.mxu0 %v30444_v10 }
 0x488   : > { %35146 = vmatmul.mubr.f32.gmra.mrb[2].mxu1 %v45363_v22  ;;  %36930 = vmatprep.mubr.f32.mxu0 %v45404_v34 }
 0x489   : > { %35153 = vmatpush3.msra.mxu1 %v45322_v63  ;;  %35154 = vmatprep.mubr.f32.mxu1 %v14673_v32  ;;  %v15344_v32 = vand.u32 4294901760, %v15343_v44 }
 0x48a   : > { %37553 = vmatprep.subr.bf16.mxu1 %v37552_v62  ;;  %36929 = vmatpush3.msra.mxu0 %v30444_v10 }
 0x48b   : > { %36931 = vmatmul.mubr.f32.vlgmr.msra.gmra.mrb[0].mxu0 %v45419_v40  ;;  %38145 = vmatprep.subr.bf16.mxu0 %v38144_v59 }
 0x48c   : > { %35155 = vmatmul.mubr.f32.vlgmr.msra.gmra.mrb[0].mxu1 %v14683_v30  ;;  %36933 = vmatprep.mubr.f32.mxu0 %v45439_v7  ;;  %v45682_v30 = vand.u32 4294901760, %v39428_v28 }
 0x48d   : > { %37555 = vmatpush3.bf16.msra.mxu1 %v37552_v62  ;;  %35157 = vmatprep.mubr.f32.mxu1 %v14693_v29 }
 0x48e   : > { %35164 = vmatprep.subr.mxu1 %v45389_v12  ;;  %38147 = vmatpush3.bf16.msra.mxu0 %v38144_v59  ;;  %v15312_v22 = vsub.f32 %v39428_v28, %v45682_v30 }
 0x48f   : > { %36934 = vmatmul.mubr.f32.gmra.mrb[2].mxu0 %v45453_v36  ;;  %36940 = vmatprep.subr.mxu0 %v45478_v23 }
 0x490   : > { %35158 = vmatmul.mubr.f32.gmra.mrb[2].mxu1 %v14703_v19  ;;  %36942 = vmatprep.mubr.f32.mxu0 %v45437_v39  ;;  %v15357_v19 = vsub.f32 %v39488_v58, %v39507_v3  ;;  %v45686_v39 = vld [vmem:[#allocation3_spill] sm:$0xff] }
 0x491   : > { %35165 = vmatpush3.msra.mxu1 %v45389_v12  ;;  %35166 = vmatprep.mubr.f32.mxu1 %v45295_v43  ;;  %v37564_v12 = vpack.c.bf16 %v15351_v51, %v15344_v32 }
 0x492   : > { %37557 = vmatprep.subr.bf16.mxu1 %v45337_v55  ;;  %36941 = vmatpush3.msra.mxu0 %v45478_v23  ;;  %v15358_v3 = vand.u32 4294901760, %v15357_v19 }
 0x493   : > { %36943 = vmatmul.mubr.f32.vlgmr.msra.gmra.mrb[0].mxu0 %v45445_v4  ;;  %38149 = vmatprep.subr.bf16.mxu0 %v45463_v33 }
 0x494   : > { %35167 = vmatmul.mubr.f32.vlgmr.msra.gmra.mrb[0].mxu1 %v45307_v37  ;;  %36945 = vmatprep.mubr.f32.mxu0 %v45458_v52 }
 0x495   : > { %37559 = vmatpush3.bf16.msra.mxu1 %v45337_v55  ;;  %35169 = vmatprep.mubr.f32.mxu1 %v45318_v0  ;;  %v15302_v55 = vsub.f32 %v39425_v27, %v45681_v35 }
 0x496   : > { %35176 = vmatprep.subr.mxu1 %v45322_v63  ;;  %38151 = vmatpush3.bf16.msra.mxu0 %v45463_v33 }
 0x497   : > { %36946 = vmatmul.mubr.f32.gmra.mrb[2].mxu0 %v45475_v46  ;;  %36952 = vmatprep.subr.mxu0 %v45450_v60 }
 0x498   : > { %35170 = vmatmul.mubr.f32.gmra.mrb[2].mxu1 %v45331_v18  ;;  %36954 = vmatprep.mubr.f32.mxu0 %v30387_v9 }
 0x499   : > { %35177 = vmatpush3.msra.mxu1 %v45322_v63  ;;  %35178 = vmatprep.mubr.f32.mxu1 %v45295_v43  ;;  %v15303_v43 = vand.u32 4294901760, %v15302_v55  ;;  %v45683_v63 = vand.u32 4294901760, %v39472_v48 }
 0x49a   : > { %37561 = vmatprep.subr.bf16.mxu1 %v39399_v13  ;;  %36953 = vmatpush3.msra.mxu0 %v45450_v60 }
 0x49b   : > { %36955 = vmatmul.mubr.f32.vlgmr.msra.gmra.mrb[0].mxu0 %v30397_v21  ;;  %38153 = vmatprep.subr.bf16.mxu0 %v38152_v42  ;;  %v15322_v29 = vsub.f32 %v39472_v48, %v45683_v63 }
 0x49c   : > { %35179 = vmatmul.mubr.f32.vlgmr.msra.gmra.mrb[0].mxu1 %v45307_v37  ;;  %36957 = vmatprep.mubr.f32.mxu0 %v30407_v6  ;;  %v45684_v37 = vand.u32 4294901760, %v39492_v61 }
 0x49d   : > { %37563 = vmatpush3.bf16.msra.mxu1 %v39399_v13  ;;  %35181 = vmatprep.mubr.f32.mxu1 %v45318_v0  ;;  %v15313_v13 = vand.u32 4294901760, %v15312_v22  ;;  %v15323_v50 = vand.u32 4294901760, %v15322_v29 }
 0x49e   : > { %35188 = vmatprep.subr.mxu1 %v39401_v14  ;;  %38155 = vmatpush3.bf16.msra.mxu0 %v38152_v42  ;;  %v15332_v0 = vsub.f32 %v39492_v61, %v45684_v37 }
 0x49f   : > { %36958 = vmatmul.mubr.f32.gmra.mrb[2].mxu0 %v30417_v57  ;;  %36964 = vmatprep.subr.mxu0 %v45494_v41 }
 0x4a0   : > { %35182 = vmatmul.mubr.f32.gmra.mrb[2].mxu1 %v45331_v18  ;;  %36966 = vmatprep.mubr.f32.mxu0 %v45404_v34  ;;  %v15333_v18 = vand.u32 4294901760, %v15332_v0 }
 0x4a1   : > { %35189 = vmatpush3.msra.mxu1 %v39401_v14  ;;  %35190 = vmatprep.mubr.f32.mxu1 %v15303_v43  ;;  %v37568_v14 = vpack.c.bf16 %v39419_v25, %v39417_v24  ;;  %v45687_v24 = vld [vmem:[#allocation4_spill] sm:$0xff]  ;;  %v45688_v25 = vld [vmem:[#allocation5_spill] sm:$0xff] }
 0x4a2   : > { %37565 = vmatprep.subr.bf16.mxu1 %v37564_v12  ;;  %36965 = vmatpush3.msra.mxu0 %v45494_v41 }
 0x4a3   : > { %36967 = vmatmul.mubr.f32.vlgmr.msra.gmra.mrb[0].mxu0 %v45419_v40  ;;  %38157 = vmatprep.subr.bf16.mxu0 %v45463_v33 }
 0x4a4   : > { %35191 = vmatmul.mubr.f32.vlgmr.msra.gmra.mrb[0].mxu1 %v15313_v13  ;;  %36969 = vmatprep.mubr.f32.mxu0 %v45439_v7 }
 0x4a5   : > { %37567 = vmatpush3.bf16.msra.mxu1 %v37564_v12  ;;  %35193 = vmatprep.mubr.f32.mxu1 %v15323_v50 }
 0x4a6   : > { %35200 = vmatprep.subr.mxu1 %v15358_v3  ;;  %38159 = vmatpush3.bf16.msra.mxu0 %v45463_v33 }
 0x4a7   : > { %36970 = vmatmul.mubr.f32.gmra.mrb[2].mxu0 %v45453_v36  ;;  %36976 = vmatprep.subr.mxu0 %v45450_v60 }
 0x4a8   : > { %35194 = vmatmul.mubr.f32.gmra.mrb[2].mxu1 %v15333_v18  ;;  %36978 = vmatprep.mubr.f32.mxu0 %v45404_v34 }
 0x4a9   : > { %35201 = vmatpush3.msra.mxu1 %v15358_v3  ;;  %35202 = vmatprep.mubr.f32.mxu1 %v45685_v2 }
 0x4aa   : > { %37569 = vmatprep.subr.bf16.mxu1 %v37568_v14  ;;  %36977 = vmatpush3.msra.mxu0 %v45450_v60 }
 0x4ab   : > { %36979 = vmatmul.mubr.f32.vlgmr.msra.gmra.mrb[0].mxu0 %v45419_v40 }
 0x4ac   : > { %35203 = vmatmul.mubr.f32.vlgmr.msra.gmra.mrb[0].mxu1 %v45686_v39  ;;  %36981 = vmatprep.mubr.f32.mxu0 %v45439_v7 }
 0x4ad   : > { %37571 = vmatpush3.bf16.msra.mxu1 %v37568_v14  ;;  %35205 = vmatprep.mubr.f32.mxu1 %v45687_v24 }
 0x4ae   : > { %35212 = vmatprep.subr.mxu1 %v39488_v58 }
 0x4af   : > { %36982 = vmatmul.mubr.f32.gmra.mrb[2].mxu0 %v45453_v36 }
 0x4b0   : > { %35206 = vmatmul.mubr.f32.gmra.mrb[2].mxu1 %v45688_v25 }
 0x4b1   : > { %35213 = vmatpush3.msra.mxu1 %v39488_v58  ;;  %35214 = vmatprep.mubr.f32.mxu1 %v39425_v27 }
 0x4b4   : > { %35215 = vmatmul.mubr.f32.vlgmr.msra.gmra.mrb[0].mxu1 %v39428_v28 }
 0x4b5   : > { %35217 = vmatprep.mubr.f32.mxu1 %v39472_v48 }
 0x4b8   : > { %35218 = vmatmul.mubr.f32.gmra.mrb[2].mxu1 %v39492_v61 }
 0x57e   : > { %v36980_v34 = vpop.f32.mrb[0].mxu0 }
 0x57f   : > { %v30896_v40 = vpop.f32.mrb[1].mxu0 }
 0x582   : > { %v36983_v7 = vpop.f32.mrb[2].mxu0 }
 0x583   : > { %v30908_v4 = vpop.f32.mrb[3].mxu0 }
 0x587   : > { %v35216_v11 = vpop.f32.mrb[0].mxu1 }
 0x588   : > { %v38160_v60 = vadd.f32 %v36980_v34, %v35216_v11  ;;  %v15517_v38 = vpop.f32.mrb[1].mxu1 }
 0x589   : > { %v38161_v58 = vadd.f32 %v30896_v40, %v15517_v38 }
 0x58a   : > { %v30923_v27 = vmax.f32 %v38160_v60, 5.9 }
 0x58b   : > { %v30922_v36 = vmax.f32 %v38161_v58, 5.9  ;;  %v35219_v28 = vpop.f32.mrb[2].mxu1 }
 0x58c   : > { %v38162_v48 = vadd.f32 %v36983_v7, %v35219_v28  ;;  %v15531_v61 = vpop.f32.mrb[3].mxu1  ;;  %v30927_v33 = vmin.f32 %v30923_v27, 6.6 }
 0x58d   : > { %v30926_v9 = vmin.f32 %v30922_v36, 6.6  ;;  %v38163_v52 = vadd.f32 %v30908_v4, %v15531_v61 }
 0x58e   : > { %v30925_v21 = vmax.f32 %v38162_v48, 5.9  ;;  %30932 = vst.msk [vmem:[%s123_s11 + $0x8] sm:$0xff] %vm30930_vm2, %v30927_v33 }
 0x58f   : > { %30931 = vst.msk [vmem:[%s123_s11] sm:$0xff] %vm30930_vm2, %v30926_v9  ;;  %v30924_v46 = vmax.f32 %v38163_v52, 5.9 }
 0x590   : > { %v30929_v54 = vmin.f32 %v30925_v21, 6.6 }
 0x591   : > { %v30928_v23 = vmin.f32 %v30924_v46, 6.6 }
 0x592   : > { %30934 = vst.msk [vmem:[%s123_s11 + $0x18] sm:$0xff] %vm30930_vm2, %v30929_v54 }
 0x593   : > { %30933 = vst.msk [vmem:[%s123_s11 + $0x10] sm:$0xff] %vm30930_vm2, %v30928_v23 }
 0x594 PF: > { %s12_s9 = sadd.s32 1, %s39346_s9  }
 0x595   : > { %p9_p4 = scmp.ge.s32.totalorder %s12_s9, 4  }
 0x597   :  { %11 = sbr.rel (!%p9_p4) target bundleno = 1 (0x1), region = 117 }

</bundles_post_ra>
